<compile_context>
chip_gen: v6e
topology: v6e:2x2x1
jax: 0.10.0
libtpu: 0.0.40
codegen_flags: <defaults>
</compile_context>

<pallas_src>
import jax
import jax.numpy as jnp
from jax.experimental import pallas as pl
from jax.experimental.pallas import tpu as pltpu

RATES = (1, 6, 12, 18)
EPS = 1e-5
HIGHEST = jax.lax.Precision.HIGHEST
VMEM_LIMIT = 32 * 1024 * 1024


# ------------------------------ tiling helpers -------------------------------

def _row_tile(n, cap=512):
    for t in (1024, 512, 256, 128, 64, 32, 16, 8):
        if t <= cap and n % t == 0:
            return t
    return n


def _lane_tile(n, cap=2048):
    for t in (2048, 1024, 512, 256, 128):
        if t <= cap and n % t == 0:
            return t
    return n


def _batch_tile(n, cap=16):
    for t in (16, 8, 4, 2):
        if t <= cap and n % t == 0:
            return t
    return 1


# ------------------------------- Pallas kernels -------------------------------

def _aspp_concat_kernel(x_ref, w_ref, b_ref, o_ref):
    # x_ref: (4, TR, 9*Cin) bf16   w_ref: (4, 9*Cin, Cin) bf16   b_ref: (4, 1, Cin) f32
    # o_ref: (TR, 4*Cin) bf16  -- channel concat of the four dilated-conv branches,
    # written directly as one lane-dense block (no transpose / extra HBM pass).
    outs = []
    for r in range(x_ref.shape[0]):
        acc = jnp.dot(x_ref[r], w_ref[r], preferred_element_type=jnp.float32)
        outs.append(acc + b_ref[r])
    o_ref[...] = jnp.concatenate(outs, axis=-1).astype(o_ref.dtype)


def _mm_bias_relu_stats_kernel(x_ref, w_ref, b_ref, y_ref, sum_ref, ssq_ref):
    # Row-tiled conv-as-matmul + bias + ReLU.  Per-channel sum and sum-of-squares
    # are accumulated across all row tiles (two-pass BatchNorm, pass A).
    i = pl.program_id(0)
    y = jnp.dot(x_ref[...].astype(jnp.bfloat16), w_ref[...],
                preferred_element_type=jnp.float32)
    y = jnp.maximum(y + b_ref[...], 0.0)
    y_ref[...] = y

    @pl.when(i == 0)
    def _():
        sum_ref[...] = jnp.zeros_like(sum_ref)
        ssq_ref[...] = jnp.zeros_like(ssq_ref)

    sum_ref[...] += jnp.sum(y, axis=0, keepdims=True)
    ssq_ref[...] += jnp.sum(y * y, axis=0, keepdims=True)
    # TODO(synk): BatchNorm running-stat updates are a training side effect and
    # do not influence the forward output, so they are not materialized here.


def _hinterp_bn_kernel(a_ref, x_ref, s_ref, t_ref, o_ref):
    # Bilinear interpolation along H (o = Ah @ x), channels-last, with the BN1
    # per-channel affine (tiled per column) fused in.
    y = jnp.dot(a_ref[...], x_ref[0],
                preferred_element_type=jnp.float32, precision=HIGHEST)
    o_ref[0] = y * s_ref[...] + t_ref[...]


def _winterp_kernel(a_ref, x_ref, o_ref):
    # Bilinear interpolation along W: per (n, h) row a small 2D matmul Aw @ x.
    for b in range(x_ref.shape[0]):
        o_ref[b] = jnp.dot(a_ref[...], x_ref[b],
                           preferred_element_type=jnp.float32,
                           precision=HIGHEST).astype(o_ref.dtype)


def _affine_kernel(x_ref, s_ref, t_ref, o_ref):
    # BatchNorm pass B: per-channel affine (scale/offset precomputed from the
    # accumulated batch statistics).
    o_ref[...] = x_ref[...] * s_ref[...] + t_ref[...]


# ------------------------------ kernel wrappers -------------------------------

def aspp_concat(x_cols, w_cols, b_cols):
    # x_cols: (4, NHW, 9*Cin) bf16, w_cols: (4, 9*Cin, Cin) bf16, b_cols: (4, 1, Cin) f32
    R, NHW, K9 = x_cols.shape
    Cin = w_cols.shape[-1]
    TR = _row_tile(NHW, cap=256)
    return pl.pallas_call(
        _aspp_concat_kernel,
        out_shape=jax.ShapeDtypeStruct((NHW, R * Cin), jnp.bfloat16),
        grid=(NHW // TR,),
        in_specs=[
            pl.BlockSpec((R, TR, K9), lambda i: (0, i, 0)),
            pl.BlockSpec((R, K9, Cin), lambda i: (0, 0, 0)),
            pl.BlockSpec((R, 1, Cin), lambda i: (0, 0, 0)),
        ],
        out_specs=pl.BlockSpec((TR, R * Cin), lambda i: (i, 0)),
        compiler_params=pltpu.CompilerParams(
            dimension_semantics=("parallel",),
            vmem_limit_bytes=VMEM_LIMIT),
    )(x_cols, w_cols, b_cols)


def matmul_bias_relu_stats(x, w_bf16, b, *, cap=256):
    # Conv-as-matmul + bias + ReLU, tiled over rows; returns (y, sum, sumsq).
    M, K = x.shape
    N = w_bf16.shape[1]
    TR = _row_tile(M, cap=cap)
    return pl.pallas_call(
        _mm_bias_relu_stats_kernel,
        out_shape=(jax.ShapeDtypeStruct((M, N), jnp.float32),
                   jax.ShapeDtypeStruct((1, N), jnp.float32),
                   jax.ShapeDtypeStruct((1, N), jnp.float32)),
        grid=(M // TR,),
        in_specs=[
            pl.BlockSpec((TR, K), lambda i: (i, 0)),
            pl.BlockSpec((K, N), lambda i: (0, 0)),
            pl.BlockSpec((1, N), lambda i: (0, 0)),
        ],
        out_specs=(pl.BlockSpec((TR, N), lambda i: (i, 0)),
                   pl.BlockSpec((1, N), lambda i: (0, 0)),
                   pl.BlockSpec((1, N), lambda i: (0, 0))),
        compiler_params=pltpu.CompilerParams(
            # "arbitrary": the stats blocks are revisited accumulators.
            dimension_semantics=("arbitrary",),
            vmem_limit_bytes=VMEM_LIMIT),
    )(x, w_bf16, b)


def h_interp_bn(y_nhw, Ah, col_scale, col_offset):
    # y_nhw: (N, H, W*C) f32 -> (N, 2H, W*C) f32, BN1 affine fused.
    N, H, WC = y_nhw.shape
    H2 = Ah.shape[0]
    CT = _lane_tile(WC)
    return pl.pallas_call(
        _hinterp_bn_kernel,
        out_shape=jax.ShapeDtypeStruct((N, H2, WC), jnp.float32),
        grid=(N, WC // CT),
        in_specs=[
            pl.BlockSpec((H2, H), lambda n, j: (0, 0)),
            pl.BlockSpec((1, H, CT), lambda n, j: (n, 0, j)),
            pl.BlockSpec((1, CT), lambda n, j: (0, j)),
            pl.BlockSpec((1, CT), lambda n, j: (0, j)),
        ],
        out_specs=pl.BlockSpec((1, H2, CT), lambda n, j: (n, 0, j)),
        compiler_params=pltpu.CompilerParams(
            dimension_semantics=("parallel", "parallel"),
            vmem_limit_bytes=VMEM_LIMIT),
    )(Ah, y_nhw, col_scale, col_offset)


def w_interp(y_rows, Aw):
    # y_rows: (N*2H, W, C) f32 -> (N*2H, 2W, C) bf16 (feeds the conv3x3 matmul).
    B, W, C = y_rows.shape
    W2 = Aw.shape[0]
    TB = _batch_tile(B)
    return pl.pallas_call(
        _winterp_kernel,
        out_shape=jax.ShapeDtypeStruct((B, W2, C), jnp.bfloat16),
        grid=(B // TB,),
        in_specs=[
            pl.BlockSpec((W2, W), lambda i: (0, 0)),
            pl.BlockSpec((TB, W, C), lambda i: (i, 0, 0)),
        ],
        out_specs=pl.BlockSpec((TB, W2, C), lambda i: (i, 0, 0)),
        compiler_params=pltpu.CompilerParams(
            dimension_semantics=("parallel",),
            vmem_limit_bytes=VMEM_LIMIT),
    )(Aw, y_rows)


def affine_rows(y, scale, offset):
    M, N = y.shape
    TR = _row_tile(M, cap=512)
    return pl.pallas_call(
        _affine_kernel,
        out_shape=jax.ShapeDtypeStruct((M, N), jnp.float32),
        grid=(M // TR,),
        in_specs=[
            pl.BlockSpec((TR, N), lambda i: (i, 0)),
            pl.BlockSpec((1, N), lambda i: (0, 0)),
            pl.BlockSpec((1, N), lambda i: (0, 0)),
        ],
        out_specs=pl.BlockSpec((TR, N), lambda i: (i, 0)),
        compiler_params=pltpu.CompilerParams(
            dimension_semantics=("parallel",),
            vmem_limit_bytes=VMEM_LIMIT),
    )(y, scale, offset)


# --------------------------------- JAX glue -----------------------------------

def im2col_3x3(x_nhwc, rate):
    """Same-size 3x3 conv (stride 1, dilation=rate, pad=rate) -> (N*H*W, 9*C)."""
    N, H, W, C = x_nhwc.shape
    xp = jnp.pad(x_nhwc, ((0, 0), (rate, rate), (rate, rate), (0, 0)))
    taps = []
    for ky in range(3):
        for kx in range(3):
            taps.append(xp[:, ky * rate:ky * rate + H, kx * rate:kx * rate + W, :])
    col = jnp.stack(taps, axis=3)                  # (N, H, W, 9, C), tap = ky*3+kx
    return col.reshape(N * H * W, 9 * C)


def conv_w_to_col(w_oihw):
    """PyTorch (O, I, KH, KW) -> im2col weight (KH*KW*I, O), matching im2col order."""
    O, I, KH, KW = w_oihw.shape
    return jnp.transpose(w_oihw, (2, 3, 1, 0)).reshape(KH * KW * I, O)


def interp_matrix(in_size, out_size):
    """Bilinear interpolation matrix, align_corners=True (rows sum to 1)."""
    if in_size == 1:
        return jnp.ones((out_size, 1), jnp.float32)
    i = jnp.arange(out_size, dtype=jnp.float32)
    s = i * (in_size - 1) / (out_size - 1)
    lo = jnp.clip(jnp.floor(s).astype(jnp.int32), 0, in_size - 2)
    frac = s - lo.astype(jnp.float32)
    A = jnp.zeros((out_size, in_size), jnp.float32)
    A = A.at[jnp.arange(out_size), lo].add(1.0 - frac)
    A = A.at[jnp.arange(out_size), lo + 1].add(frac)
    return A


# -------------------------------- forward pass --------------------------------

@jax.jit
def aspp_block_forward(x_nchw, params):
    N, Cin, H, W = x_nchw.shape
    NHW = N * H * W
    x = jnp.transpose(x_nchw, (0, 2, 3, 1))                           # NHWC throughout

    # ---- _ASPP: four parallel dilated 3x3 convs, concat written in-kernel ----
    x_cols = jnp.stack([im2col_3x3(x, r) for r in RATES],
                       axis=0).astype(jnp.bfloat16)                   # (4, NHW, 9*Cin)
    w_cols = jnp.stack([conv_w_to_col(w) for w in params["aspp_w"]],
                       axis=0).astype(jnp.bfloat16)                   # (4, 9*Cin, Cin)
    b_cols = jnp.stack([b.reshape(1, Cin) for b in params["aspp_b"]], axis=0)
    y = aspp_concat(x_cols, w_cols, b_cols)                           # (NHW, 4*Cin) bf16

    # ---- conv1x1 + bias + ReLU, BN1 stats accumulated across row tiles ----
    C1 = params["conv1_w"].shape[0]
    w1 = params["conv1_w"].reshape(C1, 4 * Cin).T.astype(jnp.bfloat16)
    y, s1, ss1 = matmul_bias_relu_stats(y, w1, params["conv1_b"].reshape(1, C1))
    mean1 = s1 / NHW
    var1 = ss1 / NHW - mean1 ** 2                  # biased variance (PyTorch BN)
    scale1 = params["bn1_g"].reshape(1, C1) * jax.lax.rsqrt(var1 + EPS)
    off1 = params["bn1_b"].reshape(1, C1) - mean1 * scale1

    # ---- bilinear x2 upsample (align_corners=True), separable, channels-last;
    #      BN1 affine folded into the H pass (bilinear weights sum to 1) ----
    H2, W2 = 2 * H, 2 * W
    Ah, Aw = interp_matrix(H, H2), interp_matrix(W, W2)
    col_s = jnp.tile(scale1, (1, W))               # column (w, c) -> scale[c]
    col_t = jnp.tile(off1, (1, W))
    y = h_interp_bn(y.reshape(N, H, W * C1), Ah, col_s, col_t)        # (N, 2H, W*C1)
    y = w_interp(y.reshape(N * H2, W, C1), Aw)                        # (N*2H, 2W, C1) bf16
    y = y.reshape(N, H2, W2, C1)

    # ---- conv3x3 (pad 1) + bias + ReLU, BN2 stats; BN2 affine as final pass ----
    NHW2 = N * H2 * W2
    y_col = im2col_3x3(y, 1)                                          # (NHW2, 9*C1) bf16
    w3 = conv_w_to_col(params["conv3_w"]).astype(jnp.bfloat16)
    y, s2, ss2 = matmul_bias_relu_stats(y_col, w3, params["conv3_b"].reshape(1, C1),
                                        cap=512)
    mean2 = s2 / NHW2
    var2 = ss2 / NHW2 - mean2 ** 2
    scale2 = params["bn2_g"].reshape(1, C1) * jax.lax.rsqrt(var2 + EPS)
    off2 = params["bn2_b"].reshape(1, C1) - mean2 * scale2
    y = affine_rows(y, scale2, off2)                                  # (NHW2, C1)

    return y.reshape(N, H2, W2, C1).transpose(0, 3, 1, 2)             # NCHW interface


# ---------------------------- parameters (synthetic) ---------------------------

def init_params(key, in_ch, out_ch):
    ks = jax.random.split(key, 16)
    p = {}
    p["aspp_w"] = [0.1 * jax.random.normal(ks[i], (in_ch, in_ch, 3, 3), jnp.float32)
                   for i in range(4)]
    p["aspp_b"] = [0.05 * jax.random.normal(ks[4 + i], (in_ch,), jnp.float32)
                   for i in range(4)]
    p["conv1_w"] = 0.1 * jax.random.normal(ks[8], (out_ch, 4 * in_ch, 1, 1), jnp.float32)
    p["conv1_b"] = 0.05 * jax.random.normal(ks[9], (out_ch,), jnp.float32)
    p["bn1_g"] = 1.0 + 0.1 * jax.random.normal(ks[10], (out_ch,), jnp.float32)
    p["bn1_b"] = 0.1 * jax.random.normal(ks[11], (out_ch,), jnp.float32)
    p["conv3_w"] = 0.1 * jax.random.normal(ks[12], (out_ch, out_ch, 3, 3), jnp.float32)
    p["conv3_b"] = 0.05 * jax.random.normal(ks[13], (out_ch,), jnp.float32)
    p["bn2_g"] = 1.0 + 0.1 * jax.random.normal(ks[14], (out_ch,), jnp.float32)
    p["bn2_b"] = 0.1 * jax.random.normal(ks[15], (out_ch,), jnp.float32)
    return p


# ----------------------------- pure-JAX references -----------------------------

def _conv_ref(x, w, b, rate, pad, cast_bf16):
    if cast_bf16:
        x = x.astype(jnp.bfloat16)
        w = w.astype(jnp.bfloat16)
    y = jax.lax.conv_general_dilated(
        x, w, window_strides=(1, 1), padding=((pad, pad), (pad, pad)),
        rhs_dilation=(rate, rate), dimension_numbers=("NCHW", "OIHW", "NCHW"),
        preferred_element_type=jnp.float32, precision=HIGHEST)
    return y + b[None, :, None, None]


def _bn_train_ref(x, g, b):
    mean = x.mean(axis=(0, 2, 3), keepdims=True)
    var = ((x - mean) ** 2).mean(axis=(0, 2, 3), keepdims=True)
    return (x - mean) / jnp.sqrt(var + EPS) * g[None, :, None, None] + b[None, :, None, None]


def _reference(x, p, cast_bf16):
    y = jnp.concatenate([_conv_ref(x, p["aspp_w"][i], p["aspp_b"][i], r, r, cast_bf16)
                         for i, r in enumerate(RATES)], axis=1)
    y = _conv_ref(y, p["conv1_w"], p["conv1_b"], 1, 0, cast_bf16)
    y = jnp.maximum(y, 0.0)
    y = _bn_train_ref(y, p["bn1_g"], p["bn1_b"])
    _, _, H, W = y.shape
    Ah, Aw = interp_matrix(H, 2 * H), interp_matrix(W, 2 * W)
    y = jnp.einsum("Hh,Ww,nchw->ncHW", Ah, Aw, y, precision=HIGHEST)
    y = _conv_ref(y, p["conv3_w"], p["conv3_b"], 1, 1, cast_bf16)
    y = jnp.maximum(y, 0.0)
    y = _bn_train_ref(y, p["bn2_g"], p["bn2_b"])
    return y


reference_f32 = jax.jit(lambda x, p: _reference(x, p, False))
reference_bf16 = jax.jit(lambda x, p: _reference(x, p, True))


# ------------------------------------ main -------------------------------------

if __name__ == "__main__":
    key = jax.random.PRNGKey(0)
    kx, kp = jax.random.split(key)
    in_ch, out_ch = 4, 8
    x = jax.random.normal(kx, (2, in_ch, 16, 16), jnp.float32)   # PyTorch NCHW input
    params = init_params(kp, in_ch, out_ch)

    out = jax.block_until_ready(aspp_block_forward(x, params))
    assert out.shape == (2, out_ch, 32, 32), out.shape

    # Structural check: reference with identical bf16-matmul-operand numerics.
    ref_b = jax.block_until_ready(reference_bf16(x, params))
    err_struct = float(jnp.max(jnp.abs(out - ref_b)))
    assert jnp.allclose(out, ref_b, rtol=1e-2, atol=1e-2), (
        f"structural mismatch vs bf16-matmul reference: max abs err {err_struct}")

    # Numerical check vs full-f32 module semantics.  bf16 MXU operands bound
    # this error; the BN variance normalization amplifies it at these tiny toy
    # channel counts (Cin=4), hence the looser 5e-2 tolerance (structural bugs
    # would produce O(1) errors).
    ref_f = jax.block_until_ready(reference_f32(x, params))
    err_full = float(jnp.max(jnp.abs(out - ref_f)))
    assert jnp.allclose(out, ref_f, rtol=5e-2, atol=5e-2), (
        f"mismatch vs full-f32 reference: max abs err {err_full}")

    print("KERNEL_OK")
</pallas_src>

<mosaic_0001>
module attributes {stable_mosaic.version = 11 : i64} {
  func.func private @main(%arg0: i32) attributes {dimension_semantics = [#tpu.dimension_semantics<core_parallel>], iteration_bounds = array<i64: 2>, tpu.core_type = #tpu.core_type<sc_scalar_subcore>, window_params = []} {
    return
  }
}

module attributes {stable_mosaic.version = 11 : i64} {
  func.func private @main(%arg0: i32) attributes {dimension_semantics = [#tpu.dimension_semantics<core_parallel>], iteration_bounds = array<i64: 2>, tpu.core_type = #tpu.core_type<sc_scalar_subcore>, window_params = []} {
    return
  }
}

module attributes {stable_mosaic.version = 11 : i64} {
  func.func @_aspp_concat_kernel(%arg0: i32, %arg1: memref<4x256x36xbf16, #tpu.memory_space<vmem>>, %arg2: memref<4x36x4xbf16, #tpu.memory_space<vmem>>, %arg3: memref<4x1x4xf32, #tpu.memory_space<vmem>>, %arg4: memref<256x16xbf16, #tpu.memory_space<vmem>>) attributes {dimension_semantics = [#tpu.dimension_semantics<parallel>], iteration_bounds = array<i64: 2>, scalar_prefetch = 0 : i64, scratch_operands = 0 : i64, tpu.core_type = #tpu.core_type<tc>, window_params = [{transform_indices = @transform_0, window_bounds = array<i64: 4, 256, 36>}, {pipeline_mode = #tpu.pipeline_mode<synchronous>, transform_indices = @transform_1, window_bounds = array<i64: 4, 36, 4>}, {pipeline_mode = #tpu.pipeline_mode<synchronous>, transform_indices = @transform_2, window_bounds = array<i64: 4, 1, 4>}, {transform_indices = @transform_3, window_bounds = array<i64: 256, 16>}]} {
    %c0 = arith.constant 0 : index
    %c0_0 = arith.constant 0 : index
    %c0_1 = arith.constant 0 : index
    %0 = vector.load %arg1[%c0, %c0_0, %c0_1] : memref<4x256x36xbf16, #tpu.memory_space<vmem>>, vector<1x256x36xbf16>
    %1 = vector.shape_cast %0 : vector<1x256x36xbf16> to vector<256x36xbf16>
    %c0_2 = arith.constant 0 : index
    %c0_3 = arith.constant 0 : index
    %c0_4 = arith.constant 0 : index
    %2 = vector.load %arg2[%c0_2, %c0_3, %c0_4] : memref<4x36x4xbf16, #tpu.memory_space<vmem>>, vector<1x36x4xbf16>
    %3 = vector.shape_cast %2 : vector<1x36x4xbf16> to vector<36x4xbf16>
    %cst = arith.constant dense<0.000000e+00> : vector<256x4xf32>
    %4 = tpu.matmul %1, %3, %cst {dimension_numbers = #tpu.dot_dimension_numbers<[1], [0], [0], [1], [0, 0, 1, 1], [], []>} : vector<256x36xbf16>, vector<36x4xbf16>, vector<256x4xf32> -> vector<256x4xf32>
    %c0_5 = arith.constant 0 : index
    %c0_6 = arith.constant 0 : index
    %c0_7 = arith.constant 0 : index
    %5 = vector.load %arg3[%c0_5, %c0_6, %c0_7] : memref<4x1x4xf32, #tpu.memory_space<vmem>>, vector<1x1x4xf32>
    %6 = vector.shape_cast %5 : vector<1x1x4xf32> to vector<1x4xf32>
    %7 = vector.broadcast %6 : vector<1x4xf32> to vector<256x4xf32>
    %8 = arith.addf %4, %7 : vector<256x4xf32>
    %c1 = arith.constant 1 : index
    %c0_8 = arith.constant 0 : index
    %c0_9 = arith.constant 0 : index
    %9 = vector.load %arg1[%c1, %c0_8, %c0_9] : memref<4x256x36xbf16, #tpu.memory_space<vmem>>, vector<1x256x36xbf16>
    %10 = vector.shape_cast %9 : vector<1x256x36xbf16> to vector<256x36xbf16>
    %c1_10 = arith.constant 1 : index
    %c0_11 = arith.constant 0 : index
    %c0_12 = arith.constant 0 : index
    %11 = vector.load %arg2[%c1_10, %c0_11, %c0_12] : memref<4x36x4xbf16, #tpu.memory_space<vmem>>, vector<1x36x4xbf16>
    %12 = vector.shape_cast %11 : vector<1x36x4xbf16> to vector<36x4xbf16>
    %cst_13 = arith.constant dense<0.000000e+00> : vector<256x4xf32>
    %13 = tpu.matmul %10, %12, %cst_13 {dimension_numbers = #tpu.dot_dimension_numbers<[1], [0], [0], [1], [0, 0, 1, 1], [], []>} : vector<256x36xbf16>, vector<36x4xbf16>, vector<256x4xf32> -> vector<256x4xf32>
    %c1_14 = arith.constant 1 : index
    %c0_15 = arith.constant 0 : index
    %c0_16 = arith.constant 0 : index
    %14 = vector.load %arg3[%c1_14, %c0_15, %c0_16] : memref<4x1x4xf32, #tpu.memory_space<vmem>>, vector<1x1x4xf32>
    %15 = vector.shape_cast %14 : vector<1x1x4xf32> to vector<1x4xf32>
    %16 = vector.broadcast %15 : vector<1x4xf32> to vector<256x4xf32>
    %17 = arith.addf %13, %16 : vector<256x4xf32>
    %c2 = arith.constant 2 : index
    %c0_17 = arith.constant 0 : index
    %c0_18 = arith.constant 0 : index
    %18 = vector.load %arg1[%c2, %c0_17, %c0_18] : memref<4x256x36xbf16, #tpu.memory_space<vmem>>, vector<1x256x36xbf16>
    %19 = vector.shape_cast %18 : vector<1x256x36xbf16> to vector<256x36xbf16>
    %c2_19 = arith.constant 2 : index
    %c0_20 = arith.constant 0 : index
    %c0_21 = arith.constant 0 : index
    %20 = vector.load %arg2[%c2_19, %c0_20, %c0_21] : memref<4x36x4xbf16, #tpu.memory_space<vmem>>, vector<1x36x4xbf16>
    %21 = vector.shape_cast %20 : vector<1x36x4xbf16> to vector<36x4xbf16>
    %cst_22 = arith.constant dense<0.000000e+00> : vector<256x4xf32>
    %22 = tpu.matmul %19, %21, %cst_22 {dimension_numbers = #tpu.dot_dimension_numbers<[1], [0], [0], [1], [0, 0, 1, 1], [], []>} : vector<256x36xbf16>, vector<36x4xbf16>, vector<256x4xf32> -> vector<256x4xf32>
    %c2_23 = arith.constant 2 : index
    %c0_24 = arith.constant 0 : index
    %c0_25 = arith.constant 0 : index
    %23 = vector.load %arg3[%c2_23, %c0_24, %c0_25] : memref<4x1x4xf32, #tpu.memory_space<vmem>>, vector<1x1x4xf32>
    %24 = vector.shape_cast %23 : vector<1x1x4xf32> to vector<1x4xf32>
    %25 = vector.broadcast %24 : vector<1x4xf32> to vector<256x4xf32>
    %26 = arith.addf %22, %25 : vector<256x4xf32>
    %c3 = arith.constant 3 : index
    %c0_26 = arith.constant 0 : index
    %c0_27 = arith.constant 0 : index
    %27 = vector.load %arg1[%c3, %c0_26, %c0_27] : memref<4x256x36xbf16, #tpu.memory_space<vmem>>, vector<1x256x36xbf16>
    %28 = vector.shape_cast %27 : vector<1x256x36xbf16> to vector<256x36xbf16>
    %c3_28 = arith.constant 3 : index
    %c0_29 = arith.constant 0 : index
    %c0_30 = arith.constant 0 : index
    %29 = vector.load %arg2[%c3_28, %c0_29, %c0_30] : memref<4x36x4xbf16, #tpu.memory_space<vmem>>, vector<1x36x4xbf16>
    %30 = vector.shape_cast %29 : vector<1x36x4xbf16> to vector<36x4xbf16>
    %cst_31 = arith.constant dense<0.000000e+00> : vector<256x4xf32>
    %31 = tpu.matmul %28, %30, %cst_31 {dimension_numbers = #tpu.dot_dimension_numbers<[1], [0], [0], [1], [0, 0, 1, 1], [], []>} : vector<256x36xbf16>, vector<36x4xbf16>, vector<256x4xf32> -> vector<256x4xf32>
    %c3_32 = arith.constant 3 : index
    %c0_33 = arith.constant 0 : index
    %c0_34 = arith.constant 0 : index
    %32 = vector.load %arg3[%c3_32, %c0_33, %c0_34] : memref<4x1x4xf32, #tpu.memory_space<vmem>>, vector<1x1x4xf32>
    %33 = vector.shape_cast %32 : vector<1x1x4xf32> to vector<1x4xf32>
    %34 = vector.broadcast %33 : vector<1x4xf32> to vector<256x4xf32>
    %35 = arith.addf %31, %34 : vector<256x4xf32>
    %36 = tpu.concatenate %8, %17, %26, %35 in 1 : vector<256x4xf32>, vector<256x4xf32>, vector<256x4xf32>, vector<256x4xf32> -> vector<256x16xf32>
    %37 = arith.truncf %36 : vector<256x16xf32> to vector<256x16xbf16>
    %c0_35 = arith.constant 0 : index
    %c0_36 = arith.constant 0 : index
    %38 = vector.load %arg4[%c0_35, %c0_36] : memref<256x16xbf16, #tpu.memory_space<vmem>>, vector<256x16xbf16>
    tpu.vector_store %arg4[%c0_35, %c0_36], %37 {strides = array<i32>} : memref<256x16xbf16, #tpu.memory_space<vmem>>, vector<256x16xbf16>,
    return
  }
  func.func @transform_0(%arg0: i32) -> (i32, i32, i32) {
    %c0_i32 = arith.constant 0 : i32
    %c0_i32_0 = arith.constant 0 : i32
    %c0_i32_1 = arith.constant 0 : i32
    return %c0_i32, %arg0, %c0_i32_0 : i32, i32, i32
  }
  func.func @transform_1(%arg0: i32) -> (i32, i32, i32) {
    %c0_i32 = arith.constant 0 : i32
    %c0_i32_0 = arith.constant 0 : i32
    %c0_i32_1 = arith.constant 0 : i32
    %c0_i32_2 = arith.constant 0 : i32
    return %c0_i32, %c0_i32_0, %c0_i32_1 : i32, i32, i32
  }
  func.func @transform_2(%arg0: i32) -> (i32, i32, i32) {
    %c0_i32 = arith.constant 0 : i32
    %c0_i32_0 = arith.constant 0 : i32
    %c0_i32_1 = arith.constant 0 : i32
    %c0_i32_2 = arith.constant 0 : i32
    return %c0_i32, %c0_i32_0, %c0_i32_1 : i32, i32, i32
  }
  func.func @transform_3(%arg0: i32) -> (i32, i32) {
    %c0_i32 = arith.constant 0 : i32
    %c0_i32_0 = arith.constant 0 : i32
    return %arg0, %c0_i32 : i32, i32
  }
}

module attributes {stable_mosaic.version = 11 : i64} {
  func.func @_mm_bias_relu_stats_kernel(%arg0: i32, %arg1: memref<256x16xbf16, #tpu.memory_space<vmem>>, %arg2: memref<16x8xbf16, #tpu.memory_space<vmem>>, %arg3: memref<1x8xf32, #tpu.memory_space<vmem>>, %arg4: memref<256x8xf32, #tpu.memory_space<vmem>>, %arg5: memref<1x8xf32, #tpu.memory_space<vmem>>, %arg6: memref<1x8xf32, #tpu.memory_space<vmem>>) attributes {dimension_semantics = [#tpu.dimension_semantics<arbitrary>], iteration_bounds = array<i64: 2>, scalar_prefetch = 0 : i64, scratch_operands = 0 : i64, tpu.core_type = #tpu.core_type<tc>, window_params = [{transform_indices = @transform_0, window_bounds = array<i64: 256, 16>}, {pipeline_mode = #tpu.pipeline_mode<synchronous>, transform_indices = @transform_1, window_bounds = array<i64: 16, 8>}, {pipeline_mode = #tpu.pipeline_mode<synchronous>, transform_indices = @transform_2, window_bounds = array<i64: 1, 8>}, {transform_indices = @transform_3, window_bounds = array<i64: 256, 8>}, {pipeline_mode = #tpu.pipeline_mode<synchronous>, transform_indices = @transform_4, window_bounds = array<i64: 1, 8>}, {pipeline_mode = #tpu.pipeline_mode<synchronous>, transform_indices = @transform_5, window_bounds = array<i64: 1, 8>}]} {
    %c0 = arith.constant 0 : index
    %c0_0 = arith.constant 0 : index
    %0 = vector.load %arg1[%c0, %c0_0] : memref<256x16xbf16, #tpu.memory_space<vmem>>, vector<256x16xbf16>
    %c0_1 = arith.constant 0 : index
    %c0_2 = arith.constant 0 : index
    %1 = vector.load %arg2[%c0_1, %c0_2] : memref<16x8xbf16, #tpu.memory_space<vmem>>, vector<16x8xbf16>
    %cst = arith.constant dense<0.000000e+00> : vector<256x8xf32>
    %2 = tpu.matmul %0, %1, %cst {dimension_numbers = #tpu.dot_dimension_numbers<[1], [0], [0], [1], [0, 0, 1, 1], [], []>} : vector<256x16xbf16>, vector<16x8xbf16>, vector<256x8xf32> -> vector<256x8xf32>
    %c0_3 = arith.constant 0 : index
    %c0_4 = arith.constant 0 : index
    %3 = vector.load %arg3[%c0_3, %c0_4] : memref<1x8xf32, #tpu.memory_space<vmem>>, vector<1x8xf32>
    %4 = vector.broadcast %3 : vector<1x8xf32> to vector<256x8xf32>
    %5 = arith.addf %2, %4 : vector<256x8xf32>
    %cst_5 = arith.constant 0.000000e+00 : f32
    %6 = vector.broadcast %cst_5 : f32 to vector<256x8xf32>
    %7 = arith.maximumf %5, %6 : vector<256x8xf32>
    %c0_6 = arith.constant 0 : index
    %c0_7 = arith.constant 0 : index
    %8 = vector.load %arg4[%c0_6, %c0_7] : memref<256x8xf32, #tpu.memory_space<vmem>>, vector<256x8xf32>
    tpu.vector_store %arg4[%c0_6, %c0_7], %7 {strides = array<i32>} : memref<256x8xf32, #tpu.memory_space<vmem>>, vector<256x8xf32>,
    %c0_i32 = arith.constant 0 : i32
    %9 = arith.cmpi eq, %arg0, %c0_i32 : i32
    %10 = arith.extui %9 : i1 to i32
    %c0_i32_8 = arith.constant 0 : i32
    %11 = arith.cmpi ne, %10, %c0_i32_8 : i32
    scf.if %11 {
      %cst_19 = arith.constant 0.000000e+00 : f32
      %23 = vector.broadcast %cst_19 : f32 to vector<1x8xf32>
      %c0_20 = arith.constant 0 : index
      %c0_21 = arith.constant 0 : index
      %24 = vector.load %arg5[%c0_20, %c0_21] : memref<1x8xf32, #tpu.memory_space<vmem>>, vector<1x8xf32>
      tpu.vector_store %arg5[%c0_20, %c0_21], %23 {strides = array<i32>} : memref<1x8xf32, #tpu.memory_space<vmem>>, vector<1x8xf32>,
      %cst_22 = arith.constant 0.000000e+00 : f32
      %25 = vector.broadcast %cst_22 : f32 to vector<1x8xf32>
      %c0_23 = arith.constant 0 : index
      %c0_24 = arith.constant 0 : index
      %26 = vector.load %arg6[%c0_23, %c0_24] : memref<1x8xf32, #tpu.memory_space<vmem>>, vector<1x8xf32>
      tpu.vector_store %arg6[%c0_23, %c0_24], %25 {strides = array<i32>} : memref<1x8xf32, #tpu.memory_space<vmem>>, vector<1x8xf32>,
    } else {
    }
    %c0_9 = arith.constant 0 : index
    %c0_10 = arith.constant 0 : index
    %12 = vector.load %arg5[%c0_9, %c0_10] : memref<1x8xf32, #tpu.memory_space<vmem>>, vector<1x8xf32>
    %cst_11 = arith.constant dense<0.000000e+00> : vector<8xf32>
    %13 = vector.multi_reduction <add>, %7, %cst_11 [0] : vector<256x8xf32> to vector<8xf32>
    %14 = vector.shape_cast %13 : vector<8xf32> to vector<1x8xf32>
    %15 = arith.addf %12, %14 : vector<1x8xf32>
    %c0_12 = arith.constant 0 : index
    %c0_13 = arith.constant 0 : index
    %16 = vector.load %arg5[%c0_12, %c0_13] : memref<1x8xf32, #tpu.memory_space<vmem>>, vector<1x8xf32>
    tpu.vector_store %arg5[%c0_12, %c0_13], %15 {strides = array<i32>} : memref<1x8xf32, #tpu.memory_space<vmem>>, vector<1x8xf32>,
    %c0_14 = arith.constant 0 : index
    %c0_15 = arith.constant 0 : index
    %17 = vector.load %arg6[%c0_14, %c0_15] : memref<1x8xf32, #tpu.memory_space<vmem>>, vector<1x8xf32>
    %18 = arith.mulf %7, %7 : vector<256x8xf32>
    %cst_16 = arith.constant dense<0.000000e+00> : vector<8xf32>
    %19 = vector.multi_reduction <add>, %18, %cst_16 [0] : vector<256x8xf32> to vector<8xf32>
    %20 = vector.shape_cast %19 : vector<8xf32> to vector<1x8xf32>
    %21 = arith.addf %17, %20 : vector<1x8xf32>
    %c0_17 = arith.constant 0 : index
    %c0_18 = arith.constant 0 : index
    %22 = vector.load %arg6[%c0_17, %c0_18] : memref<1x8xf32, #tpu.memory_space<vmem>>, vector<1x8xf32>
    tpu.vector_store %arg6[%c0_17, %c0_18], %21 {strides = array<i32>} : memref<1x8xf32, #tpu.memory_space<vmem>>, vector<1x8xf32>,
    return
  }
  func.func @transform_0(%arg0: i32) -> (i32, i32) {
    %c0_i32 = arith.constant 0 : i32
    %c0_i32_0 = arith.constant 0 : i32
    return %arg0, %c0_i32 : i32, i32
  }
  func.func @transform_1(%arg0: i32) -> (i32, i32) {
    %c0_i32 = arith.constant 0 : i32
    %c0_i32_0 = arith.constant 0 : i32
    %c0_i32_1 = arith.constant 0 : i32
    return %c0_i32, %c0_i32_0 : i32, i32
  }
  func.func @transform_2(%arg0: i32) -> (i32, i32) {
    %c0_i32 = arith.constant 0 : i32
    %c0_i32_0 = arith.constant 0 : i32
    %c0_i32_1 = arith.constant 0 : i32
    return %c0_i32, %c0_i32_0 : i32, i32
  }
  func.func @transform_3(%arg0: i32) -> (i32, i32) {
    %c0_i32 = arith.constant 0 : i32
    %c0_i32_0 = arith.constant 0 : i32
    return %arg0, %c0_i32 : i32, i32
  }
  func.func @transform_4(%arg0: i32) -> (i32, i32) {
    %c0_i32 = arith.constant 0 : i32
    %c0_i32_0 = arith.constant 0 : i32
    %c0_i32_1 = arith.constant 0 : i32
    return %c0_i32, %c0_i32_0 : i32, i32
  }
  func.func @transform_5(%arg0: i32) -> (i32, i32) {
    %c0_i32 = arith.constant 0 : i32
    %c0_i32_0 = arith.constant 0 : i32
    %c0_i32_1 = arith.constant 0 : i32
    return %c0_i32, %c0_i32_0 : i32, i32
  }
}

module attributes {stable_mosaic.version = 11 : i64} {
  func.func @_hinterp_bn_kernel(%arg0: i32, %arg1: i32, %arg2: memref<32x16xf32, #tpu.memory_space<vmem>>, %arg3: memref<1x16x128xf32, #tpu.memory_space<vmem>>, %arg4: memref<1x128xf32, #tpu.memory_space<vmem>>, %arg5: memref<1x128xf32, #tpu.memory_space<vmem>>, %arg6: memref<1x32x128xf32, #tpu.memory_space<vmem>>) attributes {dimension_semantics = [#tpu.dimension_semantics<parallel>, #tpu.dimension_semantics<parallel>], iteration_bounds = array<i64: 2, 1>, scalar_prefetch = 0 : i64, scratch_operands = 0 : i64, tpu.core_type = #tpu.core_type<tc>, window_params = [{pipeline_mode = #tpu.pipeline_mode<synchronous>, transform_indices = @transform_0, window_bounds = array<i64: 32, 16>}, {transform_indices = @transform_1, window_bounds = array<i64: 1, 16, 128>}, {transform_indices = @transform_2, window_bounds = array<i64: 1, 128>}, {transform_indices = @transform_3, window_bounds = array<i64: 1, 128>}, {transform_indices = @transform_4, window_bounds = array<i64: 1, 32, 128>}]} {
    %c0 = arith.constant 0 : index
    %c0_0 = arith.constant 0 : index
    %0 = vector.load %arg2[%c0, %c0_0] : memref<32x16xf32, #tpu.memory_space<vmem>>, vector<32x16xf32>
    %c0_1 = arith.constant 0 : index
    %c0_2 = arith.constant 0 : index
    %c0_3 = arith.constant 0 : index
    %1 = vector.load %arg3[%c0_1, %c0_2, %c0_3] : memref<1x16x128xf32, #tpu.memory_space<vmem>>, vector<1x16x128xf32>
    %2 = vector.shape_cast %1 : vector<1x16x128xf32> to vector<16x128xf32>
    %cst = arith.constant dense<0.000000e+00> : vector<32x128xf32>
    %3 = tpu.matmul %0, %2, %cst {dimension_numbers = #tpu.dot_dimension_numbers<[1], [0], [0], [1], [0, 0, 1, 1], [], []>, precision = #tpu.contract_precision<fp32>} : vector<32x16xf32>, vector<16x128xf32>, vector<32x128xf32> -> vector<32x128xf32>
    %c0_4 = arith.constant 0 : index
    %c0_5 = arith.constant 0 : index
    %4 = vector.load %arg4[%c0_4, %c0_5] : memref<1x128xf32, #tpu.memory_space<vmem>>, vector<1x128xf32>
    %5 = vector.broadcast %4 : vector<1x128xf32> to vector<32x128xf32>
    %6 = arith.mulf %3, %5 : vector<32x128xf32>
    %c0_6 = arith.constant 0 : index
    %c0_7 = arith.constant 0 : index
    %7 = vector.load %arg5[%c0_6, %c0_7] : memref<1x128xf32, #tpu.memory_space<vmem>>, vector<1x128xf32>
    %8 = vector.broadcast %7 : vector<1x128xf32> to vector<32x128xf32>
    %9 = arith.addf %6, %8 : vector<32x128xf32>
    %c0_8 = arith.constant 0 : index
    %c0_9 = arith.constant 0 : index
    %c0_10 = arith.constant 0 : index
    %10 = vector.load %arg6[%c0_8, %c0_9, %c0_10] : memref<1x32x128xf32, #tpu.memory_space<vmem>>, vector<1x32x128xf32>
    %11 = vector.shape_cast %10 : vector<1x32x128xf32> to vector<32x128xf32>
    %12 = vector.shape_cast %9 : vector<32x128xf32> to vector<1x32x128xf32>
    tpu.vector_store %arg6[%c0_8, %c0_9, %c0_10], %12 {strides = array<i32>} : memref<1x32x128xf32, #tpu.memory_space<vmem>>, vector<1x32x128xf32>,
    return
  }
  func.func @transform_0(%arg0: i32, %arg1: i32) -> (i32, i32) {
    %c0_i32 = arith.constant 0 : i32
    %c0_i32_0 = arith.constant 0 : i32
    %c0_i32_1 = arith.constant 0 : i32
    return %c0_i32, %c0_i32_0 : i32, i32
  }
  func.func @transform_1(%arg0: i32, %arg1: i32) -> (i32, i32, i32) {
    %c0_i32 = arith.constant 0 : i32
    %c0_i32_0 = arith.constant 0 : i32
    return %arg0, %c0_i32, %arg1 : i32, i32, i32
  }
  func.func @transform_2(%arg0: i32, %arg1: i32) -> (i32, i32) {
    %c0_i32 = arith.constant 0 : i32
    %c0_i32_0 = arith.constant 0 : i32
    return %c0_i32, %arg1 : i32, i32
  }
  func.func @transform_3(%arg0: i32, %arg1: i32) -> (i32, i32) {
    %c0_i32 = arith.constant 0 : i32
    %c0_i32_0 = arith.constant 0 : i32
    return %c0_i32, %arg1 : i32, i32
  }
  func.func @transform_4(%arg0: i32, %arg1: i32) -> (i32, i32, i32) {
    %c0_i32 = arith.constant 0 : i32
    %c0_i32_0 = arith.constant 0 : i32
    return %arg0, %c0_i32, %arg1 : i32, i32, i32
  }
}

module attributes {stable_mosaic.version = 11 : i64} {
  func.func @_winterp_kernel(%arg0: i32, %arg1: memref<32x16xf32, #tpu.memory_space<vmem>>, %arg2: memref<16x16x8xf32, #tpu.memory_space<vmem>>, %arg3: memref<16x32x8xbf16, #tpu.memory_space<vmem>>) attributes {dimension_semantics = [#tpu.dimension_semantics<parallel>], iteration_bounds = array<i64: 4>, scalar_prefetch = 0 : i64, scratch_operands = 0 : i64, tpu.core_type = #tpu.core_type<tc>, window_params = [{pipeline_mode = #tpu.pipeline_mode<synchronous>, transform_indices = @transform_0, window_bounds = array<i64: 32, 16>}, {transform_indices = @transform_1, window_bounds = array<i64: 16, 16, 8>}, {transform_indices = @transform_2, window_bounds = array<i64: 16, 32, 8>}]} {
    %c0 = arith.constant 0 : index
    %c0_0 = arith.constant 0 : index
    %0 = vector.load %arg1[%c0, %c0_0] : memref<32x16xf32, #tpu.memory_space<vmem>>, vector<32x16xf32>
    %c0_1 = arith.constant 0 : index
    %c0_2 = arith.constant 0 : index
    %c0_3 = arith.constant 0 : index
    %1 = vector.load %arg2[%c0_1, %c0_2, %c0_3] : memref<16x16x8xf32, #tpu.memory_space<vmem>>, vector<1x16x8xf32>
    %2 = vector.shape_cast %1 : vector<1x16x8xf32> to vector<16x8xf32>
    %cst = arith.constant dense<0.000000e+00> : vector<32x8xf32>
    %3 = tpu.matmul %0, %2, %cst {dimension_numbers = #tpu.dot_dimension_numbers<[1], [0], [0], [1], [0, 0, 1, 1], [], []>, precision = #tpu.contract_precision<fp32>} : vector<32x16xf32>, vector<16x8xf32>, vector<32x8xf32> -> vector<32x8xf32>
    %4 = arith.truncf %3 : vector<32x8xf32> to vector<32x8xbf16>
    %c0_4 = arith.constant 0 : index
    %c0_5 = arith.constant 0 : index
    %c0_6 = arith.constant 0 : index
    %5 = vector.load %arg3[%c0_4, %c0_5, %c0_6] : memref<16x32x8xbf16, #tpu.memory_space<vmem>>, vector<1x32x8xbf16>
    %6 = vector.shape_cast %5 : vector<1x32x8xbf16> to vector<32x8xbf16>
    %7 = vector.shape_cast %4 : vector<32x8xbf16> to vector<1x32x8xbf16>
    tpu.vector_store %arg3[%c0_4, %c0_5, %c0_6], %7 {strides = array<i32>} : memref<16x32x8xbf16, #tpu.memory_space<vmem>>, vector<1x32x8xbf16>,
    %c0_7 = arith.constant 0 : index
    %c0_8 = arith.constant 0 : index
    %8 = vector.load %arg1[%c0_7, %c0_8] : memref<32x16xf32, #tpu.memory_space<vmem>>, vector<32x16xf32>
    %c1 = arith.constant 1 : index
    %c0_9 = arith.constant 0 : index
    %c0_10 = arith.constant 0 : index
    %9 = vector.load %arg2[%c1, %c0_9, %c0_10] : memref<16x16x8xf32, #tpu.memory_space<vmem>>, vector<1x16x8xf32>
    %10 = vector.shape_cast %9 : vector<1x16x8xf32> to vector<16x8xf32>
    %cst_11 = arith.constant dense<0.000000e+00> : vector<32x8xf32>
    %11 = tpu.matmul %8, %10, %cst_11 {dimension_numbers = #tpu.dot_dimension_numbers<[1], [0], [0], [1], [0, 0, 1, 1], [], []>, precision = #tpu.contract_precision<fp32>} : vector<32x16xf32>, vector<16x8xf32>, vector<32x8xf32> -> vector<32x8xf32>
    %12 = arith.truncf %11 : vector<32x8xf32> to vector<32x8xbf16>
    %c1_12 = arith.constant 1 : index
    %c0_13 = arith.constant 0 : index
    %c0_14 = arith.constant 0 : index
    %13 = vector.load %arg3[%c1_12, %c0_13, %c0_14] : memref<16x32x8xbf16, #tpu.memory_space<vmem>>, vector<1x32x8xbf16>
    %14 = vector.shape_cast %13 : vector<1x32x8xbf16> to vector<32x8xbf16>
    %15 = vector.shape_cast %12 : vector<32x8xbf16> to vector<1x32x8xbf16>
    tpu.vector_store %arg3[%c1_12, %c0_13, %c0_14], %15 {strides = array<i32>} : memref<16x32x8xbf16, #tpu.memory_space<vmem>>, vector<1x32x8xbf16>,
    %c0_15 = arith.constant 0 : index
    %c0_16 = arith.constant 0 : index
    %16 = vector.load %arg1[%c0_15, %c0_16] : memref<32x16xf32, #tpu.memory_space<vmem>>, vector<32x16xf32>
    %c2 = arith.constant 2 : index
    %c0_17 = arith.constant 0 : index
    %c0_18 = arith.constant 0 : index
    %17 = vector.load %arg2[%c2, %c0_17, %c0_18] : memref<16x16x8xf32, #tpu.memory_space<vmem>>, vector<1x16x8xf32>
    %18 = vector.shape_cast %17 : vector<1x16x8xf32> to vector<16x8xf32>
    %cst_19 = arith.constant dense<0.000000e+00> : vector<32x8xf32>
    %19 = tpu.matmul %16, %18, %cst_19 {dimension_numbers = #tpu.dot_dimension_numbers<[1], [0], [0], [1], [0, 0, 1, 1], [], []>, precision = #tpu.contract_precision<fp32>} : vector<32x16xf32>, vector<16x8xf32>, vector<32x8xf32> -> vector<32x8xf32>
    %20 = arith.truncf %19 : vector<32x8xf32> to vector<32x8xbf16>
    %c2_20 = arith.constant 2 : index
    %c0_21 = arith.constant 0 : index
    %c0_22 = arith.constant 0 : index
    %21 = vector.load %arg3[%c2_20, %c0_21, %c0_22] : memref<16x32x8xbf16, #tpu.memory_space<vmem>>, vector<1x32x8xbf16>
    %22 = vector.shape_cast %21 : vector<1x32x8xbf16> to vector<32x8xbf16>
    %23 = vector.shape_cast %20 : vector<32x8xbf16> to vector<1x32x8xbf16>
    tpu.vector_store %arg3[%c2_20, %c0_21, %c0_22], %23 {strides = array<i32>} : memref<16x32x8xbf16, #tpu.memory_space<vmem>>, vector<1x32x8xbf16>,
    %c0_23 = arith.constant 0 : index
    %c0_24 = arith.constant 0 : index
    %24 = vector.load %arg1[%c0_23, %c0_24] : memref<32x16xf32, #tpu.memory_space<vmem>>, vector<32x16xf32>
    %c3 = arith.constant 3 : index
    %c0_25 = arith.constant 0 : index
    %c0_26 = arith.constant 0 : index
    %25 = vector.load %arg2[%c3, %c0_25, %c0_26] : memref<16x16x8xf32, #tpu.memory_space<vmem>>, vector<1x16x8xf32>
    %26 = vector.shape_cast %25 : vector<1x16x8xf32> to vector<16x8xf32>
    %cst_27 = arith.constant dense<0.000000e+00> : vector<32x8xf32>
    %27 = tpu.matmul %24, %26, %cst_27 {dimension_numbers = #tpu.dot_dimension_numbers<[1], [0], [0], [1], [0, 0, 1, 1], [], []>, precision = #tpu.contract_precision<fp32>} : vector<32x16xf32>, vector<16x8xf32>, vector<32x8xf32> -> vector<32x8xf32>
    %28 = arith.truncf %27 : vector<32x8xf32> to vector<32x8xbf16>
    %c3_28 = arith.constant 3 : index
    %c0_29 = arith.constant 0 : index
    %c0_30 = arith.constant 0 : index
    %29 = vector.load %arg3[%c3_28, %c0_29, %c0_30] : memref<16x32x8xbf16, #tpu.memory_space<vmem>>, vector<1x32x8xbf16>
    %30 = vector.shape_cast %29 : vector<1x32x8xbf16> to vector<32x8xbf16>
    %31 = vector.shape_cast %28 : vector<32x8xbf16> to vector<1x32x8xbf16>
    tpu.vector_store %arg3[%c3_28, %c0_29, %c0_30], %31 {strides = array<i32>} : memref<16x32x8xbf16, #tpu.memory_space<vmem>>, vector<1x32x8xbf16>,
    %c0_31 = arith.constant 0 : index
    %c0_32 = arith.constant 0 : index
    %32 = vector.load %arg1[%c0_31, %c0_32] : memref<32x16xf32, #tpu.memory_space<vmem>>, vector<32x16xf32>
    %c4 = arith.constant 4 : index
    %c0_33 = arith.constant 0 : index
    %c0_34 = arith.constant 0 : index
    %33 = vector.load %arg2[%c4, %c0_33, %c0_34] : memref<16x16x8xf32, #tpu.memory_space<vmem>>, vector<1x16x8xf32>
    %34 = vector.shape_cast %33 : vector<1x16x8xf32> to vector<16x8xf32>
    %cst_35 = arith.constant dense<0.000000e+00> : vector<32x8xf32>
    %35 = tpu.matmul %32, %34, %cst_35 {dimension_numbers = #tpu.dot_dimension_numbers<[1], [0], [0], [1], [0, 0, 1, 1], [], []>, precision = #tpu.contract_precision<fp32>} : vector<32x16xf32>, vector<16x8xf32>, vector<32x8xf32> -> vector<32x8xf32>
    %36 = arith.truncf %35 : vector<32x8xf32> to vector<32x8xbf16>
    %c4_36 = arith.constant 4 : index
    %c0_37 = arith.constant 0 : index
    %c0_38 = arith.constant 0 : index
    %37 = vector.load %arg3[%c4_36, %c0_37, %c0_38] : memref<16x32x8xbf16, #tpu.memory_space<vmem>>, vector<1x32x8xbf16>
    %38 = vector.shape_cast %37 : vector<1x32x8xbf16> to vector<32x8xbf16>
    %39 = vector.shape_cast %36 : vector<32x8xbf16> to vector<1x32x8xbf16>
    tpu.vector_store %arg3[%c4_36, %c0_37, %c0_38], %39 {strides = array<i32>} : memref<16x32x8xbf16, #tpu.memory_space<vmem>>, vector<1x32x8xbf16>,
    %c0_39 = arith.constant 0 : index
    %c0_40 = arith.constant 0 : index
    %40 = vector.load %arg1[%c0_39, %c0_40] : memref<32x16xf32, #tpu.memory_space<vmem>>, vector<32x16xf32>
    %c5 = arith.constant 5 : index
    %c0_41 = arith.constant 0 : index
    %c0_42 = arith.constant 0 : index
    %41 = vector.load %arg2[%c5, %c0_41, %c0_42] : memref<16x16x8xf32, #tpu.memory_space<vmem>>, vector<1x16x8xf32>
    %42 = vector.shape_cast %41 : vector<1x16x8xf32> to vector<16x8xf32>
    %cst_43 = arith.constant dense<0.000000e+00> : vector<32x8xf32>
    %43 = tpu.matmul %40, %42, %cst_43 {dimension_numbers = #tpu.dot_dimension_numbers<[1], [0], [0], [1], [0, 0, 1, 1], [], []>, precision = #tpu.contract_precision<fp32>} : vector<32x16xf32>, vector<16x8xf32>, vector<32x8xf32> -> vector<32x8xf32>
    %44 = arith.truncf %43 : vector<32x8xf32> to vector<32x8xbf16>
    %c5_44 = arith.constant 5 : index
    %c0_45 = arith.constant 0 : index
    %c0_46 = arith.constant 0 : index
    %45 = vector.load %arg3[%c5_44, %c0_45, %c0_46] : memref<16x32x8xbf16, #tpu.memory_space<vmem>>, vector<1x32x8xbf16>
    %46 = vector.shape_cast %45 : vector<1x32x8xbf16> to vector<32x8xbf16>
    %47 = vector.shape_cast %44 : vector<32x8xbf16> to vector<1x32x8xbf16>
    tpu.vector_store %arg3[%c5_44, %c0_45, %c0_46], %47 {strides = array<i32>} : memref<16x32x8xbf16, #tpu.memory_space<vmem>>, vector<1x32x8xbf16>,
    %c0_47 = arith.constant 0 : index
    %c0_48 = arith.constant 0 : index
    %48 = vector.load %arg1[%c0_47, %c0_48] : memref<32x16xf32, #tpu.memory_space<vmem>>, vector<32x16xf32>
    %c6 = arith.constant 6 : index
    %c0_49 = arith.constant 0 : index
    %c0_50 = arith.constant 0 : index
    %49 = vector.load %arg2[%c6, %c0_49, %c0_50] : memref<16x16x8xf32, #tpu.memory_space<vmem>>, vector<1x16x8xf32>
    %50 = vector.shape_cast %49 : vector<1x16x8xf32> to vector<16x8xf32>
    %cst_51 = arith.constant dense<0.000000e+00> : vector<32x8xf32>
    %51 = tpu.matmul %48, %50, %cst_51 {dimension_numbers = #tpu.dot_dimension_numbers<[1], [0], [0], [1], [0, 0, 1, 1], [], []>, precision = #tpu.contract_precision<fp32>} : vector<32x16xf32>, vector<16x8xf32>, vector<32x8xf32> -> vector<32x8xf32>
    %52 = arith.truncf %51 : vector<32x8xf32> to vector<32x8xbf16>
    %c6_52 = arith.constant 6 : index
    %c0_53 = arith.constant 0 : index
    %c0_54 = arith.constant 0 : index
    %53 = vector.load %arg3[%c6_52, %c0_53, %c0_54] : memref<16x32x8xbf16, #tpu.memory_space<vmem>>, vector<1x32x8xbf16>
    %54 = vector.shape_cast %53 : vector<1x32x8xbf16> to vector<32x8xbf16>
    %55 = vector.shape_cast %52 : vector<32x8xbf16> to vector<1x32x8xbf16>
    tpu.vector_store %arg3[%c6_52, %c0_53, %c0_54], %55 {strides = array<i32>} : memref<16x32x8xbf16, #tpu.memory_space<vmem>>, vector<1x32x8xbf16>,
    %c0_55 = arith.constant 0 : index
    %c0_56 = arith.constant 0 : index
    %56 = vector.load %arg1[%c0_55, %c0_56] : memref<32x16xf32, #tpu.memory_space<vmem>>, vector<32x16xf32>
    %c7 = arith.constant 7 : index
    %c0_57 = arith.constant 0 : index
    %c0_58 = arith.constant 0 : index
    %57 = vector.load %arg2[%c7, %c0_57, %c0_58] : memref<16x16x8xf32, #tpu.memory_space<vmem>>, vector<1x16x8xf32>
    %58 = vector.shape_cast %57 : vector<1x16x8xf32> to vector<16x8xf32>
    %cst_59 = arith.constant dense<0.000000e+00> : vector<32x8xf32>
    %59 = tpu.matmul %56, %58, %cst_59 {dimension_numbers = #tpu.dot_dimension_numbers<[1], [0], [0], [1], [0, 0, 1, 1], [], []>, precision = #tpu.contract_precision<fp32>} : vector<32x16xf32>, vector<16x8xf32>, vector<32x8xf32> -> vector<32x8xf32>
    %60 = arith.truncf %59 : vector<32x8xf32> to vector<32x8xbf16>
    %c7_60 = arith.constant 7 : index
    %c0_61 = arith.constant 0 : index
    %c0_62 = arith.constant 0 : index
    %61 = vector.load %arg3[%c7_60, %c0_61, %c0_62] : memref<16x32x8xbf16, #tpu.memory_space<vmem>>, vector<1x32x8xbf16>
    %62 = vector.shape_cast %61 : vector<1x32x8xbf16> to vector<32x8xbf16>
    %63 = vector.shape_cast %60 : vector<32x8xbf16> to vector<1x32x8xbf16>
    tpu.vector_store %arg3[%c7_60, %c0_61, %c0_62], %63 {strides = array<i32>} : memref<16x32x8xbf16, #tpu.memory_space<vmem>>, vector<1x32x8xbf16>,
    %c0_63 = arith.constant 0 : index
    %c0_64 = arith.constant 0 : index
    %64 = vector.load %arg1[%c0_63, %c0_64] : memref<32x16xf32, #tpu.memory_space<vmem>>, vector<32x16xf32>
    %c8 = arith.constant 8 : index
    %c0_65 = arith.constant 0 : index
    %c0_66 = arith.constant 0 : index
    %65 = vector.load %arg2[%c8, %c0_65, %c0_66] : memref<16x16x8xf32, #tpu.memory_space<vmem>>, vector<1x16x8xf32>
    %66 = vector.shape_cast %65 : vector<1x16x8xf32> to vector<16x8xf32>
    %cst_67 = arith.constant dense<0.000000e+00> : vector<32x8xf32>
    %67 = tpu.matmul %64, %66, %cst_67 {dimension_numbers = #tpu.dot_dimension_numbers<[1], [0], [0], [1], [0, 0, 1, 1], [], []>, precision = #tpu.contract_precision<fp32>} : vector<32x16xf32>, vector<16x8xf32>, vector<32x8xf32> -> vector<32x8xf32>
    %68 = arith.truncf %67 : vector<32x8xf32> to vector<32x8xbf16>
    %c8_68 = arith.constant 8 : index
    %c0_69 = arith.constant 0 : index
    %c0_70 = arith.constant 0 : index
    %69 = vector.load %arg3[%c8_68, %c0_69, %c0_70] : memref<16x32x8xbf16, #tpu.memory_space<vmem>>, vector<1x32x8xbf16>
    %70 = vector.shape_cast %69 : vector<1x32x8xbf16> to vector<32x8xbf16>
    %71 = vector.shape_cast %68 : vector<32x8xbf16> to vector<1x32x8xbf16>
    tpu.vector_store %arg3[%c8_68, %c0_69, %c0_70], %71 {strides = array<i32>} : memref<16x32x8xbf16, #tpu.memory_space<vmem>>, vector<1x32x8xbf16>,
    %c0_71 = arith.constant 0 : index
    %c0_72 = arith.constant 0 : index
    %72 = vector.load %arg1[%c0_71, %c0_72] : memref<32x16xf32, #tpu.memory_space<vmem>>, vector<32x16xf32>
    %c9 = arith.constant 9 : index
    %c0_73 = arith.constant 0 : index
    %c0_74 = arith.constant 0 : index
    %73 = vector.load %arg2[%c9, %c0_73, %c0_74] : memref<16x16x8xf32, #tpu.memory_space<vmem>>, vector<1x16x8xf32>
    %74 = vector.shape_cast %73 : vector<1x16x8xf32> to vector<16x8xf32>
    %cst_75 = arith.constant dense<0.000000e+00> : vector<32x8xf32>
    %75 = tpu.matmul %72, %74, %cst_75 {dimension_numbers = #tpu.dot_dimension_numbers<[1], [0], [0], [1], [0, 0, 1, 1], [], []>, precision = #tpu.contract_precision<fp32>} : vector<32x16xf32>, vector<16x8xf32>, vector<32x8xf32> -> vector<32x8xf32>
    %76 = arith.truncf %75 : vector<32x8xf32> to vector<32x8xbf16>
    %c9_76 = arith.constant 9 : index
    %c0_77 = arith.constant 0 : index
    %c0_78 = arith.constant 0 : index
    %77 = vector.load %arg3[%c9_76, %c0_77, %c0_78] : memref<16x32x8xbf16, #tpu.memory_space<vmem>>, vector<1x32x8xbf16>
    %78 = vector.shape_cast %77 : vector<1x32x8xbf16> to vector<32x8xbf16>
    %79 = vector.shape_cast %76 : vector<32x8xbf16> to vector<1x32x8xbf16>
    tpu.vector_store %arg3[%c9_76, %c0_77, %c0_78], %79 {strides = array<i32>} : memref<16x32x8xbf16, #tpu.memory_space<vmem>>, vector<1x32x8xbf16>,
    %c0_79 = arith.constant 0 : index
    %c0_80 = arith.constant 0 : index
    %80 = vector.load %arg1[%c0_79, %c0_80] : memref<32x16xf32, #tpu.memory_space<vmem>>, vector<32x16xf32>
    %c10 = arith.constant 10 : index
    %c0_81 = arith.constant 0 : index
    %c0_82 = arith.constant 0 : index
    %81 = vector.load %arg2[%c10, %c0_81, %c0_82] : memref<16x16x8xf32, #tpu.memory_space<vmem>>, vector<1x16x8xf32>
    %82 = vector.shape_cast %81 : vector<1x16x8xf32> to vector<16x8xf32>
    %cst_83 = arith.constant dense<0.000000e+00> : vector<32x8xf32>
    %83 = tpu.matmul %80, %82, %cst_83 {dimension_numbers = #tpu.dot_dimension_numbers<[1], [0], [0], [1], [0, 0, 1, 1], [], []>, precision = #tpu.contract_precision<fp32>} : vector<32x16xf32>, vector<16x8xf32>, vector<32x8xf32> -> vector<32x8xf32>
    %84 = arith.truncf %83 : vector<32x8xf32> to vector<32x8xbf16>
    %c10_84 = arith.constant 10 : index
    %c0_85 = arith.constant 0 : index
    %c0_86 = arith.constant 0 : index
    %85 = vector.load %arg3[%c10_84, %c0_85, %c0_86] : memref<16x32x8xbf16, #tpu.memory_space<vmem>>, vector<1x32x8xbf16>
    %86 = vector.shape_cast %85 : vector<1x32x8xbf16> to vector<32x8xbf16>
    %87 = vector.shape_cast %84 : vector<32x8xbf16> to vector<1x32x8xbf16>
    tpu.vector_store %arg3[%c10_84, %c0_85, %c0_86], %87 {strides = array<i32>} : memref<16x32x8xbf16, #tpu.memory_space<vmem>>, vector<1x32x8xbf16>,
    %c0_87 = arith.constant 0 : index
    %c0_88 = arith.constant 0 : index
    %88 = vector.load %arg1[%c0_87, %c0_88] : memref<32x16xf32, #tpu.memory_space<vmem>>, vector<32x16xf32>
    %c11 = arith.constant 11 : index
    %c0_89 = arith.constant 0 : index
    %c0_90 = arith.constant 0 : index
    %89 = vector.load %arg2[%c11, %c0_89, %c0_90] : memref<16x16x8xf32, #tpu.memory_space<vmem>>, vector<1x16x8xf32>
    %90 = vector.shape_cast %89 : vector<1x16x8xf32> to vector<16x8xf32>
    %cst_91 = arith.constant dense<0.000000e+00> : vector<32x8xf32>
    %91 = tpu.matmul %88, %90, %cst_91 {dimension_numbers = #tpu.dot_dimension_numbers<[1], [0], [0], [1], [0, 0, 1, 1], [], []>, precision = #tpu.contract_precision<fp32>} : vector<32x16xf32>, vector<16x8xf32>, vector<32x8xf32> -> vector<32x8xf32>
    %92 = arith.truncf %91 : vector<32x8xf32> to vector<32x8xbf16>
    %c11_92 = arith.constant 11 : index
    %c0_93 = arith.constant 0 : index
    %c0_94 = arith.constant 0 : index
    %93 = vector.load %arg3[%c11_92, %c0_93, %c0_94] : memref<16x32x8xbf16, #tpu.memory_space<vmem>>, vector<1x32x8xbf16>
    %94 = vector.shape_cast %93 : vector<1x32x8xbf16> to vector<32x8xbf16>
    %95 = vector.shape_cast %92 : vector<32x8xbf16> to vector<1x32x8xbf16>
    tpu.vector_store %arg3[%c11_92, %c0_93, %c0_94], %95 {strides = array<i32>} : memref<16x32x8xbf16, #tpu.memory_space<vmem>>, vector<1x32x8xbf16>,
    %c0_95 = arith.constant 0 : index
    %c0_96 = arith.constant 0 : index
    %96 = vector.load %arg1[%c0_95, %c0_96] : memref<32x16xf32, #tpu.memory_space<vmem>>, vector<32x16xf32>
    %c12 = arith.constant 12 : index
    %c0_97 = arith.constant 0 : index
    %c0_98 = arith.constant 0 : index
    %97 = vector.load %arg2[%c12, %c0_97, %c0_98] : memref<16x16x8xf32, #tpu.memory_space<vmem>>, vector<1x16x8xf32>
    %98 = vector.shape_cast %97 : vector<1x16x8xf32> to vector<16x8xf32>
    %cst_99 = arith.constant dense<0.000000e+00> : vector<32x8xf32>
    %99 = tpu.matmul %96, %98, %cst_99 {dimension_numbers = #tpu.dot_dimension_numbers<[1], [0], [0], [1], [0, 0, 1, 1], [], []>, precision = #tpu.contract_precision<fp32>} : vector<32x16xf32>, vector<16x8xf32>, vector<32x8xf32> -> vector<32x8xf32>
    %100 = arith.truncf %99 : vector<32x8xf32> to vector<32x8xbf16>
    %c12_100 = arith.constant 12 : index
    %c0_101 = arith.constant 0 : index
    %c0_102 = arith.constant 0 : index
    %101 = vector.load %arg3[%c12_100, %c0_101, %c0_102] : memref<16x32x8xbf16, #tpu.memory_space<vmem>>, vector<1x32x8xbf16>
    %102 = vector.shape_cast %101 : vector<1x32x8xbf16> to vector<32x8xbf16>
    %103 = vector.shape_cast %100 : vector<32x8xbf16> to vector<1x32x8xbf16>
    tpu.vector_store %arg3[%c12_100, %c0_101, %c0_102], %103 {strides = array<i32>} : memref<16x32x8xbf16, #tpu.memory_space<vmem>>, vector<1x32x8xbf16>,
    %c0_103 = arith.constant 0 : index
    %c0_104 = arith.constant 0 : index
    %104 = vector.load %arg1[%c0_103, %c0_104] : memref<32x16xf32, #tpu.memory_space<vmem>>, vector<32x16xf32>
    %c13 = arith.constant 13 : index
    %c0_105 = arith.constant 0 : index
    %c0_106 = arith.constant 0 : index
    %105 = vector.load %arg2[%c13, %c0_105, %c0_106] : memref<16x16x8xf32, #tpu.memory_space<vmem>>, vector<1x16x8xf32>
    %106 = vector.shape_cast %105 : vector<1x16x8xf32> to vector<16x8xf32>
    %cst_107 = arith.constant dense<0.000000e+00> : vector<32x8xf32>
    %107 = tpu.matmul %104, %106, %cst_107 {dimension_numbers = #tpu.dot_dimension_numbers<[1], [0], [0], [1], [0, 0, 1, 1], [], []>, precision = #tpu.contract_precision<fp32>} : vector<32x16xf32>, vector<16x8xf32>, vector<32x8xf32> -> vector<32x8xf32>
    %108 = arith.truncf %107 : vector<32x8xf32> to vector<32x8xbf16>
    %c13_108 = arith.constant 13 : index
    %c0_109 = arith.constant 0 : index
    %c0_110 = arith.constant 0 : index
    %109 = vector.load %arg3[%c13_108, %c0_109, %c0_110] : memref<16x32x8xbf16, #tpu.memory_space<vmem>>, vector<1x32x8xbf16>
    %110 = vector.shape_cast %109 : vector<1x32x8xbf16> to vector<32x8xbf16>
    %111 = vector.shape_cast %108 : vector<32x8xbf16> to vector<1x32x8xbf16>
    tpu.vector_store %arg3[%c13_108, %c0_109, %c0_110], %111 {strides = array<i32>} : memref<16x32x8xbf16, #tpu.memory_space<vmem>>, vector<1x32x8xbf16>,
    %c0_111 = arith.constant 0 : index
    %c0_112 = arith.constant 0 : index
    %112 = vector.load %arg1[%c0_111, %c0_112] : memref<32x16xf32, #tpu.memory_space<vmem>>, vector<32x16xf32>
    %c14 = arith.constant 14 : index
    %c0_113 = arith.constant 0 : index
    %c0_114 = arith.constant 0 : index
    %113 = vector.load %arg2[%c14, %c0_113, %c0_114] : memref<16x16x8xf32, #tpu.memory_space<vmem>>, vector<1x16x8xf32>
    %114 = vector.shape_cast %113 : vector<1x16x8xf32> to vector<16x8xf32>
    %cst_115 = arith.constant dense<0.000000e+00> : vector<32x8xf32>
    %115 = tpu.matmul %112, %114, %cst_115 {dimension_numbers = #tpu.dot_dimension_numbers<[1], [0], [0], [1], [0, 0, 1, 1], [], []>, precision = #tpu.contract_precision<fp32>} : vector<32x16xf32>, vector<16x8xf32>, vector<32x8xf32> -> vector<32x8xf32>
    %116 = arith.truncf %115 : vector<32x8xf32> to vector<32x8xbf16>
    %c14_116 = arith.constant 14 : index
    %c0_117 = arith.constant 0 : index
    %c0_118 = arith.constant 0 : index
    %117 = vector.load %arg3[%c14_116, %c0_117, %c0_118] : memref<16x32x8xbf16, #tpu.memory_space<vmem>>, vector<1x32x8xbf16>
    %118 = vector.shape_cast %117 : vector<1x32x8xbf16> to vector<32x8xbf16>
    %119 = vector.shape_cast %116 : vector<32x8xbf16> to vector<1x32x8xbf16>
    tpu.vector_store %arg3[%c14_116, %c0_117, %c0_118], %119 {strides = array<i32>} : memref<16x32x8xbf16, #tpu.memory_space<vmem>>, vector<1x32x8xbf16>,
    %c0_119 = arith.constant 0 : index
    %c0_120 = arith.constant 0 : index
    %120 = vector.load %arg1[%c0_119, %c0_120] : memref<32x16xf32, #tpu.memory_space<vmem>>, vector<32x16xf32>
    %c15 = arith.constant 15 : index
    %c0_121 = arith.constant 0 : index
    %c0_122 = arith.constant 0 : index
    %121 = vector.load %arg2[%c15, %c0_121, %c0_122] : memref<16x16x8xf32, #tpu.memory_space<vmem>>, vector<1x16x8xf32>
    %122 = vector.shape_cast %121 : vector<1x16x8xf32> to vector<16x8xf32>
    %cst_123 = arith.constant dense<0.000000e+00> : vector<32x8xf32>
    %123 = tpu.matmul %120, %122, %cst_123 {dimension_numbers = #tpu.dot_dimension_numbers<[1], [0], [0], [1], [0, 0, 1, 1], [], []>, precision = #tpu.contract_precision<fp32>} : vector<32x16xf32>, vector<16x8xf32>, vector<32x8xf32> -> vector<32x8xf32>
    %124 = arith.truncf %123 : vector<32x8xf32> to vector<32x8xbf16>
    %c15_124 = arith.constant 15 : index
    %c0_125 = arith.constant 0 : index
    %c0_126 = arith.constant 0 : index
    %125 = vector.load %arg3[%c15_124, %c0_125, %c0_126] : memref<16x32x8xbf16, #tpu.memory_space<vmem>>, vector<1x32x8xbf16>
    %126 = vector.shape_cast %125 : vector<1x32x8xbf16> to vector<32x8xbf16>
    %127 = vector.shape_cast %124 : vector<32x8xbf16> to vector<1x32x8xbf16>
    tpu.vector_store %arg3[%c15_124, %c0_125, %c0_126], %127 {strides = array<i32>} : memref<16x32x8xbf16, #tpu.memory_space<vmem>>, vector<1x32x8xbf16>,
    return
  }
  func.func @transform_0(%arg0: i32) -> (i32, i32) {
    %c0_i32 = arith.constant 0 : i32
    %c0_i32_0 = arith.constant 0 : i32
    %c0_i32_1 = arith.constant 0 : i32
    return %c0_i32, %c0_i32_0 : i32, i32
  }
  func.func @transform_1(%arg0: i32) -> (i32, i32, i32) {
    %c0_i32 = arith.constant 0 : i32
    %c0_i32_0 = arith.constant 0 : i32
    %c0_i32_1 = arith.constant 0 : i32
    return %arg0, %c0_i32, %c0_i32_0 : i32, i32, i32
  }
  func.func @transform_2(%arg0: i32) -> (i32, i32, i32) {
    %c0_i32 = arith.constant 0 : i32
    %c0_i32_0 = arith.constant 0 : i32
    %c0_i32_1 = arith.constant 0 : i32
    return %arg0, %c0_i32, %c0_i32_0 : i32, i32, i32
  }
}

module attributes {stable_mosaic.version = 11 : i64} {
  func.func @_mm_bias_relu_stats_kernel(%arg0: i32, %arg1: memref<512x72xbf16, #tpu.memory_space<vmem>>, %arg2: memref<72x8xbf16, #tpu.memory_space<vmem>>, %arg3: memref<1x8xf32, #tpu.memory_space<vmem>>, %arg4: memref<512x8xf32, #tpu.memory_space<vmem>>, %arg5: memref<1x8xf32, #tpu.memory_space<vmem>>, %arg6: memref<1x8xf32, #tpu.memory_space<vmem>>) attributes {dimension_semantics = [#tpu.dimension_semantics<arbitrary>], iteration_bounds = array<i64: 4>, scalar_prefetch = 0 : i64, scratch_operands = 0 : i64, tpu.core_type = #tpu.core_type<tc>, window_params = [{transform_indices = @transform_0, window_bounds = array<i64: 512, 72>}, {pipeline_mode = #tpu.pipeline_mode<synchronous>, transform_indices = @transform_1, window_bounds = array<i64: 72, 8>}, {pipeline_mode = #tpu.pipeline_mode<synchronous>, transform_indices = @transform_2, window_bounds = array<i64: 1, 8>}, {transform_indices = @transform_3, window_bounds = array<i64: 512, 8>}, {pipeline_mode = #tpu.pipeline_mode<synchronous>, transform_indices = @transform_4, window_bounds = array<i64: 1, 8>}, {pipeline_mode = #tpu.pipeline_mode<synchronous>, transform_indices = @transform_5, window_bounds = array<i64: 1, 8>}]} {
    %c0 = arith.constant 0 : index
    %c0_0 = arith.constant 0 : index
    %0 = vector.load %arg1[%c0, %c0_0] : memref<512x72xbf16, #tpu.memory_space<vmem>>, vector<512x72xbf16>
    %c0_1 = arith.constant 0 : index
    %c0_2 = arith.constant 0 : index
    %1 = vector.load %arg2[%c0_1, %c0_2] : memref<72x8xbf16, #tpu.memory_space<vmem>>, vector<72x8xbf16>
    %cst = arith.constant dense<0.000000e+00> : vector<512x8xf32>
    %2 = tpu.matmul %0, %1, %cst {dimension_numbers = #tpu.dot_dimension_numbers<[1], [0], [0], [1], [0, 0, 1, 1], [], []>} : vector<512x72xbf16>, vector<72x8xbf16>, vector<512x8xf32> -> vector<512x8xf32>
    %c0_3 = arith.constant 0 : index
    %c0_4 = arith.constant 0 : index
    %3 = vector.load %arg3[%c0_3, %c0_4] : memref<1x8xf32, #tpu.memory_space<vmem>>, vector<1x8xf32>
    %4 = vector.broadcast %3 : vector<1x8xf32> to vector<512x8xf32>
    %5 = arith.addf %2, %4 : vector<512x8xf32>
    %cst_5 = arith.constant 0.000000e+00 : f32
    %6 = vector.broadcast %cst_5 : f32 to vector<512x8xf32>
    %7 = arith.maximumf %5, %6 : vector<512x8xf32>
    %c0_6 = arith.constant 0 : index
    %c0_7 = arith.constant 0 : index
    %8 = vector.load %arg4[%c0_6, %c0_7] : memref<512x8xf32, #tpu.memory_space<vmem>>, vector<512x8xf32>
    tpu.vector_store %arg4[%c0_6, %c0_7], %7 {strides = array<i32>} : memref<512x8xf32, #tpu.memory_space<vmem>>, vector<512x8xf32>,
    %c0_i32 = arith.constant 0 : i32
    %9 = arith.cmpi eq, %arg0, %c0_i32 : i32
    %10 = arith.extui %9 : i1 to i32
    %c0_i32_8 = arith.constant 0 : i32
    %11 = arith.cmpi ne, %10, %c0_i32_8 : i32
    scf.if %11 {
      %cst_19 = arith.constant 0.000000e+00 : f32
      %23 = vector.broadcast %cst_19 : f32 to vector<1x8xf32>
      %c0_20 = arith.constant 0 : index
      %c0_21 = arith.constant 0 : index
      %24 = vector.load %arg5[%c0_20, %c0_21] : memref<1x8xf32, #tpu.memory_space<vmem>>, vector<1x8xf32>
      tpu.vector_store %arg5[%c0_20, %c0_21], %23 {strides = array<i32>} : memref<1x8xf32, #tpu.memory_space<vmem>>, vector<1x8xf32>,
      %cst_22 = arith.constant 0.000000e+00 : f32
      %25 = vector.broadcast %cst_22 : f32 to vector<1x8xf32>
      %c0_23 = arith.constant 0 : index
      %c0_24 = arith.constant 0 : index
      %26 = vector.load %arg6[%c0_23, %c0_24] : memref<1x8xf32, #tpu.memory_space<vmem>>, vector<1x8xf32>
      tpu.vector_store %arg6[%c0_23, %c0_24], %25 {strides = array<i32>} : memref<1x8xf32, #tpu.memory_space<vmem>>, vector<1x8xf32>,
    } else {
    }
    %c0_9 = arith.constant 0 : index
    %c0_10 = arith.constant 0 : index
    %12 = vector.load %arg5[%c0_9, %c0_10] : memref<1x8xf32, #tpu.memory_space<vmem>>, vector<1x8xf32>
    %cst_11 = arith.constant dense<0.000000e+00> : vector<8xf32>
    %13 = vector.multi_reduction <add>, %7, %cst_11 [0] : vector<512x8xf32> to vector<8xf32>
    %14 = vector.shape_cast %13 : vector<8xf32> to vector<1x8xf32>
    %15 = arith.addf %12, %14 : vector<1x8xf32>
    %c0_12 = arith.constant 0 : index
    %c0_13 = arith.constant 0 : index
    %16 = vector.load %arg5[%c0_12, %c0_13] : memref<1x8xf32, #tpu.memory_space<vmem>>, vector<1x8xf32>
    tpu.vector_store %arg5[%c0_12, %c0_13], %15 {strides = array<i32>} : memref<1x8xf32, #tpu.memory_space<vmem>>, vector<1x8xf32>,
    %c0_14 = arith.constant 0 : index
    %c0_15 = arith.constant 0 : index
    %17 = vector.load %arg6[%c0_14, %c0_15] : memref<1x8xf32, #tpu.memory_space<vmem>>, vector<1x8xf32>
    %18 = arith.mulf %7, %7 : vector<512x8xf32>
    %cst_16 = arith.constant dense<0.000000e+00> : vector<8xf32>
    %19 = vector.multi_reduction <add>, %18, %cst_16 [0] : vector<512x8xf32> to vector<8xf32>
    %20 = vector.shape_cast %19 : vector<8xf32> to vector<1x8xf32>
    %21 = arith.addf %17, %20 : vector<1x8xf32>
    %c0_17 = arith.constant 0 : index
    %c0_18 = arith.constant 0 : index
    %22 = vector.load %arg6[%c0_17, %c0_18] : memref<1x8xf32, #tpu.memory_space<vmem>>, vector<1x8xf32>
    tpu.vector_store %arg6[%c0_17, %c0_18], %21 {strides = array<i32>} : memref<1x8xf32, #tpu.memory_space<vmem>>, vector<1x8xf32>,
    return
  }
  func.func @transform_0(%arg0: i32) -> (i32, i32) {
    %c0_i32 = arith.constant 0 : i32
    %c0_i32_0 = arith.constant 0 : i32
    return %arg0, %c0_i32 : i32, i32
  }
  func.func @transform_1(%arg0: i32) -> (i32, i32) {
    %c0_i32 = arith.constant 0 : i32
    %c0_i32_0 = arith.constant 0 : i32
    %c0_i32_1 = arith.constant 0 : i32
    return %c0_i32, %c0_i32_0 : i32, i32
  }
  func.func @transform_2(%arg0: i32) -> (i32, i32) {
    %c0_i32 = arith.constant 0 : i32
    %c0_i32_0 = arith.constant 0 : i32
    %c0_i32_1 = arith.constant 0 : i32
    return %c0_i32, %c0_i32_0 : i32, i32
  }
  func.func @transform_3(%arg0: i32) -> (i32, i32) {
    %c0_i32 = arith.constant 0 : i32
    %c0_i32_0 = arith.constant 0 : i32
    return %arg0, %c0_i32 : i32, i32
  }
  func.func @transform_4(%arg0: i32) -> (i32, i32) {
    %c0_i32 = arith.constant 0 : i32
    %c0_i32_0 = arith.constant 0 : i32
    %c0_i32_1 = arith.constant 0 : i32
    return %c0_i32, %c0_i32_0 : i32, i32
  }
  func.func @transform_5(%arg0: i32) -> (i32, i32) {
    %c0_i32 = arith.constant 0 : i32
    %c0_i32_0 = arith.constant 0 : i32
    %c0_i32_1 = arith.constant 0 : i32
    return %c0_i32, %c0_i32_0 : i32, i32
  }
}

module attributes {stable_mosaic.version = 11 : i64} {
  func.func @_affine_kernel(%arg0: i32, %arg1: memref<512x8xf32, #tpu.memory_space<vmem>>, %arg2: memref<1x8xf32, #tpu.memory_space<vmem>>, %arg3: memref<1x8xf32, #tpu.memory_space<vmem>>, %arg4: memref<512x8xf32, #tpu.memory_space<vmem>>) attributes {dimension_semantics = [#tpu.dimension_semantics<parallel>], iteration_bounds = array<i64: 4>, scalar_prefetch = 0 : i64, scratch_operands = 0 : i64, tpu.core_type = #tpu.core_type<tc>, window_params = [{transform_indices = @transform_0, window_bounds = array<i64: 512, 8>}, {pipeline_mode = #tpu.pipeline_mode<synchronous>, transform_indices = @transform_1, window_bounds = array<i64: 1, 8>}, {pipeline_mode = #tpu.pipeline_mode<synchronous>, transform_indices = @transform_2, window_bounds = array<i64: 1, 8>}, {transform_indices = @transform_3, window_bounds = array<i64: 512, 8>}]} {
    %c0 = arith.constant 0 : index
    %c0_0 = arith.constant 0 : index
    %0 = vector.load %arg1[%c0, %c0_0] : memref<512x8xf32, #tpu.memory_space<vmem>>, vector<512x8xf32>
    %c0_1 = arith.constant 0 : index
    %c0_2 = arith.constant 0 : index
    %1 = vector.load %arg2[%c0_1, %c0_2] : memref<1x8xf32, #tpu.memory_space<vmem>>, vector<1x8xf32>
    %2 = vector.broadcast %1 : vector<1x8xf32> to vector<512x8xf32>
    %3 = arith.mulf %0, %2 : vector<512x8xf32>
    %c0_3 = arith.constant 0 : index
    %c0_4 = arith.constant 0 : index
    %4 = vector.load %arg3[%c0_3, %c0_4] : memref<1x8xf32, #tpu.memory_space<vmem>>, vector<1x8xf32>
    %5 = vector.broadcast %4 : vector<1x8xf32> to vector<512x8xf32>
    %6 = arith.addf %3, %5 : vector<512x8xf32>
    %c0_5 = arith.constant 0 : index
    %c0_6 = arith.constant 0 : index
    %7 = vector.load %arg4[%c0_5, %c0_6] : memref<512x8xf32, #tpu.memory_space<vmem>>, vector<512x8xf32>
    tpu.vector_store %arg4[%c0_5, %c0_6], %6 {strides = array<i32>} : memref<512x8xf32, #tpu.memory_space<vmem>>, vector<512x8xf32>,
    return
  }
  func.func @transform_0(%arg0: i32) -> (i32, i32) {
    %c0_i32 = arith.constant 0 : i32
    %c0_i32_0 = arith.constant 0 : i32
    return %arg0, %c0_i32 : i32, i32
  }
  func.func @transform_1(%arg0: i32) -> (i32, i32) {
    %c0_i32 = arith.constant 0 : i32
    %c0_i32_0 = arith.constant 0 : i32
    %c0_i32_1 = arith.constant 0 : i32
    return %c0_i32, %c0_i32_0 : i32, i32
  }
  func.func @transform_2(%arg0: i32) -> (i32, i32) {
    %c0_i32 = arith.constant 0 : i32
    %c0_i32_0 = arith.constant 0 : i32
    %c0_i32_1 = arith.constant 0 : i32
    return %c0_i32, %c0_i32_0 : i32, i32
  }
  func.func @transform_3(%arg0: i32) -> (i32, i32) {
    %c0_i32 = arith.constant 0 : i32
    %c0_i32_0 = arith.constant 0 : i32
    return %arg0, %c0_i32 : i32, i32
  }
}

</mosaic_0001>

<bundles_post_ra>
// kernel: aspp_block_forward.7
= control target key start
LH: loop header
LB: loop body
LE: loop exit
PB: predicated region body
PF: predicated region fallthrough
CT: control target
= control target key end

     0   :  { %s1042_s18 = smov 0   ;;  %s1483_s0 = inlined_call_operand.vmem [shape: bf16[512,16], index: 0, kind: input, shape index: {}]   ;;  %s1484_s1 = inlined_call_operand.vmem [shape: bf16[16,8], index: 1, kind: input, shape index: {}]   ;;  %s1485_s2 = inlined_call_operand.vmem [shape: f32[1,8], index: 2, kind: input, shape index: {}]   ;;  %s1486_s3 = inlined_call_operand.vmem [shape: f32[512,8], index: 3, kind: output, shape index: {0}]   ;;  %s1487_s4 = inlined_call_operand.vmem [shape: f32[1,8], index: 4, kind: output, shape index: {1}]   ;;  %s1488_s5 = inlined_call_operand.vmem [shape: f32[1,8], index: 5, kind: output, shape index: {2}]  }
   0x1 LB: > { %s878_s19 = sadd.s32 4294967295, %s1009_s18   ;;  %p882_p0 = scmp.ge.s32.totalorder %s1009_s18, 1  ;;  %s1009_s18 = sphi %s1042_s18, %s16_s18  }
   0x2   : > { %p183_p1 = scmp.lt.s32.totalorder %s1009_s18, 3 }
   0x4   : > { %p184_p2 = pnand %p882_p0, %p183_p1 }
   0x5   : > { %s883_s22 = sshll.u32 (!%p184_p2), %s878_s19, 5  ;;  %p921_p4 = scmp.ne.s32.totalorder (!%p184_p2), %s878_s19, 0 }
   0x6   : > { %187 = sbr.rel (%p184_p2) target bundleno = 330 (0x14a), region = 32  ;;  %p212_p3 = scmp.lt.s32.totalorder (!%p184_p2), %s883_s22, 63 }
   0xb   : > { %v986_v0 = vld [vmem:[%s1484_s1] sm:$0xff]   ;;  %s1490_s22 = smov (!%p212_p3, %s883_s22), 63  ;;  %vm351_vm0 = vcmask 130048   ;;  %vm593_vm1 = vcmask 64512  }
   0xc   : > { %941 = vmatprep.subr.bf16.mxu0 %v986_v0  ;;  %975 = vmatprep.subr.bf16.mxu1 %v986_v0  ;;  %s884_s23 = sshll.u32 %s1490_s22, 2  ;;  %v1098_v17 = vld [vmem:[%s1485_s2] ss:$0 sm:$0xff]  ;;  %s886_s29 = sshll.u32 %s1490_s22, 3 }
   0xd   : > { %942 = vmatpush3.bf16.msra.mxu0 %v986_v0  ;;  %976 = vmatpush3.bf16.msra.mxu1 %v986_v0  ;;  %s1061_s26 = scalar_lea.vmem %s1483_s0, %s884_s23  ;;  %s1105_s7 = scalar_lea.vmem %s1486_s3, %s886_s29 }
   0xe   : > { %v987_v1 = vld [vmem:[%s1061_s26] sm:$0xff]   ;;  %v989_v3 = vld [vmem:[%s1061_s26 + $0x8] sm:$0xff]   ;;  %v991_v5 = vld [vmem:[%s1061_s26 + $0x10] sm:$0xff]  }
   0xf   : > { %v988_v2 = vld [vmem:[%s1061_s26 + $0x40] sm:$0xff]   ;;  %943 = vmatprep.mubr.msk.bf16.mxu0 %vm351_vm0, %v987_v1  ;;  %v990_v4 = vld [vmem:[%s1061_s26 + $0x48] sm:$0xff]   ;;  %v992_v6 = vld [vmem:[%s1061_s26 + $0x50] sm:$0xff]  }
  0x10   : > { %959 = vmatprep.mubr.msk.bf16.mxu1 %vm351_vm0, %v988_v2  ;;  %944 = vmatmul.mubr.msk.bf16.vlgmr.msra.gmra.mxu0 %vm351_vm0, %v989_v3  ;;  %v993_v7 = vld [vmem:[%s1061_s26 + $0x18] sm:$0xff]   ;;  %v995_v9 = vld [vmem:[%s1061_s26 + $0x20] sm:$0xff]   ;;  %v997_v11 = vld [vmem:[%s1061_s26 + $0x28] sm:$0xff]  }
  0x11   : > { %960 = vmatmul.mubr.msk.bf16.vlgmr.msra.gmra.mxu1 %vm351_vm0, %v990_v4  ;;  %947 = vmatprep.mubr.msk.bf16.mxu0 %vm351_vm0, %v991_v5  ;;  %v994_v8 = vld [vmem:[%s1061_s26 + $0x58] sm:$0xff]   ;;  %v996_v10 = vld [vmem:[%s1061_s26 + $0x60] sm:$0xff]   ;;  %v998_v12 = vld [vmem:[%s1061_s26 + $0x68] sm:$0xff]  }
  0x12   : > { %963 = vmatprep.mubr.msk.bf16.mxu1 %vm351_vm0, %v992_v6  ;;  %v999_v13 = vld [vmem:[%s1061_s26 + $0x30] sm:$0xff]   ;;  %v1001_v15 = vld [vmem:[%s1061_s26 + $0x38] sm:$0xff]  }
  0x13   : > { %v1000_v14 = vld [vmem:[%s1061_s26 + $0x70] sm:$0xff]   ;;  %v1002_v16 = vld [vmem:[%s1061_s26 + $0x78] sm:$0xff]  }
  0x18   : > { %948 = vmatmul.mubr.msk.bf16.gmra.mxu0 %vm351_vm0, %v993_v7 }
  0x19   : > { %964 = vmatmul.mubr.msk.bf16.gmra.mxu1 %vm351_vm0, %v994_v8  ;;  %951 = vmatprep.mubr.msk.bf16.mxu0 %vm351_vm0, %v995_v9 }
  0x1a   : > { %967 = vmatprep.mubr.msk.bf16.mxu1 %vm351_vm0, %v996_v10 }
  0x20   : > { %952 = vmatmul.mubr.msk.bf16.gmra.mxu0 %vm351_vm0, %v997_v11 }
  0x21   : > { %968 = vmatmul.mubr.msk.bf16.gmra.mxu1 %vm351_vm0, %v998_v12  ;;  %955 = vmatprep.mubr.msk.bf16.mxu0 %vm351_vm0, %v999_v13 }
  0x22   : > { %971 = vmatprep.mubr.msk.bf16.mxu1 %vm351_vm0, %v1000_v14 }
  0x28   : > { %956 = vmatmul.mubr.msk.bf16.gmra.mxu0 %vm351_vm0, %v1001_v15 }
  0x29   : > { %972 = vmatmul.mubr.msk.bf16.gmra.mxu1 %vm351_vm0, %v1002_v16 }
  0xd0   : > { %v945_v18 = vpop.f32.mrf.mxu0 }
  0xd1   : > { %v443_v19 = vadd.f32 %v945_v18, %v1098_v17  ;;  %v961_v20 = vpop.f32.mrf.mxu1 }
  0xd2   : > { %v507_v21 = vadd.f32 %v961_v20, %v1098_v17  ;;  %v434_v22 = vpop.f32.mrf.mxu0 }
  0xd3   : > { %v1108_v23 = vmax.f32 %v443_v19, 0.0  ;;  %v435_v24 = vadd.f32 %v1098_v17, %v434_v22  ;;  %v498_v25 = vpop.f32.mrf.mxu1 }
  0xd4   : > { %v1111_v26 = vmax.f32 %v507_v21, 0.0  ;;  %v499_v27 = vadd.f32 %v1098_v17, %v498_v25  ;;  %v946_v28 = vpop.f32.mrf.mxu0 }
  0xd5   : > { %596 = vst.msk [vmem:[%s1105_s7 + $0x10] sm:$0xff] %vm593_vm1, %v1108_v23  ;;  %v1117_v29 = vmax.f32 %v435_v24, 0.0  ;;  %v446_v30 = vadd.f32 %v946_v28, %v1098_v17  ;;  %v962_v31 = vpop.f32.mrf.mxu1 }
  0xd6   : > { %612 = vst.msk [vmem:[%s1105_s7 + $0x90] sm:$0xff] %vm593_vm1, %v1111_v26  ;;  %v1123_v32 = vmax.f32 %v499_v27, 0.0  ;;  %v510_v33 = vadd.f32 %v962_v31, %v1098_v17  ;;  %v437_v34 = vpop.f32.mrf.mxu0 }
  0xd7   : > { %594 = vst.msk [vmem:[%s1105_s7] sm:$0xff] %vm593_vm1, %v1117_v29  ;;  %v1129_v35 = vmax.f32 %v446_v30, 0.0  ;;  %v438_v36 = vadd.f32 %v1098_v17, %v437_v34  ;;  %v501_v37 = vpop.f32.mrf.mxu1 }
  0xd8   : > { %610 = vst.msk [vmem:[%s1105_s7 + $0x80] sm:$0xff] %vm593_vm1, %v1123_v32  ;;  %v1135_v38 = vmax.f32 %v510_v33, 0.0  ;;  %v502_v39 = vadd.f32 %v1098_v17, %v501_v37  ;;  %v949_v40 = vpop.f32.mrf.mxu0 }
  0xd9   : > { %597 = vst.msk [vmem:[%s1105_s7 + $0x18] sm:$0xff] %vm593_vm1, %v1129_v35  ;;  %v1141_v41 = vmax.f32 %v438_v36, 0.0  ;;  %v459_v42 = vadd.f32 %v949_v40, %v1098_v17  ;;  %v965_v43 = vpop.f32.mrf.mxu1 }
  0xda   : > { %613 = vst.msk [vmem:[%s1105_s7 + $0x98] sm:$0xff] %vm593_vm1, %v1135_v38  ;;  %v1147_v44 = vmax.f32 %v502_v39, 0.0  ;;  %v523_v45 = vadd.f32 %v965_v43, %v1098_v17  ;;  %v450_v46 = vpop.f32.mrf.mxu0 }
  0xdb   : > { %595 = vst.msk [vmem:[%s1105_s7 + $0x8] sm:$0xff] %vm593_vm1, %v1141_v41  ;;  %v1153_v47 = vmax.f32 %v459_v42, 0.0  ;;  %v451_v48 = vadd.f32 %v1098_v17, %v450_v46  ;;  %v514_v49 = vpop.f32.mrf.mxu1 }
  0xdc   : > { %611 = vst.msk [vmem:[%s1105_s7 + $0x88] sm:$0xff] %vm593_vm1, %v1147_v44  ;;  %v1159_v50 = vmax.f32 %v523_v45, 0.0  ;;  %v515_v51 = vadd.f32 %v1098_v17, %v514_v49  ;;  %v950_v52 = vpop.f32.mrf.mxu0 }
  0xdd   : > { %600 = vst.msk [vmem:[%s1105_s7 + $0x30] sm:$0xff] %vm593_vm1, %v1153_v47  ;;  %v1165_v53 = vmax.f32 %v451_v48, 0.0  ;;  %v462_v54 = vadd.f32 %v950_v52, %v1098_v17  ;;  %v966_v55 = vpop.f32.mrf.mxu1 }
  0xde   : > { %616 = vst.msk [vmem:[%s1105_s7 + $0xb0] sm:$0xff] %vm593_vm1, %v1159_v50  ;;  %v1171_v56 = vmax.f32 %v515_v51, 0.0  ;;  %v526_v57 = vadd.f32 %v966_v55, %v1098_v17  ;;  %v453_v58 = vpop.f32.mrf.mxu0 }
  0xdf   : > { %598 = vst.msk [vmem:[%s1105_s7 + $0x20] sm:$0xff] %vm593_vm1, %v1165_v53  ;;  %v1177_v59 = vmax.f32 %v462_v54, 0.0  ;;  %v454_v60 = vadd.f32 %v1098_v17, %v453_v58  ;;  %v517_v61 = vpop.f32.mrf.mxu1 }
  0xe0   : > { %614 = vst.msk [vmem:[%s1105_s7 + $0xa0] sm:$0xff] %vm593_vm1, %v1171_v56  ;;  %v1183_v62 = vmax.f32 %v526_v57, 0.0  ;;  %v518_v63 = vadd.f32 %v1098_v17, %v517_v61  ;;  %v953_v0 = vpop.f32.mrf.mxu0 }
  0xe1   : > { %601 = vst.msk [vmem:[%s1105_s7 + $0x38] sm:$0xff] %vm593_vm1, %v1177_v59  ;;  %v1189_v1 = vmax.f32 %v454_v60, 0.0  ;;  %v475_v2 = vadd.f32 %v953_v0, %v1098_v17  ;;  %v969_v3 = vpop.f32.mrf.mxu1 }
  0xe2   : > { %617 = vst.msk [vmem:[%s1105_s7 + $0xb8] sm:$0xff] %vm593_vm1, %v1183_v62  ;;  %v1195_v4 = vmax.f32 %v518_v63, 0.0  ;;  %v539_v5 = vadd.f32 %v969_v3, %v1098_v17  ;;  %v466_v6 = vpop.f32.mrf.mxu0 }
  0xe3   : > { %599 = vst.msk [vmem:[%s1105_s7 + $0x28] sm:$0xff] %vm593_vm1, %v1189_v1  ;;  %v1201_v7 = vmax.f32 %v475_v2, 0.0  ;;  %v467_v8 = vadd.f32 %v1098_v17, %v466_v6  ;;  %v530_v9 = vpop.f32.mrf.mxu1 }
  0xe4   : > { %615 = vst.msk [vmem:[%s1105_s7 + $0xa8] sm:$0xff] %vm593_vm1, %v1195_v4  ;;  %v1207_v10 = vmax.f32 %v539_v5, 0.0  ;;  %v531_v11 = vadd.f32 %v1098_v17, %v530_v9  ;;  %v954_v12 = vpop.f32.mrf.mxu0 }
  0xe5   : > { %604 = vst.msk [vmem:[%s1105_s7 + $0x50] sm:$0xff] %vm593_vm1, %v1201_v7  ;;  %v1213_v13 = vmax.f32 %v467_v8, 0.0  ;;  %v478_v14 = vadd.f32 %v954_v12, %v1098_v17  ;;  %v970_v15 = vpop.f32.mrf.mxu1 }
  0xe6   : > { %620 = vst.msk [vmem:[%s1105_s7 + $0xd0] sm:$0xff] %vm593_vm1, %v1207_v10  ;;  %v1219_v16 = vmax.f32 %v531_v11, 0.0  ;;  %v542_v18 = vadd.f32 %v970_v15, %v1098_v17  ;;  %v469_v19 = vpop.f32.mrf.mxu0 }
  0xe7   : > { %602 = vst.msk [vmem:[%s1105_s7 + $0x40] sm:$0xff] %vm593_vm1, %v1213_v13  ;;  %v1225_v20 = vmax.f32 %v478_v14, 0.0  ;;  %v470_v21 = vadd.f32 %v1098_v17, %v469_v19  ;;  %v533_v22 = vpop.f32.mrf.mxu1 }
  0xe8   : > { %618 = vst.msk [vmem:[%s1105_s7 + $0xc0] sm:$0xff] %vm593_vm1, %v1219_v16  ;;  %v1231_v24 = vmax.f32 %v542_v18, 0.0  ;;  %v534_v25 = vadd.f32 %v1098_v17, %v533_v22  ;;  %v957_v27 = vpop.f32.mrf.mxu0 }
  0xe9   : > { %605 = vst.msk [vmem:[%s1105_s7 + $0x58] sm:$0xff] %vm593_vm1, %v1225_v20  ;;  %v1237_v28 = vmax.f32 %v470_v21, 0.0  ;;  %v491_v30 = vadd.f32 %v957_v27, %v1098_v17  ;;  %v973_v31 = vpop.f32.mrf.mxu1 }
  0xea   : > { %621 = vst.msk [vmem:[%s1105_s7 + $0xd8] sm:$0xff] %vm593_vm1, %v1231_v24  ;;  %v1243_v33 = vmax.f32 %v534_v25, 0.0  ;;  %v555_v34 = vadd.f32 %v973_v31, %v1098_v17  ;;  %v482_v36 = vpop.f32.mrf.mxu0 }
  0xeb   : > { %603 = vst.msk [vmem:[%s1105_s7 + $0x48] sm:$0xff] %vm593_vm1, %v1237_v28  ;;  %v1249_v37 = vmax.f32 %v491_v30, 0.0  ;;  %v483_v39 = vadd.f32 %v1098_v17, %v482_v36  ;;  %v546_v40 = vpop.f32.mrf.mxu1 }
  0xec   : > { %619 = vst.msk [vmem:[%s1105_s7 + $0xc8] sm:$0xff] %vm593_vm1, %v1243_v33  ;;  %v1255_v42 = vmax.f32 %v555_v34, 0.0  ;;  %v547_v43 = vadd.f32 %v1098_v17, %v546_v40  ;;  %v958_v45 = vpop.f32.mrf.mxu0 }
  0xed   : > { %608 = vst.msk [vmem:[%s1105_s7 + $0x70] sm:$0xff] %vm593_vm1, %v1249_v37  ;;  %v1261_v46 = vmax.f32 %v483_v39, 0.0  ;;  %v494_v48 = vadd.f32 %v958_v45, %v1098_v17  ;;  %v974_v49 = vpop.f32.mrf.mxu1 }
  0xee   : > { %624 = vst.msk [vmem:[%s1105_s7 + $0xf0] sm:$0xff] %vm593_vm1, %v1255_v42  ;;  %v1267_v51 = vmax.f32 %v547_v43, 0.0  ;;  %v558_v52 = vadd.f32 %v974_v49, %v1098_v17  ;;  %v485_v54 = vpop.f32.mrf.mxu0 }
  0xef   : > { %606 = vst.msk [vmem:[%s1105_s7 + $0x60] sm:$0xff] %vm593_vm1, %v1261_v46  ;;  %v1273_v55 = vmax.f32 %v494_v48, 0.0  ;;  %v486_v57 = vadd.f32 %v1098_v17, %v485_v54  ;;  %v549_v58 = vpop.f32.mrf.mxu1 }
  0xf0   : > { %622 = vst.msk [vmem:[%s1105_s7 + $0xe0] sm:$0xff] %vm593_vm1, %v1267_v51  ;;  %v1279_v60 = vmax.f32 %v558_v52, 0.0  ;;  %v550_v61 = vadd.f32 %v1098_v17, %v549_v58  ;;  %629 = sbr.rel (%p921_p4) target bundleno = 247 (0xf7), region = 36 }
  0xf1   : > { %609 = vst.msk [vmem:[%s1105_s7 + $0x78] sm:$0xff] %vm593_vm1, %v1273_v55  ;;  %v1285_v63 = vmax.f32 %v486_v57, 0.0 }
  0xf2   : > { %625 = vst.msk [vmem:[%s1105_s7 + $0xf8] sm:$0xff] %vm593_vm1, %v1279_v60  ;;  %v1290_v0 = vmax.f32 %v550_v61, 0.0 }
  0xf3   : > { %607 = vst.msk [vmem:[%s1105_s7 + $0x68] sm:$0xff] %vm593_vm1, %v1285_v63 }
  0xf4   : > { %623 = vst.msk [vmem:[%s1105_s7 + $0xe8] sm:$0xff] %vm593_vm1, %v1290_v0 }
  0xf5   : > { %vm630_vm2 = vcmask 57344   ;;  %v1011_v17 = vmov 0.0  }
  0xf6   : > { %631 = vst.msk [vmem:[%s1487_s4] sm:$0x1] %vm630_vm2, %v1011_v17  ;;  %632 = vst.msk [vmem:[%s1488_s5] sm:$0x1] %vm630_vm2, %v1011_v17 }
  0xf7 PF: > { %v634_v2 = vsel %vm593_vm1, %v1117_v29, 0.0  ;;  %v635_v3 = vsel %vm593_vm1, %v1141_v41, 0.0  ;;  %v637_v5 = vsel %vm593_vm1, %v1108_v23, 0.0  ;;  %v639_v8 = vsel %vm593_vm1, %v1129_v35, 0.0 }
  0xf8   : > { %v636_v6 = vadd.f32 %v635_v3, %v634_v2  ;;  %v641_v11 = vsel %vm593_vm1, %v1165_v53, 0.0  ;;  %v643_v14 = vsel %vm593_vm1, %v1189_v1, 0.0  ;;  %v645_v18 = vsel %vm593_vm1, %v1153_v47, 0.0 }
  0xf9   : > { %v647_v21 = vsel %vm593_vm1, %v1177_v59, 0.0  ;;  %v649_v25 = vsel %vm593_vm1, %v1213_v13, 0.0  ;;  %v651_v30 = vsel %vm593_vm1, %v1237_v28, 0.0  ;;  %v707_v31 = vmul.f32 %v1117_v29, %v1117_v29 }
  0xfa   : > { %v638_v9 = vadd.f32 %v637_v5, %v636_v6  ;;  %v708_v34 = vmul.f32 %v1141_v41, %v1141_v41  ;;  %v709_v39 = vmul.f32 %v1108_v23, %v1108_v23  ;;  %v653_v40 = vsel %vm593_vm1, %v1201_v7, 0.0 }
  0xfb   : > { %v710_v43 = vmul.f32 %v1129_v35, %v1129_v35  ;;  %v655_v48 = vsel %vm593_vm1, %v1225_v20, 0.0  ;;  %v711_v29 = vmul.f32 %v1165_v53, %v1165_v53  ;;  %v739_v49 = vsel %vm593_vm1, %v707_v31, 0.0 }
  0xfc   : > { %v640_v12 = vadd.f32 %v639_v8, %v638_v9  ;;  %v740_v41 = vsel %vm593_vm1, %v708_v34, 0.0  ;;  %v742_v23 = vsel %vm593_vm1, %v709_v39, 0.0  ;;  %v657_v57 = vsel %vm593_vm1, %v1261_v46, 0.0 }
  0xfd   : > { %v741_v54 = vadd.f32 %v740_v41, %v739_v49  ;;  %v712_v35 = vmul.f32 %v1189_v1, %v1189_v1  ;;  %v744_v58 = vsel %vm593_vm1, %v710_v43, 0.0  ;;  %v659_v53 = vsel %vm593_vm1, %v1285_v63, 0.0 }
  0xfe   : > { %v642_v15 = vadd.f32 %v641_v11, %v640_v12  ;;  %v713_v2 = vmul.f32 %v1153_v47, %v1153_v47  ;;  %v746_v3 = vsel %vm593_vm1, %v711_v29, 0.0  ;;  %v661_v8 = vsel %vm593_vm1, %v1249_v37, 0.0 }
  0xff   : > { %v743_v17 = vadd.f32 %v742_v23, %v741_v54  ;;  %v714_v1 = vmul.f32 %v1177_v59, %v1177_v59  ;;  %v748_v9 = vsel %vm593_vm1, %v712_v35, 0.0  ;;  %v715_v47 = vmul.f32 %v1213_v13, %v1213_v13 }
 0x100   : > { %v644_v19 = vadd.f32 %v643_v14, %v642_v15  ;;  %v663_v14 = vsel %vm593_vm1, %v1273_v55, 0.0  ;;  %v750_v15 = vsel %vm593_vm1, %v713_v2, 0.0  ;;  %v716_v59 = vmul.f32 %v1237_v28, %v1237_v28 }
 0x101   : > { %v745_v6 = vadd.f32 %v744_v58, %v743_v17  ;;  %v717_v13 = vmul.f32 %v1201_v7, %v1201_v7  ;;  %v754_v31 = vsel %vm593_vm1, %v715_v47, 0.0  ;;  %v669_v39 = vsel %vm593_vm1, %v1111_v26, 0.0 }
 0x102   : > { %v646_v22 = vadd.f32 %v645_v18, %v644_v19  ;;  %v718_v28 = vmul.f32 %v1225_v20, %v1225_v20  ;;  %v719_v7 = vmul.f32 %v1261_v46, %v1261_v46  ;;  %v720_v20 = vmul.f32 %v1285_v63, %v1285_v63 }
 0x103   : > { %v747_v12 = vadd.f32 %v746_v3, %v745_v6  ;;  %v758_v29 = vsel %vm593_vm1, %v717_v13, 0.0  ;;  %v675_v35 = vsel %vm593_vm1, %v1195_v4, 0.0  ;;  %v721_v46 = vmul.f32 %v1249_v37, %v1249_v37 }
 0x104   : > { %v648_v27 = vadd.f32 %v647_v21, %v646_v22  ;;  %v665_v21 = vsel %vm593_vm1, %v1123_v32, 0.0  ;;  %v752_v22 = vsel %vm593_vm1, %v714_v1, 0.0  ;;  %v760_v54 = vsel %vm593_vm1, %v718_v28, 0.0 }
 0x105   : > { %v749_v19 = vadd.f32 %v748_v9, %v747_v12  ;;  %v762_v58 = vsel %vm593_vm1, %v719_v7, 0.0  ;;  %v722_v63 = vmul.f32 %v1273_v55, %v1273_v55  ;;  %v764_v2 = vsel %vm593_vm1, %v720_v20, 0.0 }
 0x106   : > { %v650_v36 = vadd.f32 %v649_v25, %v648_v27  ;;  %v679_v6 = vsel %vm593_vm1, %v1183_v62, 0.0  ;;  %v723_v37 = vmul.f32 %v1123_v32, %v1123_v32  ;;  %v724_v55 = vmul.f32 %v1147_v44, %v1147_v44 }
 0x107   : > { %v751_v27 = vadd.f32 %v750_v15, %v749_v19  ;;  %v768_v12 = vsel %vm593_vm1, %v722_v63, 0.0  ;;  %v683_v15 = vsel %vm593_vm1, %v1243_v33, 0.0  ;;  %v725_v32 = vmul.f32 %v1111_v26, %v1111_v26 }
 0x108   : > { %v652_v45 = vadd.f32 %v651_v30, %v650_v36  ;;  %v667_v30 = vsel %vm593_vm1, %v1147_v44, 0.0  ;;  %v726_v44 = vmul.f32 %v1135_v38, %v1135_v38  ;;  %v727_v26 = vmul.f32 %v1171_v56, %v1171_v56 }
 0x109   : > { %v753_v36 = vadd.f32 %v752_v22, %v751_v27  ;;  %v772_v22 = vsel %vm593_vm1, %v724_v55, 0.0  ;;  %v774_v13 = vsel %vm593_vm1, %v725_v32, 0.0  ;;  %v695_v20 = vsel %vm593_vm1, %v1279_v60, 0.0 }
 0x10a   : > { %v654_v52 = vadd.f32 %v653_v40, %v652_v45  ;;  %v756_v40 = vsel %vm593_vm1, %v716_v59, 0.0  ;;  %v685_v59 = vsel %vm593_vm1, %v1207_v10, 0.0  ;;  %vm704_vm3 = vcmask 57344  }
 0x10b   : > { %v755_v45 = vadd.f32 %v754_v31, %v753_v36  ;;  %v689_v36 = vsel %vm593_vm1, %v1267_v51, 0.0 }
 0x10c   : > { %v656_v61 = vadd.f32 %v655_v48, %v654_v52  ;;  %v671_v48 = vsel %vm593_vm1, %v1135_v38, 0.0  ;;  %v673_v52 = vsel %vm593_vm1, %v1171_v56, 0.0  ;;  %v728_v38 = vmul.f32 %v1195_v4, %v1195_v4 }
 0x10d   : > { %v757_v41 = vadd.f32 %v756_v40, %v755_v45  ;;  %v729_v56 = vmul.f32 %v1159_v50, %v1159_v50  ;;  %v778_v45 = vsel %vm593_vm1, %v727_v26, 0.0  ;;  %v730_v4 = vmul.f32 %v1183_v62, %v1183_v62  ;;  %v706_v26 = vld [vmem:[%s1488_s5] sm:$0x1] }
 0x10e   : > { %v658_v5 = vadd.f32 %v657_v57, %v656_v61 }
 0x10f   : > { %v759_v57 = vadd.f32 %v758_v29, %v757_v41  ;;  %v693_v29 = vsel %vm593_vm1, %v1255_v42, 0.0 }
 0x110   : > { %v660_v11 = vadd.f32 %v659_v53, %v658_v5  ;;  %v677_v53 = vsel %vm593_vm1, %v1159_v50, 0.0  ;;  %v731_v50 = vmul.f32 %v1219_v16, %v1219_v16 }
 0x111   : > { %v761_v17 = vadd.f32 %v760_v54, %v759_v57  ;;  %v782_v54 = vsel %vm593_vm1, %v729_v56, 0.0 }
 0x112   : > { %v662_v18 = vadd.f32 %v661_v8, %v660_v11  ;;  %v766_v8 = vsel %vm593_vm1, %v721_v46, 0.0  ;;  %v681_v11 = vsel %vm593_vm1, %v1219_v16, 0.0  ;;  %v784_v46 = vsel %vm593_vm1, %v730_v4, 0.0 }
 0x113   : > { %v763_v5 = vadd.f32 %v762_v58, %v761_v17  ;;  %v786_v17 = vsel %vm593_vm1, %v731_v50, 0.0  ;;  %v734_v16 = vmul.f32 %v1231_v24, %v1231_v24 }
 0x114   : > { %v664_v25 = vadd.f32 %v663_v14, %v662_v18  ;;  %v770_v18 = vsel %vm593_vm1, %v723_v37, 0.0 }
 0x115   : > { %v765_v9 = vadd.f32 %v764_v2, %v763_v5 }
 0x116   : > { %v666_v34 = vadd.f32 %v665_v21, %v664_v25 }
 0x117   : > { %v767_v47 = vadd.f32 %v766_v8, %v765_v9 }
 0x118   : > { %v668_v43 = vadd.f32 %v667_v30, %v666_v34  ;;  %v687_v30 = vsel %vm593_vm1, %v1231_v24, 0.0  ;;  %v737_v24 = vmul.f32 %v1255_v42, %v1255_v42 }
 0x119   : > { %v769_v21 = vadd.f32 %v768_v12, %v767_v47  ;;  %v738_v47 = vmul.f32 %v1279_v60, %v1279_v60 }
 0x11a   : > { %v670_v49 = vadd.f32 %v669_v39, %v668_v43  ;;  %v776_v39 = vsel %vm593_vm1, %v726_v44, 0.0  ;;  %v691_v43 = vsel %vm593_vm1, %v1290_v0, 0.0 }
 0x11b   : > { %v771_v27 = vadd.f32 %v770_v18, %v769_v21  ;;  %v798_v18 = vsel %vm593_vm1, %v737_v24, 0.0  ;;  %v800_v21 = vsel %vm593_vm1, %v738_v47, 0.0 }
 0x11c   : > { %v672_v23 = vadd.f32 %v671_v48, %v670_v49  ;;  %v780_v49 = vsel %vm593_vm1, %v728_v38, 0.0 }
 0x11d   : > { %v773_v34 = vadd.f32 %v772_v22, %v771_v27 }
 0x11e   : > { %v674_v61 = vadd.f32 %v673_v52, %v672_v23 }
 0x11f   : > { %v775_v40 = vadd.f32 %v774_v13, %v773_v34 }
 0x120   : > { %v676_v3 = vadd.f32 %v675_v35, %v674_v61  ;;  %v732_v35 = vmul.f32 %v1243_v33, %v1243_v33  ;;  %v733_v61 = vmul.f32 %v1207_v10, %v1207_v10  ;;  %v735_v33 = vmul.f32 %v1267_v51, %v1267_v51  ;;  %v633_v51 = vld [vmem:[%s1487_s4] sm:$0x1] }
 0x121   : > { %v777_v7 = vadd.f32 %v776_v39, %v775_v40  ;;  %v736_v10 = vmul.f32 %v1290_v0, %v1290_v0 }
 0x122   : > { %v678_v1 = vadd.f32 %v677_v53, %v676_v3  ;;  %v788_v2 = vsel %vm593_vm1, %v732_v35, 0.0  ;;  %v794_v55 = vsel %vm593_vm1, %v735_v33, 0.0 }
 0x123   : > { %v779_v52 = vadd.f32 %v778_v45, %v777_v7  ;;  %v796_v0 = vsel %vm593_vm1, %v736_v10, 0.0 }
 0x124   : > { %v680_v14 = vadd.f32 %v679_v6, %v678_v1  ;;  %v790_v6 = vsel %vm593_vm1, %v733_v61, 0.0  ;;  %v792_v1 = vsel %vm593_vm1, %v734_v16, 0.0 }
 0x125   : > { %v781_v57 = vadd.f32 %v780_v49, %v779_v52 }
 0x126   : > { %v682_v19 = vadd.f32 %v681_v11, %v680_v14 }
 0x127   : > { %v783_v58 = vadd.f32 %v782_v54, %v781_v57 }
 0x128   : > { %v684_v25 = vadd.f32 %v683_v15, %v682_v19 }
 0x129   : > { %v785_v63 = vadd.f32 %v784_v46, %v783_v58 }
 0x12a   : > { %v686_v31 = vadd.f32 %v685_v59, %v684_v25 }
 0x12b   : > { %v787_v5 = vadd.f32 %v786_v17, %v785_v63 }
 0x12c   : > { %v688_v28 = vadd.f32 %v687_v30, %v686_v31 }
 0x12d   : > { %v789_v8 = vadd.f32 %v788_v2, %v787_v5 }
 0x12e   : > { %v690_v48 = vadd.f32 %v689_v36, %v688_v28 }
 0x12f   : > { %v791_v11 = vadd.f32 %v790_v6, %v789_v8 }
 0x130   : > { %v692_v41 = vadd.f32 %v691_v43, %v690_v48 }
 0x131   : > { %v793_v14 = vadd.f32 %v792_v1, %v791_v11 }
 0x132   : > { %v694_v23 = vadd.f32 %v693_v29, %v692_v41 }
 0x133   : > { %v795_v32 = vadd.f32 %v794_v55, %v793_v14 }
 0x134   : > { %v696_v62 = vadd.f32 %v695_v20, %v694_v23 }
 0x135   : > { %v797_v42 = vadd.f32 %v796_v0, %v795_v32 }
 0x136   : > { %v697_v53 = vrot.slane %v696_v62, 4 }
 0x137   : > { %v799_v59 = vadd.f32 %v798_v18, %v797_v42 }
 0x138   : > { %v698_v3 = vadd.f32 %v697_v53, %v696_v62 }
 0x139   : > { %v801_v44 = vadd.f32 %v800_v21, %v799_v59 }
 0x13a   : > { %v699_v37 = vrot.slane %v698_v3, 2 }
 0x13b   : > { %v802_v22 = vrot.slane %v801_v44, 4 }
 0x13c   : > { %v700_v9 = vadd.f32 %v699_v37, %v698_v3 }
 0x13d   : > { %v803_v60 = vadd.f32 %v802_v22, %v801_v44 }
 0x13e   : > { %v701_v12 = vrot.slane %v700_v9, 1 }
 0x13f   : > { %v804_v25 = vrot.slane %v803_v60, 2 }
 0x140   : > { %v702_v15 = vadd.f32 %v701_v12, %v700_v9 }
 0x141   : > { %v805_v27 = vadd.f32 %v804_v25, %v803_v60 }
 0x142   : > { %v703_v19 = vadd.f32 %v702_v15, %v633_v51 }
 0x143   : > { %v806_v30 = vrot.slane %v805_v27, 1 }
 0x144   : > { %705 = vst.msk [vmem:[%s1487_s4] sm:$0x1] %vm704_vm3, %v703_v19 }
 0x145   : > { %v807_v13 = vadd.f32 %v806_v30, %v805_v27 }
 0x147   : > { %v808_v31 = vadd.f32 %v807_v13, %v706_v26 }
 0x149   : > { %809 = vst.msk [vmem:[%s1488_s5] sm:$0x1] %vm704_vm3, %v808_v31 }
 0x14a PF: > { %s16_s18 = sadd.s32 1, %s1009_s18  }
 0x14b   : > { %p13_p5 = scmp.ge.s32.totalorder %s16_s18, 4  }
 0x14d   :  { %15 = sbr.rel (!%p13_p5) target bundleno = 1 (0x1), region = 82 }

// kernel: aspp_block_forward.6
= control target key start
LH: loop header
LB: loop body
LE: loop exit
PB: predicated region body
PF: predicated region fallthrough
CT: control target
= control target key end

     0   :  { %s3805_s12 = smov 0   ;;  %s3807_s13 = smov 0   ;;  %s4676_s0 = inlined_call_operand.vmem [shape: bf16[4,512,36], index: 0, kind: input, shape index: {}]   ;;  %s4677_s1 = inlined_call_operand.vmem [shape: bf16[4,36,4], index: 1, kind: input, shape index: {}]   ;;  %s4678_s2 = inlined_call_operand.vmem [shape: f32[4,1,4], index: 2, kind: input, shape index: {}]   ;;  %s4679_s3 = inlined_call_operand.vmem [shape: bf16[512,16], index: 3, kind: output, shape index: {}]  }
   0x1   :  { %s3809_s14 = smov 0  }
   0x2 LB: > { %s2847_s15 = sadd.s32 4294967295, %s3780_s14   ;;  %s3822_s16 = sadd.s32 1, %s3780_s14   ;;  %s3780_s14 = sphi %s3809_s14, %s4686_s14   ;;  %s3776_s13 = sphi %s3807_s13, %s4685_s13   ;;  %s3772_s12 = sphi %s3805_s12, %s4684_s12  }
   0x3   : > { %s17_s17 = ssub.s32 %s3780_s14, %s3822_s16  ;;  %s20_s18 = sadd.s32 1, %s3776_s13 }
   0x4   : > { %p18_p0 = scmp.eq.s32.totalorder %s17_s17, 0  ;;  %p27_p1 = scmp.ne.s32.totalorder %s3776_s13, %s3772_s12 }
   0x5   : > { %p28_p2 = scmp.eq.s32.totalorder %s3780_s14, 0  ;;  %p2850_p4 = scmp.ge.s32.totalorder %s3780_s14, 2 }
   0x6   : > { %s3831_s19 = scalar_select %p18_p0, %s3776_s13, %s20_s18  }
   0x7   : > { %p29_p3 = por %p28_p2, %p27_p1  ;;  %127 = sbr.rel (%p2850_p4) target bundleno = 48 (0x30), region = 24 }
   0xc   : > { %130 = sbr.rel (!%p29_p3) target bundleno = 48 (0x30), region = 28  ;;  %s132_s20 = sand.u32 (%p29_p3), 1, %s3776_s13  }
   0xd   : > { %s3150_s21 = sshll.u32 (%p29_p3), %s3780_s14, 7  ;;  %s2851_s22 = sshll.u32 (%p29_p3), %s132_s20, 9 }
   0xe   : > { %s3839_s25 = scalar_lea.vmem (%p29_p3), %s4676_s0, %s3150_s21  ;;  %s3844_s26 = scalar_lea.vmem (%p29_p3), [#allocation2], %s2851_s22 }
   0xf   : > { %v154_v0 = vld [vmem:[%s3839_s25] sm:$0xff] (%p29_p3)   ;;  %v158_v1 = vld [vmem:[%s3839_s25 + $0x8] sm:$0xff] (%p29_p3)   ;;  %v162_v2 = vld [vmem:[%s3839_s25 + $0x10] sm:$0xff] (%p29_p3)  }
  0x10   : > { %155 = vst [vmem:[%s3844_s26] sm:$0xff] (%p29_p3), %v154_v0   ;;  %159 = vst [vmem:[%s3844_s26 + $0x8] sm:$0xff] (%p29_p3), %v158_v1   ;;  %v166_v3 = vld [vmem:[%s3839_s25 + $0x18] sm:$0xff] (%p29_p3)   ;;  %v170_v4 = vld [vmem:[%s3839_s25 + $0x20] sm:$0xff] (%p29_p3)  }
  0x11   : > { %163 = vst [vmem:[%s3844_s26 + $0x10] sm:$0xff] %v162_v2   ;;  %v174_v5 = vld [vmem:[%s3839_s25 + $0x28] sm:$0xff]   ;;  %167 = vst [vmem:[%s3844_s26 + $0x18] sm:$0xff] %v166_v3   ;;  %v178_v6 = vld [vmem:[%s3839_s25 + $0x30] sm:$0xff]  }
  0x12   : > { %171 = vst [vmem:[%s3844_s26 + $0x20] sm:$0xff] %v170_v4   ;;  %175 = vst [vmem:[%s3844_s26 + $0x28] sm:$0xff] %v174_v5   ;;  %v182_v7 = vld [vmem:[%s3839_s25 + $0x38] sm:$0xff]   ;;  %v186_v8 = vld [vmem:[%s3839_s25 + $0x40] sm:$0xff]  }
  0x13   : > { %179 = vst [vmem:[%s3844_s26 + $0x30] sm:$0xff] %v178_v6   ;;  %183 = vst [vmem:[%s3844_s26 + $0x38] sm:$0xff] %v182_v7   ;;  %v190_v9 = vld [vmem:[%s3839_s25 + $0x48] sm:$0xff]   ;;  %v194_v10 = vld [vmem:[%s3839_s25 + $0x50] sm:$0xff]  }
  0x14   : > { %187 = vst [vmem:[%s3844_s26 + $0x40] sm:$0xff] %v186_v8   ;;  %v198_v11 = vld [vmem:[%s3839_s25 + $0x58] sm:$0xff]   ;;  %191 = vst [vmem:[%s3844_s26 + $0x48] sm:$0xff] %v190_v9   ;;  %v202_v12 = vld [vmem:[%s3839_s25 + $0x60] sm:$0xff]  }
  0x15   : > { %195 = vst [vmem:[%s3844_s26 + $0x50] sm:$0xff] %v194_v10   ;;  %199 = vst [vmem:[%s3844_s26 + $0x58] sm:$0xff] %v198_v11   ;;  %v206_v13 = vld [vmem:[%s3839_s25 + $0x68] sm:$0xff]   ;;  %v210_v14 = vld [vmem:[%s3839_s25 + $0x70] sm:$0xff]  }
  0x16   : > { %203 = vst [vmem:[%s3844_s26 + $0x60] sm:$0xff] %v202_v12   ;;  %207 = vst [vmem:[%s3844_s26 + $0x68] sm:$0xff] %v206_v13   ;;  %v214_v15 = vld [vmem:[%s3839_s25 + $0x78] sm:$0xff]   ;;  %v218_v16 = vld [vmem:[%s3839_s25 + $0x100] sm:$0xff]  }
  0x17   : > { %211 = vst [vmem:[%s3844_s26 + $0x70] sm:$0xff] %v210_v14   ;;  %v222_v17 = vld [vmem:[%s3839_s25 + $0x108] sm:$0xff]   ;;  %215 = vst [vmem:[%s3844_s26 + $0x78] sm:$0xff] %v214_v15   ;;  %v226_v18 = vld [vmem:[%s3839_s25 + $0x110] sm:$0xff]  }
  0x18   : > { %219 = vst [vmem:[%s3844_s26 + $0x80] sm:$0xff] %v218_v16   ;;  %223 = vst [vmem:[%s3844_s26 + $0x88] sm:$0xff] %v222_v17   ;;  %v230_v19 = vld [vmem:[%s3839_s25 + $0x118] sm:$0xff]   ;;  %v234_v20 = vld [vmem:[%s3839_s25 + $0x120] sm:$0xff]  }
  0x19   : > { %227 = vst [vmem:[%s3844_s26 + $0x90] sm:$0xff] %v226_v18   ;;  %231 = vst [vmem:[%s3844_s26 + $0x98] sm:$0xff] %v230_v19   ;;  %v238_v21 = vld [vmem:[%s3839_s25 + $0x128] sm:$0xff]   ;;  %v242_v22 = vld [vmem:[%s3839_s25 + $0x130] sm:$0xff]  }
  0x1a   : > { %235 = vst [vmem:[%s3844_s26 + $0xa0] sm:$0xff] %v234_v20   ;;  %v246_v23 = vld [vmem:[%s3839_s25 + $0x138] sm:$0xff]   ;;  %239 = vst [vmem:[%s3844_s26 + $0xa8] sm:$0xff] %v238_v21   ;;  %v250_v24 = vld [vmem:[%s3839_s25 + $0x140] sm:$0xff]  }
  0x1b   : > { %243 = vst [vmem:[%s3844_s26 + $0xb0] sm:$0xff] %v242_v22   ;;  %247 = vst [vmem:[%s3844_s26 + $0xb8] sm:$0xff] %v246_v23   ;;  %v254_v25 = vld [vmem:[%s3839_s25 + $0x148] sm:$0xff]   ;;  %v258_v26 = vld [vmem:[%s3839_s25 + $0x150] sm:$0xff]  }
  0x1c   : > { %251 = vst [vmem:[%s3844_s26 + $0xc0] sm:$0xff] %v250_v24   ;;  %255 = vst [vmem:[%s3844_s26 + $0xc8] sm:$0xff] %v254_v25   ;;  %v262_v27 = vld [vmem:[%s3839_s25 + $0x158] sm:$0xff]   ;;  %v266_v28 = vld [vmem:[%s3839_s25 + $0x160] sm:$0xff]  }
  0x1d   : > { %259 = vst [vmem:[%s3844_s26 + $0xd0] sm:$0xff] %v258_v26   ;;  %v270_v29 = vld [vmem:[%s3839_s25 + $0x168] sm:$0xff]   ;;  %263 = vst [vmem:[%s3844_s26 + $0xd8] sm:$0xff] %v262_v27   ;;  %v274_v30 = vld [vmem:[%s3839_s25 + $0x170] sm:$0xff]  }
  0x1e   : > { %267 = vst [vmem:[%s3844_s26 + $0xe0] sm:$0xff] %v266_v28   ;;  %271 = vst [vmem:[%s3844_s26 + $0xe8] sm:$0xff] %v270_v29   ;;  %v278_v31 = vld [vmem:[%s3839_s25 + $0x178] sm:$0xff]   ;;  %v282_v32 = vld [vmem:[%s3839_s25 + $0x200] sm:$0xff]  }
  0x1f   : > { %275 = vst [vmem:[%s3844_s26 + $0xf0] sm:$0xff] %v274_v30   ;;  %279 = vst [vmem:[%s3844_s26 + $0xf8] sm:$0xff] %v278_v31   ;;  %v286_v33 = vld [vmem:[%s3839_s25 + $0x208] sm:$0xff]   ;;  %v290_v34 = vld [vmem:[%s3839_s25 + $0x210] sm:$0xff]  }
  0x20   : > { %283 = vst [vmem:[%s3844_s26 + $0x100] sm:$0xff] %v282_v32   ;;  %v294_v35 = vld [vmem:[%s3839_s25 + $0x218] sm:$0xff]   ;;  %287 = vst [vmem:[%s3844_s26 + $0x108] sm:$0xff] %v286_v33   ;;  %v298_v36 = vld [vmem:[%s3839_s25 + $0x220] sm:$0xff]  }
  0x21   : > { %291 = vst [vmem:[%s3844_s26 + $0x110] sm:$0xff] %v290_v34   ;;  %295 = vst [vmem:[%s3844_s26 + $0x118] sm:$0xff] %v294_v35   ;;  %v302_v37 = vld [vmem:[%s3839_s25 + $0x228] sm:$0xff]   ;;  %v306_v38 = vld [vmem:[%s3839_s25 + $0x230] sm:$0xff]  }
  0x22   : > { %299 = vst [vmem:[%s3844_s26 + $0x120] sm:$0xff] %v298_v36   ;;  %303 = vst [vmem:[%s3844_s26 + $0x128] sm:$0xff] %v302_v37   ;;  %v310_v39 = vld [vmem:[%s3839_s25 + $0x238] sm:$0xff]   ;;  %v314_v40 = vld [vmem:[%s3839_s25 + $0x240] sm:$0xff]  }
  0x23   : > { %307 = vst [vmem:[%s3844_s26 + $0x130] sm:$0xff] %v306_v38   ;;  %v318_v41 = vld [vmem:[%s3839_s25 + $0x248] sm:$0xff]   ;;  %311 = vst [vmem:[%s3844_s26 + $0x138] sm:$0xff] %v310_v39   ;;  %v322_v42 = vld [vmem:[%s3839_s25 + $0x250] sm:$0xff]  }
  0x24   : > { %315 = vst [vmem:[%s3844_s26 + $0x140] sm:$0xff] %v314_v40   ;;  %319 = vst [vmem:[%s3844_s26 + $0x148] sm:$0xff] %v318_v41   ;;  %v326_v43 = vld [vmem:[%s3839_s25 + $0x258] sm:$0xff]   ;;  %v330_v44 = vld [vmem:[%s3839_s25 + $0x260] sm:$0xff]  }
  0x25   : > { %323 = vst [vmem:[%s3844_s26 + $0x150] sm:$0xff] %v322_v42   ;;  %327 = vst [vmem:[%s3844_s26 + $0x158] sm:$0xff] %v326_v43   ;;  %v334_v45 = vld [vmem:[%s3839_s25 + $0x268] sm:$0xff]   ;;  %v338_v46 = vld [vmem:[%s3839_s25 + $0x270] sm:$0xff]  }
  0x26   : > { %331 = vst [vmem:[%s3844_s26 + $0x160] sm:$0xff] %v330_v44   ;;  %v342_v47 = vld [vmem:[%s3839_s25 + $0x278] sm:$0xff]   ;;  %335 = vst [vmem:[%s3844_s26 + $0x168] sm:$0xff] %v334_v45   ;;  %v346_v48 = vld [vmem:[%s3839_s25 + $0x300] sm:$0xff]  }
  0x27   : > { %339 = vst [vmem:[%s3844_s26 + $0x170] sm:$0xff] %v338_v46   ;;  %343 = vst [vmem:[%s3844_s26 + $0x178] sm:$0xff] %v342_v47   ;;  %v350_v49 = vld [vmem:[%s3839_s25 + $0x308] sm:$0xff]   ;;  %v354_v50 = vld [vmem:[%s3839_s25 + $0x310] sm:$0xff]  }
  0x28   : > { %347 = vst [vmem:[%s3844_s26 + $0x180] sm:$0xff] %v346_v48   ;;  %351 = vst [vmem:[%s3844_s26 + $0x188] sm:$0xff] %v350_v49   ;;  %v358_v51 = vld [vmem:[%s3839_s25 + $0x318] sm:$0xff]   ;;  %v362_v52 = vld [vmem:[%s3839_s25 + $0x320] sm:$0xff]  }
  0x29   : > { %355 = vst [vmem:[%s3844_s26 + $0x190] sm:$0xff] %v354_v50   ;;  %v366_v53 = vld [vmem:[%s3839_s25 + $0x328] sm:$0xff]   ;;  %359 = vst [vmem:[%s3844_s26 + $0x198] sm:$0xff] %v358_v51   ;;  %v370_v54 = vld [vmem:[%s3839_s25 + $0x330] sm:$0xff]  }
  0x2a   : > { %363 = vst [vmem:[%s3844_s26 + $0x1a0] sm:$0xff] %v362_v52   ;;  %367 = vst [vmem:[%s3844_s26 + $0x1a8] sm:$0xff] %v366_v53   ;;  %v374_v55 = vld [vmem:[%s3839_s25 + $0x338] sm:$0xff]   ;;  %v378_v56 = vld [vmem:[%s3839_s25 + $0x340] sm:$0xff]  }
  0x2b   : > { %371 = vst [vmem:[%s3844_s26 + $0x1b0] sm:$0xff] %v370_v54   ;;  %375 = vst [vmem:[%s3844_s26 + $0x1b8] sm:$0xff] %v374_v55   ;;  %v382_v57 = vld [vmem:[%s3839_s25 + $0x348] sm:$0xff]   ;;  %v386_v58 = vld [vmem:[%s3839_s25 + $0x350] sm:$0xff]  }
  0x2c   : > { %379 = vst [vmem:[%s3844_s26 + $0x1c0] sm:$0xff] %v378_v56   ;;  %v390_v59 = vld [vmem:[%s3839_s25 + $0x358] sm:$0xff]   ;;  %383 = vst [vmem:[%s3844_s26 + $0x1c8] sm:$0xff] %v382_v57   ;;  %v394_v60 = vld [vmem:[%s3839_s25 + $0x360] sm:$0xff]  }
  0x2d   : > { %387 = vst [vmem:[%s3844_s26 + $0x1d0] sm:$0xff] %v386_v58   ;;  %391 = vst [vmem:[%s3844_s26 + $0x1d8] sm:$0xff] %v390_v59   ;;  %v398_v61 = vld [vmem:[%s3839_s25 + $0x368] sm:$0xff]   ;;  %v402_v62 = vld [vmem:[%s3839_s25 + $0x370] sm:$0xff]  }
  0x2e   : > { %395 = vst [vmem:[%s3844_s26 + $0x1e0] sm:$0xff] %v394_v60   ;;  %399 = vst [vmem:[%s3844_s26 + $0x1e8] sm:$0xff] %v398_v61   ;;  %v406_v63 = vld [vmem:[%s3839_s25 + $0x378] sm:$0xff]  }
  0x2f   : > { %403 = vst [vmem:[%s3844_s26 + $0x1f0] sm:$0xff] %v402_v62   ;;  %407 = vst [vmem:[%s3844_s26 + $0x1f8] sm:$0xff] %v406_v63  }
  0x30 PF: > { %p2854_p5 = scmp.ge.s32.totalorder %s3780_s14, 1  ;;  %p688_p6 = scmp.lt.s32.totalorder %s3780_s14, 3 }
  0x32   : > { %p689_p7 = pnand %p2854_p5, %p688_p6 }
  0x34   : > { %692 = sbr.rel (%p689_p7) target bundleno = 518 (0x206), region = 69 }
  0x39   : > { %v3682_v0 = vld [vmem:[%s4677_s1 + $0x10] ss:$0 sps:$4 sm:$0x33]   ;;  %vm914_vm0 = vcmask 1041408   ;;  %v3684_v2 = vld [vmem:[%s4677_s1 + $0x8] sm:$0xff]   ;;  %v3685_v4 = vld [vmem:[%s4677_s1 + $0x1c] sm:$0xff]  }
  0x3a   : > { %v3683_v1 = vld [vmem:[%s4677_s1 + $0x24] ss:$0 sps:$4 sm:$0x33]   ;;  %3411 = vmatprep.subr.msk.bf16.mxu0 %vm914_vm0, %v3682_v0  ;;  %v916_v3 = vsel %vm914_vm0, %v3682_v0, 0  ;;  %v3687_v7 = vld [vmem:[%s4677_s1 + $0x14] sm:$0xff]   ;;  %s695_s17 = sand.u32 1, %s3772_s12  }
  0x3b   : > { %3412 = vmatprep.subr.msk.bf16.mxu1 %vm914_vm0, %v3683_v1  ;;  %3260 = vmatpush3.bf16.msra.mxu0 %v916_v3  ;;  %v1270_v5 = vsel %vm914_vm0, %v3683_v1, 0  ;;  %v3686_v6 = vld [vmem:[%s4677_s1] sm:$0xff]   ;;  %vm865_vm1 = vcmask 293888   ;;  %s2855_s18 = sshll.u32 %s695_s17, 9  ;;  %v3702_v14 = vld [vmem:[%s4677_s1 + $0x30] sm:$0xff]   ;;  %v3716_v30 = vld [vmem:[%s4677_s1 + $0x28] sm:$0xff]  }
  0x3c   : > { %3298 = vmatpush3.bf16.msra.mxu1 %v1270_v5  ;;  %3261 = vmatprep.subr.bf16.mxu0 %v3684_v2  ;;  %v3692_v8 = vld [vmem:[%s4677_s1 + $0x38] ss:$0 sps:$4 sm:$0x33]   ;;  %v3693_v9 = vld [vmem:[%s4677_s1 + $0x4c] ss:$0 sps:$4 sm:$0x33]  }
  0x3d   : > { %3299 = vmatprep.subr.bf16.mxu1 %v3685_v4  ;;  %s4002_s24 = scalar_lea.vmem [#allocation2], %s2855_s18  ;;  %v1624_v15 = vsel %vm914_vm0, %v3692_v8, 0  ;;  %v1978_v17 = vsel %vm914_vm0, %v3693_v9, 0  ;;  %v3707_v24 = vld [vmem:[%s4677_s1 + $0x44] sm:$0xff]   ;;  %v3719_v33 = vld [vmem:[%s4677_s1 + $0x3c] sm:$0xff]   ;;  %s3782_s7 = smov 4  }
  0x3e   : > { %v3688_v10 = vld [vmem:[%s4002_s24] sm:$0xff]   ;;  %v3690_v12 = vld [vmem:[%s4002_s24 + $0x8] sm:$0xff]   ;;  %v3694_v16 = vld [vmem:[%s4002_s24 + $0x10] sm:$0xff]   ;;  %s3783_s17 = smov 8   ;;  %s3784_s18 = smov 12   ;;  %vm2525_vm2 = vcmask 31744  }
  0x3f   : > { %3262 = vmatpush3.bf16.msra.mxu0 %v3684_v2  ;;  %v3689_v11 = vld [vmem:[%s4002_s24 + $0x80] sm:$0xff]   ;;  %3265 = vmatprep.mubr.msk.bf16.mxu0 %vm865_vm1, %v3688_v10  ;;  %v3691_v13 = vld [vmem:[%s4002_s24 + $0x88] sm:$0xff]   ;;  %v3695_v18 = vld [vmem:[%s4002_s24 + $0x90] sm:$0xff]   ;;  %s2856_s20 = sshll.u32 %s2847_s15, 5  ;;  %vm2558_vm3 = vcmask 64512   ;;  %vm2591_vm4 = vcmask 97280  }
  0x40   : > { %3300 = vmatpush3.bf16.msra.mxu1 %v3685_v4  ;;  %3263 = vmatprep.subr.bf16.mxu0 %v3686_v6  ;;  %v3696_v19 = vld [vmem:[%s4002_s24 + $0x18] sm:$0xff]   ;;  %v3698_v21 = vld [vmem:[%s4002_s24 + $0x20] sm:$0xff]   ;;  %v3700_v23 = vld [vmem:[%s4002_s24 + $0x28] sm:$0xff]   ;;  %p720_p8 = scmp.lt.s32.totalorder %s2856_s20, 63  ;;  %vm2752_vm5 = vcmask 125952  }
  0x41   : > { %3301 = vmatprep.subr.bf16.mxu1 %v3687_v7  ;;  %3303 = vmatprep.mubr.msk.bf16.mxu1 %vm865_vm1, %v3689_v11  ;;  %v3697_v20 = vld [vmem:[%s4002_s24 + $0x98] sm:$0xff]   ;;  %v3699_v22 = vld [vmem:[%s4002_s24 + $0xa0] sm:$0xff]   ;;  %v3701_v25 = vld [vmem:[%s4002_s24 + $0xa8] sm:$0xff]  }
  0x42   : > { %v3703_v26 = vld [vmem:[%s4002_s24 + $0x30] sm:$0xff]   ;;  %v3705_v28 = vld [vmem:[%s4002_s24 + $0x38] sm:$0xff]   ;;  %v3708_v31 = vld [vmem:[%s4002_s24 + $0x40] sm:$0xff]   ;;  %s4688_s20 = smov (!%p720_p8, %s2856_s20), 63 }
  0x43   : > { %3264 = vmatpush3.bf16.msra.mxu0 %v3686_v6  ;;  %v3704_v27 = vld [vmem:[%s4002_s24 + $0xb0] sm:$0xff]   ;;  %v3706_v29 = vld [vmem:[%s4002_s24 + $0xb8] sm:$0xff]   ;;  %v3709_v32 = vld [vmem:[%s4002_s24 + $0xc0] sm:$0xff]   ;;  %s2857_s14 = sshll.u32 %s4688_s20, 2 }
  0x44   : > { %3302 = vmatpush3.bf16.msra.mxu1 %v3687_v7  ;;  %3413 = vmatprep.subr.msk.bf16.mxu0 %vm914_vm0, %v3692_v8  ;;  %v3710_v34 = vld [vmem:[%s4002_s24 + $0x48] sm:$0xff]   ;;  %v3712_v36 = vld [vmem:[%s4002_s24 + $0x50] sm:$0xff]   ;;  %v3714_v38 = vld [vmem:[%s4002_s24 + $0x58] sm:$0xff]  }
  0x45   : > { %3414 = vmatprep.subr.msk.bf16.mxu1 %vm914_vm0, %v3693_v9  ;;  %v3711_v35 = vld [vmem:[%s4002_s24 + $0xc8] sm:$0xff]   ;;  %v3713_v37 = vld [vmem:[%s4002_s24 + $0xd0] sm:$0xff]   ;;  %v3715_v39 = vld [vmem:[%s4002_s24 + $0xd8] sm:$0xff]  }
  0x46   : > { %3266 = vmatmul.mubr.msk.bf16.vlgmr.msra.gmra.mxu0 %vm865_vm1, %v3690_v12  ;;  %v3717_v40 = vld [vmem:[%s4002_s24 + $0x60] sm:$0xff]   ;;  %v3720_v42 = vld [vmem:[%s4002_s24 + $0x68] sm:$0xff]   ;;  %v3722_v44 = vld [vmem:[%s4002_s24 + $0x70] sm:$0xff]  }
  0x47   : > { %3304 = vmatmul.mubr.msk.bf16.vlgmr.msra.gmra.mxu1 %vm865_vm1, %v3691_v13  ;;  %3336 = vmatpush3.bf16.msra.mxu0 %v1624_v15  ;;  %v3718_v41 = vld [vmem:[%s4002_s24 + $0xe0] sm:$0xff]   ;;  %v3721_v43 = vld [vmem:[%s4002_s24 + $0xe8] sm:$0xff]   ;;  %v3723_v45 = vld [vmem:[%s4002_s24 + $0xf0] sm:$0xff]  }
  0x48   : > { %3374 = vmatpush3.bf16.msra.mxu1 %v1978_v17  ;;  %3269 = vmatprep.mubr.msk.bf16.mxu0 %vm865_vm1, %v3694_v16  ;;  %v3724_v46 = vld [vmem:[%s4002_s24 + $0x78] sm:$0xff]   ;;  %v3726_v48 = vld [vmem:[%s4002_s24 + $0x100] sm:$0xff]   ;;  %v3728_v50 = vld [vmem:[%s4002_s24 + $0x108] sm:$0xff]  }
  0x49   : > { %3307 = vmatprep.mubr.msk.bf16.mxu1 %vm865_vm1, %v3695_v18  ;;  %3337 = vmatprep.subr.bf16.mxu0 %v3702_v14  ;;  %v3725_v47 = vld [vmem:[%s4002_s24 + $0xf8] sm:$0xff]   ;;  %v3727_v49 = vld [vmem:[%s4002_s24 + $0x180] sm:$0xff]   ;;  %v3729_v51 = vld [vmem:[%s4002_s24 + $0x188] sm:$0xff]  }
  0x4a   : > { %3375 = vmatprep.subr.bf16.mxu1 %v3707_v24  ;;  %v3730_v52 = vld [vmem:[%s4002_s24 + $0x110] sm:$0xff]   ;;  %v3732_v54 = vld [vmem:[%s4002_s24 + $0x118] sm:$0xff]   ;;  %v3734_v56 = vld [vmem:[%s4002_s24 + $0x120] sm:$0xff]  }
  0x4b   : > { %3338 = vmatpush3.bf16.msra.mxu0 %v3702_v14  ;;  %v3731_v53 = vld [vmem:[%s4002_s24 + $0x190] sm:$0xff]   ;;  %v3733_v55 = vld [vmem:[%s4002_s24 + $0x198] sm:$0xff]   ;;  %v3735_v57 = vld [vmem:[%s4002_s24 + $0x1a0] sm:$0xff]  }
  0x4c   : > { %3376 = vmatpush3.bf16.msra.mxu1 %v3707_v24  ;;  %3339 = vmatprep.subr.bf16.mxu0 %v3716_v30  ;;  %v3736_v58 = vld [vmem:[%s4002_s24 + $0x128] sm:$0xff]   ;;  %v3738_v60 = vld [vmem:[%s4002_s24 + $0x130] sm:$0xff]   ;;  %v3740_v62 = vld [vmem:[%s4002_s24 + $0x138] sm:$0xff]  }
  0x4d   : > { %3377 = vmatprep.subr.bf16.mxu1 %v3719_v33  ;;  %v3737_v59 = vld [vmem:[%s4002_s24 + $0x1a8] sm:$0xff]   ;;  %v3739_v61 = vld [vmem:[%s4002_s24 + $0x1b0] sm:$0xff]   ;;  %v3741_v63 = vld [vmem:[%s4002_s24 + $0x1b8] sm:$0xff]  }
  0x4e   : > { %3270 = vmatmul.mubr.msk.bf16.gmra.mxu0 %vm865_vm1, %v3696_v19  ;;  %v3742_v0 = vld [vmem:[%s4002_s24 + $0x140] sm:$0xff]   ;;  %v3744_v2 = vld [vmem:[%s4002_s24 + $0x148] sm:$0xff]   ;;  %v3746_v4 = vld [vmem:[%s4002_s24 + $0x150] sm:$0xff]  }
  0x4f   : > { %3308 = vmatmul.mubr.msk.bf16.gmra.mxu1 %vm865_vm1, %v3697_v20  ;;  %3273 = vmatprep.mubr.msk.bf16.mxu0 %vm865_vm1, %v3698_v21  ;;  %v3743_v1 = vld [vmem:[%s4002_s24 + $0x1c0] sm:$0xff]   ;;  %v3745_v3 = vld [vmem:[%s4002_s24 + $0x1c8] sm:$0xff]   ;;  %v3747_v5 = vld [vmem:[%s4002_s24 + $0x1d0] sm:$0xff]  }
  0x50   : > { %3311 = vmatprep.mubr.msk.bf16.mxu1 %vm865_vm1, %v3699_v22  ;;  %3340 = vmatpush3.bf16.msra.mxu0 %v3716_v30  ;;  %v3748_v6 = vld [vmem:[%s4002_s24 + $0x158] sm:$0xff]   ;;  %v3750_v8 = vld [vmem:[%s4002_s24 + $0x160] sm:$0xff]   ;;  %v3752_v10 = vld [vmem:[%s4002_s24 + $0x168] sm:$0xff]  }
  0x51   : > { %3378 = vmatpush3.bf16.msra.mxu1 %v3719_v33  ;;  %v3749_v7 = vld [vmem:[%s4002_s24 + $0x1d8] sm:$0xff]   ;;  %v3751_v9 = vld [vmem:[%s4002_s24 + $0x1e0] sm:$0xff]   ;;  %v3753_v11 = vld [vmem:[%s4002_s24 + $0x1e8] sm:$0xff]  }
  0x52   : > { %v3754_v12 = vld [vmem:[%s4002_s24 + $0x170] sm:$0xff]   ;;  %v3756_v14 = vld [vmem:[%s4002_s24 + $0x178] sm:$0xff]   ;;  %v4153_v18 = vld [vmem:[%s4678_s2 + $0x1] ss:$0 sm:$0xff] }
  0x53   : > { %v3755_v13 = vld [vmem:[%s4002_s24 + $0x1f0] sm:$0xff]   ;;  %v3757_v15 = vld [vmem:[%s4002_s24 + $0x1f8] sm:$0xff]   ;;  %s4432_s24 = scalar_lea.vmem %s4679_s3, %s2857_s14 }
  0x56   : > { %3274 = vmatmul.mubr.msk.bf16.gmra.mxu0 %vm865_vm1, %v3700_v23 }
  0x57   : > { %3312 = vmatmul.mubr.msk.bf16.gmra.mxu1 %vm865_vm1, %v3701_v25  ;;  %3277 = vmatprep.mubr.msk.bf16.mxu0 %vm865_vm1, %v3703_v26 }
  0x58   : > { %3315 = vmatprep.mubr.msk.bf16.mxu1 %vm865_vm1, %v3704_v27 }
  0x5e   : > { %3278 = vmatmul.mubr.msk.bf16.gmra.mxu0 %vm865_vm1, %v3705_v28 }
  0x5f   : > { %3316 = vmatmul.mubr.msk.bf16.gmra.mxu1 %vm865_vm1, %v3706_v29  ;;  %3281 = vmatprep.mubr.msk.bf16.mxu0 %vm865_vm1, %v3708_v31 }
  0x60   : > { %3319 = vmatprep.mubr.msk.bf16.mxu1 %vm865_vm1, %v3709_v32 }
  0x66   : > { %3282 = vmatmul.mubr.msk.bf16.gmra.mxu0 %vm865_vm1, %v3710_v34 }
  0x67   : > { %3320 = vmatmul.mubr.msk.bf16.gmra.mxu1 %vm865_vm1, %v3711_v35  ;;  %3285 = vmatprep.mubr.msk.bf16.mxu0 %vm865_vm1, %v3712_v36 }
  0x68   : > { %3323 = vmatprep.mubr.msk.bf16.mxu1 %vm865_vm1, %v3713_v37 }
  0x6e   : > { %3286 = vmatmul.mubr.msk.bf16.gmra.mxu0 %vm865_vm1, %v3714_v38 }
  0x6f   : > { %3324 = vmatmul.mubr.msk.bf16.gmra.mxu1 %vm865_vm1, %v3715_v39  ;;  %3289 = vmatprep.mubr.msk.bf16.mxu0 %vm865_vm1, %v3717_v40 }
  0x70   : > { %3327 = vmatprep.mubr.msk.bf16.mxu1 %vm865_vm1, %v3718_v41 }
  0x76   : > { %3290 = vmatmul.mubr.msk.bf16.gmra.mxu0 %vm865_vm1, %v3720_v42 }
  0x77   : > { %3328 = vmatmul.mubr.msk.bf16.gmra.mxu1 %vm865_vm1, %v3721_v43  ;;  %3293 = vmatprep.mubr.msk.bf16.mxu0 %vm865_vm1, %v3722_v44 }
  0x78   : > { %3331 = vmatprep.mubr.msk.bf16.mxu1 %vm865_vm1, %v3723_v45 }
  0x7e   : > { %3294 = vmatmul.mubr.msk.bf16.gmra.mxu0 %vm865_vm1, %v3724_v46 }
  0x7f   : > { %3332 = vmatmul.mubr.msk.bf16.gmra.mxu1 %vm865_vm1, %v3725_v47  ;;  %3341 = vmatprep.mubr.msk.bf16.mxu0 %vm865_vm1, %v3726_v48 }
  0x80   : > { %3379 = vmatprep.mubr.msk.bf16.mxu1 %vm865_vm1, %v3727_v49 }
  0x86   : > { %3342 = vmatmul.mubr.msk.bf16.vlgmr.msra.gmra.mxu0 %vm865_vm1, %v3728_v50 }
  0x87   : > { %3380 = vmatmul.mubr.msk.bf16.vlgmr.msra.gmra.mxu1 %vm865_vm1, %v3729_v51  ;;  %3345 = vmatprep.mubr.msk.bf16.mxu0 %vm865_vm1, %v3730_v52 }
  0x88   : > { %3383 = vmatprep.mubr.msk.bf16.mxu1 %vm865_vm1, %v3731_v53 }
  0x8e   : > { %3346 = vmatmul.mubr.msk.bf16.gmra.mxu0 %vm865_vm1, %v3732_v54 }
  0x8f   : > { %3384 = vmatmul.mubr.msk.bf16.gmra.mxu1 %vm865_vm1, %v3733_v55  ;;  %3349 = vmatprep.mubr.msk.bf16.mxu0 %vm865_vm1, %v3734_v56 }
  0x90   : > { %3387 = vmatprep.mubr.msk.bf16.mxu1 %vm865_vm1, %v3735_v57 }
  0x96   : > { %3350 = vmatmul.mubr.msk.bf16.gmra.mxu0 %vm865_vm1, %v3736_v58 }
  0x97   : > { %3388 = vmatmul.mubr.msk.bf16.gmra.mxu1 %vm865_vm1, %v3737_v59  ;;  %3353 = vmatprep.mubr.msk.bf16.mxu0 %vm865_vm1, %v3738_v60 }
  0x98   : > { %3391 = vmatprep.mubr.msk.bf16.mxu1 %vm865_vm1, %v3739_v61 }
  0x9e   : > { %3354 = vmatmul.mubr.msk.bf16.gmra.mxu0 %vm865_vm1, %v3740_v62 }
  0x9f   : > { %3392 = vmatmul.mubr.msk.bf16.gmra.mxu1 %vm865_vm1, %v3741_v63  ;;  %3357 = vmatprep.mubr.msk.bf16.mxu0 %vm865_vm1, %v3742_v0 }
  0xa0   : > { %3395 = vmatprep.mubr.msk.bf16.mxu1 %vm865_vm1, %v3743_v1 }
  0xa6   : > { %3358 = vmatmul.mubr.msk.bf16.gmra.mxu0 %vm865_vm1, %v3744_v2 }
  0xa7   : > { %3396 = vmatmul.mubr.msk.bf16.gmra.mxu1 %vm865_vm1, %v3745_v3  ;;  %3361 = vmatprep.mubr.msk.bf16.mxu0 %vm865_vm1, %v3746_v4 }
  0xa8   : > { %3399 = vmatprep.mubr.msk.bf16.mxu1 %vm865_vm1, %v3747_v5 }
  0xae   : > { %3362 = vmatmul.mubr.msk.bf16.gmra.mxu0 %vm865_vm1, %v3748_v6 }
  0xaf   : > { %3400 = vmatmul.mubr.msk.bf16.gmra.mxu1 %vm865_vm1, %v3749_v7  ;;  %3365 = vmatprep.mubr.msk.bf16.mxu0 %vm865_vm1, %v3750_v8 }
  0xb0   : > { %3403 = vmatprep.mubr.msk.bf16.mxu1 %vm865_vm1, %v3751_v9 }
  0xb6   : > { %3366 = vmatmul.mubr.msk.bf16.gmra.mxu0 %vm865_vm1, %v3752_v10 }
  0xb7   : > { %3404 = vmatmul.mubr.msk.bf16.gmra.mxu1 %vm865_vm1, %v3753_v11  ;;  %3369 = vmatprep.mubr.msk.bf16.mxu0 %vm865_vm1, %v3754_v12 }
  0xb8   : > { %3407 = vmatprep.mubr.msk.bf16.mxu1 %vm865_vm1, %v3755_v13 }
  0xbe   : > { %3370 = vmatmul.mubr.msk.bf16.gmra.mxu0 %vm865_vm1, %v3756_v14 }
  0xbf   : > { %3408 = vmatmul.mubr.msk.bf16.gmra.mxu1 %vm865_vm1, %v3757_v15 }
 0x106   : > { %v4148_v16 = vpop.f32.mrf.mxu0 }
 0x107   : > { %v3305_v17 = vpop.f32.mrf.mxu1 }
 0x108   : > { %v4155_v19 = vpop.f32.mrf.mxu0  ;;  %v1315_v21 = vadd.f32 %v3305_v17, %v4153_v18 }
 0x109   : > { %v1306_v20 = vpop.f32.mrf.mxu1 }
 0x10a   : > { %v4158_v22 = vpop.f32.mrf.mxu0  ;;  %v1307_v31 = vadd.f32 %v4153_v18, %v1306_v20 }
 0x10b   : > { %v3306_v23 = vpop.f32.mrf.mxu1 }
 0x10c   : > { %v1318_v24 = vadd.f32 %v3306_v23, %v4153_v18  ;;  %v4161_v25 = vpop.f32.mrf.mxu0 }
 0x10d   : > { %v1309_v26 = vpop.f32.mrf.mxu1 }
 0x10e   : > { %v1310_v27 = vadd.f32 %v4153_v18, %v1309_v26  ;;  %v4164_v28 = vpop.f32.mrf.mxu0  ;;  %v3442_v29 = vpack.i.bf16 %v1318_v24, %v1315_v21 }
 0x10f   : > { %v3309_v30 = vpop.f32.mrf.mxu1 }
 0x110   : > { %3443 = vrot.lane.b32.xlu0 %v3442_v29, %s3782_s7  ;;  %v4168_v32 = vpop.f32.mrf.mxu0  ;;  %v3447_v34 = vpack.i.bf16 %v1310_v27, %v1307_v31  ;;  %v1331_v35 = vadd.f32 %v3309_v30, %v4153_v18 }
 0x111   : > { %v1322_v33 = vpop.f32.mrf.mxu1 }
 0x112   : > { %v4171_v36 = vpop.f32.mrf.mxu0  ;;  %v1323_v45 = vadd.f32 %v4153_v18, %v1322_v33 }
 0x113   : > { %v3310_v37 = vpop.f32.mrf.mxu1 }
 0x114   : > { %v1334_v38 = vadd.f32 %v3310_v37, %v4153_v18  ;;  %3448 = vrot.lane.b32.xlu0 %v3447_v34, %s3782_s7  ;;  %v4175_v39 = vpop.f32.mrf.mxu0 }
 0x115   : > { %v1325_v40 = vpop.f32.mrf.mxu1 }
 0x116   : > { %v1326_v41 = vadd.f32 %v4153_v18, %v1325_v40  ;;  %v4178_v42 = vpop.f32.mrf.mxu0  ;;  %v3452_v43 = vpack.i.bf16 %v1334_v38, %v1331_v35 }
 0x117   : > { %v3313_v44 = vpop.f32.mrf.mxu1 }
 0x118   : > { %3453 = vrot.lane.b32.xlu1 %v3452_v43, %s3782_s7  ;;  %v4182_v46 = vpop.f32.mrf.mxu0  ;;  %v3457_v48 = vpack.i.bf16 %v1326_v41, %v1323_v45  ;;  %v1347_v49 = vadd.f32 %v3313_v44, %v4153_v18 }
 0x119   : > { %v1338_v47 = vpop.f32.mrf.mxu1 }
 0x11a   : > { %v4185_v50 = vpop.f32.mrf.mxu0  ;;  %v1339_v55 = vadd.f32 %v4153_v18, %v1338_v47 }
 0x11b   : > { %v3314_v51 = vpop.f32.mrf.mxu1 }
 0x11c   : > { %v1350_v52 = vadd.f32 %v3314_v51, %v4153_v18  ;;  %3458 = vrot.lane.b32.xlu1 %v3457_v48, %s3782_s7  ;;  %v4189_v53 = vpop.f32.mrf.mxu0 }
 0x11d   : > { %v1341_v54 = vpop.f32.mrf.mxu1 }
 0x11e   : > { %v3462_v56 = vpack.i.bf16 %v1350_v52, %v1347_v49  ;;  %v1342_v57 = vadd.f32 %v4153_v18, %v1341_v54  ;;  %v4193_v58 = vpop.f32.mrf.mxu0 }
 0x11f   : > { %v3317_v59 = vpop.f32.mrf.mxu1 }
 0x120   : > { %v3467_v60 = vpack.i.bf16 %v1342_v57, %v1339_v55  ;;  %3463 = vrot.lane.b32.xlu1 %v3462_v56, %s3782_s7  ;;  %v4196_v61 = vpop.f32.mrf.mxu0  ;;  %v1363_v63 = vadd.f32 %v3317_v59, %v4153_v18 }
 0x121   : > { %v1354_v62 = vpop.f32.mrf.mxu1 }
 0x122   : > { %3468 = vrot.lane.b32.xlu0 %v3467_v60, %s3782_s7  ;;  %v4200_v0 = vpop.f32.mrf.mxu0  ;;  %v1355_v5 = vadd.f32 %v4153_v18, %v1354_v62 }
 0x123   : > { %v3318_v1 = vpop.f32.mrf.mxu1 }
 0x124   : > { %v1366_v2 = vadd.f32 %v3318_v1, %v4153_v18  ;;  %v4203_v3 = vpop.f32.mrf.mxu0 }
 0x125   : > { %v1357_v4 = vpop.f32.mrf.mxu1 }
 0x126   : > { %v3472_v6 = vpack.i.bf16 %v1366_v2, %v1363_v63  ;;  %v1358_v7 = vadd.f32 %v4153_v18, %v1357_v4  ;;  %v4207_v8 = vpop.f32.mrf.mxu0 }
 0x127   : > { %v3321_v9 = vpop.f32.mrf.mxu1 }
 0x128   : > { %v3477_v10 = vpack.i.bf16 %v1358_v7, %v1355_v5  ;;  %3473 = vrot.lane.b32.xlu1 %v3472_v6, %s3782_s7  ;;  %v4210_v11 = vpop.f32.mrf.mxu0  ;;  %v1379_v13 = vadd.f32 %v3321_v9, %v4153_v18 }
 0x129   : > { %v1370_v12 = vpop.f32.mrf.mxu1 }
 0x12a   : > { %3478 = vrot.lane.b32.xlu0 %v3477_v10, %s3782_s7  ;;  %v4214_v14 = vpop.f32.mrf.mxu0  ;;  %v1371_v23 = vadd.f32 %v4153_v18, %v1370_v12 }
 0x12b   : > { %v3322_v15 = vpop.f32.mrf.mxu1 }
 0x12c   : > { %v1382_v17 = vadd.f32 %v3322_v15, %v4153_v18  ;;  %v4217_v20 = vpop.f32.mrf.mxu0 }
 0x12d   : > { %v1373_v21 = vpop.f32.mrf.mxu1 }
 0x12e   : > { %v3482_v24 = vpack.i.bf16 %v1382_v17, %v1379_v13  ;;  %v1374_v26 = vadd.f32 %v4153_v18, %v1373_v21  ;;  %v4221_v27 = vpop.f32.mrf.mxu0 }
 0x12f   : > { %v3325_v29 = vpop.f32.mrf.mxu1 }
 0x130   : > { %v3487_v30 = vpack.i.bf16 %v1374_v26, %v1371_v23  ;;  %3483 = vrot.lane.b32.xlu1 %v3482_v24, %s3782_s7  ;;  %v4224_v31 = vpop.f32.mrf.mxu0  ;;  %v1395_v34 = vadd.f32 %v3325_v29, %v4153_v18 }
 0x131   : > { %v1386_v33 = vpop.f32.mrf.mxu1 }
 0x132   : > { %3488 = vrot.lane.b32.xlu0 %v3487_v30, %s3782_s7  ;;  %v4228_v35 = vpop.f32.mrf.mxu0  ;;  %v1387_v43 = vadd.f32 %v4153_v18, %v1386_v33  ;;  %v4266_v33 = vld [vmem:[%s4678_s2 + $0x2] ss:$0 sm:$0xff] }
 0x133   : > { %v3326_v37 = vpop.f32.mrf.mxu1 }
 0x134   : > { %v1398_v38 = vadd.f32 %v3326_v37, %v4153_v18  ;;  %v4231_v40 = vpop.f32.mrf.mxu0  ;;  %v4272_v37 = vld [vmem:[%s4678_s2 + $0x3] ss:$0 sm:$0xff] }
 0x135   : > { %v1389_v41 = vpop.f32.mrf.mxu1 }
 0x136   : > { %v3492_v44 = vpack.i.bf16 %v1398_v38, %v1395_v34  ;;  %v1390_v45 = vadd.f32 %v4153_v18, %v1389_v41  ;;  %v4235_v47 = vpop.f32.mrf.mxu0 }
 0x137   : > { %v3329_v48 = vpop.f32.mrf.mxu1 }
 0x138   : > { %v3497_v49 = vpack.i.bf16 %v1390_v45, %v1387_v43  ;;  %3493 = vrot.lane.b32.xlu1 %v3492_v44, %s3782_s7  ;;  %v4238_v51 = vpop.f32.mrf.mxu0  ;;  %v1411_v54 = vadd.f32 %v3329_v48, %v4153_v18 }
 0x139   : > { %v1402_v52 = vpop.f32.mrf.mxu1 }
 0x13a   : > { %3498 = vrot.lane.b32.xlu0 %v3497_v49, %s3782_s7  ;;  %v4242_v55 = vpop.f32.mrf.mxu0  ;;  %v1403_v62 = vadd.f32 %v4153_v18, %v1402_v52 }
 0x13b   : > { %v3330_v56 = vpop.f32.mrf.mxu1 }
 0x13c   : > { %v1414_v57 = vadd.f32 %v3330_v56, %v4153_v18  ;;  %v4245_v59 = vpop.f32.mrf.mxu0 }
 0x13d   : > { %v1405_v60 = vpop.f32.mrf.mxu1 }
 0x13e   : > { %v3502_v63 = vpack.i.bf16 %v1414_v57, %v1411_v54  ;;  %v1406_v1 = vadd.f32 %v4153_v18, %v1405_v60  ;;  %v4249_v2 = vpop.f32.mrf.mxu0 }
 0x13f   : > { %v3333_v4 = vpop.f32.mrf.mxu1 }
 0x140   : > { %v3507_v5 = vpack.i.bf16 %v1406_v1, %v1403_v62  ;;  %3503 = vrot.lane.b32.xlu1 %v3502_v63, %s3782_s7  ;;  %v4252_v6 = vpop.f32.mrf.mxu0  ;;  %v1427_v9 = vadd.f32 %v3333_v4, %v4153_v18 }
 0x141   : > { %4680 = vst [vmem:[#allocation3_spill] sm:$0xff] %v4252_v6  ;;  %v1418_v7 = vpop.f32.mrf.mxu1 }
 0x142   : > { %3508 = vrot.lane.b32.xlu0 %v3507_v5, %s3782_s7  ;;  %v4256_v10 = vpop.f32.mrf.mxu0  ;;  %v1419_v21 = vadd.f32 %v4153_v18, %v1418_v7 }
 0x143   : > { %v3334_v12 = vpop.f32.mrf.mxu1 }
 0x144   : > { %v1430_v13 = vadd.f32 %v3334_v12, %v4153_v18  ;;  %v4259_v15 = vpop.f32.mrf.mxu0 }
 0x145   : > { %4681 = vst [vmem:[#allocation4_spill] sm:$0xff] %v4259_v15  ;;  %v1421_v17 = vpop.f32.mrf.mxu1 }
 0x146   : > { %v3512_v23 = vpack.i.bf16 %v1430_v13, %v1427_v9  ;;  %v1422_v24 = vadd.f32 %v4153_v18, %v1421_v17  ;;  %v3343_v26 = vpop.f32.mrf.mxu0 }
 0x147   : > { %v3381_v29 = vpop.f32.mrf.mxu1  ;;  %v1669_v41 = vadd.f32 %v3343_v26, %v4266_v33 }
 0x148   : > { %v3517_v30 = vpack.i.bf16 %v1422_v24, %v1419_v21  ;;  %3513 = vrot.lane.b32.xlu1 %v3512_v23, %s3782_s7  ;;  %v1660_v34 = vpop.f32.mrf.mxu0  ;;  %v2023_v45 = vadd.f32 %v3381_v29, %v4272_v37 }
 0x149   : > { %v2014_v38 = vpop.f32.mrf.mxu1  ;;  %v1661_v49 = vadd.f32 %v4266_v33, %v1660_v34 }
 0x14a   : > { %3518 = vrot.lane.b32.xlu0 %v3517_v30, %s3782_s7  ;;  %v3344_v18 = vpop.f32.mrf.mxu0  ;;  %v2015_v5 = vadd.f32 %v4272_v37, %v2014_v38 }
 0x14b   : > { %v1672_v43 = vadd.f32 %v3344_v18, %v4266_v33  ;;  %v3382_v44 = vpop.f32.mrf.mxu1 }
 0x14c   : > { %v1663_v48 = vpop.f32.mrf.mxu0  ;;  %v2026_v54 = vadd.f32 %v3382_v44, %v4272_v37 }
 0x14d   : > { %v3522_v52 = vpack.i.bf16 %v1672_v43, %v1669_v41  ;;  %v1664_v56 = vadd.f32 %v4266_v33, %v1663_v48  ;;  %v2017_v57 = vpop.f32.mrf.mxu1 }
 0x14e   : > { %v3347_v60 = vpop.f32.mrf.mxu0  ;;  %v2018_v63 = vadd.f32 %v4272_v37, %v2017_v57  ;;  %v3527_v7 = vpack.i.bf16 %v2026_v54, %v2023_v45 }
 0x14f   : > { %v3532_v62 = vpack.i.bf16 %v1664_v56, %v1661_v49  ;;  %v3385_v1 = vpop.f32.mrf.mxu1  ;;  %3523 = vrot.lane.b32.xlu1 %v3522_v52, %s3783_s17  ;;  %v1685_v17 = vadd.f32 %v3347_v60, %v4266_v33 }
 0x150   : > { %v1676_v4 = vpop.f32.mrf.mxu0  ;;  %v3537_v13 = vpack.i.bf16 %v2018_v63, %v2015_v5  ;;  %v2039_v24 = vadd.f32 %v3385_v1, %v4272_v37 }
 0x151   : > { %v2030_v9 = vpop.f32.mrf.mxu1  ;;  %3533 = vrot.lane.b32.xlu0 %v3532_v62, %s3783_s17  ;;  %v1677_v29 = vadd.f32 %v4266_v33, %v1676_v4 }
 0x152   : > { %v3348_v12 = vpop.f32.mrf.mxu0  ;;  %v2031_v49 = vadd.f32 %v4272_v37, %v2030_v9 }
 0x153   : > { %v1688_v21 = vadd.f32 %v3348_v12, %v4266_v33  ;;  %v3386_v23 = vpop.f32.mrf.mxu1  ;;  %3528 = vrot.lane.b32.xlu1 %v3527_v7, %s3784_s18 }
 0x154   : > { %v1679_v26 = vpop.f32.mrf.mxu0  ;;  %v2042_v34 = vadd.f32 %v3386_v23, %v4272_v37 }
 0x155   : > { %v3542_v30 = vpack.i.bf16 %v1688_v21, %v1685_v17  ;;  %v1680_v38 = vadd.f32 %v4266_v33, %v1679_v26  ;;  %v2033_v18 = vpop.f32.mrf.mxu1  ;;  %3538 = vrot.lane.b32.xlu0 %v3537_v13, %s3784_s18 }
 0x156   : > { %v3351_v41 = vpop.f32.mrf.mxu0  ;;  %v2034_v44 = vadd.f32 %v4272_v37, %v2033_v18  ;;  %v3547_v52 = vpack.i.bf16 %v2042_v34, %v2039_v24 }
 0x157   : > { %v3552_v43 = vpack.i.bf16 %v1680_v38, %v1677_v29  ;;  %v3389_v45 = vpop.f32.mrf.mxu1  ;;  %3543 = vrot.lane.b32.xlu1 %v3542_v30, %s3783_s17  ;;  %v1701_v60 = vadd.f32 %v3351_v41, %v4266_v33 }
 0x158   : > { %v1692_v48 = vpop.f32.mrf.mxu0  ;;  %v3557_v57 = vpack.i.bf16 %v2034_v44, %v2031_v49  ;;  %v2055_v1 = vadd.f32 %v3389_v45, %v4272_v37 }
 0x159   : > { %v2046_v54 = vpop.f32.mrf.mxu1  ;;  %3553 = vrot.lane.b32.xlu0 %v3552_v43, %s3783_s17  ;;  %v1693_v5 = vadd.f32 %v4266_v33, %v1692_v48 }
 0x15a   : > { %v3352_v56 = vpop.f32.mrf.mxu0  ;;  %v2047_v29 = vadd.f32 %v4272_v37, %v2046_v54 }
 0x15b   : > { %v1704_v62 = vadd.f32 %v3352_v56, %v4266_v33  ;;  %v3390_v63 = vpop.f32.mrf.mxu1  ;;  %3548 = vrot.lane.b32.xlu1 %v3547_v52, %s3784_s18 }
 0x15c   : > { %v1695_v4 = vpop.f32.mrf.mxu0  ;;  %v2058_v9 = vadd.f32 %v3390_v63, %v4272_v37 }
 0x15d   : > { %v3562_v7 = vpack.i.bf16 %v1704_v62, %v1701_v60  ;;  %v1696_v12 = vadd.f32 %v4266_v33, %v1695_v4  ;;  %v2049_v13 = vpop.f32.mrf.mxu1  ;;  %3558 = vrot.lane.b32.xlu0 %v3557_v57, %s3784_s18 }
 0x15e   : > { %v3355_v17 = vpop.f32.mrf.mxu0  ;;  %v2050_v23 = vadd.f32 %v4272_v37, %v2049_v13  ;;  %v3567_v30 = vpack.i.bf16 %v2058_v9, %v2055_v1 }
 0x15f   : > { %v3572_v21 = vpack.i.bf16 %v1696_v12, %v1693_v5  ;;  %v3393_v24 = vpop.f32.mrf.mxu1  ;;  %3563 = vrot.lane.b32.xlu1 %v3562_v7, %s3783_s17  ;;  %v1717_v41 = vadd.f32 %v3355_v17, %v4266_v33 }
 0x160   : > { %v1708_v26 = vpop.f32.mrf.mxu0  ;;  %v3577_v18 = vpack.i.bf16 %v2050_v23, %v2047_v29  ;;  %v2071_v45 = vadd.f32 %v3393_v24, %v4272_v37 }
 0x161   : > { %v2062_v34 = vpop.f32.mrf.mxu1  ;;  %3573 = vrot.lane.b32.xlu0 %v3572_v21, %s3783_s17  ;;  %v1709_v49 = vadd.f32 %v4266_v33, %v1708_v26 }
 0x162   : > { %v3356_v38 = vpop.f32.mrf.mxu0  ;;  %v2063_v5 = vadd.f32 %v4272_v37, %v2062_v34 }
 0x163   : > { %v1720_v43 = vadd.f32 %v3356_v38, %v4266_v33  ;;  %v3394_v44 = vpop.f32.mrf.mxu1  ;;  %3568 = vrot.lane.b32.xlu1 %v3567_v30, %s3784_s18 }
 0x164   : > { %v1711_v48 = vpop.f32.mrf.mxu0  ;;  %v2074_v54 = vadd.f32 %v3394_v44, %v4272_v37 }
 0x165   : > { %v3582_v52 = vpack.i.bf16 %v1720_v43, %v1717_v41  ;;  %v1712_v56 = vadd.f32 %v4266_v33, %v1711_v48  ;;  %v2065_v57 = vpop.f32.mrf.mxu1  ;;  %3578 = vrot.lane.b32.xlu0 %v3577_v18, %s3784_s18 }
 0x166   : > { %v3359_v60 = vpop.f32.mrf.mxu0  ;;  %v2066_v63 = vadd.f32 %v4272_v37, %v2065_v57  ;;  %v3587_v7 = vpack.i.bf16 %v2074_v54, %v2071_v45 }
 0x167   : > { %v3592_v62 = vpack.i.bf16 %v1712_v56, %v1709_v49  ;;  %v3397_v1 = vpop.f32.mrf.mxu1  ;;  %3583 = vrot.lane.b32.xlu1 %v3582_v52, %s3783_s17  ;;  %v1733_v17 = vadd.f32 %v3359_v60, %v4266_v33 }
 0x168   : > { %v1724_v4 = vpop.f32.mrf.mxu0  ;;  %v3597_v13 = vpack.i.bf16 %v2066_v63, %v2063_v5  ;;  %v2087_v24 = vadd.f32 %v3397_v1, %v4272_v37 }
 0x169   : > { %v2078_v9 = vpop.f32.mrf.mxu1  ;;  %3593 = vrot.lane.b32.xlu0 %v3592_v62, %s3783_s17  ;;  %v1725_v29 = vadd.f32 %v4266_v33, %v1724_v4 }
 0x16a   : > { %v3360_v12 = vpop.f32.mrf.mxu0  ;;  %v2079_v49 = vadd.f32 %v4272_v37, %v2078_v9 }
 0x16b   : > { %v1736_v21 = vadd.f32 %v3360_v12, %v4266_v33  ;;  %v3398_v23 = vpop.f32.mrf.mxu1  ;;  %3588 = vrot.lane.b32.xlu1 %v3587_v7, %s3784_s18 }
 0x16c   : > { %v1727_v26 = vpop.f32.mrf.mxu0  ;;  %v2090_v34 = vadd.f32 %v3398_v23, %v4272_v37 }
 0x16d   : > { %v3602_v30 = vpack.i.bf16 %v1736_v21, %v1733_v17  ;;  %v1728_v38 = vadd.f32 %v4266_v33, %v1727_v26  ;;  %v2081_v18 = vpop.f32.mrf.mxu1  ;;  %3598 = vrot.lane.b32.xlu0 %v3597_v13, %s3784_s18 }
 0x16e   : > { %v3363_v41 = vpop.f32.mrf.mxu0  ;;  %v2082_v44 = vadd.f32 %v4272_v37, %v2081_v18  ;;  %v3607_v52 = vpack.i.bf16 %v2090_v34, %v2087_v24 }
 0x16f   : > { %v3612_v43 = vpack.i.bf16 %v1728_v38, %v1725_v29  ;;  %v3401_v45 = vpop.f32.mrf.mxu1  ;;  %3603 = vrot.lane.b32.xlu1 %v3602_v30, %s3783_s17  ;;  %v1749_v60 = vadd.f32 %v3363_v41, %v4266_v33 }
 0x170   : > { %v1740_v48 = vpop.f32.mrf.mxu0  ;;  %v3617_v57 = vpack.i.bf16 %v2082_v44, %v2079_v49  ;;  %v2103_v1 = vadd.f32 %v3401_v45, %v4272_v37 }
 0x171   : > { %v2094_v54 = vpop.f32.mrf.mxu1  ;;  %3613 = vrot.lane.b32.xlu0 %v3612_v43, %s3783_s17  ;;  %v1741_v5 = vadd.f32 %v4266_v33, %v1740_v48 }
 0x172   : > { %v3364_v56 = vpop.f32.mrf.mxu0  ;;  %v2095_v29 = vadd.f32 %v4272_v37, %v2094_v54 }
 0x173   : > { %v1752_v62 = vadd.f32 %v3364_v56, %v4266_v33  ;;  %v3402_v63 = vpop.f32.mrf.mxu1  ;;  %3608 = vrot.lane.b32.xlu1 %v3607_v52, %s3784_s18 }
 0x174   : > { %v1743_v4 = vpop.f32.mrf.mxu0  ;;  %v2106_v9 = vadd.f32 %v3402_v63, %v4272_v37 }
 0x175   : > { %v3622_v7 = vpack.i.bf16 %v1752_v62, %v1749_v60  ;;  %v1744_v12 = vadd.f32 %v4266_v33, %v1743_v4  ;;  %v2097_v13 = vpop.f32.mrf.mxu1  ;;  %3618 = vrot.lane.b32.xlu0 %v3617_v57, %s3784_s18 }
 0x176   : > { %v3367_v17 = vpop.f32.mrf.mxu0  ;;  %v2098_v23 = vadd.f32 %v4272_v37, %v2097_v13  ;;  %v3627_v30 = vpack.i.bf16 %v2106_v9, %v2103_v1 }
 0x177   : > { %v3632_v21 = vpack.i.bf16 %v1744_v12, %v1741_v5  ;;  %v3405_v24 = vpop.f32.mrf.mxu1  ;;  %3623 = vrot.lane.b32.xlu1 %v3622_v7, %s3783_s17  ;;  %v1765_v41 = vadd.f32 %v3367_v17, %v4266_v33 }
 0x178   : > { %v1756_v26 = vpop.f32.mrf.mxu0  ;;  %v3637_v18 = vpack.i.bf16 %v2098_v23, %v2095_v29  ;;  %v2119_v45 = vadd.f32 %v3405_v24, %v4272_v37 }
 0x179   : > { %v2110_v34 = vpop.f32.mrf.mxu1  ;;  %3633 = vrot.lane.b32.xlu0 %v3632_v21, %s3783_s17  ;;  %v1757_v49 = vadd.f32 %v4266_v33, %v1756_v26 }
 0x17a   : > { %v3368_v38 = vpop.f32.mrf.mxu0  ;;  %v2111_v5 = vadd.f32 %v4272_v37, %v2110_v34 }
 0x17b   : > { %v1768_v43 = vadd.f32 %v3368_v38, %v4266_v33  ;;  %v3406_v44 = vpop.f32.mrf.mxu1  ;;  %3628 = vrot.lane.b32.xlu1 %v3627_v30, %s3784_s18 }
 0x17c   : > { %v1759_v48 = vpop.f32.mrf.mxu0  ;;  %v2122_v54 = vadd.f32 %v3406_v44, %v4272_v37 }
 0x17d   : > { %v3642_v52 = vpack.i.bf16 %v1768_v43, %v1765_v41  ;;  %v1760_v56 = vadd.f32 %v4266_v33, %v1759_v48  ;;  %v2113_v57 = vpop.f32.mrf.mxu1  ;;  %3638 = vrot.lane.b32.xlu0 %v3637_v18, %s3784_s18 }
 0x17e   : > { %v3371_v60 = vpop.f32.mrf.mxu0  ;;  %v2114_v63 = vadd.f32 %v4272_v37, %v2113_v57  ;;  %v3647_v7 = vpack.i.bf16 %v2122_v54, %v2119_v45 }
 0x17f   : > { %v3652_v62 = vpack.i.bf16 %v1760_v56, %v1757_v49  ;;  %v3409_v1 = vpop.f32.mrf.mxu1  ;;  %3643 = vrot.lane.b32.xlu1 %v3642_v52, %s3783_s17  ;;  %v1781_v17 = vadd.f32 %v3371_v60, %v4266_v33 }
 0x180   : > { %v1772_v4 = vpop.f32.mrf.mxu0  ;;  %v3657_v13 = vpack.i.bf16 %v2114_v63, %v2111_v5  ;;  %v2135_v24 = vadd.f32 %v3409_v1, %v4272_v37 }
 0x181   : > { %v2126_v9 = vpop.f32.mrf.mxu1  ;;  %3653 = vrot.lane.b32.xlu0 %v3652_v62, %s3783_s17  ;;  %v1773_v29 = vadd.f32 %v4266_v33, %v1772_v4 }
 0x182   : > { %v3372_v12 = vpop.f32.mrf.mxu0  ;;  %v2127_v44 = vadd.f32 %v4272_v37, %v2126_v9  ;;  %v3444_v49 = vpop.permute.xlu0 %3443 }
 0x183   : > { %v1784_v21 = vadd.f32 %v3372_v12, %v4266_v33  ;;  %v3410_v23 = vpop.f32.mrf.mxu1  ;;  %3648 = vrot.lane.b32.xlu1 %v3647_v7, %s3784_s18  ;;  %v4402_v12 = vld [vmem:[%s4678_s2] ss:$0 sm:$0xff] }
 0x184   : > { %v1775_v26 = vpop.f32.mrf.mxu0  ;;  %v2138_v34 = vadd.f32 %v3410_v23, %v4272_v37  ;;  %v3445_v23 = vunpack.i.l.bf16 %v3444_v49 }
 0x185   : > { %v3662_v30 = vpack.i.bf16 %v1784_v21, %v1781_v17  ;;  %v1776_v38 = vadd.f32 %v4266_v33, %v1775_v26  ;;  %v2129_v18 = vpop.f32.mrf.mxu1  ;;  %3658 = vrot.lane.b32.xlu0 %v3657_v13, %s3784_s18  ;;  %v961_v17 = vadd.f32 %v4148_v16, %v4402_v12  ;;  %v3446_v21 = vunpack.i.h.bf16 %v3444_v49 }
 0x186   : > { %v2130_v43 = vadd.f32 %v4272_v37, %v2129_v18  ;;  %v3677_v45 = vpack.i.bf16 %v2138_v34, %v2135_v24  ;;  %v3449_v54 = vpop.permute.xlu0 %3448  ;;  %v953_v26 = vadd.f32 %v4402_v12, %v4155_v19  ;;  %v977_v16 = vadd.f32 %v4164_v28, %v4402_v12 }
 0x187   : > { %v3667_v41 = vpack.i.bf16 %v1776_v38, %v1773_v29  ;;  %3663 = vrot.lane.b32.xlu1 %v3662_v30, %s3783_s17  ;;  %v964_v29 = vadd.f32 %v4158_v22, %v4402_v12  ;;  %v3451_v30 = vunpack.i.h.bf16 %v3449_v54  ;;  %v3450_v34 = vunpack.i.l.bf16 %v3449_v54 }
 0x188   : > { %v3672_v48 = vpack.i.bf16 %v2130_v43, %v2127_v44  ;;  %v956_v38 = vadd.f32 %v4402_v12, %v4161_v25  ;;  %v980_v44 = vadd.f32 %v4171_v36, %v4402_v12  ;;  %v2528_v19 = vsel %vm2525_vm2, %v961_v17, %v3445_v23 }
 0x189   : > { %3668 = vrot.lane.b32.xlu0 %v3667_v41, %s3783_s17  ;;  %v2529_v22 = vsel %vm2525_vm2, %v964_v29, %v3446_v21  ;;  %v2526_v49 = vsel %vm2525_vm2, %v953_v26, %v3450_v34 }
 0x18a   : > { %v4371_v33 = vpop.permute.xlu1 %3453  ;;  %v2527_v28 = vsel %vm2525_vm2, %v956_v38, %v3451_v30 }
 0x18b   : > { %3678 = vrot.lane.b32.xlu1 %v3677_v45, %s3784_s18  ;;  %v3456_v15 = vunpack.i.h.bf16 %v4371_v33  ;;  %v3455_v36 = vunpack.i.l.bf16 %v4371_v33 }
 0x18d   : > { %3673 = vrot.lane.b32.xlu0 %v3672_v48, %s3784_s18 }
 0x18e   : > { %v4373_v52 = vpop.permute.xlu1 %3458 }
 0x192   : > { %v4375_v56 = vpop.permute.xlu1 %3463 }
 0x194   : > { %v4377_v57 = vpop.permute.xlu0 %3468 }
 0x19a   : > { %v4379_v37 = vpop.permute.xlu1 %3473 }
 0x19c   : > { %v4381_v60 = vpop.permute.xlu0 %3478 }
 0x1a2   : > { %v4383_v62 = vpop.permute.xlu1 %3483 }
 0x1a4   : > { %v4385_v63 = vpop.permute.xlu0 %3488 }
 0x1aa   : > { %v4387_v1 = vpop.permute.xlu1 %3493 }
 0x1ac   : > { %v4389_v4 = vpop.permute.xlu0 %3498 }
 0x1b2   : > { %v4391_v5 = vpop.permute.xlu1 %3503 }
 0x1b4   : > { %v4395_v7 = vpop.permute.xlu0 %3508 }
 0x1ba   : > { %v4397_v9 = vpop.permute.xlu1 %3513 }
 0x1bc   : > { %v4404_v13 = vpop.permute.xlu0 %3518 }
 0x1c1   : > { %v3524_v24 = vpop.permute.xlu1 %3523 }
 0x1c2   : > { %v3526_v18 = vunpack.i.h.bf16 %v3524_v24  ;;  %v3525_v41 = vunpack.i.l.bf16 %v3524_v24 }
 0x1c3   : > { %v3534_v43 = vpop.permute.xlu0 %3533 }
 0x1c4   : > { %v3536_v45 = vunpack.i.h.bf16 %v3534_v43  ;;  %v3535_v48 = vunpack.i.l.bf16 %v3534_v43  ;;  %v2562_v6 = vsel %vm2558_vm3, %v2529_v22, %v3526_v18  ;;  %v2561_v17 = vsel %vm2558_vm3, %v2528_v19, %v3525_v41 }
 0x1c5   : > { %v3529_v25 = vpop.permute.xlu1 %3528  ;;  %v3461_v43 = vunpack.i.h.bf16 %v4373_v52  ;;  %v3460_v19 = vunpack.i.l.bf16 %v4373_v52  ;;  %v972_v52 = vadd.f32 %v4402_v12, %v4175_v39 }
 0x1c6   : > { %v3531_v54 = vunpack.i.h.bf16 %v3529_v25  ;;  %v3530_v24 = vunpack.i.l.bf16 %v3529_v25  ;;  %v2559_v33 = vsel %vm2558_vm3, %v2526_v49, %v3535_v48  ;;  %v2560_v34 = vsel %vm2558_vm3, %v2527_v28, %v3536_v45 }
 0x1c7   : > { %v3539_v23 = vpop.permute.xlu0 %3538  ;;  %v2531_v39 = vsel %vm2525_vm2, %v972_v52, %v3461_v43 }
 0x1c8   : > { %v2594_v21 = vsel %vm2591_vm4, %v2561_v17, %v3530_v24  ;;  %v2595_v26 = vsel %vm2591_vm4, %v2562_v6, %v3531_v54  ;;  %v3541_v29 = vunpack.i.h.bf16 %v3539_v23  ;;  %v3540_v30 = vunpack.i.l.bf16 %v3539_v23 }
 0x1c9   : > { %v3153_v38 = vpack.c.bf16 %v2594_v21, %v2594_v21  ;;  %v3154_v18 = vpack.c.bf16 %v2595_v26, %v2595_v26  ;;  %v3544_v41 = vpop.permute.xlu1 %3543  ;;  %v969_v54 = vadd.f32 %v4402_v12, %v4168_v32  ;;  %v993_v24 = vadd.f32 %v4178_v42, %v4402_v12 }
 0x1ca   : > { %v2592_v22 = vsel %vm2591_vm4, %v2559_v33, %v3540_v30  ;;  %v2593_v25 = vsel %vm2591_vm4, %v2560_v34, %v3541_v29  ;;  %v3546_v45 = vunpack.i.h.bf16 %v3544_v41  ;;  %v3545_v49 = vunpack.i.l.bf16 %v3544_v41 }
 0x1cb   : > { %2755 = vst.msk [vmem:[%s4432_s24 + $0x8] sm:$0xf] %vm2752_vm5, %v3153_v38  ;;  %2756 = vst.msk [vmem:[%s4432_s24 + $0xc] sm:$0xf] %vm2752_vm5, %v3154_v18  ;;  %v3151_v6 = vpack.c.bf16 %v2592_v22, %v2592_v22  ;;  %v3152_v48 = vpack.c.bf16 %v2593_v25, %v2593_v25  ;;  %v3554_v28 = vpop.permute.xlu0 %3553  ;;  %v996_v17 = vadd.f32 %v4185_v50, %v4402_v12  ;;  %v3466_v34 = vunpack.i.h.bf16 %v4375_v56 }
 0x1cc   : > { %v2532_v23 = vsel %vm2525_vm2, %v977_v16, %v3455_v36  ;;  %v2533_v21 = vsel %vm2525_vm2, %v980_v44, %v3456_v15  ;;  %v3556_v26 = vunpack.i.h.bf16 %v3554_v28  ;;  %v3555_v29 = vunpack.i.l.bf16 %v3554_v28 }
 0x1cd   : > { %2753 = vst.msk [vmem:[%s4432_s24] sm:$0xf] %vm2752_vm5, %v3151_v6  ;;  %2754 = vst.msk [vmem:[%s4432_s24 + $0x4] sm:$0xf] %vm2752_vm5, %v3152_v48  ;;  %v3549_v32 = vpop.permute.xlu1 %3548  ;;  %v2530_v30 = vsel %vm2525_vm2, %v969_v54, %v3460_v19  ;;  %v3465_v50 = vunpack.i.l.bf16 %v4375_v56  ;;  %v2566_v16 = vsel %vm2558_vm3, %v2533_v21, %v3546_v45  ;;  %v2565_v15 = vsel %vm2558_vm3, %v2532_v23, %v3545_v49 }
 0x1ce   : > { %v3551_v33 = vunpack.i.h.bf16 %v3549_v32  ;;  %v3550_v42 = vunpack.i.l.bf16 %v3549_v32  ;;  %v2563_v43 = vsel %vm2558_vm3, %v2530_v30, %v3555_v29  ;;  %v2564_v19 = vsel %vm2558_vm3, %v2531_v39, %v3556_v26 }
 0x1cf   : > { %v3559_v44 = vpop.permute.xlu0 %3558  ;;  %v3471_v6 = vunpack.i.h.bf16 %v4377_v57  ;;  %v3470_v48 = vunpack.i.l.bf16 %v4377_v57  ;;  %v985_v26 = vadd.f32 %v4402_v12, %v4182_v46  ;;  %v988_v57 = vadd.f32 %v4402_v12, %v4189_v53 }
 0x1d0   : > { %v2598_v36 = vsel %vm2591_vm4, %v2565_v15, %v3550_v42  ;;  %v2599_v38 = vsel %vm2591_vm4, %v2566_v16, %v3551_v33  ;;  %v3561_v18 = vunpack.i.h.bf16 %v3559_v44  ;;  %v3560_v41 = vunpack.i.l.bf16 %v3559_v44 }
 0x1d1   : > { %v3157_v22 = vpack.c.bf16 %v2598_v36, %v2598_v36  ;;  %v3158_v25 = vpack.c.bf16 %v2599_v38, %v2599_v38  ;;  %v3564_v56 = vpop.permute.xlu1 %3563  ;;  %v1009_v29 = vadd.f32 %v4193_v58, %v4402_v12  ;;  %v1012_v32 = vadd.f32 %v4200_v0, %v4402_v12 }
 0x1d2   : > { %v2596_v45 = vsel %vm2591_vm4, %v2563_v43, %v3560_v41  ;;  %v2597_v49 = vsel %vm2591_vm4, %v2564_v19, %v3561_v18  ;;  %v3566_v52 = vunpack.i.h.bf16 %v3564_v56  ;;  %v3565_v23 = vunpack.i.l.bf16 %v3564_v56 }
 0x1d3   : > { %2759 = vst.msk [vmem:[%s4432_s24 + $0x18] sm:$0xf] %vm2752_vm5, %v3157_v22  ;;  %2760 = vst.msk [vmem:[%s4432_s24 + $0x1c] sm:$0xf] %vm2752_vm5, %v3158_v25  ;;  %v3155_v28 = vpack.c.bf16 %v2596_v45, %v2596_v45  ;;  %v3156_v54 = vpack.c.bf16 %v2597_v49, %v2597_v49  ;;  %v3574_v21 = vpop.permute.xlu0 %3573  ;;  %v2536_v30 = vsel %vm2525_vm2, %v993_v24, %v3465_v50  ;;  %v3476_v44 = vunpack.i.h.bf16 %v4379_v37 }
 0x1d4   : > { %v2537_v39 = vsel %vm2525_vm2, %v996_v17, %v3466_v34  ;;  %v3576_v33 = vunpack.i.h.bf16 %v3574_v21  ;;  %v3575_v42 = vunpack.i.l.bf16 %v3574_v21  ;;  %v2534_v16 = vsel %vm2525_vm2, %v985_v26, %v3470_v48 }
 0x1d5   : > { %2757 = vst.msk [vmem:[%s4432_s24 + $0x10] sm:$0xf] %vm2752_vm5, %v3155_v28  ;;  %2758 = vst.msk [vmem:[%s4432_s24 + $0x14] sm:$0xf] %vm2752_vm5, %v3156_v54  ;;  %v3569_v46 = vpop.permute.xlu1 %3568  ;;  %v2535_v53 = vsel %vm2525_vm2, %v988_v57, %v3471_v6  ;;  %v3475_v0 = vunpack.i.l.bf16 %v4379_v37  ;;  %v2570_v24 = vsel %vm2558_vm3, %v2537_v39, %v3566_v52  ;;  %v2569_v17 = vsel %vm2558_vm3, %v2536_v30, %v3565_v23 }
 0x1d6   : > { %v3571_v15 = vunpack.i.h.bf16 %v3569_v46  ;;  %v3570_v58 = vunpack.i.l.bf16 %v3569_v46  ;;  %v2567_v41 = vsel %vm2558_vm3, %v2534_v16, %v3575_v42  ;;  %v2568_v43 = vsel %vm2558_vm3, %v2535_v53, %v3576_v33 }
 0x1d7   : > { %v3579_v34 = vpop.permute.xlu0 %3578  ;;  %v3481_v25 = vunpack.i.h.bf16 %v4381_v60  ;;  %v3480_v56 = vunpack.i.l.bf16 %v4381_v60  ;;  %v1001_v23 = vadd.f32 %v4402_v12, %v4196_v61  ;;  %v1004_v60 = vadd.f32 %v4402_v12, %v4203_v3 }
 0x1d8   : > { %v2602_v50 = vsel %vm2591_vm4, %v2569_v17, %v3570_v58  ;;  %v2603_v36 = vsel %vm2591_vm4, %v2570_v24, %v3571_v15  ;;  %v3581_v38 = vunpack.i.h.bf16 %v3579_v34  ;;  %v3580_v18 = vunpack.i.l.bf16 %v3579_v34 }
 0x1d9   : > { %v3161_v19 = vpack.c.bf16 %v2602_v50, %v2602_v50  ;;  %v3162_v22 = vpack.c.bf16 %v2603_v36, %v2603_v36  ;;  %v3584_v37 = vpop.permute.xlu1 %3583  ;;  %v1025_v21 = vadd.f32 %v4207_v8, %v4402_v12  ;;  %v1028_v26 = vadd.f32 %v4214_v14, %v4402_v12 }
 0x1da   : > { %v2600_v6 = vsel %vm2591_vm4, %v2567_v41, %v3580_v18  ;;  %v2601_v48 = vsel %vm2591_vm4, %v2568_v43, %v3581_v38  ;;  %v3586_v28 = vunpack.i.h.bf16 %v3584_v37  ;;  %v3585_v54 = vunpack.i.l.bf16 %v3584_v37 }
 0x1db   : > { %2763 = vst.msk [vmem:[%s4432_s24 + $0x28] sm:$0xf] %vm2752_vm5, %v3161_v19  ;;  %2764 = vst.msk [vmem:[%s4432_s24 + $0x2c] sm:$0xf] %vm2752_vm5, %v3162_v22  ;;  %v3159_v45 = vpack.c.bf16 %v2600_v6, %v2600_v6  ;;  %v3160_v49 = vpack.c.bf16 %v2601_v48, %v2601_v48  ;;  %v3594_v52 = vpop.permute.xlu0 %3593  ;;  %v2540_v57 = vsel %vm2525_vm2, %v1009_v29, %v3475_v0  ;;  %v3486_v16 = vunpack.i.h.bf16 %v4383_v62 }
 0x1dc   : > { %v2541_v30 = vsel %vm2525_vm2, %v1012_v32, %v3476_v44  ;;  %v3596_v39 = vunpack.i.h.bf16 %v3594_v52  ;;  %v3595_v33 = vunpack.i.l.bf16 %v3594_v52  ;;  %v2538_v42 = vsel %vm2525_vm2, %v1001_v23, %v3480_v56 }
 0x1dd   : > { %2761 = vst.msk [vmem:[%s4432_s24 + $0x20] sm:$0xf] %vm2752_vm5, %v3159_v45  ;;  %2762 = vst.msk [vmem:[%s4432_s24 + $0x24] sm:$0xf] %vm2752_vm5, %v3160_v49  ;;  %v3589_v61 = vpop.permute.xlu1 %3588  ;;  %v2539_v3 = vsel %vm2525_vm2, %v1004_v60, %v3481_v25  ;;  %v3485_v14 = vunpack.i.l.bf16 %v4383_v62  ;;  %v2574_v29 = vsel %vm2558_vm3, %v2541_v30, %v3586_v28  ;;  %v2573_v32 = vsel %vm2558_vm3, %v2540_v57, %v3585_v54 }
 0x1de   : > { %v3591_v46 = vunpack.i.h.bf16 %v3589_v61  ;;  %v3590_v8 = vunpack.i.l.bf16 %v3589_v61  ;;  %v2571_v24 = vsel %vm2558_vm3, %v2538_v42, %v3595_v33  ;;  %v2572_v17 = vsel %vm2558_vm3, %v2539_v3, %v3596_v39 }
 0x1df   : > { %v3599_v53 = vpop.permute.xlu0 %3598  ;;  %v3491_v36 = vunpack.i.h.bf16 %v4385_v63  ;;  %v3490_v38 = vunpack.i.l.bf16 %v4385_v63  ;;  %v1017_v56 = vadd.f32 %v4402_v12, %v4210_v11  ;;  %v1020_v63 = vadd.f32 %v4402_v12, %v4217_v20 }
 0x1e0   : > { %v2606_v15 = vsel %vm2591_vm4, %v2573_v32, %v3590_v8  ;;  %v2607_v58 = vsel %vm2591_vm4, %v2574_v29, %v3591_v46  ;;  %v3601_v44 = vunpack.i.h.bf16 %v3599_v53  ;;  %v3600_v0 = vunpack.i.l.bf16 %v3599_v53 }
 0x1e1   : > { %v3165_v34 = vpack.c.bf16 %v2606_v15, %v2606_v15  ;;  %v3166_v50 = vpack.c.bf16 %v2607_v58, %v2607_v58  ;;  %v3604_v62 = vpop.permute.xlu1 %3603  ;;  %v1041_v6 = vadd.f32 %v4221_v27, %v4402_v12  ;;  %v1044_v48 = vadd.f32 %v4228_v35, %v4402_v12 }
 0x1e2   : > { %v2604_v18 = vsel %vm2591_vm4, %v2571_v24, %v3600_v0  ;;  %v2605_v41 = vsel %vm2591_vm4, %v2572_v17, %v3601_v44  ;;  %v3606_v22 = vunpack.i.h.bf16 %v3604_v62  ;;  %v3605_v37 = vunpack.i.l.bf16 %v3604_v62 }
 0x1e3   : > { %2767 = vst.msk [vmem:[%s4432_s24 + $0x38] sm:$0xf] %vm2752_vm5, %v3165_v34  ;;  %2768 = vst.msk [vmem:[%s4432_s24 + $0x3c] sm:$0xf] %vm2752_vm5, %v3166_v50  ;;  %v3163_v43 = vpack.c.bf16 %v2604_v18, %v2604_v18  ;;  %v3164_v19 = vpack.c.bf16 %v2605_v41, %v2605_v41  ;;  %v3614_v25 = vpop.permute.xlu0 %3613  ;;  %v2544_v45 = vsel %vm2525_vm2, %v1025_v21, %v3485_v14  ;;  %v3496_v60 = vunpack.i.h.bf16 %v4387_v1 }
 0x1e4   : > { %v2545_v49 = vsel %vm2525_vm2, %v1028_v26, %v3486_v16  ;;  %v3616_v28 = vunpack.i.h.bf16 %v3614_v25  ;;  %v3615_v54 = vunpack.i.l.bf16 %v3614_v25  ;;  %v2542_v52 = vsel %vm2525_vm2, %v1017_v56, %v3490_v38 }
 0x1e5   : > { %2765 = vst.msk [vmem:[%s4432_s24 + $0x30] sm:$0xf] %vm2752_vm5, %v3163_v43  ;;  %2766 = vst.msk [vmem:[%s4432_s24 + $0x34] sm:$0xf] %vm2752_vm5, %v3164_v19  ;;  %v3609_v11 = vpop.permute.xlu1 %3608  ;;  %v2543_v20 = vsel %vm2525_vm2, %v1020_v63, %v3491_v36  ;;  %v3495_v35 = vunpack.i.l.bf16 %v4387_v1  ;;  %v2578_v21 = vsel %vm2558_vm3, %v2545_v49, %v3606_v22  ;;  %v2577_v26 = vsel %vm2558_vm3, %v2544_v45, %v3605_v37 }
 0x1e6   : > { %v3611_v23 = vunpack.i.h.bf16 %v3609_v11  ;;  %v3610_v27 = vunpack.i.l.bf16 %v3609_v11  ;;  %v2575_v42 = vsel %vm2558_vm3, %v2542_v52, %v3615_v54  ;;  %v2576_v3 = vsel %vm2558_vm3, %v2543_v20, %v3616_v28 }
 0x1e7   : > { %v3619_v57 = vpop.permute.xlu0 %3618  ;;  %v3501_v16 = vunpack.i.h.bf16 %v4389_v4  ;;  %v3500_v14 = vunpack.i.l.bf16 %v4389_v4  ;;  %v1033_v24 = vadd.f32 %v4402_v12, %v4224_v31  ;;  %v1036_v4 = vadd.f32 %v4402_v12, %v4231_v40 }
 0x1e8   : > { %v2610_v30 = vsel %vm2591_vm4, %v2577_v26, %v3610_v27  ;;  %v2611_v39 = vsel %vm2591_vm4, %v2578_v21, %v3611_v23  ;;  %v3621_v33 = vunpack.i.h.bf16 %v3619_v57  ;;  %v3620_v61 = vunpack.i.l.bf16 %v3619_v57 }
 0x1e9   : > { %v3169_v46 = vpack.c.bf16 %v2610_v30, %v2610_v30  ;;  %v3170_v8 = vpack.c.bf16 %v2611_v39, %v2611_v39  ;;  %v3624_v1 = vpop.permute.xlu1 %3623  ;;  %v1057_v17 = vadd.f32 %v4235_v47, %v4402_v12  ;;  %v1060_v34 = vadd.f32 %v4242_v55, %v4402_v12 }
 0x1ea   : > { %v2608_v29 = vsel %vm2591_vm4, %v2575_v42, %v3620_v61  ;;  %v2609_v32 = vsel %vm2591_vm4, %v2576_v3, %v3621_v33  ;;  %v3626_v58 = vunpack.i.h.bf16 %v3624_v1  ;;  %v3625_v44 = vunpack.i.l.bf16 %v3624_v1 }
 0x1eb   : > { %2771 = vst.msk [vmem:[%s4432_s24 + $0x48] sm:$0xf] %vm2752_vm5, %v3169_v46  ;;  %2772 = vst.msk [vmem:[%s4432_s24 + $0x4c] sm:$0xf] %vm2752_vm5, %v3170_v8  ;;  %v3167_v53 = vpack.c.bf16 %v2608_v29, %v2608_v29  ;;  %v3168_v15 = vpack.c.bf16 %v2609_v32, %v2609_v32  ;;  %v3634_v0 = vpop.permute.xlu0 %3633  ;;  %v2548_v50 = vsel %vm2525_vm2, %v1041_v6, %v3495_v35  ;;  %v3506_v43 = vunpack.i.h.bf16 %v4391_v5 }
 0x1ec   : > { %v2549_v62 = vsel %vm2525_vm2, %v1044_v48, %v3496_v60  ;;  %v3636_v36 = vunpack.i.h.bf16 %v3634_v0  ;;  %v3635_v38 = vunpack.i.l.bf16 %v3634_v0  ;;  %v2546_v18 = vsel %vm2525_vm2, %v1033_v24, %v3500_v14 }
 0x1ed   : > { %2769 = vst.msk [vmem:[%s4432_s24 + $0x40] sm:$0xf] %vm2752_vm5, %v3167_v53  ;;  %2770 = vst.msk [vmem:[%s4432_s24 + $0x44] sm:$0xf] %vm2752_vm5, %v3168_v15  ;;  %v3629_v31 = vpop.permute.xlu1 %3628  ;;  %v2547_v40 = vsel %vm2525_vm2, %v1036_v4, %v3501_v16  ;;  %v3505_v55 = vunpack.i.l.bf16 %v4391_v5  ;;  %v2582_v19 = vsel %vm2558_vm3, %v2549_v62, %v3626_v58  ;;  %v2581_v22 = vsel %vm2558_vm3, %v2548_v50, %v3625_v44 }
 0x1ee   : > { %v3631_v41 = vunpack.i.h.bf16 %v3629_v31  ;;  %v3630_v47 = vunpack.i.l.bf16 %v3629_v31  ;;  %v2579_v48 = vsel %vm2558_vm3, %v2546_v18, %v3635_v38  ;;  %v2580_v45 = vsel %vm2558_vm3, %v2547_v40, %v3636_v36 }
 0x1ef   : > { %v3639_v37 = vpop.permute.xlu0 %3638  ;;  %v3511_v54 = vunpack.i.h.bf16 %v4395_v7  ;;  %v3510_v11 = vunpack.i.l.bf16 %v4395_v7  ;;  %v1049_v26 = vadd.f32 %v4402_v12, %v4238_v51  ;;  %v1052_v57 = vadd.f32 %v4402_v12, %v4245_v59 }
 0x1f0   : > { %v2614_v25 = vsel %vm2591_vm4, %v2581_v22, %v3630_v47  ;;  %v2615_v56 = vsel %vm2591_vm4, %v2582_v19, %v3631_v41  ;;  %v3641_v63 = vunpack.i.h.bf16 %v3639_v37  ;;  %v3640_v6 = vunpack.i.l.bf16 %v3639_v37 }
 0x1f1   : > { %v3173_v49 = vpack.c.bf16 %v2614_v25, %v2614_v25  ;;  %v3174_v28 = vpack.c.bf16 %v2615_v56, %v2615_v56  ;;  %v3644_v5 = vpop.permute.xlu1 %3643  ;;  %v2552_v7 = vsel %vm2525_vm2, %v1057_v17, %v3505_v55  ;;  %v2553_v30 = vsel %vm2525_vm2, %v1060_v34, %v3506_v43  ;;  %v4683_v43 = vld [vmem:[#allocation4_spill] sm:$0xff] }
 0x1f2   : > { %v2612_v52 = vsel %vm2591_vm4, %v2579_v48, %v3640_v6  ;;  %v2613_v20 = vsel %vm2591_vm4, %v2580_v45, %v3641_v63  ;;  %v3646_v60 = vunpack.i.h.bf16 %v3644_v5  ;;  %v3645_v35 = vunpack.i.l.bf16 %v3644_v5 }
 0x1f3   : > { %2775 = vst.msk [vmem:[%s4432_s24 + $0x58] sm:$0xf] %vm2752_vm5, %v3173_v49  ;;  %2776 = vst.msk [vmem:[%s4432_s24 + $0x5c] sm:$0xf] %vm2752_vm5, %v3174_v28  ;;  %v3171_v23 = vpack.c.bf16 %v2612_v52, %v2612_v52  ;;  %v3172_v27 = vpack.c.bf16 %v2613_v20, %v2613_v20  ;;  %v3654_v21 = vpop.permute.xlu0 %3653  ;;  %v2550_v42 = vsel %vm2525_vm2, %v1049_v26, %v3510_v11  ;;  %v3516_v8 = vunpack.i.h.bf16 %v4397_v9 }
 0x1f4   : > { %v3656_v39 = vunpack.i.h.bf16 %v3654_v21  ;;  %v3655_v33 = vunpack.i.l.bf16 %v3654_v21  ;;  %v2551_v3 = vsel %vm2525_vm2, %v1052_v57, %v3511_v54  ;;  %v3515_v59 = vunpack.i.l.bf16 %v4397_v9 }
 0x1f5   : > { %2773 = vst.msk [vmem:[%s4432_s24 + $0x50] sm:$0xf] %vm2752_vm5, %v3171_v23  ;;  %2774 = vst.msk [vmem:[%s4432_s24 + $0x54] sm:$0xf] %vm2752_vm5, %v3172_v27  ;;  %v3649_v61 = vpop.permute.xlu1 %3648  ;;  %v2586_v1 = vsel %vm2558_vm3, %v2553_v30, %v3646_v60  ;;  %v2585_v16 = vsel %vm2558_vm3, %v2552_v7, %v3645_v35  ;;  %v3521_v4 = vunpack.i.h.bf16 %v4404_v13  ;;  %v3520_v17 = vunpack.i.l.bf16 %v4404_v13  ;;  %v4682_v13 = vld [vmem:[#allocation3_spill] sm:$0xff] }
 0x1f6   : > { %v3651_v46 = vunpack.i.h.bf16 %v3649_v61  ;;  %v3650_v51 = vunpack.i.l.bf16 %v3649_v61  ;;  %v2583_v58 = vsel %vm2558_vm3, %v2550_v42, %v3655_v33  ;;  %v2584_v44 = vsel %vm2558_vm3, %v2551_v3, %v3656_v39 }
 0x1f7   : > { %v3659_v14 = vpop.permute.xlu0 %3658  ;;  %v1073_v40 = vadd.f32 %v4249_v2, %v4402_v12  ;;  %v1076_v41 = vadd.f32 %v4256_v10, %v4402_v12  ;;  %v1065_v47 = vadd.f32 %v4402_v12, %v4682_v13  ;;  %v1068_v55 = vadd.f32 %v4402_v12, %v4683_v43 }
 0x1f8   : > { %v2618_v29 = vsel %vm2591_vm4, %v2585_v16, %v3650_v51  ;;  %v2619_v32 = vsel %vm2591_vm4, %v2586_v1, %v3651_v46  ;;  %v3661_v53 = vunpack.i.h.bf16 %v3659_v14  ;;  %v3660_v15 = vunpack.i.l.bf16 %v3659_v14 }
 0x1f9   : > { %v3177_v0 = vpack.c.bf16 %v2618_v29, %v2618_v29  ;;  %v3178_v24 = vpack.c.bf16 %v2619_v32, %v2619_v32  ;;  %v3664_v9 = vpop.permute.xlu1 %3663  ;;  %v2556_v25 = vsel %vm2525_vm2, %v1073_v40, %v3515_v59  ;;  %v2557_v2 = vsel %vm2525_vm2, %v1076_v41, %v3516_v8 }
 0x1fa   : > { %v2616_v34 = vsel %vm2591_vm4, %v2583_v58, %v3660_v15  ;;  %v2617_v50 = vsel %vm2591_vm4, %v2584_v44, %v3661_v53  ;;  %v3666_v38 = vunpack.i.h.bf16 %v3664_v9  ;;  %v3665_v31 = vunpack.i.l.bf16 %v3664_v9 }
 0x1fb   : > { %2779 = vst.msk [vmem:[%s4432_s24 + $0x68] sm:$0xf] %vm2752_vm5, %v3177_v0  ;;  %2780 = vst.msk [vmem:[%s4432_s24 + $0x6c] sm:$0xf] %vm2752_vm5, %v3178_v24  ;;  %v3175_v62 = vpack.c.bf16 %v2616_v34, %v2616_v34  ;;  %v3176_v36 = vpack.c.bf16 %v2617_v50, %v2617_v50  ;;  %v3669_v18 = vpop.permute.xlu0 %3668  ;;  %v2554_v10 = vsel %vm2525_vm2, %v1065_v47, %v3520_v17 }
 0x1fc   : > { %v3671_v19 = vunpack.i.h.bf16 %v3669_v18  ;;  %v3670_v22 = vunpack.i.l.bf16 %v3669_v18  ;;  %v2555_v6 = vsel %vm2525_vm2, %v1068_v55, %v3521_v4  ;;  %v2590_v12 = vsel %vm2558_vm3, %v2557_v2, %v3666_v38 }
 0x1fd   : > { %2777 = vst.msk [vmem:[%s4432_s24 + $0x60] sm:$0xf] %vm2752_vm5, %v3175_v62  ;;  %2778 = vst.msk [vmem:[%s4432_s24 + $0x64] sm:$0xf] %vm2752_vm5, %v3176_v36  ;;  %v3679_v37 = vpop.permute.xlu1 %3678  ;;  %v2589_v48 = vsel %vm2558_vm3, %v2556_v25, %v3665_v31 }
 0x1fe   : > { %v3681_v56 = vunpack.i.h.bf16 %v3679_v37  ;;  %v3680_v63 = vunpack.i.l.bf16 %v3679_v37  ;;  %v2587_v11 = vsel %vm2558_vm3, %v2554_v10, %v3670_v22  ;;  %v2588_v52 = vsel %vm2558_vm3, %v2555_v6, %v3671_v19 }
 0x1ff   : > { %v3674_v45 = vpop.permute.xlu0 %3673 }
 0x200   : > { %v2622_v49 = vsel %vm2591_vm4, %v2589_v48, %v3680_v63  ;;  %v2623_v28 = vsel %vm2591_vm4, %v2590_v12, %v3681_v56  ;;  %v3676_v5 = vunpack.i.h.bf16 %v3674_v45  ;;  %v3675_v54 = vunpack.i.l.bf16 %v3674_v45 }
 0x201   : > { %v3181_v20 = vpack.c.bf16 %v2622_v49, %v2622_v49  ;;  %v3182_v23 = vpack.c.bf16 %v2623_v28, %v2623_v28 }
 0x202   : > { %v2620_v27 = vsel %vm2591_vm4, %v2587_v11, %v3675_v54  ;;  %v2621_v60 = vsel %vm2591_vm4, %v2588_v52, %v3676_v5 }
 0x203   : > { %2783 = vst.msk [vmem:[%s4432_s24 + $0x78] sm:$0xf] %vm2752_vm5, %v3181_v20  ;;  %2784 = vst.msk [vmem:[%s4432_s24 + $0x7c] sm:$0xf] %vm2752_vm5, %v3182_v23  ;;  %v3179_v35 = vpack.c.bf16 %v2620_v27, %v2620_v27  ;;  %v3180_v21 = vpack.c.bf16 %v2621_v60, %v2621_v60 }
 0x205   : > { %2781 = vst.msk [vmem:[%s4432_s24 + $0x70] sm:$0xf] %vm2752_vm5, %v3179_v35  ;;  %2782 = vst.msk [vmem:[%s4432_s24 + $0x74] sm:$0xf] %vm2752_vm5, %v3180_v21 }
 0x206 PF: > { %p10_p9 = scmp.ge.s32.totalorder %s3822_s16, 4   ;;  %s4684_s12 = smov %s3776_s13 }
 0x207   : > { %s4685_s13 = smov %s3831_s19  ;;  %s4686_s14 = smov %s3822_s16 }
 0x208   :  { %12 = sbr.rel (!%p10_p9) target bundleno = 2 (0x2), region = 117 }

// kernel: aspp_block_forward.8
= control target key start
LH: loop header
LB: loop body
LE: loop exit
PB: predicated region body
PF: predicated region fallthrough
CT: control target
= control target key end

     0   :  { %s1184_s15 = smov 0   ;;  %s1186_s16 = smov 0   ;;  %s1278_s0 = inlined_call_operand.vmem [shape: f32[32,16], index: 0, kind: input, shape index: {}]   ;;  %s1279_s1 = inlined_call_operand.vmem [shape: f32[2,16,128], index: 1, kind: input, shape index: {}]   ;;  %s1280_s2 = inlined_call_operand.vmem [shape: f32[1,128], index: 2, kind: input, shape index: {}]   ;;  %s1281_s3 = inlined_call_operand.vmem [shape: f32[1,128], index: 3, kind: input, shape index: {}]   ;;  %s1282_s4 = inlined_call_operand.vmem [shape: f32[2,32,128], index: 4, kind: output, shape index: {}]  }
   0x1   :  { %s1188_s17 = smov 0  }
   0x2 LB: > { %s26_s18 = sadd.s32 1, %s1153_s16  ;;  %p1004_p0 = scmp.ge.s32.totalorder %s1157_s17, 1  ;;  %s1157_s17 = sphi %s1188_s17, %s14_s17   ;;  %s1153_s16 = sphi %s1186_s16, %s1284_s16   ;;  %s1149_s15 = sphi %s1184_s15, %s1283_s15  }
   0x3   : > { %p28_p1 = scmp.ge.s32.totalorder %s26_s18, 2  ;;  %p197_p2 = scmp.lt.s32.totalorder %s1157_s17, 3 }
   0x5   : > { %s1286_s18 = smov (%p28_p1, %s26_s18), 0  ;;  %p198_p3 = pnand %p1004_p0, %p197_p2 }
   0x6   : > { %p235_p4 = scmp.lt.s32.totalorder (!%p198_p3), %s1149_s15, 1 }
   0x7   : > { %201 = sbr.rel (%p198_p3) target bundleno = 254 (0xfe), region = 36 }
   0xc   : > { %v257_v0 = vld [vmem:[%s1278_s0] sm:$0xff]  ;;  %vm263_vm0 = vcmask 130048   ;;  %v258_v1 = vld [vmem:[%s1278_s0 + $0x8] sm:$0xff]  ;;  %v259_v2 = vld [vmem:[%s1278_s0 + $0x10] sm:$0xff]  ;;  %s1288_s15 = smov (!%p235_p4, %s1149_s15), 1 }
   0xd   : > { %v265_v3 = vsel %vm263_vm0, %v257_v0, 0  ;;  %v268_v4 = vsel %vm263_vm0, %v258_v1, 0  ;;  %v271_v5 = vsel %vm263_vm0, %v259_v2, 0  ;;  %v260_v6 = vld [vmem:[%s1278_s0 + $0x18] sm:$0xff]  ;;  %s1013_s27 = sshll.u32 %s1288_s15, 4  ;;  %s1014_s7 = sshll.u32 %s1288_s15, 5 }
   0xe   : > { %v1216_v7 = vand.u32 4294901760, %v265_v3  ;;  %v1218_v8 = vand.u32 4294901760, %v268_v4  ;;  %v1220_v9 = vand.u32 4294901760, %v271_v5  ;;  %v274_v10 = vsel %vm263_vm0, %v260_v6, 0  ;;  %s242_s30 = scalar_lea.vmem %s1279_s1, %s1013_s27  ;;  %s256_s12 = scalar_lea.vmem %s1282_s4, %s1014_s7 }
   0xf   : > { %v1222_v11 = vand.u32 4294901760, %v274_v10  ;;  %v262_v16 = vld [vmem:[%s242_s30 + $0x8] sm:$0xff]  ;;  %v261_v17 = vld [vmem:[%s242_s30] sm:$0xff] }
  0x10   : > { %v344_v12 = vsub.f32 %v265_v3, %v1216_v7  ;;  %v1227_v13 = vsub.f32 %v268_v4, %v1218_v8  ;;  %v1230_v14 = vsub.f32 %v271_v5, %v1220_v9  ;;  %1065 = vmatprep.mubr.f32.mxu1 %v1216_v7  ;;  %v305_v21 = vand.u32 4294901760, %v262_v16 }
  0x11   : > { %v1237_v15 = vsub.f32 %v274_v10, %v1222_v11  ;;  %v308_v22 = vand.u32 4294901760, %v261_v17 }
  0x12   : > { %v345_v18 = vand.u32 4294901760, %v344_v12  ;;  %v355_v19 = vand.u32 4294901760, %v1227_v13  ;;  %v365_v20 = vand.u32 4294901760, %v1230_v14  ;;  %1051 = vmatprep.subr.mxu0 %v305_v21  ;;  %v413_v27 = vsub.f32 %v262_v16, %v305_v21 }
  0x13   : > { %v375_v23 = vand.u32 4294901760, %v1237_v15  ;;  %v420_v29 = vsub.f32 %v261_v17, %v308_v22  ;;  %1052 = vmatpush3.msra.mxu0 %v305_v21 }
  0x14   : > { %v346_v24 = vsub.f32 %v344_v12, %v345_v18  ;;  %v356_v25 = vsub.f32 %v1227_v13, %v355_v19  ;;  %v366_v26 = vsub.f32 %v1230_v14, %v365_v20  ;;  %1053 = vmatprep.subr.mxu0 %v308_v22  ;;  %v414_v33 = vand.u32 4294901760, %v413_v27 }
  0x15   : > { %v376_v28 = vsub.f32 %v1237_v15, %v375_v23  ;;  %v421_v34 = vand.u32 4294901760, %v420_v29  ;;  %1054 = vmatpush3.msra.mxu0 %v308_v22 }
  0x16   : > { %v347_v30 = vand.u32 4294901760, %v346_v24  ;;  %v357_v31 = vand.u32 4294901760, %v356_v25  ;;  %v367_v32 = vand.u32 4294901760, %v366_v26  ;;  %v415_v35 = vsub.f32 %v413_v27, %v414_v33  ;;  %1071 = vmatprep.subr.mxu0 %v413_v27 }
  0x17   : > { %v377_v36 = vand.u32 4294901760, %v376_v28  ;;  %v422_v37 = vsub.f32 %v420_v29, %v421_v34 }
  0x18   : > { %1055 = vmatprep.mubr.f32.mxu0 %v347_v30  ;;  %v416_v38 = vand.u32 4294901760, %v415_v35 }
  0x19   : > { %1056 = vmatmul.mubr.f32.vlgmr.msra.gmra.mxu0 %v357_v31  ;;  %v423_v39 = vand.u32 4294901760, %v422_v37 }
  0x1a   : > { %1058 = vmatprep.mubr.f32.mxu0 %v367_v32  ;;  %1072 = vmatpush3.msra.mxu0 %v413_v27 }
  0x1b   : > { %1073 = vmatprep.subr.mxu0 %v420_v29  ;;  %1061 = vmatprep.subr.mxu1 %v416_v38 }
  0x1c   : > { %1074 = vmatpush3.msra.mxu0 %v420_v29  ;;  %1062 = vmatpush3.msra.mxu1 %v416_v38 }
  0x1d   : > { %1059 = vmatmul.mubr.f32.gmra.mxu0 %v377_v36  ;;  %1063 = vmatprep.subr.mxu1 %v423_v39 }
  0x1e   : > { %1075 = vmatprep.mubr.f32.mxu0 %v344_v12  ;;  %1091 = vmatprep.subr.mxu0 %v414_v33 }
  0x1f   : > { %1064 = vmatpush3.msra.mxu1 %v423_v39 }
  0x20   : > { %1066 = vmatmul.mubr.f32.vlgmr.msra.gmra.mxu1 %v1218_v8  ;;  %1081 = vmatprep.subr.mxu1 %v305_v21 }
  0x21   : > { %1082 = vmatpush3.msra.mxu1 %v305_v21  ;;  %1076 = vmatmul.mubr.f32.vlgmr.msra.gmra.mxu0 %v1227_v13  ;;  %v1010_v13 = vld [vmem:[%s1281_s3] ss:$0 sm:$0xff] }
  0x22   : > { %1068 = vmatprep.mubr.f32.mxu1 %v1220_v9  ;;  %1083 = vmatprep.subr.mxu1 %v308_v22 }
  0x23   : > { %1078 = vmatprep.mubr.f32.mxu0 %v1230_v14  ;;  %1084 = vmatpush3.msra.mxu1 %v308_v22 }
  0x24   : > { %1069 = vmatmul.mubr.f32.gmra.mxu1 %v1222_v11  ;;  %1092 = vmatpush3.msra.mxu0 %v414_v33 }
  0x25   : > { %1079 = vmatmul.mubr.f32.gmra.mxu0 %v1237_v15  ;;  %1085 = vmatprep.mubr.f32.mxu1 %v345_v18 }
  0x26   : > { %1093 = vmatprep.subr.mxu0 %v421_v34  ;;  %1101 = vmatprep.subr.mxu1 %v305_v21 }
  0x27   : > { %1094 = vmatpush3.msra.mxu0 %v421_v34  ;;  %1095 = vmatprep.mubr.f32.mxu0 %v1216_v7 }
  0x28   : > { %1086 = vmatmul.mubr.f32.vlgmr.msra.gmra.mxu1 %v355_v19 }
  0x29   : > { %1102 = vmatpush3.msra.mxu1 %v305_v21  ;;  %1096 = vmatmul.mubr.f32.vlgmr.msra.gmra.mxu0 %v1218_v8 }
  0x2a   : > { %1088 = vmatprep.mubr.f32.mxu1 %v365_v20  ;;  %1103 = vmatprep.subr.mxu1 %v308_v22 }
  0x2b   : > { %1098 = vmatprep.mubr.f32.mxu0 %v1220_v9  ;;  %1104 = vmatpush3.msra.mxu1 %v308_v22 }
  0x2c   : > { %1089 = vmatmul.mubr.f32.gmra.mxu1 %v375_v23 }
  0x2d   : > { %1099 = vmatmul.mubr.f32.gmra.mxu0 %v1222_v11  ;;  %1105 = vmatprep.mubr.f32.mxu1 %v1216_v7 }
  0x30   : > { %1106 = vmatmul.mubr.f32.vlgmr.msra.gmra.mxu1 %v1218_v8  ;;  %v1009_v8 = vld [vmem:[%s1280_s2] ss:$0 sm:$0xff] }
  0x31   : > { %1108 = vmatprep.mubr.f32.mxu1 %v1220_v9 }
  0x34   : > { %1109 = vmatmul.mubr.f32.gmra.mxu1 %v1222_v11 }
  0xd9   : > { %v1057_v40 = vpop.f32.mrf.mxu0 }
  0xdb   : > { %v349_v41 = vpop.f32.mrf.mxu0 }
  0xdd   : > { %v1060_v42 = vpop.f32.mrf.mxu0 }
  0xdf   : > { %v369_v43 = vpop.f32.mrf.mxu0 }
  0xe0   : > { %v1067_v44 = vpop.f32.mrf.mxu1 }
  0xe1   : > { %v1077_v45 = vpop.f32.mrf.mxu0  ;;  %v467_v49 = vadd.f32 %v1067_v44, %v1057_v40 }
  0xe2   : > { %v460_v46 = vpop.f32.mrf.mxu1 }
  0xe3   : > { %v554_v47 = vpop.f32.mrf.mxu0  ;;  %v461_v52 = vadd.f32 %v460_v46, %v349_v41  ;;  %v562_v55 = vadd.f32 %v1077_v45, %v467_v49 }
  0xe4   : > { %v1070_v48 = vpop.f32.mrf.mxu1 }
  0xe5   : > { %v1080_v50 = vpop.f32.mrf.mxu0  ;;  %v479_v56 = vadd.f32 %v1070_v48, %v1060_v42  ;;  %v555_v59 = vadd.f32 %v554_v47, %v461_v52 }
  0xe6   : > { %v472_v51 = vpop.f32.mrf.mxu1 }
  0xe7   : > { %v568_v53 = vpop.f32.mrf.mxu0  ;;  %v473_v60 = vadd.f32 %v472_v51, %v369_v43  ;;  %v576_v0 = vadd.f32 %v1080_v50, %v479_v56 }
  0xe8   : > { %v1087_v54 = vpop.f32.mrf.mxu1 }
  0xe9   : > { %v1097_v57 = vpop.f32.mrf.mxu0  ;;  %v659_v61 = vadd.f32 %v1087_v54, %v562_v55  ;;  %v569_v4 = vadd.f32 %v568_v53, %v473_v60 }
  0xea   : > { %v650_v58 = vpop.f32.mrf.mxu1 }
  0xeb   : > { %v751_v62 = vpop.f32.mrf.mxu0  ;;  %v651_v1 = vadd.f32 %v650_v58, %v555_v59  ;;  %v758_v5 = vadd.f32 %v1097_v57, %v659_v61 }
  0xec   : > { %v1090_v63 = vpop.f32.mrf.mxu1 }
  0xed   : > { %v1100_v3 = vpop.f32.mrf.mxu0  ;;  %v675_v6 = vadd.f32 %v1090_v63, %v576_v0  ;;  %v752_v9 = vadd.f32 %v751_v62, %v651_v1 }
  0xee   : > { %v666_v2 = vpop.f32.mrf.mxu1 }
  0xef   : > { %v667_v10 = vadd.f32 %v666_v2, %v569_v4  ;;  %v763_v12 = vpop.f32.mrf.mxu0  ;;  %v770_v15 = vadd.f32 %v1100_v3, %v675_v6 }
  0xf0   : > { %v1107_v7 = vpop.f32.mrf.mxu1 }
  0xf1   : > { %v849_v11 = vadd.f32 %v1107_v7, %v758_v5  ;;  %v764_v19 = vadd.f32 %v763_v12, %v667_v10 }
  0xf2   : > { %v842_v14 = vpop.f32.mrf.mxu1 }
  0xf3   : > { %v872_v16 = vmul.f32 %v1009_v8, %v849_v11  ;;  %v843_v17 = vadd.f32 %v842_v14, %v752_v9 }
  0xf4   : > { %v1110_v18 = vpop.f32.mrf.mxu1 }
  0xf5   : > { %v883_v20 = vadd.f32 %v1010_v13, %v872_v16  ;;  %v871_v21 = vmul.f32 %v1009_v8, %v843_v17  ;;  %v861_v22 = vadd.f32 %v1110_v18, %v770_v15 }
  0xf6   : > { %v854_v23 = vpop.f32.mrf.mxu1 }
  0xf7   : > { %887 = vst [vmem:[%s256_s12 + $0x8] sm:$0xff] %v883_v20  ;;  %v882_v24 = vadd.f32 %v1010_v13, %v871_v21  ;;  %v874_v25 = vmul.f32 %v1009_v8, %v861_v22  ;;  %v855_v26 = vadd.f32 %v854_v23, %v764_v19 }
  0xf9   : > { %886 = vst [vmem:[%s256_s12] sm:$0xff] %v882_v24  ;;  %v885_v27 = vadd.f32 %v1010_v13, %v874_v25  ;;  %v873_v28 = vmul.f32 %v1009_v8, %v855_v26 }
  0xfb   : > { %889 = vst [vmem:[%s256_s12 + $0x18] sm:$0xff] %v885_v27  ;;  %v884_v29 = vadd.f32 %v1010_v13, %v873_v28 }
  0xfd   : > { %888 = vst [vmem:[%s256_s12 + $0x10] sm:$0xff] %v884_v29 }
  0xfe PF: > { %s14_s17 = sadd.s32 1, %s1157_s17   ;;  %s1283_s15 = smov %s1153_s16 }
  0xff   : > { %p11_p5 = scmp.ge.s32.totalorder %s14_s17, 4   ;;  %s1284_s16 = smov %s1286_s18 }
 0x101   :  { %13 = sbr.rel (!%p11_p5) target bundleno = 2 (0x2), region = 72 }

// kernel: aspp_block_forward.9
= control target key start
LH: loop header
LB: loop body
LE: loop exit
PB: predicated region body
PF: predicated region fallthrough
CT: control target
= control target key end

     0   :  { %s12058_s9 = smov 0   ;;  %s13392_s0 = inlined_call_operand.vmem [shape: f32[32,16], index: 0, kind: input, shape index: {}]   ;;  %s13393_s1 = inlined_call_operand.vmem [shape: f32[64,16,8], index: 1, kind: input, shape index: {}]   ;;  %s13394_s2 = inlined_call_operand.vmem [shape: bf16[64,32,8], index: 2, kind: output, shape index: {}]  }
   0x1 LB: > { %s10258_s10 = sadd.s32 4294967295, %s12041_s9   ;;  %p10262_p0 = scmp.ge.s32.totalorder %s12041_s9, 1  ;;  %s12041_s9 = sphi %s12058_s9, %s12_s9  }
   0x2   : > { %p114_p1 = scmp.lt.s32.totalorder %s12041_s9, 5 }
   0x4   : > { %p115_p2 = pnand %p10262_p0, %p114_p1 }
   0x5   : > { %s10263_s11 = sshll.u32 (!%p115_p2), %s10258_s10, 4 }
   0x6   : > { %118 = sbr.rel (%p115_p2) target bundleno = 611 (0x263), region = 28  ;;  %p139_p3 = scmp.lt.s32.totalorder (!%p115_p2), %s10263_s11, 63 }
   0xb   : > { %v152_v0 = vld [vmem:[%s13392_s0] sm:$0xff]  ;;  %vm158_vm0 = vcmask 130048   ;;  %v153_v1 = vld [vmem:[%s13392_s0 + $0x8] sm:$0xff]  ;;  %v154_v2 = vld [vmem:[%s13392_s0 + $0x10] sm:$0xff]  ;;  %s13396_s11 = smov (!%p139_p3, %s10263_s11), 63  ;;  %vm775_vm1 = vcmask 60416  }
   0xc   : > { %v160_v3 = vsel %vm158_vm0, %v152_v0, 0  ;;  %v163_v4 = vsel %vm158_vm0, %v153_v1, 0  ;;  %v166_v5 = vsel %vm158_vm0, %v154_v2, 0  ;;  %v155_v6 = vld [vmem:[%s13392_s0 + $0x18] sm:$0xff]  ;;  %s10425_s20 = sshll.u32 %s13396_s11, 4 }
   0xd   : > { %v12081_v7 = vand.u32 4294901760, %v160_v3  ;;  %v12083_v8 = vand.u32 4294901760, %v163_v4  ;;  %v12085_v9 = vand.u32 4294901760, %v166_v5  ;;  %v169_v10 = vsel %vm158_vm0, %v155_v6, 0  ;;  %s12111_s23 = scalar_lea.vmem %s13393_s1, %s10425_s20  ;;  %s12691_s6 = scalar_lea.vmem %s13394_s2, %s10425_s20 }
   0xe   : > { %v12090_v11 = vand.u32 4294901760, %v169_v10  ;;  %v157_v19 = vld [vmem:[%s12111_s23 + $0x8] sm:$0xff]  ;;  %v156_v20 = vld [vmem:[%s12111_s23] sm:$0xff]  ;;  %v10274_v35 = vld [vmem:[%s12111_s23 + $0x18] sm:$0xff] }
   0xf   : > { %v12093_v12 = vsub.f32 %v160_v3, %v12081_v7  ;;  %v12096_v13 = vsub.f32 %v163_v4, %v12083_v8  ;;  %v12099_v14 = vsub.f32 %v166_v5, %v12085_v9  ;;  %11081 = vmatprep.mubr.f32.mxu1 %v12081_v7  ;;  %v200_v22 = vand.u32 4294901760, %v157_v19  ;;  %v10273_v42 = vld [vmem:[%s12111_s23 + $0x10] sm:$0xff]  ;;  %v10284_v52 = vld [vmem:[%s12111_s23 + $0x28] sm:$0xff]  ;;  %v10283_v54 = vld [vmem:[%s12111_s23 + $0x20] sm:$0xff] }
  0x10   : > { %v12104_v15 = vsub.f32 %v169_v10, %v12090_v11  ;;  %v12127_v23 = vand.u32 4294901760, %v156_v20  ;;  %v12152_v41 = vand.u32 4294901760, %v10274_v35  ;;  %v12157_v43 = vand.u32 4294901760, %v10273_v42  ;;  %v10294_v0 = vld [vmem:[%s12111_s23 + $0x38] sm:$0xff]  ;;  %v10293_v2 = vld [vmem:[%s12111_s23 + $0x30] sm:$0xff] }
  0x11   : > { %v12114_v16 = vand.u32 4294901760, %v12093_v12  ;;  %v12117_v17 = vand.u32 4294901760, %v12096_v13  ;;  %v12120_v18 = vand.u32 4294901760, %v12099_v14  ;;  %11067 = vmatprep.subr.mxu0 %v200_v22  ;;  %v308_v30 = vsub.f32 %v157_v19, %v200_v22 }
  0x12   : > { %v12125_v21 = vand.u32 4294901760, %v12104_v15  ;;  %v315_v31 = vsub.f32 %v156_v20, %v12127_v23  ;;  %11068 = vmatpush3.msra.mxu0 %v200_v22  ;;  %v936_v44 = vsub.f32 %v10274_v35, %v12152_v41  ;;  %v943_v46 = vsub.f32 %v10273_v42, %v12157_v43  ;;  %v10313_v42 = vld [vmem:[%s12111_s23 + $0x50] sm:$0xff] }
  0x13   : > { %v241_v24 = vsub.f32 %v12093_v12, %v12114_v16  ;;  %v251_v25 = vsub.f32 %v12096_v13, %v12117_v17  ;;  %v261_v26 = vsub.f32 %v12099_v14, %v12120_v18  ;;  %11069 = vmatprep.subr.mxu0 %v12127_v23  ;;  %v309_v33 = vand.u32 4294901760, %v308_v30 }
  0x14   : > { %v271_v27 = vsub.f32 %v12104_v15, %v12125_v21  ;;  %v316_v34 = vand.u32 4294901760, %v315_v31  ;;  %11070 = vmatpush3.msra.mxu0 %v12127_v23  ;;  %v12164_v45 = vand.u32 4294901760, %v936_v44  ;;  %v944_v48 = vand.u32 4294901760, %v943_v46 }
  0x15   : > { %v12137_v28 = vand.u32 4294901760, %v241_v24  ;;  %v12139_v29 = vand.u32 4294901760, %v251_v25  ;;  %v12142_v32 = vand.u32 4294901760, %v261_v26  ;;  %v310_v36 = vsub.f32 %v308_v30, %v309_v33  ;;  %11087 = vmatprep.subr.mxu0 %v308_v30  ;;  %v10304_v24 = vld [vmem:[%s12111_s23 + $0x48] sm:$0xff]  ;;  %v10303_v26 = vld [vmem:[%s12111_s23 + $0x40] sm:$0xff] }
  0x16   : > { %v12149_v37 = vand.u32 4294901760, %v271_v27  ;;  %v317_v38 = vsub.f32 %v315_v31, %v316_v34  ;;  %v938_v47 = vsub.f32 %v936_v44, %v12164_v45  ;;  %v945_v50 = vsub.f32 %v943_v46, %v944_v48 }
  0x17   : > { %11071 = vmatprep.mubr.f32.mxu0 %v12137_v28  ;;  %v311_v39 = vand.u32 4294901760, %v310_v36  ;;  %v12192_v53 = vand.u32 4294901760, %v10284_v52  ;;  %v12200_v55 = vand.u32 4294901760, %v10283_v54  ;;  %v12241_v1 = vand.u32 4294901760, %v10294_v0 }
  0x18   : > { %11072 = vmatmul.mubr.f32.vlgmr.msra.gmra.mxu0 %v12139_v29  ;;  %v318_v40 = vand.u32 4294901760, %v317_v38  ;;  %v939_v49 = vand.u32 4294901760, %v938_v47  ;;  %v946_v51 = vand.u32 4294901760, %v945_v50  ;;  %v12249_v3 = vand.u32 4294901760, %v10293_v2 }
  0x19   : > { %11074 = vmatprep.mubr.f32.mxu0 %v12142_v32  ;;  %11088 = vmatpush3.msra.mxu0 %v308_v30  ;;  %v1564_v56 = vsub.f32 %v10284_v52, %v12192_v53  ;;  %v1571_v58 = vsub.f32 %v10283_v54, %v12200_v55  ;;  %v2192_v4 = vsub.f32 %v10294_v0, %v12241_v1  ;;  %v12290_v25 = vand.u32 4294901760, %v10304_v24  ;;  %v3921_v54 = vld [vmem:[%s13392_s0 + $0x8] sm:$0xff] }
  0x1a   : > { %11089 = vmatprep.subr.mxu0 %v315_v31  ;;  %11077 = vmatprep.subr.mxu1 %v311_v39  ;;  %v2199_v6 = vsub.f32 %v10293_v2, %v12249_v3  ;;  %v12298_v27 = vand.u32 4294901760, %v10303_v26 }
  0x1b   : > { %11090 = vmatpush3.msra.mxu0 %v315_v31  ;;  %11078 = vmatpush3.msra.mxu1 %v311_v39  ;;  %v12210_v57 = vand.u32 4294901760, %v1564_v56  ;;  %v1572_v60 = vand.u32 4294901760, %v1571_v58  ;;  %v12259_v5 = vand.u32 4294901760, %v2192_v4  ;;  %v2820_v30 = vsub.f32 %v10304_v24, %v12290_v25 }
  0x1c   : > { %11075 = vmatmul.mubr.f32.gmra.mxu0 %v12149_v37  ;;  %11079 = vmatprep.subr.mxu1 %v318_v40  ;;  %v2200_v19 = vand.u32 4294901760, %v2199_v6 }
  0x1d   : > { %11091 = vmatprep.mubr.f32.mxu0 %v12093_v12  ;;  %11107 = vmatprep.subr.mxu0 %v309_v33  ;;  %v1566_v59 = vsub.f32 %v1564_v56, %v12210_v57  ;;  %v1573_v62 = vsub.f32 %v1571_v58, %v1572_v60  ;;  %v2194_v10 = vsub.f32 %v2192_v4, %v12259_v5  ;;  %v12308_v31 = vand.u32 4294901760, %v2820_v30 }
  0x1e   : > { %11080 = vmatpush3.msra.mxu1 %v318_v40  ;;  %v10314_v40 = vld [vmem:[%s12111_s23 + $0x58] sm:$0xff] }
  0x1f   : > { %11082 = vmatmul.mubr.f32.vlgmr.msra.gmra.mxu1 %v12083_v8  ;;  %11097 = vmatprep.subr.mxu1 %v200_v22  ;;  %v1567_v61 = vand.u32 4294901760, %v1566_v59  ;;  %v1574_v63 = vand.u32 4294901760, %v1573_v62  ;;  %v2195_v20 = vand.u32 4294901760, %v2194_v10 }
  0x20   : > { %11098 = vmatpush3.msra.mxu1 %v200_v22  ;;  %11092 = vmatmul.mubr.f32.vlgmr.msra.gmra.mxu0 %v12096_v13 }
  0x21   : > { %11084 = vmatprep.mubr.f32.mxu1 %v12085_v9  ;;  %11099 = vmatprep.subr.mxu1 %v12127_v23 }
  0x22   : > { %11094 = vmatprep.mubr.f32.mxu0 %v12099_v14  ;;  %11100 = vmatpush3.msra.mxu1 %v12127_v23 }
  0x23   : > { %11085 = vmatmul.mubr.f32.gmra.mxu1 %v12090_v11  ;;  %11108 = vmatpush3.msra.mxu0 %v309_v33  ;;  %v2827_v33 = vsub.f32 %v10303_v26, %v12298_v27 }
  0x24   : > { %11095 = vmatmul.mubr.f32.gmra.mxu0 %v12104_v15  ;;  %11101 = vmatprep.mubr.f32.mxu1 %v12114_v16 }
  0x25   : > { %11109 = vmatprep.subr.mxu0 %v316_v34  ;;  %11117 = vmatprep.subr.mxu1 %v200_v22  ;;  %v2828_v35 = vand.u32 4294901760, %v2827_v33 }
  0x26   : > { %11110 = vmatpush3.msra.mxu0 %v316_v34  ;;  %11111 = vmatprep.mubr.f32.mxu0 %v12081_v7  ;;  %v2822_v34 = vsub.f32 %v2820_v30, %v12308_v31 }
  0x27   : > { %11102 = vmatmul.mubr.f32.vlgmr.msra.gmra.mxu1 %v12117_v17  ;;  %11127 = vmatprep.subr.mxu0 %v12152_v41  ;;  %v2829_v38 = vsub.f32 %v2827_v33, %v2828_v35 }
  0x28   : > { %11118 = vmatpush3.msra.mxu1 %v200_v22  ;;  %11112 = vmatmul.mubr.f32.vlgmr.msra.gmra.mxu0 %v12083_v8  ;;  %v2201_v22 = vsub.f32 %v2199_v6, %v2200_v19  ;;  %v2823_v36 = vand.u32 4294901760, %v2822_v34 }
  0x29   : > { %11104 = vmatprep.mubr.f32.mxu1 %v12120_v18  ;;  %11119 = vmatprep.subr.mxu1 %v12127_v23  ;;  %v2830_v39 = vand.u32 4294901760, %v2829_v38 }
  0x2a   : > { %11114 = vmatprep.mubr.f32.mxu0 %v12085_v9  ;;  %11120 = vmatpush3.msra.mxu1 %v12127_v23  ;;  %v2202_v23 = vand.u32 4294901760, %v2201_v22 }
  0x2b   : > { %11105 = vmatmul.mubr.f32.gmra.mxu1 %v12125_v21  ;;  %11128 = vmatpush3.msra.mxu0 %v12152_v41 }
  0x2c   : > { %11115 = vmatmul.mubr.f32.gmra.mxu0 %v12090_v11  ;;  %11121 = vmatprep.mubr.f32.mxu1 %v12081_v7 }
  0x2d   : > { %11129 = vmatprep.subr.mxu0 %v12157_v43  ;;  %11137 = vmatprep.subr.mxu1 %v939_v49 }
  0x2e   : > { %11130 = vmatpush3.msra.mxu0 %v12157_v43  ;;  %11131 = vmatprep.mubr.f32.mxu0 %v12137_v28 }
  0x2f   : > { %11122 = vmatmul.mubr.f32.vlgmr.msra.gmra.mxu1 %v12083_v8  ;;  %11147 = vmatprep.subr.mxu0 %v936_v44 }
  0x30   : > { %11138 = vmatpush3.msra.mxu1 %v939_v49  ;;  %11132 = vmatmul.mubr.f32.vlgmr.msra.gmra.mxu0 %v12139_v29 }
  0x31   : > { %11124 = vmatprep.mubr.f32.mxu1 %v12085_v9  ;;  %11139 = vmatprep.subr.mxu1 %v946_v51 }
  0x32   : > { %11134 = vmatprep.mubr.f32.mxu0 %v12142_v32  ;;  %11140 = vmatpush3.msra.mxu1 %v946_v51  ;;  %v3920_v51 = vld [vmem:[%s13392_s0] sm:$0xff] }
  0x33   : > { %11125 = vmatmul.mubr.f32.gmra.mxu1 %v12090_v11  ;;  %11148 = vmatpush3.msra.mxu0 %v936_v44 }
  0x34   : > { %11135 = vmatmul.mubr.f32.gmra.mxu0 %v12149_v37  ;;  %11141 = vmatprep.mubr.f32.mxu1 %v12081_v7 }
  0x35   : > { %11149 = vmatprep.subr.mxu0 %v943_v46  ;;  %11157 = vmatprep.subr.mxu1 %v12152_v41 }
  0x36   : > { %11150 = vmatpush3.msra.mxu0 %v943_v46  ;;  %11151 = vmatprep.mubr.f32.mxu0 %v12093_v12 }
  0x37   : > { %11142 = vmatmul.mubr.f32.vlgmr.msra.gmra.mxu1 %v12083_v8  ;;  %11167 = vmatprep.subr.mxu0 %v12164_v45 }
  0x38   : > { %11158 = vmatpush3.msra.mxu1 %v12152_v41  ;;  %11152 = vmatmul.mubr.f32.vlgmr.msra.gmra.mxu0 %v12096_v13 }
  0x39   : > { %11144 = vmatprep.mubr.f32.mxu1 %v12085_v9  ;;  %11159 = vmatprep.subr.mxu1 %v12157_v43 }
  0x3a   : > { %11154 = vmatprep.mubr.f32.mxu0 %v12099_v14  ;;  %11160 = vmatpush3.msra.mxu1 %v12157_v43 }
  0x3b   : > { %11145 = vmatmul.mubr.f32.gmra.mxu1 %v12090_v11  ;;  %11168 = vmatpush3.msra.mxu0 %v12164_v45 }
  0x3c   : > { %11155 = vmatmul.mubr.f32.gmra.mxu0 %v12104_v15  ;;  %11161 = vmatprep.mubr.f32.mxu1 %v12114_v16 }
  0x3d   : > { %11169 = vmatprep.subr.mxu0 %v944_v48  ;;  %11177 = vmatprep.subr.mxu1 %v12152_v41 }
  0x3e   : > { %11170 = vmatpush3.msra.mxu0 %v944_v48  ;;  %11171 = vmatprep.mubr.f32.mxu0 %v12081_v7 }
  0x3f   : > { %11162 = vmatmul.mubr.f32.vlgmr.msra.gmra.mxu1 %v12117_v17  ;;  %11187 = vmatprep.subr.mxu0 %v12192_v53 }
  0x40   : > { %11178 = vmatpush3.msra.mxu1 %v12152_v41  ;;  %11172 = vmatmul.mubr.f32.vlgmr.msra.gmra.mxu0 %v12083_v8  ;;  %v12339_v41 = vand.u32 4294901760, %v10314_v40 }
  0x41   : > { %11164 = vmatprep.mubr.f32.mxu1 %v12120_v18  ;;  %11179 = vmatprep.subr.mxu1 %v12157_v43 }
  0x42   : > { %11174 = vmatprep.mubr.f32.mxu0 %v12085_v9  ;;  %11180 = vmatpush3.msra.mxu1 %v12157_v43  ;;  %v12347_v43 = vand.u32 4294901760, %v10313_v42  ;;  %v3448_v44 = vsub.f32 %v10314_v40, %v12339_v41  ;;  %v10344_v40 = vld [vmem:[%s12111_s23 + $0x88] sm:$0xff] }
  0x43   : > { %11165 = vmatmul.mubr.f32.gmra.mxu1 %v12125_v21  ;;  %11188 = vmatpush3.msra.mxu0 %v12192_v53 }
  0x44   : > { %11175 = vmatmul.mubr.f32.gmra.mxu0 %v12090_v11  ;;  %11181 = vmatprep.mubr.f32.mxu1 %v12081_v7  ;;  %v12357_v45 = vand.u32 4294901760, %v3448_v44  ;;  %v3455_v46 = vsub.f32 %v10313_v42, %v12347_v43  ;;  %v10343_v42 = vld [vmem:[%s12111_s23 + $0x80] sm:$0xff] }
  0x45   : > { %11189 = vmatprep.subr.mxu0 %v12200_v55  ;;  %11197 = vmatprep.subr.mxu1 %v1567_v61 }
  0x46   : > { %11190 = vmatpush3.msra.mxu0 %v12200_v55  ;;  %11191 = vmatprep.mubr.f32.mxu0 %v12137_v28  ;;  %v3450_v47 = vsub.f32 %v3448_v44, %v12357_v45  ;;  %v12368_v48 = vand.u32 4294901760, %v3455_v46 }
  0x47   : > { %11182 = vmatmul.mubr.f32.vlgmr.msra.gmra.mxu1 %v12083_v8  ;;  %11207 = vmatprep.subr.mxu0 %v1564_v56 }
  0x48   : > { %11198 = vmatpush3.msra.mxu1 %v1567_v61  ;;  %11192 = vmatmul.mubr.f32.vlgmr.msra.gmra.mxu0 %v12139_v29  ;;  %v3451_v49 = vand.u32 4294901760, %v3450_v47  ;;  %v3457_v50 = vsub.f32 %v3455_v46, %v12368_v48 }
  0x49   : > { %11184 = vmatprep.mubr.f32.mxu1 %v12085_v9  ;;  %11199 = vmatprep.subr.mxu1 %v1574_v63 }
  0x4a   : > { %11194 = vmatprep.mubr.f32.mxu0 %v12142_v32  ;;  %11200 = vmatpush3.msra.mxu1 %v1574_v63  ;;  %v3458_v52 = vand.u32 4294901760, %v3457_v50 }
  0x4b   : > { %11185 = vmatmul.mubr.f32.gmra.mxu1 %v12090_v11  ;;  %11208 = vmatpush3.msra.mxu0 %v1564_v56  ;;  %v3922_v56 = vld [vmem:[%s13392_s0 + $0x10] sm:$0xff] }
  0x4c   : > { %11195 = vmatmul.mubr.f32.gmra.mxu0 %v12149_v37  ;;  %11201 = vmatprep.mubr.f32.mxu1 %v12081_v7 }
  0x4d   : > { %11209 = vmatprep.subr.mxu0 %v1571_v58  ;;  %11217 = vmatprep.subr.mxu1 %v12192_v53 }
  0x4e   : > { %11210 = vmatpush3.msra.mxu0 %v1571_v58  ;;  %11211 = vmatprep.mubr.f32.mxu0 %v12093_v12  ;;  %v10323_v58 = vld [vmem:[%s12111_s23 + $0x60] sm:$0xff] }
  0x4f   : > { %11202 = vmatmul.mubr.f32.vlgmr.msra.gmra.mxu1 %v12083_v8  ;;  %11227 = vmatprep.subr.mxu0 %v12210_v57 }
  0x50   : > { %11218 = vmatpush3.msra.mxu1 %v12192_v53  ;;  %11212 = vmatmul.mubr.f32.vlgmr.msra.gmra.mxu0 %v12096_v13 }
  0x51   : > { %11204 = vmatprep.mubr.f32.mxu1 %v12085_v9  ;;  %11219 = vmatprep.subr.mxu1 %v12200_v55 }
  0x52   : > { %11214 = vmatprep.mubr.f32.mxu0 %v12099_v14  ;;  %11220 = vmatpush3.msra.mxu1 %v12200_v55 }
  0x53   : > { %11205 = vmatmul.mubr.f32.gmra.mxu1 %v12090_v11  ;;  %11228 = vmatpush3.msra.mxu0 %v12210_v57  ;;  %v3931_v57 = vsel %vm158_vm0, %v3921_v54, 0 }
  0x54   : > { %11215 = vmatmul.mubr.f32.gmra.mxu0 %v12104_v15  ;;  %11221 = vmatprep.mubr.f32.mxu1 %v12114_v16  ;;  %v12415_v61 = vand.u32 4294901760, %v3931_v57 }
  0x55   : > { %11229 = vmatprep.subr.mxu0 %v1572_v60  ;;  %11237 = vmatprep.subr.mxu1 %v12192_v53 }
  0x56   : > { %11230 = vmatpush3.msra.mxu0 %v1572_v60  ;;  %11231 = vmatprep.mubr.f32.mxu0 %v12081_v7  ;;  %v3934_v60 = vsel %vm158_vm0, %v3922_v56, 0  ;;  %v10353_v56 = vld [vmem:[%s12111_s23 + $0x90] sm:$0xff] }
  0x57   : > { %11222 = vmatmul.mubr.f32.vlgmr.msra.gmra.mxu1 %v12117_v17  ;;  %11247 = vmatprep.subr.mxu0 %v12241_v1 }
  0x58   : > { %11238 = vmatpush3.msra.mxu1 %v12192_v53  ;;  %11232 = vmatmul.mubr.f32.vlgmr.msra.gmra.mxu0 %v12083_v8  ;;  %v10324_v53 = vld [vmem:[%s12111_s23 + $0x68] sm:$0xff] }
  0x59   : > { %11224 = vmatprep.mubr.f32.mxu1 %v12120_v18  ;;  %11239 = vmatprep.subr.mxu1 %v12200_v55 }
  0x5a   : > { %11234 = vmatprep.mubr.f32.mxu0 %v12085_v9  ;;  %11240 = vmatpush3.msra.mxu1 %v12200_v55  ;;  %v3928_v55 = vsel %vm158_vm0, %v3920_v51, 0 }
  0x5b   : > { %11225 = vmatmul.mubr.f32.gmra.mxu1 %v12125_v21  ;;  %11248 = vmatpush3.msra.mxu0 %v12241_v1  ;;  %v12406_v59 = vand.u32 4294901760, %v3928_v55 }
  0x5c   : > { %11235 = vmatmul.mubr.f32.gmra.mxu0 %v12090_v11  ;;  %11241 = vmatprep.mubr.f32.mxu1 %v12081_v7 }
  0x5d   : > { %11249 = vmatprep.subr.mxu0 %v12249_v3  ;;  %11257 = vmatprep.subr.mxu1 %v2195_v20  ;;  %v12426_v0 = vsub.f32 %v3928_v55, %v12406_v59 }
  0x5e   : > { %11250 = vmatpush3.msra.mxu0 %v12249_v3  ;;  %11251 = vmatprep.mubr.f32.mxu0 %v12137_v28 }
  0x5f   : > { %11242 = vmatmul.mubr.f32.vlgmr.msra.gmra.mxu1 %v12083_v8  ;;  %11267 = vmatprep.subr.mxu0 %v2192_v4 }
  0x60   : > { %11258 = vmatpush3.msra.mxu1 %v2195_v20  ;;  %11252 = vmatmul.mubr.f32.vlgmr.msra.gmra.mxu0 %v12139_v29 }
  0x61   : > { %11244 = vmatprep.mubr.f32.mxu1 %v12085_v9  ;;  %11259 = vmatprep.subr.mxu1 %v2202_v23 }
  0x62   : > { %11254 = vmatprep.mubr.f32.mxu0 %v12142_v32  ;;  %11260 = vmatpush3.msra.mxu1 %v2202_v23 }
  0x63   : > { %11245 = vmatmul.mubr.f32.gmra.mxu1 %v12090_v11  ;;  %11268 = vmatpush3.msra.mxu0 %v2192_v4 }
  0x64   : > { %11255 = vmatmul.mubr.f32.gmra.mxu0 %v12149_v37  ;;  %11261 = vmatprep.mubr.f32.mxu1 %v12081_v7 }
  0x65   : > { %11269 = vmatprep.subr.mxu0 %v2199_v6  ;;  %11277 = vmatprep.subr.mxu1 %v12241_v1 }
  0x66   : > { %11270 = vmatpush3.msra.mxu0 %v2199_v6  ;;  %11271 = vmatprep.mubr.f32.mxu0 %v12093_v12 }
  0x67   : > { %11262 = vmatmul.mubr.f32.vlgmr.msra.gmra.mxu1 %v12083_v8  ;;  %11287 = vmatprep.subr.mxu0 %v12259_v5 }
  0x68   : > { %11278 = vmatpush3.msra.mxu1 %v12241_v1  ;;  %11272 = vmatmul.mubr.f32.vlgmr.msra.gmra.mxu0 %v12096_v13 }
  0x69   : > { %11264 = vmatprep.mubr.f32.mxu1 %v12085_v9  ;;  %11279 = vmatprep.subr.mxu1 %v12249_v3 }
  0x6a   : > { %11274 = vmatprep.mubr.f32.mxu0 %v12099_v14  ;;  %11280 = vmatpush3.msra.mxu1 %v12249_v3 }
  0x6b   : > { %11265 = vmatmul.mubr.f32.gmra.mxu1 %v12090_v11  ;;  %11288 = vmatpush3.msra.mxu0 %v12259_v5 }
  0x6c   : > { %11275 = vmatmul.mubr.f32.gmra.mxu0 %v12104_v15  ;;  %11281 = vmatprep.mubr.f32.mxu1 %v12114_v16 }
  0x6d   : > { %11289 = vmatprep.subr.mxu0 %v2200_v19  ;;  %11297 = vmatprep.subr.mxu1 %v12241_v1 }
  0x6e   : > { %11290 = vmatpush3.msra.mxu0 %v2200_v19  ;;  %11291 = vmatprep.mubr.f32.mxu0 %v12081_v7 }
  0x6f   : > { %11282 = vmatmul.mubr.f32.vlgmr.msra.gmra.mxu1 %v12117_v17  ;;  %11307 = vmatprep.subr.mxu0 %v12290_v25 }
  0x70   : > { %11298 = vmatpush3.msra.mxu1 %v12241_v1  ;;  %11292 = vmatmul.mubr.f32.vlgmr.msra.gmra.mxu0 %v12083_v8  ;;  %v12435_v1 = vsub.f32 %v3931_v57, %v12415_v61 }
  0x71   : > { %11284 = vmatprep.mubr.f32.mxu1 %v12120_v18  ;;  %11299 = vmatprep.subr.mxu1 %v12249_v3 }
  0x72   : > { %11294 = vmatprep.mubr.f32.mxu0 %v12085_v9  ;;  %11300 = vmatpush3.msra.mxu1 %v12249_v3  ;;  %v12460_v5 = vand.u32 4294901760, %v12435_v1 }
  0x73   : > { %11285 = vmatmul.mubr.f32.gmra.mxu1 %v12125_v21  ;;  %11308 = vmatpush3.msra.mxu0 %v12290_v25 }
  0x74   : > { %11295 = vmatmul.mubr.f32.gmra.mxu0 %v12090_v11  ;;  %11301 = vmatprep.mubr.f32.mxu1 %v12081_v7  ;;  %v4019_v19 = vsub.f32 %v12435_v1, %v12460_v5 }
  0x75   : > { %11309 = vmatprep.subr.mxu0 %v12298_v27  ;;  %11317 = vmatprep.subr.mxu1 %v2823_v36 }
  0x76   : > { %11310 = vmatpush3.msra.mxu0 %v12298_v27  ;;  %11311 = vmatprep.mubr.f32.mxu0 %v12137_v28 }
  0x77   : > { %11302 = vmatmul.mubr.f32.vlgmr.msra.gmra.mxu1 %v12083_v8  ;;  %11327 = vmatprep.subr.mxu0 %v2820_v30 }
  0x78   : > { %11318 = vmatpush3.msra.mxu1 %v2823_v36  ;;  %11312 = vmatmul.mubr.f32.vlgmr.msra.gmra.mxu0 %v12139_v29 }
  0x79   : > { %11304 = vmatprep.mubr.f32.mxu1 %v12085_v9  ;;  %11319 = vmatprep.subr.mxu1 %v2830_v39 }
  0x7a   : > { %11314 = vmatprep.mubr.f32.mxu0 %v12142_v32  ;;  %11320 = vmatpush3.msra.mxu1 %v2830_v39 }
  0x7b   : > { %11305 = vmatmul.mubr.f32.gmra.mxu1 %v12090_v11  ;;  %11328 = vmatpush3.msra.mxu0 %v2820_v30 }
  0x7c   : > { %11315 = vmatmul.mubr.f32.gmra.mxu0 %v12149_v37  ;;  %11321 = vmatprep.mubr.f32.mxu1 %v12081_v7 }
  0x7d   : > { %11329 = vmatprep.subr.mxu0 %v2827_v33  ;;  %11337 = vmatprep.subr.mxu1 %v12290_v25 }
  0x7e   : > { %11330 = vmatpush3.msra.mxu0 %v2827_v33  ;;  %11331 = vmatprep.mubr.f32.mxu0 %v12093_v12 }
  0x7f   : > { %11322 = vmatmul.mubr.f32.vlgmr.msra.gmra.mxu1 %v12083_v8  ;;  %11347 = vmatprep.subr.mxu0 %v12308_v31 }
  0x80   : > { %11338 = vmatpush3.msra.mxu1 %v12290_v25  ;;  %11332 = vmatmul.mubr.f32.vlgmr.msra.gmra.mxu0 %v12096_v13 }
  0x81   : > { %11324 = vmatprep.mubr.f32.mxu1 %v12085_v9  ;;  %11339 = vmatprep.subr.mxu1 %v12298_v27 }
  0x82   : > { %11334 = vmatprep.mubr.f32.mxu0 %v12099_v14  ;;  %11340 = vmatpush3.msra.mxu1 %v12298_v27 }
  0x83   : > { %11325 = vmatmul.mubr.f32.gmra.mxu1 %v12090_v11  ;;  %11348 = vmatpush3.msra.mxu0 %v12308_v31  ;;  %v10333_v31 = vld [vmem:[%s12111_s23 + $0x70] sm:$0xff] }
  0x84   : > { %11335 = vmatmul.mubr.f32.gmra.mxu0 %v12104_v15  ;;  %11341 = vmatprep.mubr.f32.mxu1 %v12114_v16 }
  0x85   : > { %11349 = vmatprep.subr.mxu0 %v2828_v35  ;;  %11357 = vmatprep.subr.mxu1 %v12290_v25 }
  0x86   : > { %11350 = vmatpush3.msra.mxu0 %v2828_v35  ;;  %11351 = vmatprep.mubr.f32.mxu0 %v12081_v7 }
  0x87   : > { %11342 = vmatmul.mubr.f32.vlgmr.msra.gmra.mxu1 %v12117_v17  ;;  %11367 = vmatprep.subr.mxu0 %v12339_v41 }
  0x88   : > { %11358 = vmatpush3.msra.mxu1 %v12290_v25  ;;  %11352 = vmatmul.mubr.f32.vlgmr.msra.gmra.mxu0 %v12083_v8 }
  0x89   : > { %11344 = vmatprep.mubr.f32.mxu1 %v12120_v18  ;;  %11359 = vmatprep.subr.mxu1 %v12298_v27 }
  0x8a   : > { %11354 = vmatprep.mubr.f32.mxu0 %v12085_v9  ;;  %11360 = vmatpush3.msra.mxu1 %v12298_v27  ;;  %v10334_v27 = vld [vmem:[%s12111_s23 + $0x78] sm:$0xff] }
  0x8b   : > { %11345 = vmatmul.mubr.f32.gmra.mxu1 %v12125_v21  ;;  %11368 = vmatpush3.msra.mxu0 %v12339_v41  ;;  %v12518_v30 = vand.u32 4294901760, %v10334_v27 }
  0x8c   : > { %11355 = vmatmul.mubr.f32.gmra.mxu0 %v12090_v11  ;;  %11361 = vmatprep.mubr.f32.mxu1 %v12081_v7 }
  0x8d   : > { %11369 = vmatprep.subr.mxu0 %v12347_v43  ;;  %11377 = vmatprep.subr.mxu1 %v3451_v49 }
  0x8e   : > { %11370 = vmatpush3.msra.mxu0 %v12347_v43  ;;  %11371 = vmatprep.mubr.f32.mxu0 %v12137_v28  ;;  %v12401_v28 = vand.u32 4294901760, %v10324_v53 }
  0x8f   : > { %11362 = vmatmul.mubr.f32.vlgmr.msra.gmra.mxu1 %v12083_v8  ;;  %11387 = vmatprep.subr.mxu0 %v3448_v44 }
  0x90   : > { %11378 = vmatpush3.msra.mxu1 %v3451_v49  ;;  %11372 = vmatmul.mubr.f32.vlgmr.msra.gmra.mxu0 %v12139_v29  ;;  %v3923_v29 = vld [vmem:[%s13392_s0 + $0x18] sm:$0xff]  ;;  %v12421_v62 = vsub.f32 %v10324_v53, %v12401_v28 }
  0x91   : > { %11364 = vmatprep.mubr.f32.mxu1 %v12085_v9  ;;  %11379 = vmatprep.subr.mxu1 %v3458_v52  ;;  %v3937_v63 = vsel %vm158_vm0, %v3923_v29, 0 }
  0x92   : > { %11374 = vmatprep.mubr.f32.mxu0 %v12142_v32  ;;  %11380 = vmatpush3.msra.mxu1 %v3458_v52  ;;  %v12418_v32 = vand.u32 4294901760, %v10323_v58  ;;  %v12437_v2 = vand.u32 4294901760, %v3937_v63  ;;  %v10354_v52 = vld [vmem:[%s12111_s23 + $0x98] sm:$0xff] }
  0x93   : > { %11365 = vmatmul.mubr.f32.gmra.mxu1 %v12090_v11  ;;  %11388 = vmatpush3.msra.mxu0 %v3448_v44  ;;  %v12624_v55 = vand.u32 4294901760, %v10354_v52 }
  0x94   : > { %11375 = vmatmul.mubr.f32.gmra.mxu0 %v12149_v37  ;;  %11381 = vmatprep.mubr.f32.mxu1 %v12081_v7  ;;  %v12428_v37 = vand.u32 4294901760, %v3934_v60  ;;  %v12445_v3 = vsub.f32 %v10323_v58, %v12418_v32  ;;  %v12632_v58 = vand.u32 4294901760, %v10353_v56 }
  0x95   : > { %11389 = vmatprep.subr.mxu0 %v3455_v46  ;;  %11397 = vmatprep.subr.mxu1 %v12339_v41  ;;  %v12635_v29 = vsub.f32 %v10354_v52, %v12624_v55 }
  0x96   : > { %11390 = vmatpush3.msra.mxu0 %v3455_v46  ;;  %11391 = vmatprep.mubr.f32.mxu0 %v12093_v12  ;;  %v12442_v12 = vand.u32 4294901760, %v12421_v62  ;;  %v12453_v4 = vsub.f32 %v3934_v60, %v12428_v37  ;;  %v12470_v10 = vand.u32 4294901760, %v12445_v3 }
  0x97   : > { %11382 = vmatmul.mubr.f32.vlgmr.msra.gmra.mxu1 %v12083_v8  ;;  %11407 = vmatprep.subr.mxu0 %v12357_v45 }
  0x98   : > { %11398 = vmatpush3.msra.mxu1 %v12339_v41  ;;  %11392 = vmatmul.mubr.f32.vlgmr.msra.gmra.mxu0 %v12096_v13  ;;  %v12450_v13 = vand.u32 4294901760, %v12426_v0  ;;  %v4078_v6 = vsub.f32 %v12421_v62, %v12442_v12 }
  0x99   : > { %11384 = vmatprep.mubr.f32.mxu1 %v12085_v9  ;;  %11399 = vmatprep.subr.mxu1 %v12347_v43 }
  0x9a   : > { %11394 = vmatprep.mubr.f32.mxu0 %v12099_v14  ;;  %11400 = vmatpush3.msra.mxu1 %v12347_v43  ;;  %v12463_v14 = vsub.f32 %v3937_v63, %v12437_v2  ;;  %v4079_v22 = vand.u32 4294901760, %v4078_v6  ;;  %v12645_v63 = vand.u32 4294901760, %v12635_v29 }
  0x9b   : > { %11385 = vmatmul.mubr.f32.gmra.mxu1 %v12090_v11  ;;  %11408 = vmatpush3.msra.mxu0 %v12357_v45 }
  0x9c   : > { %11395 = vmatmul.mubr.f32.gmra.mxu0 %v12104_v15  ;;  %11401 = vmatprep.mubr.f32.mxu1 %v12114_v16  ;;  %v4009_v15 = vsub.f32 %v12426_v0, %v12450_v13  ;;  %v12477_v16 = vand.u32 4294901760, %v12453_v4  ;;  %v12486_v20 = vand.u32 4294901760, %v12463_v14 }
  0x9d   : > { %11409 = vmatprep.subr.mxu0 %v12368_v48  ;;  %11417 = vmatprep.subr.mxu1 %v12339_v41 }
  0x9e   : > { %11410 = vmatpush3.msra.mxu0 %v12368_v48  ;;  %11411 = vmatprep.mubr.f32.mxu0 %v12081_v7  ;;  %v12494_v23 = vand.u32 4294901760, %v4009_v15  ;;  %v4029_v24 = vsub.f32 %v12453_v4, %v12477_v16  ;;  %v4039_v25 = vsub.f32 %v12463_v14, %v12486_v20 }
  0x9f   : > { %11402 = vmatmul.mubr.f32.vlgmr.msra.gmra.mxu1 %v12117_v17  ;;  %11427 = vmatprep.subr.mxu0 %v12401_v28  ;;  %v4085_v17 = vsub.f32 %v12445_v3, %v12470_v10 }
  0xa0   : > { %11418 = vmatpush3.msra.mxu1 %v12339_v41  ;;  %11412 = vmatmul.mubr.f32.vlgmr.msra.gmra.mxu0 %v12083_v8  ;;  %v12572_v41 = vand.u32 4294901760, %v10344_v40 }
  0xa1   : > { %11404 = vmatprep.mubr.f32.mxu1 %v12120_v18  ;;  %11419 = vmatprep.subr.mxu1 %v12347_v43  ;;  %v12502_v18 = vand.u32 4294901760, %v4019_v19  ;;  %v4086_v26 = vand.u32 4294901760, %v4085_v17 }
  0xa2   : > { %11414 = vmatprep.mubr.f32.mxu0 %v12085_v9  ;;  %11420 = vmatpush3.msra.mxu1 %v12347_v43  ;;  %v12580_v43 = vand.u32 4294901760, %v10343_v42  ;;  %v5332_v44 = vsub.f32 %v10344_v40, %v12572_v41 }
  0xa3   : > { %11405 = vmatmul.mubr.f32.gmra.mxu1 %v12125_v21  ;;  %11428 = vmatpush3.msra.mxu0 %v12401_v28  ;;  %v12509_v21 = vand.u32 4294901760, %v4029_v24 }
  0xa4   : > { %11415 = vmatmul.mubr.f32.gmra.mxu0 %v12090_v11  ;;  %11421 = vmatprep.mubr.f32.mxu1 %v12081_v7  ;;  %v12515_v7 = vand.u32 4294901760, %v4039_v25  ;;  %v12590_v45 = vand.u32 4294901760, %v5332_v44  ;;  %v5339_v46 = vsub.f32 %v10343_v42, %v12580_v43 }
  0xa5   : > { %11429 = vmatprep.subr.mxu0 %v12418_v32  ;;  %11437 = vmatprep.subr.mxu1 %v4079_v22 }
  0xa6   : > { %11430 = vmatpush3.msra.mxu0 %v12418_v32  ;;  %11431 = vmatprep.mubr.f32.mxu0 %v12494_v23  ;;  %v5334_v47 = vsub.f32 %v5332_v44, %v12590_v45  ;;  %v12601_v48 = vand.u32 4294901760, %v5339_v46 }
  0xa7   : > { %11422 = vmatmul.mubr.f32.vlgmr.msra.gmra.mxu1 %v12083_v8  ;;  %11447 = vmatprep.subr.mxu0 %v12421_v62  ;;  %v12528_v8 = vand.u32 4294901760, %v10333_v31 }
  0xa8   : > { %11438 = vmatpush3.msra.mxu1 %v4079_v22  ;;  %11432 = vmatmul.mubr.f32.vlgmr.msra.gmra.mxu0 %v12502_v18  ;;  %v5335_v49 = vand.u32 4294901760, %v5334_v47  ;;  %v5341_v50 = vsub.f32 %v5339_v46, %v12601_v48  ;;  %v5962_v22 = vsub.f32 %v12635_v29, %v12645_v63 }
  0xa9   : > { %11424 = vmatprep.mubr.f32.mxu1 %v12085_v9  ;;  %11439 = vmatprep.subr.mxu1 %v4086_v26  ;;  %v4704_v9 = vsub.f32 %v10334_v27, %v12518_v30  ;;  %v4711_v33 = vsub.f32 %v10333_v31, %v12528_v8 }
  0xaa   : > { %11434 = vmatprep.mubr.f32.mxu0 %v12509_v21  ;;  %11440 = vmatpush3.msra.mxu1 %v4086_v26  ;;  %v5342_v51 = vand.u32 4294901760, %v5341_v50 }
  0xab   : > { %11425 = vmatmul.mubr.f32.gmra.mxu1 %v12090_v11  ;;  %11448 = vmatpush3.msra.mxu0 %v12421_v62  ;;  %v12539_v11 = vand.u32 4294901760, %v4704_v9  ;;  %v4712_v35 = vand.u32 4294901760, %v4711_v33 }
  0xac   : > { %11435 = vmatmul.mubr.f32.gmra.mxu0 %v12515_v7  ;;  %11441 = vmatprep.mubr.f32.mxu1 %v12406_v59 }
  0xad   : > { %11449 = vmatprep.subr.mxu0 %v12445_v3  ;;  %11457 = vmatprep.subr.mxu1 %v12401_v28  ;;  %v4706_v34 = vsub.f32 %v4704_v9, %v12539_v11  ;;  %v4713_v38 = vsub.f32 %v4711_v33, %v4712_v35 }
  0xae   : > { %11450 = vmatpush3.msra.mxu0 %v12445_v3  ;;  %11451 = vmatprep.mubr.f32.mxu0 %v12426_v0 }
  0xaf   : > { %11442 = vmatmul.mubr.f32.vlgmr.msra.gmra.mxu1 %v12415_v61  ;;  %11467 = vmatprep.subr.mxu0 %v12442_v12  ;;  %v4707_v36 = vand.u32 4294901760, %v4706_v34  ;;  %v4714_v39 = vand.u32 4294901760, %v4713_v38 }
  0xb0   : > { %11458 = vmatpush3.msra.mxu1 %v12401_v28  ;;  %11452 = vmatmul.mubr.f32.vlgmr.msra.gmra.mxu0 %v12435_v1 }
  0xb1   : > { %11444 = vmatprep.mubr.f32.mxu1 %v12428_v37  ;;  %11459 = vmatprep.subr.mxu1 %v12418_v32 }
  0xb2   : > { %11454 = vmatprep.mubr.f32.mxu0 %v12453_v4  ;;  %11460 = vmatpush3.msra.mxu1 %v12418_v32 }
  0xb3   : > { %11445 = vmatmul.mubr.f32.gmra.mxu1 %v12437_v2  ;;  %11468 = vmatpush3.msra.mxu0 %v12442_v12  ;;  %v12648_v12 = vsub.f32 %v10353_v56, %v12632_v58 }
  0xb4   : > { %11455 = vmatmul.mubr.f32.gmra.mxu0 %v12463_v14  ;;  %11461 = vmatprep.mubr.f32.mxu1 %v12450_v13 }
  0xb5   : > { %11469 = vmatprep.subr.mxu0 %v12470_v10  ;;  %11477 = vmatprep.subr.mxu1 %v12401_v28  ;;  %v12661_v17 = vand.u32 4294901760, %v12648_v12 }
  0xb6   : > { %11470 = vmatpush3.msra.mxu0 %v12470_v10  ;;  %11471 = vmatprep.mubr.f32.mxu0 %v12406_v59 }
  0xb7   : > { %11462 = vmatmul.mubr.f32.vlgmr.msra.gmra.mxu1 %v12460_v5  ;;  %11487 = vmatprep.subr.mxu0 %v12518_v30 }
  0xb8   : > { %11478 = vmatpush3.msra.mxu1 %v12401_v28  ;;  %11472 = vmatmul.mubr.f32.vlgmr.msra.gmra.mxu0 %v12415_v61 }
  0xb9   : > { %11464 = vmatprep.mubr.f32.mxu1 %v12477_v16  ;;  %11479 = vmatprep.subr.mxu1 %v12418_v32 }
  0xba   : > { %11474 = vmatprep.mubr.f32.mxu0 %v12428_v37  ;;  %11480 = vmatpush3.msra.mxu1 %v12418_v32 }
  0xbb   : > { %11465 = vmatmul.mubr.f32.gmra.mxu1 %v12486_v20  ;;  %11488 = vmatpush3.msra.mxu0 %v12518_v30 }
  0xbc   : > { %11475 = vmatmul.mubr.f32.gmra.mxu0 %v12437_v2  ;;  %11481 = vmatprep.mubr.f32.mxu1 %v12406_v59 }
  0xbd   : > { %11489 = vmatprep.subr.mxu0 %v12528_v8  ;;  %11497 = vmatprep.subr.mxu1 %v4707_v36 }
  0xbe   : > { %11490 = vmatpush3.msra.mxu0 %v12528_v8  ;;  %11491 = vmatprep.mubr.f32.mxu0 %v12494_v23 }
  0xbf   : > { %11482 = vmatmul.mubr.f32.vlgmr.msra.gmra.mxu1 %v12415_v61  ;;  %11507 = vmatprep.subr.mxu0 %v4704_v9 }
  0xc0   : > { %11498 = vmatpush3.msra.mxu1 %v4707_v36  ;;  %11492 = vmatmul.mubr.f32.vlgmr.msra.gmra.mxu0 %v12502_v18 }
  0xc1   : > { %11484 = vmatprep.mubr.f32.mxu1 %v12428_v37  ;;  %11499 = vmatprep.subr.mxu1 %v4714_v39 }
  0xc2   : > { %11494 = vmatprep.mubr.f32.mxu0 %v12509_v21  ;;  %11500 = vmatpush3.msra.mxu1 %v4714_v39 }
  0xc3   : > { %11485 = vmatmul.mubr.f32.gmra.mxu1 %v12437_v2  ;;  %11508 = vmatpush3.msra.mxu0 %v4704_v9  ;;  %v5963_v9 = vand.u32 4294901760, %v5962_v22 }
  0xc4   : > { %11495 = vmatmul.mubr.f32.gmra.mxu0 %v12515_v7  ;;  %11501 = vmatprep.mubr.f32.mxu1 %v12406_v59 }
  0xc5   : > { %11509 = vmatprep.subr.mxu0 %v4711_v33  ;;  %11517 = vmatprep.subr.mxu1 %v12518_v30 }
  0xc6   : > { %11510 = vmatpush3.msra.mxu0 %v4711_v33  ;;  %11511 = vmatprep.mubr.f32.mxu0 %v12426_v0 }
  0xc7   : > { %11502 = vmatmul.mubr.f32.vlgmr.msra.gmra.mxu1 %v12415_v61  ;;  %11527 = vmatprep.subr.mxu0 %v12539_v11 }
  0xc8   : > { %11518 = vmatpush3.msra.mxu1 %v12518_v30  ;;  %11512 = vmatmul.mubr.f32.vlgmr.msra.gmra.mxu0 %v12435_v1 }
  0xc9   : > { %11504 = vmatprep.mubr.f32.mxu1 %v12428_v37  ;;  %11519 = vmatprep.subr.mxu1 %v12528_v8 }
  0xca   : > { %11514 = vmatprep.mubr.f32.mxu0 %v12453_v4  ;;  %11520 = vmatpush3.msra.mxu1 %v12528_v8 }
  0xcb   : > { %11505 = vmatmul.mubr.f32.gmra.mxu1 %v12437_v2  ;;  %11528 = vmatpush3.msra.mxu0 %v12539_v11  ;;  %v5969_v11 = vsub.f32 %v12648_v12, %v12661_v17 }
  0xcc   : > { %11515 = vmatmul.mubr.f32.gmra.mxu0 %v12463_v14  ;;  %11521 = vmatprep.mubr.f32.mxu1 %v12450_v13 }
  0xcd   : > { %11529 = vmatprep.subr.mxu0 %v4712_v35  ;;  %11537 = vmatprep.subr.mxu1 %v12518_v30 }
  0xce   : > { %11530 = vmatpush3.msra.mxu0 %v4712_v35  ;;  %11531 = vmatprep.mubr.f32.mxu0 %v12406_v59 }
  0xcf   : > { %11522 = vmatmul.mubr.f32.vlgmr.msra.gmra.mxu1 %v12460_v5  ;;  %11547 = vmatprep.subr.mxu0 %v12572_v41 }
  0xd0   : > { %11538 = vmatpush3.msra.mxu1 %v12518_v30  ;;  %11532 = vmatmul.mubr.f32.vlgmr.msra.gmra.mxu0 %v12415_v61 }
  0xd1   : > { %11524 = vmatprep.mubr.f32.mxu1 %v12477_v16  ;;  %11539 = vmatprep.subr.mxu1 %v12528_v8 }
  0xd2   : > { %11534 = vmatprep.mubr.f32.mxu0 %v12428_v37  ;;  %11540 = vmatpush3.msra.mxu1 %v12528_v8 }
  0xd3   : > { %11525 = vmatmul.mubr.f32.gmra.mxu1 %v12486_v20  ;;  %11548 = vmatpush3.msra.mxu0 %v12572_v41 }
  0xd4   : > { %11535 = vmatmul.mubr.f32.gmra.mxu0 %v12437_v2  ;;  %11541 = vmatprep.mubr.f32.mxu1 %v12406_v59 }
  0xd5   : > { %11549 = vmatprep.subr.mxu0 %v12580_v43  ;;  %11557 = vmatprep.subr.mxu1 %v5335_v49 }
  0xd6   : > { %11550 = vmatpush3.msra.mxu0 %v12580_v43  ;;  %11551 = vmatprep.mubr.f32.mxu0 %v12494_v23 }
  0xd7   : > { %11542 = vmatmul.mubr.f32.vlgmr.msra.gmra.mxu1 %v12415_v61  ;;  %11567 = vmatprep.subr.mxu0 %v5332_v44 }
  0xd8   : > { %v11073_v53 = vpop.f32.mrf.mxu0  ;;  %11558 = vmatpush3.msra.mxu1 %v5335_v49  ;;  %11552 = vmatmul.mubr.f32.vlgmr.msra.gmra.mxu0 %v12502_v18 }
  0xd9   : > { %11544 = vmatprep.mubr.f32.mxu1 %v12428_v37  ;;  %11559 = vmatprep.subr.mxu1 %v5342_v51 }
  0xda   : > { %v244_v54 = vpop.f32.mrf.mxu0  ;;  %11554 = vmatprep.mubr.f32.mxu0 %v12509_v21  ;;  %11560 = vmatpush3.msra.mxu1 %v5342_v51 }
  0xdb   : > { %11545 = vmatmul.mubr.f32.gmra.mxu1 %v12437_v2  ;;  %11568 = vmatpush3.msra.mxu0 %v5332_v44  ;;  %v5970_v44 = vand.u32 4294901760, %v5969_v11 }
  0xdc   : > { %v11076_v28 = vpop.f32.mrf.mxu0  ;;  %11555 = vmatmul.mubr.f32.gmra.mxu0 %v12515_v7  ;;  %11561 = vmatprep.mubr.f32.mxu1 %v12406_v59 }
  0xdd   : > { %11569 = vmatprep.subr.mxu0 %v5339_v46  ;;  %11577 = vmatprep.subr.mxu1 %v12572_v41 }
  0xde   : > { %v264_v57 = vpop.f32.mrf.mxu0  ;;  %11570 = vmatpush3.msra.mxu0 %v5339_v46  ;;  %11571 = vmatprep.mubr.f32.mxu0 %v12426_v0 }
  0xdf   : > { %v11083_v60 = vpop.f32.mrf.mxu1  ;;  %11562 = vmatmul.mubr.f32.vlgmr.msra.gmra.mxu1 %v12415_v61  ;;  %11587 = vmatprep.subr.mxu0 %v12590_v45 }
  0xe0   : > { %11578 = vmatpush3.msra.mxu1 %v12572_v41  ;;  %v11093_v32 = vpop.f32.mrf.mxu0  ;;  %11572 = vmatmul.mubr.f32.vlgmr.msra.gmra.mxu0 %v12435_v1  ;;  %v362_v10 = vadd.f32 %v11083_v60, %v11073_v53 }
  0xe1   : > { %v355_v62 = vpop.f32.mrf.mxu1  ;;  %11564 = vmatprep.mubr.f32.mxu1 %v12428_v37  ;;  %11579 = vmatprep.subr.mxu1 %v12580_v43 }
  0xe2   : > { %v449_v3 = vpop.f32.mrf.mxu0  ;;  %11574 = vmatprep.mubr.f32.mxu0 %v12453_v4  ;;  %11580 = vmatpush3.msra.mxu1 %v12580_v43  ;;  %v356_v24 = vadd.f32 %v355_v62, %v244_v54  ;;  %v457_v27 = vadd.f32 %v11093_v32, %v362_v10  ;;  %v10363_v62 = vld [vmem:[%s12111_s23 + $0xa0] sm:$0xff] }
  0xe3   : > { %v11086_v6 = vpop.f32.mrf.mxu1  ;;  %11565 = vmatmul.mubr.f32.gmra.mxu1 %v12437_v2  ;;  %11588 = vmatpush3.msra.mxu0 %v12590_v45 }
  0xe4   : > { %v11096_v15 = vpop.f32.mrf.mxu0  ;;  %11575 = vmatmul.mubr.f32.gmra.mxu0 %v12463_v14  ;;  %11581 = vmatprep.mubr.f32.mxu1 %v12450_v13  ;;  %v374_v30 = vadd.f32 %v11086_v6, %v11076_v28  ;;  %v450_v33 = vadd.f32 %v449_v3, %v356_v24  ;;  %v12706_v24 = vand.u32 4294901760, %v10363_v62 }
  0xe5   : > { %v367_v19 = vpop.f32.mrf.mxu1  ;;  %11589 = vmatprep.subr.mxu0 %v12601_v48  ;;  %11597 = vmatprep.subr.mxu1 %v12572_v41 }
  0xe6   : > { %v463_v25 = vpop.f32.mrf.mxu0  ;;  %11590 = vmatpush3.msra.mxu0 %v12601_v48  ;;  %11591 = vmatprep.mubr.f32.mxu0 %v12406_v59  ;;  %v368_v34 = vadd.f32 %v367_v19, %v264_v57  ;;  %v471_v39 = vadd.f32 %v11096_v15, %v374_v30  ;;  %v10364_v48 = vld [vmem:[%s12111_s23 + $0xa8] sm:$0xff]  ;;  %v12727_v11 = vsub.f32 %v10363_v62, %v12706_v24 }
  0xe7   : > { %v11103_v26 = vpop.f32.mrf.mxu1  ;;  %11582 = vmatmul.mubr.f32.vlgmr.msra.gmra.mxu1 %v12460_v5  ;;  %11607 = vmatprep.subr.mxu0 %v12624_v55  ;;  %v12694_v56 = vand.u32 4294901760, %v10364_v48 }
  0xe8   : > { %11598 = vmatpush3.msra.mxu1 %v12572_v41  ;;  %v11113_v31 = vpop.f32.mrf.mxu0  ;;  %11592 = vmatmul.mubr.f32.vlgmr.msra.gmra.mxu0 %v12415_v61  ;;  %v554_v35 = vadd.f32 %v11103_v26, %v457_v27  ;;  %v464_v45 = vadd.f32 %v463_v25, %v368_v34 }
  0xe9   : > { %v545_v8 = vpop.f32.mrf.mxu1  ;;  %11584 = vmatprep.mubr.f32.mxu1 %v12477_v16  ;;  %11599 = vmatprep.subr.mxu1 %v12580_v43 }
  0xea   : > { %v646_v36 = vpop.f32.mrf.mxu0  ;;  %11594 = vmatprep.mubr.f32.mxu0 %v12428_v37  ;;  %11600 = vmatpush3.msra.mxu1 %v12580_v43  ;;  %v546_v40 = vadd.f32 %v545_v8, %v450_v33  ;;  %v653_v43 = vadd.f32 %v11113_v31, %v554_v35 }
  0xeb   : > { %v11106_v38 = vpop.f32.mrf.mxu1  ;;  %11585 = vmatmul.mubr.f32.gmra.mxu1 %v12486_v20  ;;  %11608 = vmatpush3.msra.mxu0 %v12624_v55 }
  0xec   : > { %v11116_v41 = vpop.f32.mrf.mxu0  ;;  %11595 = vmatmul.mubr.f32.gmra.mxu0 %v12437_v2  ;;  %11601 = vmatprep.mubr.f32.mxu1 %v12406_v59  ;;  %v570_v46 = vadd.f32 %v11106_v38, %v471_v39  ;;  %v647_v50 = vadd.f32 %v646_v36, %v546_v40  ;;  %v12742_v40 = vand.u32 4294901760, %v12727_v11 }
  0xed   : > { %v561_v42 = vpop.f32.mrf.mxu1  ;;  %11609 = vmatprep.subr.mxu0 %v12632_v58  ;;  %11617 = vmatprep.subr.mxu1 %v5963_v9 }
  0xee   : > { %v658_v47 = vpop.f32.mrf.mxu0  ;;  %11610 = vmatpush3.msra.mxu0 %v12632_v58  ;;  %11611 = vmatprep.mubr.f32.mxu0 %v12494_v23  ;;  %v562_v51 = vadd.f32 %v561_v42, %v464_v45  ;;  %v665_v28 = vadd.f32 %v11116_v41, %v570_v46 }
  0xef   : > { %v11123_v49 = vpop.f32.mrf.mxu1  ;;  %11602 = vmatmul.mubr.f32.vlgmr.msra.gmra.mxu1 %v12415_v61  ;;  %11627 = vmatprep.subr.mxu0 %v12635_v29 }
  0xf0   : > { %v744_v52 = vadd.f32 %v11123_v49, %v653_v43  ;;  %11618 = vmatpush3.msra.mxu1 %v5963_v9  ;;  %v11133_v53 = vpop.f32.mrf.mxu0  ;;  %11612 = vmatmul.mubr.f32.vlgmr.msra.gmra.mxu0 %v12502_v18  ;;  %v659_v6 = vadd.f32 %v658_v47, %v562_v51  ;;  %v6597_v47 = vsub.f32 %v12727_v11, %v12742_v40 }
  0xf1   : > { %v737_v54 = vpop.f32.mrf.mxu1  ;;  %11604 = vmatprep.mubr.f32.mxu1 %v12428_v37  ;;  %11619 = vmatprep.subr.mxu1 %v5970_v44 }
  0xf2   : > { %v10428_v57 = vpack.c.bf16 %v744_v52, %v744_v52  ;;  %v738_v60 = vadd.f32 %v737_v54, %v647_v50  ;;  %v872_v32 = vpop.f32.mrf.mxu0  ;;  %11614 = vmatprep.mubr.f32.mxu0 %v12509_v21  ;;  %11620 = vmatpush3.msra.mxu1 %v5970_v44  ;;  %v7060_v52 = vld [vmem:[%s13392_s0] sm:$0xff] }
  0xf3   : > { %v11126_v3 = vpop.f32.mrf.mxu1  ;;  %11605 = vmatmul.mubr.f32.gmra.mxu1 %v12437_v2  ;;  %11628 = vmatpush3.msra.mxu0 %v12635_v29  ;;  %v12709_v29 = vsub.f32 %v10364_v48, %v12694_v56 }
  0xf4   : > { %777 = vst.msk [vmem:[%s12691_s6 + $0x4] sm:$0xf] %vm775_vm1, %v10428_v57  ;;  %v10427_v10 = vpack.c.bf16 %v738_v60, %v738_v60  ;;  %v756_v15 = vadd.f32 %v11126_v3, %v665_v28  ;;  %v11136_v19 = vpop.f32.mrf.mxu0  ;;  %11615 = vmatmul.mubr.f32.gmra.mxu0 %v12515_v7  ;;  %11621 = vmatprep.mubr.f32.mxu1 %v12406_v59 }
  0xf5   : > { %v749_v22 = vpop.f32.mrf.mxu1  ;;  %11629 = vmatprep.subr.mxu0 %v12648_v12  ;;  %11637 = vmatprep.subr.mxu1 %v12624_v55 }
  0xf6   : > { %776 = vst.msk [vmem:[%s12691_s6] sm:$0xf] %vm775_vm1, %v10427_v10  ;;  %v10430_v25 = vpack.c.bf16 %v756_v15, %v756_v15  ;;  %v750_v26 = vadd.f32 %v749_v22, %v659_v6  ;;  %v892_v27 = vpop.f32.mrf.mxu0  ;;  %11630 = vmatpush3.msra.mxu0 %v12648_v12  ;;  %11631 = vmatprep.mubr.f32.mxu0 %v12426_v0  ;;  %v12724_v12 = vand.u32 4294901760, %v12709_v29  ;;  %v10374_v6 = vld [vmem:[%s12111_s23 + $0xb8] sm:$0xff]  ;;  %v7068_v10 = vsel %vm158_vm0, %v7060_v52, 0  ;;  %v7061_v15 = vld [vmem:[%s13392_s0 + $0x8] sm:$0xff] }
  0xf7   : > { %v11143_v30 = vpop.f32.mrf.mxu1  ;;  %11622 = vmatmul.mubr.f32.vlgmr.msra.gmra.mxu1 %v12415_v61  ;;  %11647 = vmatprep.subr.mxu0 %v12645_v63  ;;  %v7062_v22 = vld [vmem:[%s13392_s0 + $0x10] sm:$0xff] }
  0xf8   : > { %779 = vst.msk [vmem:[%s12691_s6 + $0xc] sm:$0xf] %vm775_vm1, %v10430_v25  ;;  %v10429_v31 = vpack.c.bf16 %v750_v26, %v750_v26  ;;  %11638 = vmatpush3.msra.mxu1 %v12624_v55  ;;  %v11153_v8 = vpop.f32.mrf.mxu0  ;;  %11632 = vmatmul.mubr.f32.vlgmr.msra.gmra.mxu0 %v12435_v1  ;;  %v990_v35 = vadd.f32 %v11143_v30, %v11133_v53 }
  0xf9   : > { %v983_v9 = vpop.f32.mrf.mxu1  ;;  %11624 = vmatprep.mubr.f32.mxu1 %v12428_v37  ;;  %11639 = vmatprep.subr.mxu1 %v12632_v58  ;;  %v6590_v39 = vsub.f32 %v12709_v29, %v12724_v12 }
  0xfa   : > { %778 = vst.msk [vmem:[%s12691_s6 + $0x8] sm:$0xf] %vm775_vm1, %v10429_v31  ;;  %v1077_v33 = vpop.f32.mrf.mxu0  ;;  %11634 = vmatprep.mubr.f32.mxu0 %v12453_v4  ;;  %11640 = vmatpush3.msra.mxu1 %v12632_v58  ;;  %v984_v41 = vadd.f32 %v983_v9, %v872_v32  ;;  %v1085_v44 = vadd.f32 %v11153_v8, %v990_v35  ;;  %v12780_v31 = vand.u32 4294901760, %v10374_v6  ;;  %v12782_v8 = vand.u32 4294901760, %v7068_v10 }
  0xfb   : > { %v11146_v34 = vpop.f32.mrf.mxu1  ;;  %11625 = vmatmul.mubr.f32.gmra.mxu1 %v12437_v2  ;;  %11648 = vmatpush3.msra.mxu0 %v12645_v63  ;;  %v7071_v9 = vsel %vm158_vm0, %v7061_v15, 0 }
  0xfc   : > { %v11156_v36 = vpop.f32.mrf.mxu0  ;;  %11635 = vmatmul.mubr.f32.gmra.mxu0 %v12463_v14  ;;  %11641 = vmatprep.mubr.f32.mxu1 %v12450_v13  ;;  %v1002_v45 = vadd.f32 %v11146_v34, %v11136_v19  ;;  %v1078_v48 = vadd.f32 %v1077_v33, %v984_v41 }
  0xfd   : > { %v995_v38 = vpop.f32.mrf.mxu1  ;;  %11649 = vmatprep.subr.mxu0 %v12661_v17  ;;  %11657 = vmatprep.subr.mxu1 %v12624_v55 }
  0xfe   : > { %v1091_v42 = vpop.f32.mrf.mxu0  ;;  %11650 = vmatpush3.msra.mxu0 %v12661_v17  ;;  %11651 = vmatprep.mubr.f32.mxu0 %v12406_v59  ;;  %v6591_v17 = vand.u32 4294901760, %v6590_v39  ;;  %v996_v49 = vadd.f32 %v995_v38, %v892_v27  ;;  %v1099_v53 = vadd.f32 %v11156_v36, %v1002_v45  ;;  %v7074_v38 = vsel %vm158_vm0, %v7062_v22, 0  ;;  %v7063_v39 = vld [vmem:[%s13392_s0 + $0x18] sm:$0xff] }
  0xff   : > { %v11163_v63 = vpop.f32.mrf.mxu1  ;;  %11642 = vmatmul.mubr.f32.vlgmr.msra.gmra.mxu1 %v12460_v5  ;;  %11667 = vmatprep.subr.mxu0 %v12694_v56  ;;  %v12801_v45 = vand.u32 4294901760, %v7071_v9 }
 0x100   : > { %11658 = vmatpush3.msra.mxu1 %v12624_v55  ;;  %v11173_v43 = vpop.f32.mrf.mxu0  ;;  %11652 = vmatmul.mubr.f32.vlgmr.msra.gmra.mxu0 %v12415_v61  ;;  %v1182_v50 = vadd.f32 %v11163_v63, %v1085_v44  ;;  %v1092_v60 = vadd.f32 %v1091_v42, %v996_v49 }
 0x101   : > { %v1173_v46 = vpop.f32.mrf.mxu1  ;;  %11644 = vmatprep.mubr.f32.mxu1 %v12477_v16  ;;  %11659 = vmatprep.subr.mxu1 %v12632_v58 }
 0x102   : > { %v1274_v51 = vpop.f32.mrf.mxu0  ;;  %11654 = vmatprep.mubr.f32.mxu0 %v12428_v37  ;;  %11660 = vmatpush3.msra.mxu1 %v12632_v58  ;;  %v1174_v54 = vadd.f32 %v1173_v46, %v1078_v48  ;;  %v6598_v58 = vand.u32 4294901760, %v6597_v47  ;;  %v1281_v32 = vadd.f32 %v11173_v43, %v1182_v50  ;;  %v12808_v46 = vsub.f32 %v10374_v6, %v12780_v31 }
 0x103   : > { %v11166_v55 = vpop.f32.mrf.mxu1  ;;  %11645 = vmatmul.mubr.f32.gmra.mxu1 %v12486_v20  ;;  %11668 = vmatpush3.msra.mxu0 %v12694_v56  ;;  %v7077_v47 = vsel %vm158_vm0, %v7063_v39, 0  ;;  %v12818_v50 = vsub.f32 %v7068_v10, %v12782_v8 }
 0x104   : > { %v11176_v28 = vpop.f32.mrf.mxu0  ;;  %11655 = vmatmul.mubr.f32.gmra.mxu0 %v12437_v2  ;;  %11661 = vmatprep.mubr.f32.mxu1 %v12406_v59  ;;  %v1198_v62 = vadd.f32 %v11166_v55, %v1099_v53  ;;  %v1275_v25 = vadd.f32 %v1274_v51, %v1174_v54  ;;  %v12834_v54 = vand.u32 4294901760, %v12808_v46 }
 0x105   : > { %v1189_v57 = vpop.f32.mrf.mxu1  ;;  %11669 = vmatprep.subr.mxu0 %v12706_v24  ;;  %11677 = vmatprep.subr.mxu1 %v6591_v17 }
 0x106   : > { %v1286_v3 = vpop.f32.mrf.mxu0  ;;  %11670 = vmatpush3.msra.mxu0 %v12706_v24  ;;  %11671 = vmatprep.mubr.f32.mxu0 %v12494_v23  ;;  %v1190_v26 = vadd.f32 %v1189_v57, %v1092_v60  ;;  %v1293_v33 = vadd.f32 %v11176_v28, %v1198_v62 }
 0x107   : > { %v11183_v19 = vpop.f32.mrf.mxu1  ;;  %11662 = vmatmul.mubr.f32.vlgmr.msra.gmra.mxu1 %v12415_v61  ;;  %11687 = vmatprep.subr.mxu0 %v12709_v29 }
 0x108   : > { %v1372_v27 = vadd.f32 %v11183_v19, %v1281_v32  ;;  %11678 = vmatpush3.msra.mxu1 %v6591_v17  ;;  %v12776_v23 = vpop.f32.mrf.mxu0  ;;  %11672 = vmatmul.mubr.f32.vlgmr.msra.gmra.mxu0 %v12502_v18  ;;  %v10373_v18 = vld [vmem:[%s12111_s23 + $0xb0] sm:$0xff]  ;;  %v1287_v42 = vadd.f32 %v1286_v3, %v1190_v26  ;;  %v12810_v17 = vand.u32 4294901760, %v7074_v38 }
 0x109   : > { %v1365_v30 = vpop.f32.mrf.mxu1  ;;  %11664 = vmatprep.mubr.f32.mxu1 %v12428_v37  ;;  %11679 = vmatprep.subr.mxu1 %v6598_v58 }
 0x10a   : > { %v10432_v34 = vpack.c.bf16 %v1372_v27, %v1372_v27  ;;  %v1366_v35 = vadd.f32 %v1365_v30, %v1275_v25  ;;  %v12785_v36 = vpop.f32.mrf.mxu0  ;;  %11674 = vmatprep.mubr.f32.mxu0 %v12509_v21  ;;  %11680 = vmatpush3.msra.mxu1 %v6598_v58  ;;  %v12840_v57 = vsub.f32 %v7074_v38, %v12810_v17  ;;  %v12847_v58 = vand.u32 4294901760, %v12818_v50 }
 0x10b   : > { %v11186_v41 = vpop.f32.mrf.mxu1  ;;  %11665 = vmatmul.mubr.f32.gmra.mxu1 %v12437_v2  ;;  %11688 = vmatpush3.msra.mxu0 %v12709_v29  ;;  %v12805_v29 = vand.u32 4294901760, %v10373_v18 }
 0x10c   : > { %10280 = vst.msk [vmem:[%s12691_s6 + $0x14] sm:$0xf] %vm775_vm1, %v10432_v34  ;;  %v10431_v63 = vpack.c.bf16 %v1366_v35, %v1366_v35  ;;  %v1384_v44 = vadd.f32 %v11186_v41, %v1293_v33  ;;  %v12797_v21 = vpop.f32.mrf.mxu0  ;;  %11675 = vmatmul.mubr.f32.gmra.mxu0 %v12515_v7  ;;  %11681 = vmatprep.mubr.f32.mxu1 %v12406_v59 }
 0x10d   : > { %v1377_v43 = vpop.f32.mrf.mxu1  ;;  %11689 = vmatprep.subr.mxu0 %v12727_v11  ;;  %11697 = vmatprep.subr.mxu1 %v12694_v56  ;;  %v12837_v28 = vsub.f32 %v10373_v18, %v12805_v29  ;;  %v7149_v19 = vsub.f32 %v12818_v50, %v12847_v58 }
 0x10e   : > { %10279 = vst.msk [vmem:[%s12691_s6 + $0x10] sm:$0xf] %vm775_vm1, %v10431_v63  ;;  %v10434_v7 = vpack.c.bf16 %v1384_v44, %v1384_v44  ;;  %v1378_v48 = vadd.f32 %v1377_v43, %v1287_v42  ;;  %v1520_v49 = vpop.f32.mrf.mxu0  ;;  %11690 = vmatpush3.msra.mxu0 %v12727_v11  ;;  %11691 = vmatprep.mubr.f32.mxu0 %v12426_v0  ;;  %v12829_v0 = vand.u32 4294901760, %v7077_v47 }
 0x10f   : > { %v11203_v51 = vpop.f32.mrf.mxu1  ;;  %11682 = vmatmul.mubr.f32.vlgmr.msra.gmra.mxu1 %v12415_v61  ;;  %11707 = vmatprep.subr.mxu0 %v12724_v12  ;;  %v12827_v11 = vsub.f32 %v7071_v9, %v12801_v45  ;;  %v12865_v10 = vand.u32 4294901760, %v12837_v28  ;;  %v12893_v18 = vand.u32 4294901760, %v7149_v19 }
 0x110   : > { %10282 = vst.msk [vmem:[%s12691_s6 + $0x1c] sm:$0xf] %vm775_vm1, %v10434_v7  ;;  %v10433_v55 = vpack.c.bf16 %v1378_v48, %v1378_v48  ;;  %11698 = vmatpush3.msra.mxu1 %v12694_v56  ;;  %v11213_v52 = vpop.f32.mrf.mxu0  ;;  %11692 = vmatmul.mubr.f32.vlgmr.msra.gmra.mxu0 %v12435_v1  ;;  %v1618_v32 = vadd.f32 %v11203_v51, %v12776_v23 }
 0x111   : > { %v1611_v53 = vpop.f32.mrf.mxu1  ;;  %11684 = vmatprep.mubr.f32.mxu1 %v12428_v37  ;;  %11699 = vmatprep.subr.mxu1 %v12706_v24  ;;  %v12855_v3 = vand.u32 4294901760, %v12827_v11  ;;  %v7225_v9 = vsub.f32 %v12837_v28, %v12865_v10 }
 0x112   : > { %10281 = vst.msk [vmem:[%s12691_s6 + $0x18] sm:$0xf] %vm775_vm1, %v10433_v55  ;;  %v1705_v1 = vpop.f32.mrf.mxu0  ;;  %11694 = vmatprep.mubr.f32.mxu0 %v12453_v4  ;;  %11700 = vmatpush3.msra.mxu1 %v12706_v24  ;;  %v12858_v4 = vsub.f32 %v7077_v47, %v12829_v0  ;;  %v1713_v25 = vadd.f32 %v11213_v52, %v1618_v32 }
 0x113   : > { %v11206_v60 = vpop.f32.mrf.mxu1  ;;  %11685 = vmatmul.mubr.f32.gmra.mxu1 %v12437_v2  ;;  %11708 = vmatpush3.msra.mxu0 %v12724_v12  ;;  %v7218_v12 = vsub.f32 %v12808_v46, %v12834_v54 }
 0x114   : > { %v11216_v62 = vpop.f32.mrf.mxu0  ;;  %11695 = vmatmul.mubr.f32.gmra.mxu0 %v12463_v14  ;;  %11701 = vmatprep.mubr.f32.mxu1 %v12450_v13  ;;  %v12868_v14 = vand.u32 4294901760, %v12840_v57  ;;  %v1612_v13 = vadd.f32 %v1611_v53, %v12785_v36  ;;  %v1630_v26 = vadd.f32 %v11206_v60, %v12797_v21  ;;  %v12883_v23 = vand.u32 4294901760, %v12858_v4 }
 0x115   : > { %v1623_v6 = vpop.f32.mrf.mxu1  ;;  %11709 = vmatprep.subr.mxu0 %v12742_v40  ;;  %11717 = vmatprep.subr.mxu1 %v12694_v56 }
 0x116   : > { %v1719_v15 = vpop.f32.mrf.mxu0  ;;  %11710 = vmatpush3.msra.mxu0 %v12742_v40  ;;  %11711 = vmatprep.mubr.f32.mxu0 %v12406_v59  ;;  %v7159_v40 = vsub.f32 %v12827_v11, %v12855_v3  ;;  %v1706_v33 = vadd.f32 %v1705_v1, %v1612_v13  ;;  %v1624_v34 = vadd.f32 %v1623_v6, %v1520_v49 }
 0x117   : > { %v11223_v22 = vpop.f32.mrf.mxu1  ;;  %11702 = vmatmul.mubr.f32.vlgmr.msra.gmra.mxu1 %v12460_v5  ;;  %11727 = vmatprep.subr.mxu0 %v12780_v31  ;;  %v7219_v5 = vand.u32 4294901760, %v7218_v12  ;;  %v1727_v38 = vadd.f32 %v11216_v62, %v1630_v26  ;;  %v10383_v12 = vld [vmem:[%s12111_s23 + $0xc0] sm:$0xff] }
 0x118   : > { %11718 = vmatpush3.msra.mxu1 %v12694_v56  ;;  %v11233_v27 = vpop.f32.mrf.mxu0  ;;  %11712 = vmatmul.mubr.f32.vlgmr.msra.gmra.mxu0 %v12415_v61  ;;  %v7169_v56 = vsub.f32 %v12840_v57, %v12868_v14  ;;  %v1810_v35 = vadd.f32 %v11223_v22, %v1713_v25  ;;  %v12899_v42 = vand.u32 4294901760, %v7159_v40  ;;  %v1720_v44 = vadd.f32 %v1719_v15, %v1624_v34 }
 0x119   : > { %v1801_v30 = vpop.f32.mrf.mxu1  ;;  %11704 = vmatprep.mubr.f32.mxu1 %v12477_v16  ;;  %11719 = vmatprep.subr.mxu1 %v12706_v24  ;;  %v12927_v26 = vand.u32 4294901760, %v10383_v12 }
 0x11a   : > { %v1902_v36 = vpop.f32.mrf.mxu0  ;;  %11714 = vmatprep.mubr.f32.mxu0 %v12428_v37  ;;  %11720 = vmatpush3.msra.mxu1 %v12706_v24  ;;  %v1802_v39 = vadd.f32 %v1801_v30, %v1706_v33  ;;  %v7179_v24 = vsub.f32 %v12858_v4, %v12883_v23  ;;  %v1909_v21 = vadd.f32 %v11233_v27, %v1810_v35  ;;  %v12906_v7 = vand.u32 4294901760, %v7169_v56 }
 0x11b   : > { %v11226_v16 = vpop.f32.mrf.mxu1  ;;  %11705 = vmatmul.mubr.f32.gmra.mxu1 %v12486_v20  ;;  %11728 = vmatpush3.msra.mxu0 %v12780_v31  ;;  %v7226_v20 = vand.u32 4294901760, %v7225_v9  ;;  %v12948_v33 = vsub.f32 %v10383_v12, %v12927_v26 }
 0x11c   : > { %v11236_v41 = vpop.f32.mrf.mxu0  ;;  %11715 = vmatmul.mubr.f32.gmra.mxu0 %v12437_v2  ;;  %11721 = vmatprep.mubr.f32.mxu1 %v12406_v59  ;;  %v1826_v43 = vadd.f32 %v11226_v16, %v1727_v38  ;;  %v10384_v59 = vld [vmem:[%s12111_s23 + $0xc8] sm:$0xff]  ;;  %v1903_v49 = vadd.f32 %v1902_v36, %v1802_v39  ;;  %v12912_v53 = vand.u32 4294901760, %v7179_v24 }
 0x11d   : > { %v1817_v63 = vpop.f32.mrf.mxu1  ;;  %11729 = vmatprep.subr.mxu0 %v12805_v29  ;;  %11737 = vmatprep.subr.mxu1 %v7219_v5  ;;  %v12915_v60 = vand.u32 4294901760, %v10384_v59 }
 0x11e   : > { %v1914_v47 = vpop.f32.mrf.mxu0  ;;  %11730 = vmatpush3.msra.mxu0 %v12805_v29  ;;  %11731 = vmatprep.mubr.f32.mxu0 %v12893_v18  ;;  %v1818_v51 = vadd.f32 %v1817_v63, %v1720_v44 }
 0x11f   : > { %v11243_v48 = vpop.f32.mrf.mxu1  ;;  %11722 = vmatmul.mubr.f32.vlgmr.msra.gmra.mxu1 %v12415_v61  ;;  %11747 = vmatprep.subr.mxu0 %v12808_v46  ;;  %v1921_v61 = vadd.f32 %v11236_v41, %v1826_v43  ;;  %v12963_v41 = vand.u32 4294901760, %v12948_v33 }
 0x120   : > { %v2000_v55 = vadd.f32 %v11243_v48, %v1909_v21  ;;  %11738 = vmatpush3.msra.mxu1 %v7219_v5  ;;  %v11253_v52 = vpop.f32.mrf.mxu0  ;;  %11732 = vmatmul.mubr.f32.vlgmr.msra.gmra.mxu0 %v12899_v42  ;;  %v1915_v15 = vadd.f32 %v1914_v47, %v1818_v51 }
 0x121   : > { %v1993_v1 = vpop.f32.mrf.mxu1  ;;  %11724 = vmatprep.mubr.f32.mxu1 %v12428_v37  ;;  %11739 = vmatprep.subr.mxu1 %v7226_v20  ;;  %v7853_v47 = vsub.f32 %v12948_v33, %v12963_v41 }
 0x122   : > { %v10436_v32 = vpack.c.bf16 %v2000_v55, %v2000_v55  ;;  %v1994_v62 = vadd.f32 %v1993_v1, %v1903_v49  ;;  %v2128_v6 = vpop.f32.mrf.mxu0  ;;  %11734 = vmatprep.mubr.f32.mxu0 %v12906_v7  ;;  %11740 = vmatpush3.msra.mxu1 %v7226_v20 }
 0x123   : > { %v11246_v13 = vpop.f32.mrf.mxu1  ;;  %11725 = vmatmul.mubr.f32.gmra.mxu1 %v12437_v2  ;;  %11748 = vmatpush3.msra.mxu0 %v12808_v46  ;;  %v12930_v2 = vsub.f32 %v10384_v59, %v12915_v60 }
 0x124   : > { %10290 = vst.msk [vmem:[%s12691_s6 + $0x24] sm:$0xf] %vm775_vm1, %v10436_v32  ;;  %v10435_v37 = vpack.c.bf16 %v1994_v62, %v1994_v62  ;;  %v2012_v19 = vadd.f32 %v11246_v13, %v1921_v61  ;;  %v11256_v22 = vpop.f32.mrf.mxu0  ;;  %11735 = vmatmul.mubr.f32.gmra.mxu0 %v12912_v53  ;;  %11741 = vmatprep.mubr.f32.mxu1 %v12782_v8  ;;  %v7854_v32 = vand.u32 4294901760, %v7853_v47  ;;  %v10394_v13 = vld [vmem:[%s12111_s23 + $0xd8] sm:$0xff] }
 0x125   : > { %v2005_v25 = vpop.f32.mrf.mxu1  ;;  %11749 = vmatprep.subr.mxu0 %v12837_v28  ;;  %11757 = vmatprep.subr.mxu1 %v12780_v31 }
 0x126   : > { %10289 = vst.msk [vmem:[%s12691_s6 + $0x20] sm:$0xf] %vm775_vm1, %v10435_v37  ;;  %v10438_v46 = vpack.c.bf16 %v2012_v19, %v2012_v19  ;;  %v2006_v27 = vadd.f32 %v2005_v25, %v1915_v15  ;;  %v2148_v40 = vpop.f32.mrf.mxu0  ;;  %11750 = vmatpush3.msra.mxu0 %v12837_v28  ;;  %11751 = vmatprep.mubr.f32.mxu0 %v12818_v50  ;;  %v12945_v28 = vand.u32 4294901760, %v12930_v2 }
 0x127   : > { %v11263_v30 = vpop.f32.mrf.mxu1  ;;  %11742 = vmatmul.mubr.f32.vlgmr.msra.gmra.mxu1 %v12801_v45  ;;  %11767 = vmatprep.subr.mxu0 %v12834_v54 }
 0x128   : > { %10292 = vst.msk [vmem:[%s12691_s6 + $0x2c] sm:$0xf] %vm775_vm1, %v10438_v46  ;;  %v10437_v5 = vpack.c.bf16 %v2006_v27, %v2006_v27  ;;  %11758 = vmatpush3.msra.mxu1 %v12780_v31  ;;  %v11273_v9 = vpop.f32.mrf.mxu0  ;;  %11752 = vmatmul.mubr.f32.vlgmr.msra.gmra.mxu0 %v12827_v11  ;;  %v2246_v36 = vadd.f32 %v11263_v30, %v11253_v52  ;;  %v12989_v27 = vand.u32 4294901760, %v10394_v13 }
 0x129   : > { %v2239_v56 = vpop.f32.mrf.mxu1  ;;  %11744 = vmatprep.mubr.f32.mxu1 %v12810_v17  ;;  %11759 = vmatprep.subr.mxu1 %v12805_v29  ;;  %v7846_v39 = vsub.f32 %v12930_v2, %v12945_v28 }
 0x12a   : > { %10291 = vst.msk [vmem:[%s12691_s6 + $0x28] sm:$0xf] %vm775_vm1, %v10437_v5  ;;  %v2333_v34 = vpop.f32.mrf.mxu0  ;;  %11754 = vmatprep.mubr.f32.mxu0 %v12840_v57  ;;  %11760 = vmatpush3.msra.mxu1 %v12805_v29  ;;  %v2240_v24 = vadd.f32 %v2239_v56, %v2128_v6  ;;  %v2341_v20 = vadd.f32 %v11273_v9, %v2246_v36  ;;  %v10393_v56 = vld [vmem:[%s12111_s23 + $0xd0] sm:$0xff] }
 0x12b   : > { %v11266_v35 = vpop.f32.mrf.mxu1  ;;  %11745 = vmatmul.mubr.f32.gmra.mxu1 %v12829_v0  ;;  %11768 = vmatpush3.msra.mxu0 %v12834_v54 }
 0x12c   : > { %v11276_v16 = vpop.f32.mrf.mxu0  ;;  %11755 = vmatmul.mubr.f32.gmra.mxu0 %v12858_v4  ;;  %11761 = vmatprep.mubr.f32.mxu1 %v12847_v58  ;;  %v2258_v44 = vadd.f32 %v11266_v35, %v11256_v22  ;;  %v2334_v59 = vadd.f32 %v2333_v34, %v2240_v24  ;;  %v13001_v24 = vand.u32 4294901760, %v10393_v56 }
 0x12d   : > { %v2251_v38 = vpop.f32.mrf.mxu1  ;;  %11769 = vmatprep.subr.mxu0 %v12865_v10  ;;  %11777 = vmatprep.subr.mxu1 %v12780_v31 }
 0x12e   : > { %v2347_v63 = vpop.f32.mrf.mxu0  ;;  %11770 = vmatpush3.msra.mxu0 %v12865_v10  ;;  %11771 = vmatprep.mubr.f32.mxu0 %v12782_v8  ;;  %v7847_v10 = vand.u32 4294901760, %v7846_v39  ;;  %v2252_v48 = vadd.f32 %v2251_v38, %v2148_v40  ;;  %v2355_v55 = vadd.f32 %v11276_v16, %v2258_v44  ;;  %v13022_v47 = vsub.f32 %v10393_v56, %v13001_v24 }
 0x12f   : > { %v11283_v54 = vpop.f32.mrf.mxu1  ;;  %11762 = vmatmul.mubr.f32.vlgmr.msra.gmra.mxu1 %v12855_v3  ;;  %11787 = vmatprep.subr.mxu0 %v12915_v60 }
 0x130   : > { %11778 = vmatpush3.msra.mxu1 %v12780_v31  ;;  %v11293_v21 = vpop.f32.mrf.mxu0  ;;  %11772 = vmatmul.mubr.f32.vlgmr.msra.gmra.mxu0 %v12801_v45  ;;  %v2438_v49 = vadd.f32 %v11283_v54, %v2341_v20  ;;  %v2348_v62 = vadd.f32 %v2347_v63, %v2252_v48 }
 0x131   : > { %v2429_v43 = vpop.f32.mrf.mxu1  ;;  %11764 = vmatprep.mubr.f32.mxu1 %v12868_v14  ;;  %11779 = vmatprep.subr.mxu1 %v12805_v29 }
 0x132   : > { %v2530_v51 = vpop.f32.mrf.mxu0  ;;  %11774 = vmatprep.mubr.f32.mxu0 %v12810_v17  ;;  %11780 = vmatpush3.msra.mxu1 %v12805_v29  ;;  %v2430_v52 = vadd.f32 %v2429_v43, %v2334_v59  ;;  %v2537_v29 = vadd.f32 %v11293_v21, %v2438_v49 }
 0x133   : > { %v11286_v31 = vpop.f32.mrf.mxu1  ;;  %11765 = vmatmul.mubr.f32.gmra.mxu1 %v12883_v23  ;;  %11788 = vmatpush3.msra.mxu0 %v12915_v60 }
 0x134   : > { %v11296_v1 = vpop.f32.mrf.mxu0  ;;  %11775 = vmatmul.mubr.f32.gmra.mxu0 %v12829_v0  ;;  %11781 = vmatprep.mubr.f32.mxu1 %v12782_v8  ;;  %v2454_v6 = vadd.f32 %v11286_v31, %v2355_v55  ;;  %v2531_v37 = vadd.f32 %v2530_v51, %v2430_v52  ;;  %v13037_v52 = vand.u32 4294901760, %v13022_v47 }
 0x135   : > { %v2445_v61 = vpop.f32.mrf.mxu1  ;;  %11789 = vmatprep.subr.mxu0 %v12927_v26  ;;  %11797 = vmatprep.subr.mxu1 %v7847_v10 }
 0x136   : > { %v2542_v12 = vpop.f32.mrf.mxu0  ;;  %11790 = vmatpush3.msra.mxu0 %v12927_v26  ;;  %11791 = vmatprep.mubr.f32.mxu0 %v12893_v18  ;;  %v2446_v19 = vadd.f32 %v2445_v61, %v2348_v62  ;;  %v2549_v40 = vadd.f32 %v11296_v1, %v2454_v6 }
 0x137   : > { %v11303_v15 = vpop.f32.mrf.mxu1  ;;  %11782 = vmatmul.mubr.f32.vlgmr.msra.gmra.mxu1 %v12801_v45  ;;  %11807 = vmatprep.subr.mxu0 %v12930_v2 }
 0x138   : > { %v2628_v22 = vadd.f32 %v11303_v15, %v2537_v29  ;;  %11798 = vmatpush3.msra.mxu1 %v7847_v10  ;;  %v11313_v25 = vpop.f32.mrf.mxu0  ;;  %11792 = vmatmul.mubr.f32.vlgmr.msra.gmra.mxu0 %v12899_v42  ;;  %v2543_v35 = vadd.f32 %v2542_v12, %v2446_v19  ;;  %v8481_v12 = vsub.f32 %v13022_v47, %v13037_v52 }
 0x139   : > { %v2621_v46 = vpop.f32.mrf.mxu1  ;;  %11784 = vmatprep.mubr.f32.mxu1 %v12810_v17  ;;  %11799 = vmatprep.subr.mxu1 %v7854_v32 }
 0x13a   : > { %v10440_v30 = vpack.c.bf16 %v2628_v22, %v2628_v22  ;;  %v2622_v5 = vadd.f32 %v2621_v46, %v2531_v37  ;;  %v2756_v9 = vpop.f32.mrf.mxu0  ;;  %11794 = vmatprep.mubr.f32.mxu0 %v12906_v7  ;;  %11800 = vmatpush3.msra.mxu1 %v7854_v32 }
 0x13b   : > { %v11306_v34 = vpop.f32.mrf.mxu1  ;;  %11785 = vmatmul.mubr.f32.gmra.mxu1 %v12829_v0  ;;  %11808 = vmatpush3.msra.mxu0 %v12930_v2  ;;  %v13004_v2 = vsub.f32 %v10394_v13, %v12989_v27 }
 0x13c   : > { %10300 = vst.msk [vmem:[%s12691_s6 + $0x34] sm:$0xf] %vm775_vm1, %v10440_v30  ;;  %v10439_v36 = vpack.c.bf16 %v2622_v5, %v2622_v5  ;;  %v2640_v16 = vadd.f32 %v11306_v34, %v2549_v40  ;;  %v11316_v38 = vpop.f32.mrf.mxu0  ;;  %11795 = vmatmul.mubr.f32.gmra.mxu0 %v12912_v53  ;;  %11801 = vmatprep.mubr.f32.mxu1 %v12782_v8  ;;  %v8482_v30 = vand.u32 4294901760, %v8481_v12  ;;  %v10404_v34 = vld [vmem:[%s12111_s23 + $0xe8] sm:$0xff] }
 0x13d   : > { %v2633_v39 = vpop.f32.mrf.mxu1  ;;  %11809 = vmatprep.subr.mxu0 %v12948_v33  ;;  %11817 = vmatprep.subr.mxu1 %v12915_v60 }
 0x13e   : > { %10299 = vst.msk [vmem:[%s12691_s6 + $0x30] sm:$0xf] %vm775_vm1, %v10439_v36  ;;  %v10442_v63 = vpack.c.bf16 %v2640_v16, %v2640_v16  ;;  %v2634_v54 = vadd.f32 %v2633_v39, %v2543_v35  ;;  %v2776_v20 = vpop.f32.mrf.mxu0  ;;  %11810 = vmatpush3.msra.mxu0 %v12948_v33  ;;  %11811 = vmatprep.mubr.f32.mxu0 %v12818_v50  ;;  %v13019_v33 = vand.u32 4294901760, %v13004_v2 }
 0x13f   : > { %v11323_v44 = vpop.f32.mrf.mxu1  ;;  %11802 = vmatmul.mubr.f32.vlgmr.msra.gmra.mxu1 %v12801_v45  ;;  %11827 = vmatprep.subr.mxu0 %v12945_v28 }
 0x140   : > { %10302 = vst.msk [vmem:[%s12691_s6 + $0x3c] sm:$0xf] %vm775_vm1, %v10442_v63  ;;  %v10441_v21 = vpack.c.bf16 %v2634_v54, %v2634_v54  ;;  %11818 = vmatpush3.msra.mxu1 %v12915_v60  ;;  %v11333_v43 = vpop.f32.mrf.mxu0  ;;  %11812 = vmatmul.mubr.f32.vlgmr.msra.gmra.mxu0 %v12827_v11  ;;  %v2874_v49 = vadd.f32 %v11323_v44, %v11313_v25  ;;  %v13063_v54 = vand.u32 4294901760, %v10404_v34 }
 0x141   : > { %v2867_v10 = vpop.f32.mrf.mxu1  ;;  %11804 = vmatprep.mubr.f32.mxu1 %v12810_v17  ;;  %11819 = vmatprep.subr.mxu1 %v12927_v26  ;;  %v8474_v55 = vsub.f32 %v13004_v2, %v13019_v33 }
 0x142   : > { %10301 = vst.msk [vmem:[%s12691_s6 + $0x38] sm:$0xf] %vm775_vm1, %v10441_v21  ;;  %v2961_v59 = vpop.f32.mrf.mxu0  ;;  %11814 = vmatprep.mubr.f32.mxu0 %v12840_v57  ;;  %11820 = vmatpush3.msra.mxu1 %v12927_v26  ;;  %v2868_v1 = vadd.f32 %v2867_v10, %v2756_v9  ;;  %v2969_v32 = vadd.f32 %v11333_v43, %v2874_v49  ;;  %v10403_v10 = vld [vmem:[%s12111_s23 + $0xe0] sm:$0xff] }
 0x143   : > { %v11326_v48 = vpop.f32.mrf.mxu1  ;;  %11805 = vmatmul.mubr.f32.gmra.mxu1 %v12829_v0  ;;  %11828 = vmatpush3.msra.mxu0 %v12945_v28 }
 0x144   : > { %v11336_v51 = vpop.f32.mrf.mxu0  ;;  %11815 = vmatmul.mubr.f32.gmra.mxu0 %v12858_v4  ;;  %11821 = vmatprep.mubr.f32.mxu1 %v12847_v58  ;;  %v2886_v62 = vadd.f32 %v11326_v48, %v11316_v38  ;;  %v2962_v13 = vadd.f32 %v2961_v59, %v2868_v1  ;;  %v13075_v1 = vand.u32 4294901760, %v10403_v10 }
 0x145   : > { %v2879_v31 = vpop.f32.mrf.mxu1  ;;  %11829 = vmatprep.subr.mxu0 %v12963_v41  ;;  %11837 = vmatprep.subr.mxu1 %v12915_v60 }
 0x146   : > { %v2975_v61 = vpop.f32.mrf.mxu0  ;;  %11830 = vmatpush3.msra.mxu0 %v12963_v41  ;;  %11831 = vmatprep.mubr.f32.mxu0 %v12782_v8  ;;  %v8475_v41 = vand.u32 4294901760, %v8474_v55  ;;  %v2880_v15 = vadd.f32 %v2879_v31, %v2776_v20  ;;  %v2983_v22 = vadd.f32 %v11336_v51, %v2886_v62  ;;  %v13096_v12 = vsub.f32 %v10403_v10, %v13075_v1 }
 0x147   : > { %v11343_v28 = vpop.f32.mrf.mxu1  ;;  %11822 = vmatmul.mubr.f32.vlgmr.msra.gmra.mxu1 %v12855_v3  ;;  %11847 = vmatprep.subr.mxu0 %v12989_v27 }
 0x148   : > { %11838 = vmatpush3.msra.mxu1 %v12915_v60  ;;  %v11353_v29 = vpop.f32.mrf.mxu0  ;;  %11832 = vmatmul.mubr.f32.vlgmr.msra.gmra.mxu0 %v12801_v45  ;;  %v3066_v37 = vadd.f32 %v11343_v28, %v2969_v32  ;;  %v2976_v5 = vadd.f32 %v2975_v61, %v2880_v15 }
 0x149   : > { %v3057_v6 = vpop.f32.mrf.mxu1  ;;  %11824 = vmatprep.mubr.f32.mxu1 %v12868_v14  ;;  %11839 = vmatprep.subr.mxu1 %v12927_v26 }
 0x14a   : > { %v3158_v19 = vpop.f32.mrf.mxu0  ;;  %11834 = vmatprep.mubr.f32.mxu0 %v12810_v17  ;;  %11840 = vmatpush3.msra.mxu1 %v12927_v26  ;;  %v3058_v25 = vadd.f32 %v3057_v6, %v2962_v13  ;;  %v3165_v26 = vadd.f32 %v11353_v29, %v3066_v37 }
 0x14b   : > { %v11346_v60 = vpop.f32.mrf.mxu1  ;;  %11825 = vmatmul.mubr.f32.gmra.mxu1 %v12883_v23  ;;  %11848 = vmatpush3.msra.mxu0 %v12989_v27 }
 0x14c   : > { %v11356_v46 = vpop.f32.mrf.mxu0  ;;  %11835 = vmatmul.mubr.f32.gmra.mxu0 %v12829_v0  ;;  %11841 = vmatprep.mubr.f32.mxu1 %v12782_v8  ;;  %v3082_v9 = vadd.f32 %v11346_v60, %v2983_v22  ;;  %v3159_v36 = vadd.f32 %v3158_v19, %v3058_v25  ;;  %v13111_v25 = vand.u32 4294901760, %v13096_v12 }
 0x14d   : > { %v3073_v40 = vpop.f32.mrf.mxu1  ;;  %11849 = vmatprep.subr.mxu0 %v13001_v24  ;;  %11857 = vmatprep.subr.mxu1 %v8475_v41 }
 0x14e   : > { %v3170_v56 = vpop.f32.mrf.mxu0  ;;  %11850 = vmatpush3.msra.mxu0 %v13001_v24  ;;  %11851 = vmatprep.mubr.f32.mxu0 %v12893_v18  ;;  %v3074_v16 = vadd.f32 %v3073_v40, %v2976_v5  ;;  %v3177_v20 = vadd.f32 %v11356_v46, %v3082_v9 }
 0x14f   : > { %v11363_v35 = vpop.f32.mrf.mxu1  ;;  %11842 = vmatmul.mubr.f32.vlgmr.msra.gmra.mxu1 %v12801_v45  ;;  %11867 = vmatprep.subr.mxu0 %v13004_v2 }
 0x150   : > { %v3256_v38 = vadd.f32 %v11363_v35, %v3165_v26  ;;  %11858 = vmatpush3.msra.mxu1 %v8475_v41  ;;  %v11373_v39 = vpop.f32.mrf.mxu0  ;;  %11852 = vmatmul.mubr.f32.vlgmr.msra.gmra.mxu0 %v12899_v42  ;;  %v3171_v48 = vadd.f32 %v3170_v56, %v3074_v16  ;;  %v9109_v56 = vsub.f32 %v13096_v12, %v13111_v25 }
 0x151   : > { %v3249_v63 = vpop.f32.mrf.mxu1  ;;  %11844 = vmatprep.mubr.f32.mxu1 %v12810_v17  ;;  %11859 = vmatprep.subr.mxu1 %v8482_v30 }
 0x152   : > { %v10444_v44 = vpack.c.bf16 %v3256_v38, %v3256_v38  ;;  %v3250_v21 = vadd.f32 %v3249_v63, %v3159_v36  ;;  %v3384_v43 = vpop.f32.mrf.mxu0  ;;  %11854 = vmatprep.mubr.f32.mxu0 %v12906_v7  ;;  %11860 = vmatpush3.msra.mxu1 %v8482_v30  ;;  %v9572_v38 = vld [vmem:[%s13392_s0] sm:$0xff] }
 0x153   : > { %v11366_v59 = vpop.f32.mrf.mxu1  ;;  %11845 = vmatmul.mubr.f32.gmra.mxu1 %v12829_v0  ;;  %11868 = vmatpush3.msra.mxu0 %v13004_v2  ;;  %v13078_v2 = vsub.f32 %v10404_v34, %v13063_v54 }
 0x154   : > { %10310 = vst.msk [vmem:[%s12691_s6 + $0x44] sm:$0xf] %vm775_vm1, %v10444_v44  ;;  %v10443_v49 = vpack.c.bf16 %v3250_v21, %v3250_v21  ;;  %v3268_v51 = vadd.f32 %v11366_v59, %v3177_v20  ;;  %v11376_v31 = vpop.f32.mrf.mxu0  ;;  %11855 = vmatmul.mubr.f32.gmra.mxu0 %v12912_v53  ;;  %11861 = vmatprep.mubr.f32.mxu1 %v12782_v8 }
 0x155   : > { %v3261_v55 = vpop.f32.mrf.mxu1  ;;  %11869 = vmatprep.subr.mxu0 %v13022_v47  ;;  %11877 = vmatprep.subr.mxu1 %v12989_v27 }
 0x156   : > { %10309 = vst.msk [vmem:[%s12691_s6 + $0x40] sm:$0xf] %vm775_vm1, %v10443_v49  ;;  %v10446_v61 = vpack.c.bf16 %v3268_v51, %v3268_v51  ;;  %v3262_v28 = vadd.f32 %v3261_v55, %v3171_v48  ;;  %v3404_v32 = vpop.f32.mrf.mxu0  ;;  %11870 = vmatpush3.msra.mxu0 %v13022_v47  ;;  %11871 = vmatprep.mubr.f32.mxu0 %v12818_v50  ;;  %v13093_v47 = vand.u32 4294901760, %v13078_v2  ;;  %v10414_v48 = vld [vmem:[%s12111_s23 + $0xf8] sm:$0xff]  ;;  %v9580_v49 = vsel %vm158_vm0, %v9572_v38, 0  ;;  %v9573_v51 = vld [vmem:[%s13392_s0 + $0x8] sm:$0xff] }
 0x157   : > { %v11383_v62 = vpop.f32.mrf.mxu1  ;;  %11862 = vmatmul.mubr.f32.vlgmr.msra.gmra.mxu1 %v12801_v45  ;;  %11887 = vmatprep.subr.mxu0 %v13019_v33  ;;  %v9574_v55 = vld [vmem:[%s13392_s0 + $0x10] sm:$0xff] }
 0x158   : > { %10312 = vst.msk [vmem:[%s12691_s6 + $0x4c] sm:$0xf] %vm775_vm1, %v10446_v61  ;;  %v10445_v29 = vpack.c.bf16 %v3262_v28, %v3262_v28  ;;  %11878 = vmatpush3.msra.mxu1 %v12989_v27  ;;  %v11393_v6 = vpop.f32.mrf.mxu0  ;;  %11872 = vmatmul.mubr.f32.vlgmr.msra.gmra.mxu0 %v12827_v11  ;;  %v3502_v37 = vadd.f32 %v11383_v62, %v11373_v39 }
 0x159   : > { %v3495_v41 = vpop.f32.mrf.mxu1  ;;  %11864 = vmatprep.mubr.f32.mxu1 %v12810_v17  ;;  %11879 = vmatprep.subr.mxu1 %v13001_v24  ;;  %v9102_v22 = vsub.f32 %v13078_v2, %v13093_v47 }
 0x15a   : > { %10311 = vst.msk [vmem:[%s12691_s6 + $0x48] sm:$0xf] %vm775_vm1, %v10445_v29  ;;  %v3589_v13 = vpop.f32.mrf.mxu0  ;;  %11874 = vmatprep.mubr.f32.mxu0 %v12840_v57  ;;  %11880 = vmatpush3.msra.mxu1 %v13001_v24  ;;  %v3496_v46 = vadd.f32 %v3495_v41, %v3384_v43  ;;  %v3597_v30 = vadd.f32 %v11393_v6, %v3502_v37  ;;  %v13149_v29 = vand.u32 4294901760, %v10414_v48  ;;  %v13151_v6 = vand.u32 4294901760, %v9580_v49 }
 0x15b   : > { %v11386_v15 = vpop.f32.mrf.mxu1  ;;  %11865 = vmatmul.mubr.f32.gmra.mxu1 %v12829_v0  ;;  %11888 = vmatpush3.msra.mxu0 %v13019_v33  ;;  %v9583_v41 = vsel %vm158_vm0, %v9573_v51, 0 }
 0x15c   : > { %v11396_v19 = vpop.f32.mrf.mxu0  ;;  %11875 = vmatmul.mubr.f32.gmra.mxu0 %v12858_v4  ;;  %11881 = vmatprep.mubr.f32.mxu1 %v12847_v58  ;;  %v3514_v5 = vadd.f32 %v11386_v15, %v11376_v31  ;;  %v3590_v34 = vadd.f32 %v3589_v13, %v3496_v46 }
 0x15d   : > { %v3507_v60 = vpop.f32.mrf.mxu1  ;;  %11889 = vmatprep.subr.mxu0 %v13037_v52  ;;  %11897 = vmatprep.subr.mxu1 %v12989_v27 }
 0x15e   : > { %v3603_v40 = vpop.f32.mrf.mxu0  ;;  %11890 = vmatpush3.msra.mxu0 %v13037_v52  ;;  %11891 = vmatprep.mubr.f32.mxu0 %v12782_v8  ;;  %v9103_v52 = vand.u32 4294901760, %v9102_v22  ;;  %v3508_v35 = vadd.f32 %v3507_v60, %v3404_v32  ;;  %v3611_v39 = vadd.f32 %v11396_v19, %v3514_v5  ;;  %v9586_v60 = vsel %vm158_vm0, %v9574_v55, 0  ;;  %v9575_v22 = vld [vmem:[%s13392_s0 + $0x18] sm:$0xff] }
 0x15f   : > { %v11403_v33 = vpop.f32.mrf.mxu1  ;;  %11882 = vmatmul.mubr.f32.vlgmr.msra.gmra.mxu1 %v12855_v3  ;;  %11907 = vmatprep.subr.mxu0 %v13063_v54  ;;  %v13170_v5 = vand.u32 4294901760, %v9583_v41 }
 0x160   : > { %11898 = vmatpush3.msra.mxu1 %v12989_v27  ;;  %v11413_v26 = vpop.f32.mrf.mxu0  ;;  %11892 = vmatmul.mubr.f32.vlgmr.msra.gmra.mxu0 %v12801_v45  ;;  %v3694_v36 = vadd.f32 %v11403_v33, %v3597_v30  ;;  %v3604_v21 = vadd.f32 %v3603_v40, %v3508_v35 }
 0x161   : > { %v3685_v9 = vpop.f32.mrf.mxu1  ;;  %11884 = vmatprep.mubr.f32.mxu1 %v12868_v14  ;;  %11899 = vmatprep.subr.mxu1 %v13001_v24 }
 0x162   : > { %v3786_v16 = vpop.f32.mrf.mxu0  ;;  %11894 = vmatprep.mubr.f32.mxu0 %v12810_v17  ;;  %11900 = vmatpush3.msra.mxu1 %v13001_v24  ;;  %v3686_v63 = vadd.f32 %v3685_v9, %v3590_v34  ;;  %v9110_v24 = vand.u32 4294901760, %v9109_v56  ;;  %v3793_v43 = vadd.f32 %v11413_v26, %v3694_v36  ;;  %v13177_v9 = vsub.f32 %v10414_v48, %v13149_v29 }
 0x163   : > { %v11406_v27 = vpop.f32.mrf.mxu1  ;;  %11885 = vmatmul.mubr.f32.gmra.mxu1 %v12883_v23  ;;  %11908 = vmatpush3.msra.mxu0 %v13063_v54  ;;  %v9589_v56 = vsel %vm158_vm0, %v9575_v22, 0  ;;  %v13187_v36 = vsub.f32 %v9580_v49, %v13151_v6 }
 0x164   : > { %v11416_v20 = vpop.f32.mrf.mxu0  ;;  %11895 = vmatmul.mubr.f32.gmra.mxu0 %v12829_v0  ;;  %11901 = vmatprep.mubr.f32.mxu1 %v12782_v8  ;;  %v3710_v10 = vadd.f32 %v11406_v27, %v3611_v39  ;;  %v3787_v61 = vadd.f32 %v3786_v16, %v3686_v63  ;;  %v13203_v63 = vand.u32 4294901760, %v13177_v9 }
 0x165   : > { %v3701_v44 = vpop.f32.mrf.mxu1  ;;  %11909 = vmatprep.subr.mxu0 %v13075_v1  ;;  %11917 = vmatprep.subr.mxu1 %v9103_v52 }
 0x166   : > { %v3798_v59 = vpop.f32.mrf.mxu0  ;;  %11910 = vmatpush3.msra.mxu0 %v13075_v1  ;;  %11911 = vmatprep.mubr.f32.mxu0 %v12893_v18  ;;  %v3702_v28 = vadd.f32 %v3701_v44, %v3604_v21  ;;  %v3805_v13 = vadd.f32 %v11416_v20, %v3710_v10 }
 0x167   : > { %v11423_v31 = vpop.f32.mrf.mxu1  ;;  %11902 = vmatmul.mubr.f32.vlgmr.msra.gmra.mxu1 %v12801_v45  ;;  %11927 = vmatprep.subr.mxu0 %v13078_v2 }
 0x168   : > { %v3884_v32 = vadd.f32 %v11423_v31, %v3793_v43  ;;  %11918 = vmatpush3.msra.mxu1 %v9103_v52  ;;  %v13145_v18 = vpop.f32.mrf.mxu0  ;;  %11912 = vmatmul.mubr.f32.vlgmr.msra.gmra.mxu0 %v12899_v42  ;;  %v10413_v42 = vld [vmem:[%s12111_s23 + $0xf0] sm:$0xff]  ;;  %v3799_v40 = vadd.f32 %v3798_v59, %v3702_v28  ;;  %v13179_v52 = vand.u32 4294901760, %v9586_v60 }
 0x169   : > { %v3877_v62 = vpop.f32.mrf.mxu1  ;;  %11904 = vmatprep.mubr.f32.mxu1 %v12810_v17  ;;  %11919 = vmatprep.subr.mxu1 %v9110_v24 }
 0x16a   : > { %v10448_v15 = vpack.c.bf16 %v3884_v32, %v3884_v32  ;;  %v3878_v37 = vadd.f32 %v3877_v62, %v3787_v61  ;;  %v13154_v19 = vpop.f32.mrf.mxu0  ;;  %11914 = vmatprep.mubr.f32.mxu0 %v12906_v7  ;;  %11920 = vmatpush3.msra.mxu1 %v9110_v24  ;;  %v13209_v44 = vsub.f32 %v9586_v60, %v13179_v52  ;;  %v9660_v24 = vand.u32 4294901760, %v13187_v36 }
 0x16b   : > { %v11426_v46 = vpop.f32.mrf.mxu1  ;;  %11905 = vmatmul.mubr.f32.gmra.mxu1 %v12829_v0  ;;  %11928 = vmatpush3.msra.mxu0 %v13078_v2  ;;  %v13174_v2 = vand.u32 4294901760, %v10413_v42 }
 0x16c   : > { %10320 = vst.msk [vmem:[%s12691_s6 + $0x54] sm:$0xf] %vm775_vm1, %v10448_v15  ;;  %v10447_v33 = vpack.c.bf16 %v3878_v37, %v3878_v37  ;;  %v3896_v30 = vadd.f32 %v11426_v46, %v3805_v13  ;;  %v13166_v7 = vpop.f32.mrf.mxu0  ;;  %11915 = vmatmul.mubr.f32.gmra.mxu0 %v12912_v53  ;;  %11921 = vmatprep.mubr.f32.mxu1 %v12782_v8 }
 0x16d   : > { %v3889_v26 = vpop.f32.mrf.mxu1  ;;  %11929 = vmatprep.subr.mxu0 %v13096_v12  ;;  %11937 = vmatprep.subr.mxu1 %v13063_v54  ;;  %v13206_v20 = vsub.f32 %v10413_v42, %v13174_v2  ;;  %v9661_v31 = vsub.f32 %v13187_v36, %v9660_v24 }
 0x16e   : > { %10319 = vst.msk [vmem:[%s12691_s6 + $0x50] sm:$0xf] %vm775_vm1, %v10447_v33  ;;  %v10450_v53 = vpack.c.bf16 %v3896_v30, %v3896_v30  ;;  %v3890_v34 = vadd.f32 %v3889_v26, %v3799_v40  ;;  %v4032_v35 = vpop.f32.mrf.mxu0  ;;  %11930 = vmatpush3.msra.mxu0 %v13096_v12  ;;  %11931 = vmatprep.mubr.f32.mxu0 %v12818_v50  ;;  %v13198_v50 = vand.u32 4294901760, %v9589_v56 }
 0x16f   : > { %v11443_v16 = vpop.f32.mrf.mxu1  ;;  %11922 = vmatmul.mubr.f32.vlgmr.msra.gmra.mxu1 %v12801_v45  ;;  %11947 = vmatprep.subr.mxu0 %v13093_v47  ;;  %v13196_v12 = vsub.f32 %v9583_v41, %v13170_v5  ;;  %v13230_v49 = vand.u32 4294901760, %v13206_v20  ;;  %v9662_v42 = vand.u32 4294901760, %v9661_v31 }
 0x170   : > { %10322 = vst.msk [vmem:[%s12691_s6 + $0x5c] sm:$0xf] %vm775_vm1, %v10450_v53  ;;  %v10449_v27 = vpack.c.bf16 %v3890_v34, %v3890_v34  ;;  %11938 = vmatpush3.msra.mxu1 %v13063_v54  ;;  %v11453_v38 = vpop.f32.mrf.mxu0  ;;  %11932 = vmatmul.mubr.f32.vlgmr.msra.gmra.mxu0 %v12827_v11  ;;  %v4130_v43 = vadd.f32 %v11443_v16, %v13145_v18 }
 0x171   : > { %v4123_v39 = vpop.f32.mrf.mxu1  ;;  %11924 = vmatprep.mubr.f32.mxu1 %v12810_v17  ;;  %11939 = vmatprep.subr.mxu1 %v13075_v1  ;;  %v9670_v59 = vand.u32 4294901760, %v13196_v12  ;;  %v9737_v41 = vsub.f32 %v13206_v20, %v13230_v49 }
 0x172   : > { %10321 = vst.msk [vmem:[%s12691_s6 + $0x58] sm:$0xf] %vm775_vm1, %v10449_v27  ;;  %v4217_v11 = vpop.f32.mrf.mxu0  ;;  %11934 = vmatprep.mubr.f32.mxu0 %v12840_v57  ;;  %11940 = vmatpush3.msra.mxu1 %v13075_v1  ;;  %v13223_v57 = vsub.f32 %v9589_v56, %v13198_v50  ;;  %v4225_v61 = vadd.f32 %v11453_v38, %v4130_v43 }
 0x173   : > { %v11446_v21 = vpop.f32.mrf.mxu1  ;;  %11925 = vmatmul.mubr.f32.gmra.mxu1 %v12829_v0  ;;  %11948 = vmatpush3.msra.mxu0 %v13093_v47  ;;  %v9730_v47 = vsub.f32 %v13177_v9, %v13203_v63 }
 0x174   : > { %v11456_v10 = vpop.f32.mrf.mxu0  ;;  %11935 = vmatmul.mubr.f32.gmra.mxu0 %v12858_v4  ;;  %11941 = vmatprep.mubr.f32.mxu1 %v12847_v58  ;;  %v9680_v4 = vand.u32 4294901760, %v13209_v44  ;;  %v4124_v58 = vadd.f32 %v4123_v39, %v13154_v19  ;;  %v4142_v28 = vadd.f32 %v11446_v21, %v13166_v7  ;;  %v9690_v18 = vand.u32 4294901760, %v13223_v57 }
 0x175   : > { %v4135_v48 = vpop.f32.mrf.mxu1  ;;  %11949 = vmatprep.subr.mxu0 %v13111_v25  ;;  %11957 = vmatprep.subr.mxu1 %v13063_v54 }
 0x176   : > { %v4231_v51 = vpop.f32.mrf.mxu0  ;;  %11950 = vmatpush3.msra.mxu0 %v13111_v25  ;;  %11951 = vmatprep.mubr.f32.mxu0 %v12782_v8  ;;  %v9671_v25 = vsub.f32 %v13196_v12, %v9670_v59  ;;  %v4218_v13 = vadd.f32 %v4217_v11, %v4124_v58  ;;  %v4136_v15 = vadd.f32 %v4135_v48, %v4032_v35 }
 0x177   : > { %v11463_v55 = vpop.f32.mrf.mxu1  ;;  %11942 = vmatmul.mubr.f32.vlgmr.msra.gmra.mxu1 %v12855_v3  ;;  %11967 = vmatprep.subr.mxu0 %v13149_v29  ;;  %v9731_v3 = vand.u32 4294901760, %v9730_v47  ;;  %v4239_v60 = vadd.f32 %v11456_v10, %v4142_v28  ;;  %v9691_v33 = vsub.f32 %v13223_v57, %v9690_v18 }
 0x178   : > { %11958 = vmatpush3.msra.mxu1 %v13063_v54  ;;  %v11473_v32 = vpop.f32.mrf.mxu0  ;;  %11952 = vmatmul.mubr.f32.vlgmr.msra.gmra.mxu0 %v12801_v45  ;;  %v9681_v54 = vsub.f32 %v13209_v44, %v9680_v4  ;;  %v4322_v37 = vadd.f32 %v11463_v55, %v4225_v61  ;;  %v9672_v40 = vand.u32 4294901760, %v9671_v25 }
 0x179   : > { %v4313_v62 = vpop.f32.mrf.mxu1  ;;  %11944 = vmatprep.mubr.f32.mxu1 %v12868_v14  ;;  %11959 = vmatprep.subr.mxu1 %v13075_v1  ;;  %v9692_v38 = vand.u32 4294901760, %v9691_v33 }
 0x17a   : > { %v4414_v19 = vpop.f32.mrf.mxu0  ;;  %11954 = vmatprep.mubr.f32.mxu0 %v12810_v17  ;;  %11960 = vmatpush3.msra.mxu1 %v13075_v1  ;;  %v4314_v22 = vadd.f32 %v4313_v62, %v4218_v13  ;;  %v9738_v1 = vand.u32 4294901760, %v9737_v41  ;;  %v4421_v7 = vadd.f32 %v11473_v32, %v4322_v37  ;;  %v9682_v53 = vand.u32 4294901760, %v9681_v54 }
 0x17b   : > { %v11466_v14 = vpop.f32.mrf.mxu1  ;;  %11945 = vmatmul.mubr.f32.gmra.mxu1 %v12883_v23  ;;  %11968 = vmatpush3.msra.mxu0 %v13149_v29  ;;  %v4232_v23 = vadd.f32 %v4231_v51, %v4136_v15 }
 0x17c   : > { %v11476_v46 = vpop.f32.mrf.mxu0  ;;  %11955 = vmatmul.mubr.f32.gmra.mxu0 %v12829_v0  ;;  %11961 = vmatprep.mubr.f32.mxu1 %v12782_v8  ;;  %v4338_v26 = vadd.f32 %v11466_v14, %v4239_v60  ;;  %v4415_v8 = vadd.f32 %v4414_v19, %v4314_v22 }
 0x17d   : > { %v4329_v30 = vpop.f32.mrf.mxu1  ;;  %11969 = vmatprep.subr.mxu0 %v13174_v2  ;;  %11977 = vmatprep.subr.mxu1 %v9731_v3 }
 0x17e   : > { %v4426_v56 = vpop.f32.mrf.mxu0  ;;  %11970 = vmatpush3.msra.mxu0 %v13174_v2  ;;  %11971 = vmatprep.mubr.f32.mxu0 %v9662_v42  ;;  %v4330_v35 = vadd.f32 %v4329_v30, %v4232_v23  ;;  %v4433_v11 = vadd.f32 %v11476_v46, %v4338_v26 }
 0x17f   : > { %v11483_v34 = vpop.f32.mrf.mxu1  ;;  %11962 = vmatmul.mubr.f32.vlgmr.msra.gmra.mxu1 %v12801_v45  ;;  %11987 = vmatprep.subr.mxu0 %v13177_v9 }
 0x180   : > { %v4512_v16 = vadd.f32 %v11483_v34, %v4421_v7  ;;  %11978 = vmatpush3.msra.mxu1 %v9731_v3  ;;  %v11493_v27 = vpop.f32.mrf.mxu0  ;;  %11972 = vmatmul.mubr.f32.vlgmr.msra.gmra.mxu0 %v9672_v40  ;;  %v4427_v48 = vadd.f32 %v4426_v56, %v4330_v35 }
 0x181   : > { %v4505_v39 = vpop.f32.mrf.mxu1  ;;  %11964 = vmatprep.mubr.f32.mxu1 %v12810_v17  ;;  %11979 = vmatprep.subr.mxu1 %v9738_v1 }
 0x182   : > { %v10452_v21 = vpack.c.bf16 %v4512_v16, %v4512_v16  ;;  %v4506_v43 = vadd.f32 %v4505_v39, %v4415_v8  ;;  %v4640_v10 = vpop.f32.mrf.mxu0  ;;  %11974 = vmatprep.mubr.f32.mxu0 %v9682_v53  ;;  %11980 = vmatpush3.msra.mxu1 %v9738_v1 }
 0x183   : > { %v11486_v45 = vpop.f32.mrf.mxu1  ;;  %11965 = vmatmul.mubr.f32.gmra.mxu1 %v12829_v0  ;;  %11988 = vmatpush3.msra.mxu0 %v13177_v9 }
 0x184   : > { %10330 = vst.msk [vmem:[%s12691_s6 + $0x64] sm:$0xf] %vm775_vm1, %v10452_v21  ;;  %v10451_v47 = vpack.c.bf16 %v4506_v43, %v4506_v43  ;;  %v4524_v58 = vadd.f32 %v11486_v45, %v4433_v11  ;;  %v11496_v17 = vpop.f32.mrf.mxu0  ;;  %11975 = vmatmul.mubr.f32.gmra.mxu0 %v9692_v38  ;;  %11981 = vmatprep.mubr.f32.mxu1 %v13151_v6 }
 0x185   : > { %v4517_v51 = vpop.f32.mrf.mxu1  ;;  %11989 = vmatprep.subr.mxu0 %v13206_v20  ;;  %11997 = vmatprep.subr.mxu1 %v13149_v29 }
 0x186   : > { %10329 = vst.msk [vmem:[%s12691_s6 + $0x60] sm:$0xf] %vm775_vm1, %v10451_v47  ;;  %v10454_v0 = vpack.c.bf16 %v4524_v58, %v4524_v58  ;;  %v4518_v9 = vadd.f32 %v4517_v51, %v4427_v48  ;;  %v4660_v31 = vpop.f32.mrf.mxu0  ;;  %11990 = vmatpush3.msra.mxu0 %v13206_v20  ;;  %11991 = vmatprep.mubr.f32.mxu0 %v13187_v36 }
 0x187   : > { %v11503_v55 = vpop.f32.mrf.mxu1  ;;  %11982 = vmatmul.mubr.f32.vlgmr.msra.gmra.mxu1 %v13170_v5  ;;  %12007 = vmatprep.subr.mxu0 %v13203_v63 }
 0x188   : > { %10332 = vst.msk [vmem:[%s12691_s6 + $0x6c] sm:$0xf] %vm775_vm1, %v10454_v0  ;;  %v10453_v61 = vpack.c.bf16 %v4518_v9, %v4518_v9  ;;  %11998 = vmatpush3.msra.mxu1 %v13149_v29  ;;  %v11513_v28 = vpop.f32.mrf.mxu0  ;;  %11992 = vmatmul.mubr.f32.vlgmr.msra.gmra.mxu0 %v13196_v12  ;;  %v4758_v62 = vadd.f32 %v11503_v55, %v11493_v27 }
 0x189   : > { %v4751_v32 = vpop.f32.mrf.mxu1  ;;  %11984 = vmatprep.mubr.f32.mxu1 %v13179_v52  ;;  %11999 = vmatprep.subr.mxu1 %v13174_v2 }
 0x18a   : > { %10331 = vst.msk [vmem:[%s12691_s6 + $0x68] sm:$0xf] %vm775_vm1, %v10453_v61  ;;  %v4845_v20 = vpop.f32.mrf.mxu0  ;;  %11994 = vmatprep.mubr.f32.mxu0 %v13209_v44  ;;  %12000 = vmatpush3.msra.mxu1 %v13174_v2  ;;  %v4752_v54 = vadd.f32 %v4751_v32, %v4640_v10 }
 0x18b   : > { %v11506_v25 = vpop.f32.mrf.mxu1  ;;  %11985 = vmatmul.mubr.f32.gmra.mxu1 %v13198_v50  ;;  %12008 = vmatpush3.msra.mxu0 %v13203_v63  ;;  %v4853_v63 = vadd.f32 %v11513_v28, %v4758_v62 }
 0x18c   : > { %v11516_v3 = vpop.f32.mrf.mxu0  ;;  %11995 = vmatmul.mubr.f32.gmra.mxu0 %v13223_v57  ;;  %12001 = vmatprep.mubr.f32.mxu1 %v9660_v24  ;;  %v4770_v37 = vadd.f32 %v11506_v25, %v11496_v17 }
 0x18d   : > { %v4763_v41 = vpop.f32.mrf.mxu1  ;;  %12009 = vmatprep.subr.mxu0 %v13230_v49  ;;  %12017 = vmatprep.subr.mxu1 %v13149_v29 }
 0x18e   : > { %v4859_v13 = vpop.f32.mrf.mxu0  ;;  %12010 = vmatpush3.msra.mxu0 %v13230_v49  ;;  %12011 = vmatprep.mubr.f32.mxu0 %v13151_v6  ;;  %v4846_v49 = vadd.f32 %v4845_v20, %v4752_v54  ;;  %v4764_v19 = vadd.f32 %v4763_v41, %v4660_v31 }
 0x18f   : > { %v11523_v15 = vpop.f32.mrf.mxu1  ;;  %12002 = vmatmul.mubr.f32.vlgmr.msra.gmra.mxu1 %v9670_v59 }
 0x190   : > { %12018 = vmatpush3.msra.mxu1 %v13149_v29  ;;  %v11533_v36 = vpop.f32.mrf.mxu0  ;;  %12012 = vmatmul.mubr.f32.vlgmr.msra.gmra.mxu0 %v13170_v5  ;;  %v4950_v42 = vadd.f32 %v11523_v15, %v4853_v63  ;;  %v4867_v29 = vadd.f32 %v11516_v3, %v4770_v37 }
 0x191   : > { %v4941_v24 = vpop.f32.mrf.mxu1  ;;  %12004 = vmatprep.mubr.f32.mxu1 %v9680_v4  ;;  %12019 = vmatprep.subr.mxu1 %v13174_v2  ;;  %v4860_v4 = vadd.f32 %v4859_v13, %v4764_v19 }
 0x192   : > { %v5042_v14 = vpop.f32.mrf.mxu0  ;;  %12014 = vmatprep.mubr.f32.mxu0 %v13179_v52  ;;  %12020 = vmatpush3.msra.mxu1 %v13174_v2  ;;  %v4942_v59 = vadd.f32 %v4941_v24, %v4846_v49  ;;  %v5049_v22 = vadd.f32 %v11533_v36, %v4950_v42 }
 0x193   : > { %v11526_v12 = vpop.f32.mrf.mxu1  ;;  %12005 = vmatmul.mubr.f32.gmra.mxu1 %v9690_v18 }
 0x194   : > { %v11536_v60 = vpop.f32.mrf.mxu0  ;;  %12015 = vmatmul.mubr.f32.gmra.mxu0 %v13198_v50  ;;  %12021 = vmatprep.mubr.f32.mxu1 %v13151_v6  ;;  %v4966_v46 = vadd.f32 %v11526_v12, %v4867_v29  ;;  %v5043_v2 = vadd.f32 %v5042_v14, %v4942_v59 }
 0x195   : > { %v4957_v44 = vpop.f32.mrf.mxu1 }
 0x196   : > { %v5054_v40 = vpop.f32.mrf.mxu0  ;;  %v4958_v30 = vadd.f32 %v4957_v44, %v4860_v4  ;;  %v5061_v23 = vadd.f32 %v11536_v60, %v4966_v46 }
 0x197   : > { %v11543_v33 = vpop.f32.mrf.mxu1  ;;  %12022 = vmatmul.mubr.f32.vlgmr.msra.gmra.mxu1 %v13170_v5 }
 0x198   : > { %v5140_v57 = vadd.f32 %v11543_v33, %v5049_v22  ;;  %v11553_v18 = vpop.f32.mrf.mxu0  ;;  %12024 = vmatprep.mubr.f32.mxu1 %v13179_v52  ;;  %v5055_v53 = vadd.f32 %v5054_v40, %v4958_v30 }
 0x199   : > { %v5133_v1 = vpop.f32.mrf.mxu1 }
 0x19a   : > { %v10456_v7 = vpack.c.bf16 %v5140_v57, %v5140_v57  ;;  %v5134_v6 = vadd.f32 %v5133_v1, %v5043_v2  ;;  %v5268_v26 = vpop.f32.mrf.mxu0 }
 0x19b   : > { %v11546_v56 = vpop.f32.mrf.mxu1  ;;  %12025 = vmatmul.mubr.f32.gmra.mxu1 %v13198_v50 }
 0x19c   : > { %10340 = vst.msk [vmem:[%s12691_s6 + $0x74] sm:$0xf] %vm775_vm1, %v10456_v7  ;;  %v10455_v5 = vpack.c.bf16 %v5134_v6, %v5134_v6  ;;  %v5152_v34 = vadd.f32 %v11546_v56, %v5061_v23  ;;  %v11556_v8 = vpop.f32.mrf.mxu0 }
 0x19d   : > { %v5145_v35 = vpop.f32.mrf.mxu1 }
 0x19e   : > { %10339 = vst.msk [vmem:[%s12691_s6 + $0x70] sm:$0xf] %vm775_vm1, %v10455_v5  ;;  %v10458_v52 = vpack.c.bf16 %v5152_v34, %v5152_v34  ;;  %v5146_v16 = vadd.f32 %v5145_v35, %v5055_v53  ;;  %v5288_v27 = vpop.f32.mrf.mxu0 }
 0x19f   : > { %v11563_v38 = vpop.f32.mrf.mxu1 }
 0x1a0   : > { %10342 = vst.msk [vmem:[%s12691_s6 + $0x7c] sm:$0xf] %vm775_vm1, %v10458_v52  ;;  %v10457_v39 = vpack.c.bf16 %v5146_v16, %v5146_v16  ;;  %v11573_v11 = vpop.f32.mrf.mxu0  ;;  %v5386_v10 = vadd.f32 %v11563_v38, %v11553_v18 }
 0x1a1   : > { %v5379_v21 = vpop.f32.mrf.mxu1 }
 0x1a2   : > { %10341 = vst.msk [vmem:[%s12691_s6 + $0x78] sm:$0xf] %vm775_vm1, %v10457_v39  ;;  %v5473_v50 = vpop.f32.mrf.mxu0  ;;  %v5380_v47 = vadd.f32 %v5379_v21, %v5268_v26  ;;  %v5481_v51 = vadd.f32 %v11573_v11, %v5386_v10 }
 0x1a3   : > { %v11566_v43 = vpop.f32.mrf.mxu1 }
 0x1a4   : > { %v11576_v45 = vpop.f32.mrf.mxu0  ;;  %v5398_v0 = vadd.f32 %v11566_v43, %v11556_v8  ;;  %v5474_v55 = vadd.f32 %v5473_v50, %v5380_v47 }
 0x1a5   : > { %v5391_v48 = vpop.f32.mrf.mxu1 }
 0x1a6   : > { %v5487_v58 = vpop.f32.mrf.mxu0  ;;  %v5392_v61 = vadd.f32 %v5391_v48, %v5288_v27  ;;  %v5495_v25 = vadd.f32 %v11576_v45, %v5398_v0 }
 0x1a7   : > { %v11583_v17 = vpop.f32.mrf.mxu1 }
 0x1a8   : > { %v11593_v9 = vpop.f32.mrf.mxu0  ;;  %v5578_v28 = vadd.f32 %v11583_v17, %v5481_v51  ;;  %v5488_v54 = vadd.f32 %v5487_v58, %v5392_v61 }
 0x1a9   : > { %v5569_v31 = vpop.f32.mrf.mxu1 }
 0x1aa   : > { %v5670_v32 = vpop.f32.mrf.mxu0  ;;  %v5570_v62 = vadd.f32 %v5569_v31, %v5474_v55  ;;  %v5677_v13 = vadd.f32 %v11593_v9, %v5578_v28 }
 0x1ab   : > { %v11586_v20 = vpop.f32.mrf.mxu1 }
 0x1ac   : > { %v11596_v3 = vpop.f32.mrf.mxu0  ;;  %v5594_v15 = vadd.f32 %v11586_v20, %v5495_v25  ;;  %v5671_v36 = vadd.f32 %v5670_v32, %v5570_v62 }
 0x1ad   : > { %v5585_v41 = vpop.f32.mrf.mxu1 }
 0x1ae   : > { %v5682_v63 = vpop.f32.mrf.mxu0  ;;  %v5586_v24 = vadd.f32 %v5585_v41, %v5488_v54  ;;  %v5689_v14 = vadd.f32 %v11596_v3, %v5594_v15 }
 0x1af   : > { %v11603_v37 = vpop.f32.mrf.mxu1 }
 0x1b0   : > { %v5768_v49 = vadd.f32 %v11603_v37, %v5677_v13  ;;  %v11613_v19 = vpop.f32.mrf.mxu0  ;;  %v5683_v44 = vadd.f32 %v5682_v63, %v5586_v24 }
 0x1b1   : > { %v5761_v42 = vpop.f32.mrf.mxu1 }
 0x1b2   : > { %v10460_v12 = vpack.c.bf16 %v5768_v49, %v5768_v49  ;;  %v5762_v29 = vadd.f32 %v5761_v42, %v5671_v36  ;;  %v5896_v59 = vpop.f32.mrf.mxu0 }
 0x1b3   : > { %v11606_v60 = vpop.f32.mrf.mxu1 }
 0x1b4   : > { %10350 = vst.msk [vmem:[%s12691_s6 + $0x84] sm:$0xf] %vm775_vm1, %v10460_v12  ;;  %v10459_v4 = vpack.c.bf16 %v5762_v29, %v5762_v29  ;;  %v5780_v22 = vadd.f32 %v11606_v60, %v5689_v14  ;;  %v11616_v46 = vpop.f32.mrf.mxu0 }
 0x1b5   : > { %v5773_v40 = vpop.f32.mrf.mxu1 }
 0x1b6   : > { %10349 = vst.msk [vmem:[%s12691_s6 + $0x80] sm:$0xf] %vm775_vm1, %v10459_v4  ;;  %v10462_v33 = vpack.c.bf16 %v5780_v22, %v5780_v22  ;;  %v5774_v2 = vadd.f32 %v5773_v40, %v5683_v44  ;;  %v5916_v30 = vpop.f32.mrf.mxu0 }
 0x1b7   : > { %v11623_v57 = vpop.f32.mrf.mxu1 }
 0x1b8   : > { %10352 = vst.msk [vmem:[%s12691_s6 + $0x8c] sm:$0xf] %vm775_vm1, %v10462_v33  ;;  %v10461_v18 = vpack.c.bf16 %v5774_v2, %v5774_v2  ;;  %v11633_v1 = vpop.f32.mrf.mxu0  ;;  %v6014_v26 = vadd.f32 %v11623_v57, %v11613_v19 }
 0x1b9   : > { %v6007_v23 = vpop.f32.mrf.mxu1 }
 0x1ba   : > { %10351 = vst.msk [vmem:[%s12691_s6 + $0x88] sm:$0xf] %vm775_vm1, %v10461_v18  ;;  %v6101_v7 = vpop.f32.mrf.mxu0  ;;  %v6008_v5 = vadd.f32 %v6007_v23, %v5896_v59  ;;  %v6109_v35 = vadd.f32 %v11633_v1, %v6014_v26 }
 0x1bb   : > { %v11626_v6 = vpop.f32.mrf.mxu1 }
 0x1bc   : > { %v11636_v56 = vpop.f32.mrf.mxu0  ;;  %v6026_v52 = vadd.f32 %v11626_v6, %v11616_v46  ;;  %v6102_v38 = vadd.f32 %v6101_v7, %v6008_v5 }
 0x1bd   : > { %v6019_v53 = vpop.f32.mrf.mxu1 }
 0x1be   : > { %v6115_v34 = vpop.f32.mrf.mxu0  ;;  %v6020_v39 = vadd.f32 %v6019_v53, %v5916_v30  ;;  %v6123_v43 = vadd.f32 %v11636_v56, %v6026_v52 }
 0x1bf   : > { %v11643_v8 = vpop.f32.mrf.mxu1 }
 0x1c0   : > { %v11653_v16 = vpop.f32.mrf.mxu0  ;;  %v6206_v11 = vadd.f32 %v11643_v8, %v6109_v35  ;;  %v6116_v47 = vadd.f32 %v6115_v34, %v6020_v39 }
 0x1c1   : > { %v6197_v27 = vpop.f32.mrf.mxu1 }
 0x1c2   : > { %v6298_v21 = vpop.f32.mrf.mxu0  ;;  %v6198_v10 = vadd.f32 %v6197_v27, %v6102_v38  ;;  %v6305_v58 = vadd.f32 %v11653_v16, %v6206_v11 }
 0x1c3   : > { %v11646_v50 = vpop.f32.mrf.mxu1 }
 0x1c4   : > { %v11656_v45 = vpop.f32.mrf.mxu0  ;;  %v6222_v17 = vadd.f32 %v11646_v50, %v6123_v43  ;;  %v6299_v9 = vadd.f32 %v6298_v21, %v6198_v10 }
 0x1c5   : > { %v6213_v48 = vpop.f32.mrf.mxu1 }
 0x1c6   : > { %v6310_v51 = vpop.f32.mrf.mxu0  ;;  %v6214_v31 = vadd.f32 %v6213_v48, %v6116_v47  ;;  %v6317_v32 = vadd.f32 %v11656_v45, %v6222_v17 }
 0x1c7   : > { %v11663_v0 = vpop.f32.mrf.mxu1 }
 0x1c8   : > { %v6396_v55 = vadd.f32 %v11663_v0, %v6305_v58  ;;  %v11673_v61 = vpop.f32.mrf.mxu0  ;;  %v6311_v41 = vadd.f32 %v6310_v51, %v6214_v31 }
 0x1c9   : > { %v6389_v28 = vpop.f32.mrf.mxu1 }
 0x1ca   : > { %v10464_v20 = vpack.c.bf16 %v6396_v55, %v6396_v55  ;;  %v6390_v25 = vadd.f32 %v6389_v28, %v6299_v9  ;;  %v6524_v62 = vpop.f32.mrf.mxu0 }
 0x1cb   : > { %v11666_v3 = vpop.f32.mrf.mxu1 }
 0x1cc   : > { %10360 = vst.msk [vmem:[%s12691_s6 + $0x94] sm:$0xf] %vm775_vm1, %v10464_v20  ;;  %v10463_v54 = vpack.c.bf16 %v6390_v25, %v6390_v25  ;;  %v6408_v13 = vadd.f32 %v11666_v3, %v6317_v32  ;;  %v11676_v15 = vpop.f32.mrf.mxu0 }
 0x1cd   : > { %v6401_v63 = vpop.f32.mrf.mxu1 }
 0x1ce   : > { %10359 = vst.msk [vmem:[%s12691_s6 + $0x90] sm:$0xf] %vm775_vm1, %v10463_v54  ;;  %v10466_v37 = vpack.c.bf16 %v6408_v13, %v6408_v13  ;;  %v6402_v36 = vadd.f32 %v6401_v63, %v6311_v41  ;;  %v6544_v24 = vpop.f32.mrf.mxu0 }
 0x1cf   : > { %v11683_v49 = vpop.f32.mrf.mxu1 }
 0x1d0   : > { %10362 = vst.msk [vmem:[%s12691_s6 + $0x9c] sm:$0xf] %vm775_vm1, %v10466_v37  ;;  %v10465_v19 = vpack.c.bf16 %v6402_v36, %v6402_v36  ;;  %v11693_v42 = vpop.f32.mrf.mxu0  ;;  %v6642_v59 = vadd.f32 %v11683_v49, %v11673_v61 }
 0x1d1   : > { %v6635_v14 = vpop.f32.mrf.mxu1 }
 0x1d2   : > { %10361 = vst.msk [vmem:[%s12691_s6 + $0x98] sm:$0xf] %vm775_vm1, %v10465_v19  ;;  %v6729_v12 = vpop.f32.mrf.mxu0  ;;  %v6636_v4 = vadd.f32 %v6635_v14, %v6524_v62  ;;  %v6737_v40 = vadd.f32 %v11693_v42, %v6642_v59 }
 0x1d3   : > { %v11686_v29 = vpop.f32.mrf.mxu1 }
 0x1d4   : > { %v11696_v60 = vpop.f32.mrf.mxu0  ;;  %v6654_v33 = vadd.f32 %v11686_v29, %v11676_v15  ;;  %v6730_v57 = vadd.f32 %v6729_v12, %v6636_v4 }
 0x1d5   : > { %v6647_v44 = vpop.f32.mrf.mxu1 }
 0x1d6   : > { %v6743_v22 = vpop.f32.mrf.mxu0  ;;  %v6648_v18 = vadd.f32 %v6647_v44, %v6544_v24  ;;  %v6751_v6 = vadd.f32 %v11696_v60, %v6654_v33 }
 0x1d7   : > { %v11703_v46 = vpop.f32.mrf.mxu1 }
 0x1d8   : > { %v11713_v2 = vpop.f32.mrf.mxu0  ;;  %v6834_v1 = vadd.f32 %v11703_v46, %v6737_v40  ;;  %v6744_v5 = vadd.f32 %v6743_v22, %v6648_v18 }
 0x1d9   : > { %v6825_v30 = vpop.f32.mrf.mxu1 }
 0x1da   : > { %v6926_v23 = vpop.f32.mrf.mxu0  ;;  %v6826_v26 = vadd.f32 %v6825_v30, %v6730_v57  ;;  %v6933_v34 = vadd.f32 %v11713_v2, %v6834_v1 }
 0x1db   : > { %v11706_v7 = vpop.f32.mrf.mxu1 }
 0x1dc   : > { %v11716_v56 = vpop.f32.mrf.mxu0  ;;  %v6850_v8 = vadd.f32 %v11706_v7, %v6751_v6  ;;  %v6927_v16 = vadd.f32 %v6926_v23, %v6826_v26 }
 0x1dd   : > { %v6841_v53 = vpop.f32.mrf.mxu1 }
 0x1de   : > { %v6938_v35 = vpop.f32.mrf.mxu0  ;;  %v6842_v27 = vadd.f32 %v6841_v53, %v6744_v5  ;;  %v6945_v21 = vadd.f32 %v11716_v56, %v6850_v8 }
 0x1df   : > { %v11723_v52 = vpop.f32.mrf.mxu1 }
 0x1e0   : > { %v7024_v38 = vadd.f32 %v11723_v52, %v6933_v34  ;;  %v11733_v39 = vpop.f32.mrf.mxu0  ;;  %v6939_v48 = vadd.f32 %v6938_v35, %v6842_v27 }
 0x1e1   : > { %v7017_v11 = vpop.f32.mrf.mxu1 }
 0x1e2   : > { %v10468_v50 = vpack.c.bf16 %v7024_v38, %v7024_v38  ;;  %v7018_v43 = vadd.f32 %v7017_v11, %v6927_v16  ;;  %v7152_v10 = vpop.f32.mrf.mxu0 }
 0x1e3   : > { %v11726_v45 = vpop.f32.mrf.mxu1 }
 0x1e4   : > { %10370 = vst.msk [vmem:[%s12691_s6 + $0xa4] sm:$0xf] %vm775_vm1, %v10468_v50  ;;  %v10467_v47 = vpack.c.bf16 %v7018_v43, %v7018_v43  ;;  %v7036_v58 = vadd.f32 %v11726_v45, %v6945_v21  ;;  %v11736_v17 = vpop.f32.mrf.mxu0 }
 0x1e5   : > { %v7029_v51 = vpop.f32.mrf.mxu1 }
 0x1e6   : > { %10369 = vst.msk [vmem:[%s12691_s6 + $0xa0] sm:$0xf] %vm775_vm1, %v10467_v47  ;;  %v10470_v0 = vpack.c.bf16 %v7036_v58, %v7036_v58  ;;  %v7030_v9 = vadd.f32 %v7029_v51, %v6939_v48  ;;  %v7172_v31 = vpop.f32.mrf.mxu0 }
 0x1e7   : > { %v11743_v55 = vpop.f32.mrf.mxu1 }
 0x1e8   : > { %10372 = vst.msk [vmem:[%s12691_s6 + $0xac] sm:$0xf] %vm775_vm1, %v10470_v0  ;;  %v10469_v61 = vpack.c.bf16 %v7030_v9, %v7030_v9  ;;  %v11753_v28 = vpop.f32.mrf.mxu0  ;;  %v7270_v62 = vadd.f32 %v11743_v55, %v11733_v39 }
 0x1e9   : > { %v7263_v32 = vpop.f32.mrf.mxu1 }
 0x1ea   : > { %10371 = vst.msk [vmem:[%s12691_s6 + $0xa8] sm:$0xf] %vm775_vm1, %v10469_v61  ;;  %v7357_v20 = vpop.f32.mrf.mxu0  ;;  %v7264_v54 = vadd.f32 %v7263_v32, %v7152_v10  ;;  %v7365_v63 = vadd.f32 %v11753_v28, %v7270_v62 }
 0x1eb   : > { %v11746_v25 = vpop.f32.mrf.mxu1 }
 0x1ec   : > { %v11756_v3 = vpop.f32.mrf.mxu0  ;;  %v7282_v37 = vadd.f32 %v11746_v25, %v11736_v17  ;;  %v7358_v49 = vadd.f32 %v7357_v20, %v7264_v54 }
 0x1ed   : > { %v7275_v41 = vpop.f32.mrf.mxu1 }
 0x1ee   : > { %v7371_v13 = vpop.f32.mrf.mxu0  ;;  %v7276_v19 = vadd.f32 %v7275_v41, %v7172_v31  ;;  %v7379_v29 = vadd.f32 %v11756_v3, %v7282_v37 }
 0x1ef   : > { %v11763_v15 = vpop.f32.mrf.mxu1 }
 0x1f0   : > { %v11773_v36 = vpop.f32.mrf.mxu0  ;;  %v7462_v42 = vadd.f32 %v11763_v15, %v7365_v63  ;;  %v7372_v4 = vadd.f32 %v7371_v13, %v7276_v19 }
 0x1f1   : > { %v7453_v24 = vpop.f32.mrf.mxu1 }
 0x1f2   : > { %v7554_v14 = vpop.f32.mrf.mxu0  ;;  %v7454_v59 = vadd.f32 %v7453_v24, %v7358_v49  ;;  %v7561_v22 = vadd.f32 %v11773_v36, %v7462_v42 }
 0x1f3   : > { %v11766_v12 = vpop.f32.mrf.mxu1 }
 0x1f4   : > { %v11776_v60 = vpop.f32.mrf.mxu0  ;;  %v7478_v46 = vadd.f32 %v11766_v12, %v7379_v29  ;;  %v7555_v2 = vadd.f32 %v7554_v14, %v7454_v59 }
 0x1f5   : > { %v7469_v44 = vpop.f32.mrf.mxu1 }
 0x1f6   : > { %v7566_v40 = vpop.f32.mrf.mxu0  ;;  %v7470_v30 = vadd.f32 %v7469_v44, %v7372_v4  ;;  %v7573_v23 = vadd.f32 %v11776_v60, %v7478_v46 }
 0x1f7   : > { %v11783_v33 = vpop.f32.mrf.mxu1 }
 0x1f8   : > { %v7652_v57 = vadd.f32 %v11783_v33, %v7561_v22  ;;  %v11793_v18 = vpop.f32.mrf.mxu0  ;;  %v7567_v53 = vadd.f32 %v7566_v40, %v7470_v30 }
 0x1f9   : > { %v7645_v1 = vpop.f32.mrf.mxu1 }
 0x1fa   : > { %v10472_v7 = vpack.c.bf16 %v7652_v57, %v7652_v57  ;;  %v7646_v6 = vadd.f32 %v7645_v1, %v7555_v2  ;;  %v7780_v26 = vpop.f32.mrf.mxu0 }
 0x1fb   : > { %v11786_v56 = vpop.f32.mrf.mxu1 }
 0x1fc   : > { %10380 = vst.msk [vmem:[%s12691_s6 + $0xb4] sm:$0xf] %vm775_vm1, %v10472_v7  ;;  %v10471_v5 = vpack.c.bf16 %v7646_v6, %v7646_v6  ;;  %v7664_v34 = vadd.f32 %v11786_v56, %v7573_v23  ;;  %v11796_v8 = vpop.f32.mrf.mxu0 }
 0x1fd   : > { %v7657_v35 = vpop.f32.mrf.mxu1 }
 0x1fe   : > { %10379 = vst.msk [vmem:[%s12691_s6 + $0xb0] sm:$0xf] %vm775_vm1, %v10471_v5  ;;  %v10474_v52 = vpack.c.bf16 %v7664_v34, %v7664_v34  ;;  %v7658_v16 = vadd.f32 %v7657_v35, %v7567_v53  ;;  %v7800_v27 = vpop.f32.mrf.mxu0 }
 0x1ff   : > { %v11803_v38 = vpop.f32.mrf.mxu1 }
 0x200   : > { %10382 = vst.msk [vmem:[%s12691_s6 + $0xbc] sm:$0xf] %vm775_vm1, %v10474_v52  ;;  %v10473_v39 = vpack.c.bf16 %v7658_v16, %v7658_v16  ;;  %v11813_v11 = vpop.f32.mrf.mxu0  ;;  %v7898_v10 = vadd.f32 %v11803_v38, %v11793_v18 }
 0x201   : > { %v7891_v21 = vpop.f32.mrf.mxu1 }
 0x202   : > { %10381 = vst.msk [vmem:[%s12691_s6 + $0xb8] sm:$0xf] %vm775_vm1, %v10473_v39  ;;  %v7985_v50 = vpop.f32.mrf.mxu0  ;;  %v7892_v47 = vadd.f32 %v7891_v21, %v7780_v26  ;;  %v7993_v51 = vadd.f32 %v11813_v11, %v7898_v10 }
 0x203   : > { %v11806_v43 = vpop.f32.mrf.mxu1 }
 0x204   : > { %v11816_v45 = vpop.f32.mrf.mxu0  ;;  %v7910_v0 = vadd.f32 %v11806_v43, %v11796_v8  ;;  %v7986_v55 = vadd.f32 %v7985_v50, %v7892_v47 }
 0x205   : > { %v7903_v48 = vpop.f32.mrf.mxu1 }
 0x206   : > { %v7999_v58 = vpop.f32.mrf.mxu0  ;;  %v7904_v61 = vadd.f32 %v7903_v48, %v7800_v27  ;;  %v8007_v25 = vadd.f32 %v11816_v45, %v7910_v0 }
 0x207   : > { %v11823_v17 = vpop.f32.mrf.mxu1 }
 0x208   : > { %v11833_v9 = vpop.f32.mrf.mxu0  ;;  %v8090_v28 = vadd.f32 %v11823_v17, %v7993_v51  ;;  %v8000_v54 = vadd.f32 %v7999_v58, %v7904_v61 }
 0x209   : > { %v8081_v31 = vpop.f32.mrf.mxu1 }
 0x20a   : > { %v8182_v32 = vpop.f32.mrf.mxu0  ;;  %v8082_v62 = vadd.f32 %v8081_v31, %v7986_v55  ;;  %v8189_v13 = vadd.f32 %v11833_v9, %v8090_v28 }
 0x20b   : > { %v11826_v20 = vpop.f32.mrf.mxu1 }
 0x20c   : > { %v11836_v3 = vpop.f32.mrf.mxu0  ;;  %v8106_v15 = vadd.f32 %v11826_v20, %v8007_v25  ;;  %v8183_v36 = vadd.f32 %v8182_v32, %v8082_v62 }
 0x20d   : > { %v8097_v41 = vpop.f32.mrf.mxu1 }
 0x20e   : > { %v8194_v63 = vpop.f32.mrf.mxu0  ;;  %v8098_v24 = vadd.f32 %v8097_v41, %v8000_v54  ;;  %v8201_v14 = vadd.f32 %v11836_v3, %v8106_v15 }
 0x20f   : > { %v11843_v37 = vpop.f32.mrf.mxu1 }
 0x210   : > { %v8280_v49 = vadd.f32 %v11843_v37, %v8189_v13  ;;  %v11853_v19 = vpop.f32.mrf.mxu0  ;;  %v8195_v44 = vadd.f32 %v8194_v63, %v8098_v24 }
 0x211   : > { %v8273_v42 = vpop.f32.mrf.mxu1 }
 0x212   : > { %v10476_v12 = vpack.c.bf16 %v8280_v49, %v8280_v49  ;;  %v8274_v29 = vadd.f32 %v8273_v42, %v8183_v36  ;;  %v8408_v59 = vpop.f32.mrf.mxu0 }
 0x213   : > { %v11846_v60 = vpop.f32.mrf.mxu1 }
 0x214   : > { %10390 = vst.msk [vmem:[%s12691_s6 + $0xc4] sm:$0xf] %vm775_vm1, %v10476_v12  ;;  %v10475_v4 = vpack.c.bf16 %v8274_v29, %v8274_v29  ;;  %v8292_v22 = vadd.f32 %v11846_v60, %v8201_v14  ;;  %v11856_v46 = vpop.f32.mrf.mxu0 }
 0x215   : > { %v8285_v40 = vpop.f32.mrf.mxu1 }
 0x216   : > { %10389 = vst.msk [vmem:[%s12691_s6 + $0xc0] sm:$0xf] %vm775_vm1, %v10475_v4  ;;  %v10478_v33 = vpack.c.bf16 %v8292_v22, %v8292_v22  ;;  %v8286_v2 = vadd.f32 %v8285_v40, %v8195_v44  ;;  %v8428_v30 = vpop.f32.mrf.mxu0 }
 0x217   : > { %v11863_v57 = vpop.f32.mrf.mxu1 }
 0x218   : > { %10392 = vst.msk [vmem:[%s12691_s6 + $0xcc] sm:$0xf] %vm775_vm1, %v10478_v33  ;;  %v10477_v18 = vpack.c.bf16 %v8286_v2, %v8286_v2  ;;  %v11873_v1 = vpop.f32.mrf.mxu0  ;;  %v8526_v26 = vadd.f32 %v11863_v57, %v11853_v19 }
 0x219   : > { %v8519_v23 = vpop.f32.mrf.mxu1 }
 0x21a   : > { %10391 = vst.msk [vmem:[%s12691_s6 + $0xc8] sm:$0xf] %vm775_vm1, %v10477_v18  ;;  %v8613_v7 = vpop.f32.mrf.mxu0  ;;  %v8520_v5 = vadd.f32 %v8519_v23, %v8408_v59  ;;  %v8621_v35 = vadd.f32 %v11873_v1, %v8526_v26 }
 0x21b   : > { %v11866_v6 = vpop.f32.mrf.mxu1 }
 0x21c   : > { %v11876_v56 = vpop.f32.mrf.mxu0  ;;  %v8538_v52 = vadd.f32 %v11866_v6, %v11856_v46  ;;  %v8614_v38 = vadd.f32 %v8613_v7, %v8520_v5 }
 0x21d   : > { %v8531_v53 = vpop.f32.mrf.mxu1 }
 0x21e   : > { %v8627_v34 = vpop.f32.mrf.mxu0  ;;  %v8532_v39 = vadd.f32 %v8531_v53, %v8428_v30  ;;  %v8635_v43 = vadd.f32 %v11876_v56, %v8538_v52 }
 0x21f   : > { %v11883_v8 = vpop.f32.mrf.mxu1 }
 0x220   : > { %v11893_v16 = vpop.f32.mrf.mxu0  ;;  %v8718_v11 = vadd.f32 %v11883_v8, %v8621_v35  ;;  %v8628_v47 = vadd.f32 %v8627_v34, %v8532_v39 }
 0x221   : > { %v8709_v27 = vpop.f32.mrf.mxu1 }
 0x222   : > { %v8810_v21 = vpop.f32.mrf.mxu0  ;;  %v8710_v10 = vadd.f32 %v8709_v27, %v8614_v38  ;;  %v8817_v58 = vadd.f32 %v11893_v16, %v8718_v11 }
 0x223   : > { %v11886_v50 = vpop.f32.mrf.mxu1 }
 0x224   : > { %v11896_v45 = vpop.f32.mrf.mxu0  ;;  %v8734_v17 = vadd.f32 %v11886_v50, %v8635_v43  ;;  %v8811_v9 = vadd.f32 %v8810_v21, %v8710_v10 }
 0x225   : > { %v8725_v48 = vpop.f32.mrf.mxu1 }
 0x226   : > { %v8822_v51 = vpop.f32.mrf.mxu0  ;;  %v8726_v31 = vadd.f32 %v8725_v48, %v8628_v47  ;;  %v8829_v32 = vadd.f32 %v11896_v45, %v8734_v17 }
 0x227   : > { %v11903_v0 = vpop.f32.mrf.mxu1 }
 0x228   : > { %v8908_v55 = vadd.f32 %v11903_v0, %v8817_v58  ;;  %v11913_v61 = vpop.f32.mrf.mxu0  ;;  %v8823_v41 = vadd.f32 %v8822_v51, %v8726_v31 }
 0x229   : > { %v8901_v28 = vpop.f32.mrf.mxu1 }
 0x22a   : > { %v10480_v20 = vpack.c.bf16 %v8908_v55, %v8908_v55  ;;  %v8902_v25 = vadd.f32 %v8901_v28, %v8811_v9  ;;  %v9036_v62 = vpop.f32.mrf.mxu0 }
 0x22b   : > { %v11906_v3 = vpop.f32.mrf.mxu1 }
 0x22c   : > { %10400 = vst.msk [vmem:[%s12691_s6 + $0xd4] sm:$0xf] %vm775_vm1, %v10480_v20  ;;  %v10479_v54 = vpack.c.bf16 %v8902_v25, %v8902_v25  ;;  %v8920_v13 = vadd.f32 %v11906_v3, %v8829_v32  ;;  %v11916_v15 = vpop.f32.mrf.mxu0 }
 0x22d   : > { %v8913_v63 = vpop.f32.mrf.mxu1 }
 0x22e   : > { %10399 = vst.msk [vmem:[%s12691_s6 + $0xd0] sm:$0xf] %vm775_vm1, %v10479_v54  ;;  %v10482_v37 = vpack.c.bf16 %v8920_v13, %v8920_v13  ;;  %v8914_v36 = vadd.f32 %v8913_v63, %v8823_v41  ;;  %v9056_v24 = vpop.f32.mrf.mxu0 }
 0x22f   : > { %v11923_v49 = vpop.f32.mrf.mxu1 }
 0x230   : > { %10402 = vst.msk [vmem:[%s12691_s6 + $0xdc] sm:$0xf] %vm775_vm1, %v10482_v37  ;;  %v10481_v19 = vpack.c.bf16 %v8914_v36, %v8914_v36  ;;  %v11933_v42 = vpop.f32.mrf.mxu0  ;;  %v9154_v59 = vadd.f32 %v11923_v49, %v11913_v61 }
 0x231   : > { %v9147_v14 = vpop.f32.mrf.mxu1 }
 0x232   : > { %10401 = vst.msk [vmem:[%s12691_s6 + $0xd8] sm:$0xf] %vm775_vm1, %v10481_v19  ;;  %v9241_v12 = vpop.f32.mrf.mxu0  ;;  %v9148_v4 = vadd.f32 %v9147_v14, %v9036_v62  ;;  %v9249_v40 = vadd.f32 %v11933_v42, %v9154_v59 }
 0x233   : > { %v11926_v29 = vpop.f32.mrf.mxu1 }
 0x234   : > { %v11936_v60 = vpop.f32.mrf.mxu0  ;;  %v9166_v33 = vadd.f32 %v11926_v29, %v11916_v15  ;;  %v9242_v57 = vadd.f32 %v9241_v12, %v9148_v4 }
 0x235   : > { %v9159_v44 = vpop.f32.mrf.mxu1 }
 0x236   : > { %v9255_v22 = vpop.f32.mrf.mxu0  ;;  %v9160_v18 = vadd.f32 %v9159_v44, %v9056_v24  ;;  %v9263_v6 = vadd.f32 %v11936_v60, %v9166_v33 }
 0x237   : > { %v11943_v46 = vpop.f32.mrf.mxu1 }
 0x238   : > { %v11953_v2 = vpop.f32.mrf.mxu0  ;;  %v9346_v1 = vadd.f32 %v11943_v46, %v9249_v40  ;;  %v9256_v5 = vadd.f32 %v9255_v22, %v9160_v18 }
 0x239   : > { %v9337_v30 = vpop.f32.mrf.mxu1 }
 0x23a   : > { %v9438_v23 = vpop.f32.mrf.mxu0  ;;  %v9338_v26 = vadd.f32 %v9337_v30, %v9242_v57  ;;  %v9445_v34 = vadd.f32 %v11953_v2, %v9346_v1 }
 0x23b   : > { %v11946_v7 = vpop.f32.mrf.mxu1 }
 0x23c   : > { %v11956_v56 = vpop.f32.mrf.mxu0  ;;  %v9362_v8 = vadd.f32 %v11946_v7, %v9263_v6  ;;  %v9439_v16 = vadd.f32 %v9438_v23, %v9338_v26 }
 0x23d   : > { %v9353_v53 = vpop.f32.mrf.mxu1 }
 0x23e   : > { %v9450_v35 = vpop.f32.mrf.mxu0  ;;  %v9354_v27 = vadd.f32 %v9353_v53, %v9256_v5  ;;  %v9457_v21 = vadd.f32 %v11956_v56, %v9362_v8 }
 0x23f   : > { %v11963_v52 = vpop.f32.mrf.mxu1 }
 0x240   : > { %v9536_v38 = vadd.f32 %v11963_v52, %v9445_v34  ;;  %v11973_v39 = vpop.f32.mrf.mxu0  ;;  %v9451_v48 = vadd.f32 %v9450_v35, %v9354_v27 }
 0x241   : > { %v9529_v11 = vpop.f32.mrf.mxu1 }
 0x242   : > { %v10484_v50 = vpack.c.bf16 %v9536_v38, %v9536_v38  ;;  %v9530_v43 = vadd.f32 %v9529_v11, %v9439_v16  ;;  %v9664_v10 = vpop.f32.mrf.mxu0 }
 0x243   : > { %v11966_v45 = vpop.f32.mrf.mxu1 }
 0x244   : > { %10410 = vst.msk [vmem:[%s12691_s6 + $0xe4] sm:$0xf] %vm775_vm1, %v10484_v50  ;;  %v10483_v47 = vpack.c.bf16 %v9530_v43, %v9530_v43  ;;  %v9548_v58 = vadd.f32 %v11966_v45, %v9457_v21  ;;  %v11976_v17 = vpop.f32.mrf.mxu0 }
 0x245   : > { %v9541_v51 = vpop.f32.mrf.mxu1 }
 0x246   : > { %10409 = vst.msk [vmem:[%s12691_s6 + $0xe0] sm:$0xf] %vm775_vm1, %v10483_v47  ;;  %v10486_v0 = vpack.c.bf16 %v9548_v58, %v9548_v58  ;;  %v9542_v9 = vadd.f32 %v9541_v51, %v9451_v48  ;;  %v9684_v31 = vpop.f32.mrf.mxu0 }
 0x247   : > { %v11983_v55 = vpop.f32.mrf.mxu1 }
 0x248   : > { %10412 = vst.msk [vmem:[%s12691_s6 + $0xec] sm:$0xf] %vm775_vm1, %v10486_v0  ;;  %v10485_v61 = vpack.c.bf16 %v9542_v9, %v9542_v9  ;;  %v11993_v28 = vpop.f32.mrf.mxu0  ;;  %v9782_v62 = vadd.f32 %v11983_v55, %v11973_v39 }
 0x249   : > { %v9775_v32 = vpop.f32.mrf.mxu1 }
 0x24a   : > { %10411 = vst.msk [vmem:[%s12691_s6 + $0xe8] sm:$0xf] %vm775_vm1, %v10485_v61  ;;  %v9869_v20 = vpop.f32.mrf.mxu0  ;;  %v9776_v54 = vadd.f32 %v9775_v32, %v9664_v10  ;;  %v9877_v63 = vadd.f32 %v11993_v28, %v9782_v62 }
 0x24b   : > { %v11986_v25 = vpop.f32.mrf.mxu1 }
 0x24c   : > { %v11996_v3 = vpop.f32.mrf.mxu0  ;;  %v9794_v37 = vadd.f32 %v11986_v25, %v11976_v17  ;;  %v9870_v49 = vadd.f32 %v9869_v20, %v9776_v54 }
 0x24d   : > { %v9787_v41 = vpop.f32.mrf.mxu1 }
 0x24e   : > { %v9883_v13 = vpop.f32.mrf.mxu0  ;;  %v9788_v19 = vadd.f32 %v9787_v41, %v9684_v31  ;;  %v9891_v29 = vadd.f32 %v11996_v3, %v9794_v37 }
 0x24f   : > { %v12003_v15 = vpop.f32.mrf.mxu1 }
 0x250   : > { %v12013_v36 = vpop.f32.mrf.mxu0  ;;  %v9974_v42 = vadd.f32 %v12003_v15, %v9877_v63  ;;  %v9884_v4 = vadd.f32 %v9883_v13, %v9788_v19 }
 0x251   : > { %v9965_v24 = vpop.f32.mrf.mxu1 }
 0x252   : > { %v10066_v14 = vpop.f32.mrf.mxu0  ;;  %v9966_v59 = vadd.f32 %v9965_v24, %v9870_v49  ;;  %v10073_v22 = vadd.f32 %v12013_v36, %v9974_v42 }
 0x253   : > { %v12006_v12 = vpop.f32.mrf.mxu1 }
 0x254   : > { %v12016_v44 = vpop.f32.mrf.mxu0  ;;  %v9990_v46 = vadd.f32 %v12006_v12, %v9891_v29  ;;  %v10067_v33 = vadd.f32 %v10066_v14, %v9966_v59 }
 0x255   : > { %v9981_v60 = vpop.f32.mrf.mxu1 }
 0x256   : > { %v9982_v2 = vadd.f32 %v9981_v60, %v9884_v4  ;;  %v10078_v57 = vpop.f32.mrf.mxu0  ;;  %v10085_v1 = vadd.f32 %v12016_v44, %v9990_v46 }
 0x257   : > { %v12023_v40 = vpop.f32.mrf.mxu1 }
 0x258   : > { %v10164_v30 = vadd.f32 %v12023_v40, %v10073_v22  ;;  %v10079_v26 = vadd.f32 %v10078_v57, %v9982_v2 }
 0x259   : > { %v10157_v18 = vpop.f32.mrf.mxu1 }
 0x25a   : > { %v10488_v23 = vpack.c.bf16 %v10164_v30, %v10164_v30  ;;  %v10158_v7 = vadd.f32 %v10157_v18, %v10067_v33 }
 0x25b   : > { %v12026_v6 = vpop.f32.mrf.mxu1 }
 0x25c   : > { %10420 = vst.msk [vmem:[%s12691_s6 + $0xf4] sm:$0xf] %vm775_vm1, %v10488_v23  ;;  %v10487_v56 = vpack.c.bf16 %v10158_v7, %v10158_v7  ;;  %v10176_v53 = vadd.f32 %v12026_v6, %v10085_v1 }
 0x25d   : > { %v10169_v5 = vpop.f32.mrf.mxu1 }
 0x25e   : > { %10419 = vst.msk [vmem:[%s12691_s6 + $0xf0] sm:$0xf] %vm775_vm1, %v10487_v56  ;;  %v10490_v34 = vpack.c.bf16 %v10176_v53, %v10176_v53  ;;  %v10170_v8 = vadd.f32 %v10169_v5, %v10079_v26 }
 0x260   : > { %10422 = vst.msk [vmem:[%s12691_s6 + $0xfc] sm:$0xf] %vm775_vm1, %v10490_v34  ;;  %v10489_v35 = vpack.c.bf16 %v10170_v8, %v10170_v8 }
 0x262   : > { %10421 = vst.msk [vmem:[%s12691_s6 + $0xf8] sm:$0xf] %vm775_vm1, %v10489_v35 }
 0x263 PF: > { %s12_s9 = sadd.s32 1, %s12041_s9  }
 0x264   : > { %p9_p4 = scmp.ge.s32.totalorder %s12_s9, 6  }
 0x266   :  { %11 = sbr.rel (!%p9_p4) target bundleno = 1 (0x1), region = 88 }

// kernel: aspp_block_forward.11
= control target key start
LH: loop header
LB: loop body
LE: loop exit
PB: predicated region body
PF: predicated region fallthrough
CT: control target
= control target key end

     0   :  { %s550_s12 = smov 0   ;;  %s901_s0 = inlined_call_operand.vmem [shape: f32[2048,8], index: 0, kind: input, shape index: {}]   ;;  %s902_s1 = inlined_call_operand.vmem [shape: f32[1,8], index: 1, kind: input, shape index: {}]   ;;  %s903_s2 = inlined_call_operand.vmem [shape: f32[1,8], index: 2, kind: input, shape index: {}]   ;;  %s904_s3 = inlined_call_operand.vmem [shape: f32[2048,8], index: 3, kind: output, shape index: {}]  }
   0x1 LB: > { %s501_s13 = sadd.s32 4294967295, %s528_s12   ;;  %p505_p0 = scmp.ge.s32.totalorder %s528_s12, 1  ;;  %s528_s12 = sphi %s550_s12, %s13_s12  }
   0x2   : > { %p138_p1 = scmp.lt.s32.totalorder %s528_s12, 5 }
   0x4   : > { %p139_p2 = pnand %p505_p0, %p138_p1 }
   0x5   : > { %s506_s14 = sshll.u32 (!%p139_p2), %s501_s13, 6 }
   0x6   : > { %142 = sbr.rel (%p139_p2) target bundleno = 57 (0x39), region = 32  ;;  %p163_p3 = scmp.lt.s32.totalorder (!%p139_p2), %s506_s14, 255 }
   0xb   : > { %s906_s14 = smov (!%p163_p3, %s506_s14), 255  ;;  %v561_v0 = vld [vmem:[%s902_s1] ss:$0 sm:$0xff]  ;;  %vm380_vm0 = vcmask 64512  }
   0xc   : > { %s507_s15 = sshll.u32 %s906_s14, 3  ;;  %v571_v1 = vld [vmem:[%s903_s2] ss:$0 sm:$0xff] }
   0xd   : > { %s566_s20 = scalar_lea.vmem %s901_s0, %s507_s15  ;;  %s585_s25 = scalar_lea.vmem %s904_s3, %s507_s15 }
   0xe   : > { %v174_v2 = vld [vmem:[%s566_s20] sm:$0xff]  ;;  %v175_v3 = vld [vmem:[%s566_s20 + $0x8] sm:$0xff]  ;;  %v176_v4 = vld [vmem:[%s566_s20 + $0x10] sm:$0xff] }
   0xf   : > { %v245_v5 = vmul.f32 %v561_v0, %v174_v2  ;;  %v246_v6 = vmul.f32 %v561_v0, %v175_v3  ;;  %v247_v7 = vmul.f32 %v561_v0, %v176_v4  ;;  %v177_v8 = vld [vmem:[%s566_s20 + $0x18] sm:$0xff]  ;;  %v178_v9 = vld [vmem:[%s566_s20 + $0x20] sm:$0xff]  ;;  %v179_v10 = vld [vmem:[%s566_s20 + $0x28] sm:$0xff] }
  0x10   : > { %v248_v11 = vmul.f32 %v561_v0, %v177_v8  ;;  %v249_v12 = vmul.f32 %v561_v0, %v178_v9  ;;  %v250_v13 = vmul.f32 %v561_v0, %v179_v10  ;;  %v180_v14 = vld [vmem:[%s566_s20 + $0x30] sm:$0xff]  ;;  %v181_v15 = vld [vmem:[%s566_s20 + $0x38] sm:$0xff]  ;;  %v182_v16 = vld [vmem:[%s566_s20 + $0x40] sm:$0xff] }
  0x11   : > { %v316_v17 = vadd.f32 %v571_v1, %v245_v5  ;;  %v317_v18 = vadd.f32 %v571_v1, %v246_v6  ;;  %v318_v19 = vadd.f32 %v571_v1, %v247_v7  ;;  %v251_v20 = vmul.f32 %v561_v0, %v180_v14  ;;  %v183_v21 = vld [vmem:[%s566_s20 + $0x48] sm:$0xff]  ;;  %v184_v22 = vld [vmem:[%s566_s20 + $0x50] sm:$0xff]  ;;  %v185_v23 = vld [vmem:[%s566_s20 + $0x58] sm:$0xff] }
  0x12   : > { %v319_v24 = vadd.f32 %v571_v1, %v248_v11  ;;  %v320_v25 = vadd.f32 %v571_v1, %v249_v12  ;;  %v321_v26 = vadd.f32 %v571_v1, %v250_v13  ;;  %v252_v27 = vmul.f32 %v561_v0, %v181_v15  ;;  %v186_v28 = vld [vmem:[%s566_s20 + $0x60] sm:$0xff]  ;;  %v187_v29 = vld [vmem:[%s566_s20 + $0x68] sm:$0xff]  ;;  %v188_v30 = vld [vmem:[%s566_s20 + $0x70] sm:$0xff] }
  0x13   : > { %381 = vst.msk [vmem:[%s585_s25] sm:$0xff] %vm380_vm0, %v316_v17  ;;  %382 = vst.msk [vmem:[%s585_s25 + $0x8] sm:$0xff] %vm380_vm0, %v317_v18  ;;  %v322_v31 = vadd.f32 %v571_v1, %v251_v20  ;;  %v253_v32 = vmul.f32 %v561_v0, %v182_v16  ;;  %v254_v33 = vmul.f32 %v561_v0, %v183_v21  ;;  %v189_v35 = vld [vmem:[%s566_s20 + $0x78] sm:$0xff]  ;;  %v190_v40 = vld [vmem:[%s566_s20 + $0x80] sm:$0xff] }
  0x14   : > { %383 = vst.msk [vmem:[%s585_s25 + $0x10] sm:$0xff] %vm380_vm0, %v318_v19  ;;  %v255_v34 = vmul.f32 %v561_v0, %v184_v22  ;;  %384 = vst.msk [vmem:[%s585_s25 + $0x18] sm:$0xff] %vm380_vm0, %v319_v24  ;;  %v323_v36 = vadd.f32 %v571_v1, %v252_v27  ;;  %v256_v37 = vmul.f32 %v561_v0, %v185_v23  ;;  %v191_v41 = vld [vmem:[%s566_s20 + $0x88] sm:$0xff]  ;;  %v192_v42 = vld [vmem:[%s566_s20 + $0x90] sm:$0xff] }
  0x15   : > { %385 = vst.msk [vmem:[%s585_s25 + $0x20] sm:$0xff] %vm380_vm0, %v320_v25  ;;  %386 = vst.msk [vmem:[%s585_s25 + $0x28] sm:$0xff] %vm380_vm0, %v321_v26  ;;  %v257_v38 = vmul.f32 %v561_v0, %v186_v28  ;;  %v258_v39 = vmul.f32 %v561_v0, %v187_v29  ;;  %v324_v43 = vadd.f32 %v571_v1, %v253_v32  ;;  %v193_v47 = vld [vmem:[%s566_s20 + $0x98] sm:$0xff]  ;;  %v194_v48 = vld [vmem:[%s566_s20 + $0xa0] sm:$0xff] }
  0x16   : > { %387 = vst.msk [vmem:[%s585_s25 + $0x30] sm:$0xff] %vm380_vm0, %v322_v31  ;;  %v325_v44 = vadd.f32 %v571_v1, %v254_v33  ;;  %v326_v45 = vadd.f32 %v571_v1, %v255_v34  ;;  %v259_v46 = vmul.f32 %v561_v0, %v188_v30  ;;  %v195_v49 = vld [vmem:[%s566_s20 + $0xa8] sm:$0xff]  ;;  %388 = vst.msk [vmem:[%s585_s25 + $0x38] sm:$0xff] %vm380_vm0, %v323_v36  ;;  %v196_v54 = vld [vmem:[%s566_s20 + $0xb0] sm:$0xff] }
  0x17   : > { %v327_v50 = vadd.f32 %v571_v1, %v256_v37  ;;  %v328_v51 = vadd.f32 %v571_v1, %v257_v38  ;;  %v329_v52 = vadd.f32 %v571_v1, %v258_v39  ;;  %v260_v53 = vmul.f32 %v561_v0, %v189_v35  ;;  %389 = vst.msk [vmem:[%s585_s25 + $0x40] sm:$0xff] %vm380_vm0, %v324_v43  ;;  %v197_v59 = vld [vmem:[%s566_s20 + $0xb8] sm:$0xff]  ;;  %v198_v2 = vld [vmem:[%s566_s20 + $0xc0] sm:$0xff]  ;;  %v199_v3 = vld [vmem:[%s566_s20 + $0xc8] sm:$0xff] }
  0x18   : > { %390 = vst.msk [vmem:[%s585_s25 + $0x48] sm:$0xff] %vm380_vm0, %v325_v44  ;;  %391 = vst.msk [vmem:[%s585_s25 + $0x50] sm:$0xff] %vm380_vm0, %v326_v45  ;;  %v330_v55 = vadd.f32 %v571_v1, %v259_v46  ;;  %v261_v56 = vmul.f32 %v561_v0, %v190_v40  ;;  %v262_v57 = vmul.f32 %v561_v0, %v191_v41  ;;  %v200_v4 = vld [vmem:[%s566_s20 + $0xd0] sm:$0xff]  ;;  %v201_v9 = vld [vmem:[%s566_s20 + $0xd8] sm:$0xff] }
  0x19   : > { %v263_v58 = vmul.f32 %v561_v0, %v192_v42  ;;  %392 = vst.msk [vmem:[%s585_s25 + $0x58] sm:$0xff] %vm380_vm0, %v327_v50  ;;  %393 = vst.msk [vmem:[%s585_s25 + $0x60] sm:$0xff] %vm380_vm0, %v328_v51  ;;  %v331_v60 = vadd.f32 %v571_v1, %v260_v53  ;;  %v264_v61 = vmul.f32 %v561_v0, %v193_v47  ;;  %v202_v10 = vld [vmem:[%s566_s20 + $0xe0] sm:$0xff]  ;;  %v203_v11 = vld [vmem:[%s566_s20 + $0xe8] sm:$0xff] }
  0x1a   : > { %394 = vst.msk [vmem:[%s585_s25 + $0x68] sm:$0xff] %vm380_vm0, %v329_v52  ;;  %v265_v62 = vmul.f32 %v561_v0, %v194_v48  ;;  %v266_v63 = vmul.f32 %v561_v0, %v195_v49  ;;  %395 = vst.msk [vmem:[%s585_s25 + $0x70] sm:$0xff] %vm380_vm0, %v330_v55  ;;  %v332_v5 = vadd.f32 %v571_v1, %v261_v56  ;;  %v204_v16 = vld [vmem:[%s566_s20 + $0xf0] sm:$0xff]  ;;  %v205_v21 = vld [vmem:[%s566_s20 + $0xf8] sm:$0xff] }
  0x1b   : > { %v333_v6 = vadd.f32 %v571_v1, %v262_v57  ;;  %v334_v7 = vadd.f32 %v571_v1, %v263_v58  ;;  %v267_v8 = vmul.f32 %v561_v0, %v196_v54  ;;  %396 = vst.msk [vmem:[%s585_s25 + $0x78] sm:$0xff] %vm380_vm0, %v331_v60  ;;  %v335_v12 = vadd.f32 %v571_v1, %v264_v61  ;;  %v206_v26 = vld [vmem:[%s566_s20 + $0x100] sm:$0xff]  ;;  %v207_v27 = vld [vmem:[%s566_s20 + $0x108] sm:$0xff]  ;;  %v208_v28 = vld [vmem:[%s566_s20 + $0x110] sm:$0xff] }
  0x1c   : > { %v336_v13 = vadd.f32 %v571_v1, %v265_v62  ;;  %v337_v14 = vadd.f32 %v571_v1, %v266_v63  ;;  %v268_v15 = vmul.f32 %v561_v0, %v197_v59  ;;  %397 = vst.msk [vmem:[%s585_s25 + $0x80] sm:$0xff] %vm380_vm0, %v332_v5  ;;  %v269_v18 = vmul.f32 %v561_v0, %v198_v2  ;;  %v209_v33 = vld [vmem:[%s566_s20 + $0x118] sm:$0xff]  ;;  %v210_v34 = vld [vmem:[%s566_s20 + $0x120] sm:$0xff]  ;;  %v211_v35 = vld [vmem:[%s566_s20 + $0x128] sm:$0xff] }
  0x1d   : > { %398 = vst.msk [vmem:[%s585_s25 + $0x88] sm:$0xff] %vm380_vm0, %v333_v6  ;;  %399 = vst.msk [vmem:[%s585_s25 + $0x90] sm:$0xff] %vm380_vm0, %v334_v7  ;;  %v338_v17 = vadd.f32 %v571_v1, %v267_v8  ;;  %v270_v19 = vmul.f32 %v561_v0, %v199_v3  ;;  %v271_v20 = vmul.f32 %v561_v0, %v200_v4  ;;  %v212_v40 = vld [vmem:[%s566_s20 + $0x130] sm:$0xff]  ;;  %v213_v45 = vld [vmem:[%s566_s20 + $0x138] sm:$0xff] }
  0x1e   : > { %400 = vst.msk [vmem:[%s585_s25 + $0x98] sm:$0xff] %vm380_vm0, %v335_v12  ;;  %401 = vst.msk [vmem:[%s585_s25 + $0xa0] sm:$0xff] %vm380_vm0, %v336_v13  ;;  %v339_v22 = vadd.f32 %v571_v1, %v268_v15  ;;  %v272_v23 = vmul.f32 %v561_v0, %v201_v9  ;;  %v273_v24 = vmul.f32 %v561_v0, %v202_v10  ;;  %v214_v50 = vld [vmem:[%s566_s20 + $0x140] sm:$0xff]  ;;  %v215_v51 = vld [vmem:[%s566_s20 + $0x148] sm:$0xff] }
  0x1f   : > { %402 = vst.msk [vmem:[%s585_s25 + $0xa8] sm:$0xff] %vm380_vm0, %v337_v14  ;;  %v274_v25 = vmul.f32 %v561_v0, %v203_v11  ;;  %403 = vst.msk [vmem:[%s585_s25 + $0xb0] sm:$0xff] %vm380_vm0, %v338_v17  ;;  %v340_v29 = vadd.f32 %v571_v1, %v269_v18  ;;  %v341_v30 = vadd.f32 %v571_v1, %v270_v19  ;;  %v216_v52 = vld [vmem:[%s566_s20 + $0x150] sm:$0xff]  ;;  %v217_v57 = vld [vmem:[%s566_s20 + $0x158] sm:$0xff] }
  0x20   : > { %v342_v31 = vadd.f32 %v571_v1, %v271_v20  ;;  %v275_v32 = vmul.f32 %v561_v0, %v204_v16  ;;  %404 = vst.msk [vmem:[%s585_s25 + $0xb8] sm:$0xff] %vm380_vm0, %v339_v22  ;;  %v343_v36 = vadd.f32 %v571_v1, %v272_v23  ;;  %v344_v37 = vadd.f32 %v571_v1, %v273_v24  ;;  %v218_v58 = vld [vmem:[%s566_s20 + $0x160] sm:$0xff]  ;;  %v219_v59 = vld [vmem:[%s566_s20 + $0x168] sm:$0xff]  ;;  %v220_v2 = vld [vmem:[%s566_s20 + $0x170] sm:$0xff] }
  0x21   : > { %v345_v38 = vadd.f32 %v571_v1, %v274_v25  ;;  %v276_v39 = vmul.f32 %v561_v0, %v205_v21  ;;  %405 = vst.msk [vmem:[%s585_s25 + $0xc0] sm:$0xff] %vm380_vm0, %v340_v29  ;;  %406 = vst.msk [vmem:[%s585_s25 + $0xc8] sm:$0xff] %vm380_vm0, %v341_v30  ;;  %v277_v42 = vmul.f32 %v561_v0, %v206_v26  ;;  %v221_v7 = vld [vmem:[%s566_s20 + $0x178] sm:$0xff]  ;;  %v222_v12 = vld [vmem:[%s566_s20 + $0x180] sm:$0xff] }
  0x22   : > { %407 = vst.msk [vmem:[%s585_s25 + $0xd0] sm:$0xff] %vm380_vm0, %v342_v31  ;;  %v346_v41 = vadd.f32 %v571_v1, %v275_v32  ;;  %v278_v43 = vmul.f32 %v561_v0, %v207_v27  ;;  %v279_v44 = vmul.f32 %v561_v0, %v208_v28  ;;  %408 = vst.msk [vmem:[%s585_s25 + $0xd8] sm:$0xff] %vm380_vm0, %v343_v36  ;;  %v223_v13 = vld [vmem:[%s566_s20 + $0x188] sm:$0xff]  ;;  %v224_v14 = vld [vmem:[%s566_s20 + $0x190] sm:$0xff] }
  0x23   : > { %409 = vst.msk [vmem:[%s585_s25 + $0xe0] sm:$0xff] %vm380_vm0, %v344_v37  ;;  %410 = vst.msk [vmem:[%s585_s25 + $0xe8] sm:$0xff] %vm380_vm0, %v345_v38  ;;  %v347_v46 = vadd.f32 %v571_v1, %v276_v39  ;;  %v280_v47 = vmul.f32 %v561_v0, %v209_v33  ;;  %v281_v48 = vmul.f32 %v561_v0, %v210_v34  ;;  %v225_v19 = vld [vmem:[%s566_s20 + $0x198] sm:$0xff]  ;;  %v226_v20 = vld [vmem:[%s566_s20 + $0x1a0] sm:$0xff] }
  0x24   : > { %v282_v49 = vmul.f32 %v561_v0, %v211_v35  ;;  %411 = vst.msk [vmem:[%s585_s25 + $0xf0] sm:$0xff] %vm380_vm0, %v346_v41  ;;  %v348_v53 = vadd.f32 %v571_v1, %v277_v42  ;;  %v349_v54 = vadd.f32 %v571_v1, %v278_v43  ;;  %v350_v55 = vadd.f32 %v571_v1, %v279_v44  ;;  %v227_v21 = vld [vmem:[%s566_s20 + $0x1a8] sm:$0xff]  ;;  %v228_v26 = vld [vmem:[%s566_s20 + $0x1b0] sm:$0xff]  ;;  %v229_v31 = vld [vmem:[%s566_s20 + $0x1b8] sm:$0xff] }
  0x25   : > { %v283_v56 = vmul.f32 %v561_v0, %v212_v40  ;;  %412 = vst.msk [vmem:[%s585_s25 + $0xf8] sm:$0xff] %vm380_vm0, %v347_v46  ;;  %v351_v60 = vadd.f32 %v571_v1, %v280_v47  ;;  %v352_v61 = vadd.f32 %v571_v1, %v281_v48  ;;  %v284_v63 = vmul.f32 %v561_v0, %v213_v45  ;;  %v230_v36 = vld [vmem:[%s566_s20 + $0x1c0] sm:$0xff]  ;;  %v231_v37 = vld [vmem:[%s566_s20 + $0x1c8] sm:$0xff]  ;;  %v232_v38 = vld [vmem:[%s566_s20 + $0x1d0] sm:$0xff] }
  0x26   : > { %v353_v62 = vadd.f32 %v571_v1, %v282_v49  ;;  %413 = vst.msk [vmem:[%s585_s25 + $0x100] sm:$0xff] %vm380_vm0, %v348_v53  ;;  %414 = vst.msk [vmem:[%s585_s25 + $0x108] sm:$0xff] %vm380_vm0, %v349_v54  ;;  %v285_v4 = vmul.f32 %v561_v0, %v214_v50  ;;  %v286_v5 = vmul.f32 %v561_v0, %v215_v51  ;;  %v233_v43 = vld [vmem:[%s566_s20 + $0x1d8] sm:$0xff]  ;;  %v234_v44 = vld [vmem:[%s566_s20 + $0x1e0] sm:$0xff] }
  0x27   : > { %415 = vst.msk [vmem:[%s585_s25 + $0x110] sm:$0xff] %vm380_vm0, %v350_v55  ;;  %v354_v3 = vadd.f32 %v571_v1, %v283_v56  ;;  %v287_v6 = vmul.f32 %v561_v0, %v216_v52  ;;  %416 = vst.msk [vmem:[%s585_s25 + $0x118] sm:$0xff] %vm380_vm0, %v351_v60  ;;  %v355_v8 = vadd.f32 %v571_v1, %v284_v63  ;;  %v235_v45 = vld [vmem:[%s566_s20 + $0x1e8] sm:$0xff]  ;;  %v236_v50 = vld [vmem:[%s566_s20 + $0x1f0] sm:$0xff] }
  0x28   : > { %417 = vst.msk [vmem:[%s585_s25 + $0x120] sm:$0xff] %vm380_vm0, %v352_v61  ;;  %418 = vst.msk [vmem:[%s585_s25 + $0x128] sm:$0xff] %vm380_vm0, %v353_v62  ;;  %v288_v9 = vmul.f32 %v561_v0, %v217_v57  ;;  %v289_v10 = vmul.f32 %v561_v0, %v218_v58  ;;  %v290_v11 = vmul.f32 %v561_v0, %v219_v59  ;;  %v237_v55 = vld [vmem:[%s566_s20 + $0x1f8] sm:$0xff] }
  0x29   : > { %419 = vst.msk [vmem:[%s585_s25 + $0x130] sm:$0xff] %vm380_vm0, %v354_v3  ;;  %v356_v15 = vadd.f32 %v571_v1, %v285_v4  ;;  %v357_v16 = vadd.f32 %v571_v1, %v286_v5  ;;  %v358_v17 = vadd.f32 %v571_v1, %v287_v6  ;;  %v291_v18 = vmul.f32 %v561_v0, %v220_v2 }
  0x2a   : > { %420 = vst.msk [vmem:[%s585_s25 + $0x138] sm:$0xff] %vm380_vm0, %v355_v8  ;;  %v359_v22 = vadd.f32 %v571_v1, %v288_v9  ;;  %v360_v23 = vadd.f32 %v571_v1, %v289_v10  ;;  %v361_v24 = vadd.f32 %v571_v1, %v290_v11  ;;  %v292_v25 = vmul.f32 %v561_v0, %v221_v7 }
  0x2b   : > { %421 = vst.msk [vmem:[%s585_s25 + $0x140] sm:$0xff] %vm380_vm0, %v356_v15  ;;  %422 = vst.msk [vmem:[%s585_s25 + $0x148] sm:$0xff] %vm380_vm0, %v357_v16  ;;  %v362_v27 = vadd.f32 %v571_v1, %v291_v18  ;;  %v293_v28 = vmul.f32 %v561_v0, %v222_v12  ;;  %v294_v29 = vmul.f32 %v561_v0, %v223_v13 }
  0x2c   : > { %423 = vst.msk [vmem:[%s585_s25 + $0x150] sm:$0xff] %vm380_vm0, %v358_v17  ;;  %v295_v30 = vmul.f32 %v561_v0, %v224_v14  ;;  %424 = vst.msk [vmem:[%s585_s25 + $0x158] sm:$0xff] %vm380_vm0, %v359_v22  ;;  %v363_v32 = vadd.f32 %v571_v1, %v292_v25  ;;  %v296_v33 = vmul.f32 %v561_v0, %v225_v19 }
  0x2d   : > { %425 = vst.msk [vmem:[%s585_s25 + $0x160] sm:$0xff] %vm380_vm0, %v360_v23  ;;  %426 = vst.msk [vmem:[%s585_s25 + $0x168] sm:$0xff] %vm380_vm0, %v361_v24  ;;  %v297_v34 = vmul.f32 %v561_v0, %v226_v20  ;;  %v298_v35 = vmul.f32 %v561_v0, %v227_v21  ;;  %v364_v39 = vadd.f32 %v571_v1, %v293_v28 }
  0x2e   : > { %427 = vst.msk [vmem:[%s585_s25 + $0x170] sm:$0xff] %vm380_vm0, %v362_v27  ;;  %v365_v40 = vadd.f32 %v571_v1, %v294_v29  ;;  %v366_v41 = vadd.f32 %v571_v1, %v295_v30  ;;  %v299_v42 = vmul.f32 %v561_v0, %v228_v26  ;;  %428 = vst.msk [vmem:[%s585_s25 + $0x178] sm:$0xff] %vm380_vm0, %v363_v32 }
  0x2f   : > { %v367_v46 = vadd.f32 %v571_v1, %v296_v33  ;;  %v368_v47 = vadd.f32 %v571_v1, %v297_v34  ;;  %v369_v48 = vadd.f32 %v571_v1, %v298_v35  ;;  %v300_v49 = vmul.f32 %v561_v0, %v229_v31  ;;  %429 = vst.msk [vmem:[%s585_s25 + $0x180] sm:$0xff] %vm380_vm0, %v364_v39 }
  0x30   : > { %430 = vst.msk [vmem:[%s585_s25 + $0x188] sm:$0xff] %vm380_vm0, %v365_v40  ;;  %431 = vst.msk [vmem:[%s585_s25 + $0x190] sm:$0xff] %vm380_vm0, %v366_v41  ;;  %v370_v51 = vadd.f32 %v571_v1, %v299_v42  ;;  %v301_v52 = vmul.f32 %v561_v0, %v230_v36  ;;  %v302_v53 = vmul.f32 %v561_v0, %v231_v37 }
  0x31   : > { %v303_v54 = vmul.f32 %v561_v0, %v232_v38  ;;  %432 = vst.msk [vmem:[%s585_s25 + $0x198] sm:$0xff] %vm380_vm0, %v367_v46  ;;  %433 = vst.msk [vmem:[%s585_s25 + $0x1a0] sm:$0xff] %vm380_vm0, %v368_v47  ;;  %v371_v56 = vadd.f32 %v571_v1, %v300_v49  ;;  %v304_v57 = vmul.f32 %v561_v0, %v233_v43 }
  0x32   : > { %434 = vst.msk [vmem:[%s585_s25 + $0x1a8] sm:$0xff] %vm380_vm0, %v369_v48  ;;  %v305_v58 = vmul.f32 %v561_v0, %v234_v44  ;;  %v306_v59 = vmul.f32 %v561_v0, %v235_v45  ;;  %435 = vst.msk [vmem:[%s585_s25 + $0x1b0] sm:$0xff] %vm380_vm0, %v370_v51  ;;  %v372_v60 = vadd.f32 %v571_v1, %v301_v52 }
  0x33   : > { %v373_v61 = vadd.f32 %v571_v1, %v302_v53  ;;  %v374_v62 = vadd.f32 %v571_v1, %v303_v54  ;;  %v307_v63 = vmul.f32 %v561_v0, %v236_v50  ;;  %436 = vst.msk [vmem:[%s585_s25 + $0x1b8] sm:$0xff] %vm380_vm0, %v371_v56  ;;  %v375_v2 = vadd.f32 %v571_v1, %v304_v57 }
  0x34   : > { %v376_v3 = vadd.f32 %v571_v1, %v305_v58  ;;  %v377_v4 = vadd.f32 %v571_v1, %v306_v59  ;;  %v308_v5 = vmul.f32 %v561_v0, %v237_v55  ;;  %437 = vst.msk [vmem:[%s585_s25 + $0x1c0] sm:$0xff] %vm380_vm0, %v372_v60 }
  0x35   : > { %438 = vst.msk [vmem:[%s585_s25 + $0x1c8] sm:$0xff] %vm380_vm0, %v373_v61  ;;  %439 = vst.msk [vmem:[%s585_s25 + $0x1d0] sm:$0xff] %vm380_vm0, %v374_v62  ;;  %v378_v6 = vadd.f32 %v571_v1, %v307_v63 }
  0x36   : > { %440 = vst.msk [vmem:[%s585_s25 + $0x1d8] sm:$0xff] %vm380_vm0, %v375_v2  ;;  %441 = vst.msk [vmem:[%s585_s25 + $0x1e0] sm:$0xff] %vm380_vm0, %v376_v3  ;;  %v379_v7 = vadd.f32 %v571_v1, %v308_v5 }
  0x37   : > { %442 = vst.msk [vmem:[%s585_s25 + $0x1e8] sm:$0xff] %vm380_vm0, %v377_v4  ;;  %443 = vst.msk [vmem:[%s585_s25 + $0x1f0] sm:$0xff] %vm380_vm0, %v378_v6 }
  0x38   : > { %444 = vst.msk [vmem:[%s585_s25 + $0x1f8] sm:$0xff] %vm380_vm0, %v379_v7 }
  0x39 PF: > { %s13_s12 = sadd.s32 1, %s528_s12  }
  0x3a   : > { %p10_p4 = scmp.ge.s32.totalorder %s13_s12, 6  }
  0x3c   :  { %12 = sbr.rel (!%p10_p4) target bundleno = 1 (0x1), region = 62 }

// kernel: aspp_block_forward.10
= control target key start
LH: loop header
LB: loop body
LE: loop exit
PB: predicated region body
PF: predicated region fallthrough
CT: control target
= control target key end

     0   :  { %s1712_s18 = smov 0   ;;  %s2549_s0 = inlined_call_operand.vmem [shape: bf16[2048,72], index: 0, kind: input, shape index: {}]   ;;  %s2550_s1 = inlined_call_operand.vmem [shape: bf16[72,8], index: 1, kind: input, shape index: {}]   ;;  %s2551_s2 = inlined_call_operand.vmem [shape: f32[1,8], index: 2, kind: input, shape index: {}]   ;;  %s2552_s3 = inlined_call_operand.vmem [shape: f32[2048,8], index: 3, kind: output, shape index: {0}]   ;;  %s2553_s4 = inlined_call_operand.vmem [shape: f32[1,8], index: 4, kind: output, shape index: {1}]   ;;  %s2554_s5 = inlined_call_operand.vmem [shape: f32[1,8], index: 5, kind: output, shape index: {2}]  }
   0x1 LB: > { %s1422_s19 = sadd.s32 4294967295, %s1679_s18   ;;  %p1426_p0 = scmp.ge.s32.totalorder %s1679_s18, 1  ;;  %s1679_s18 = sphi %s1712_s18, %s16_s18  }
   0x2   : > { %p183_p1 = scmp.lt.s32.totalorder %s1679_s18, 5 }
   0x4   : > { %p184_p2 = pnand %p1426_p0, %p183_p1 }
   0x6   : > { %187 = sbr.rel (%p184_p2) target bundleno = 471 (0x1d7), region = 32 }
   0xb   : > { %v1636_v0 = vld [vmem:[%s2550_s1 + $0x20] ss:$0 sps:$4 sm:$0xff]   ;;  %vm588_vm0 = vcmask 1043456   ;;  %v1637_v1 = vld [vmem:[%s2550_s1 + $0x18] sm:$0xff]   ;;  %s1427_s24 = sshll.u32 %s1422_s19, 6  ;;  %v1638_v3 = vld [vmem:[%s2550_s1 + $0x10] sm:$0xff]  }
   0xc   : > { %1625 = vmatprep.subr.msk.bf16.mxu0 %vm588_vm0, %v1636_v0  ;;  %1626 = vmatprep.subr.msk.bf16.mxu1 %vm588_vm0, %v1636_v0  ;;  %v590_v2 = vsel %vm588_vm0, %v1636_v0, 0  ;;  %p212_p3 = scmp.lt.s32.totalorder %s1427_s24, 255  ;;  %v1639_v4 = vld [vmem:[%s2550_s1 + $0x8] sm:$0xff]   ;;  %vm491_vm1 = vcmask 588800   ;;  %v1640_v7 = vld [vmem:[%s2550_s1] sm:$0xff]   ;;  %vm945_vm2 = vcmask 64512  }
   0xd   : > { %1542 = vmatpush3.bf16.msra.mxu0 %v590_v2  ;;  %1620 = vmatpush3.bf16.msra.mxu1 %v590_v2  ;;  %v1812_v38 = vld [vmem:[%s2551_s2] ss:$0 sm:$0xff]  ;;  %p1501_p4 = scmp.ne.s32.totalorder %s1422_s19, 0 }
   0xe   : > { %1543 = vmatprep.subr.bf16.mxu0 %v1637_v1  ;;  %1616 = vmatprep.subr.bf16.mxu1 %v1637_v1  ;;  %s2608_s24 = smov (!%p212_p3, %s1427_s24), 255 }
   0xf   : > { %s1428_s29 = sshll.u32 %s2608_s24, 2  ;;  %s1430_s12 = sshll.u32 %s2608_s24, 3 }
  0x10   : > { %s1740_s7 = scalar_lea.vmem %s2549_s0, %s1428_s29  ;;  %s1820_s15 = scalar_lea.vmem %s2552_s3, %s1430_s12 }
  0x11   : > { %1544 = vmatpush3.bf16.msra.mxu0 %v1637_v1  ;;  %1621 = vmatpush3.bf16.msra.mxu1 %v1637_v1  ;;  %v1641_v5 = vld [vmem:[%s1740_s7] sm:$0xff]   ;;  %v1643_v8 = vld [vmem:[%s1740_s7 + $0x8] sm:$0xff]   ;;  %v1645_v10 = vld [vmem:[%s1740_s7 + $0x10] sm:$0xff]  }
  0x12   : > { %1545 = vmatprep.subr.bf16.mxu0 %v1638_v3  ;;  %1617 = vmatprep.subr.bf16.mxu1 %v1638_v3  ;;  %v1642_v6 = vld [vmem:[%s1740_s7 + $0x80] sm:$0xff]   ;;  %v1644_v9 = vld [vmem:[%s1740_s7 + $0x88] sm:$0xff]   ;;  %v1646_v11 = vld [vmem:[%s1740_s7 + $0x90] sm:$0xff]  }
  0x13   : > { %1551 = vmatprep.mubr.msk.bf16.mxu0 %vm491_vm1, %v1641_v5  ;;  %1583 = vmatprep.mubr.msk.bf16.mxu1 %vm491_vm1, %v1642_v6  ;;  %v1647_v12 = vld [vmem:[%s1740_s7 + $0x18] sm:$0xff]   ;;  %v1649_v14 = vld [vmem:[%s1740_s7 + $0x20] sm:$0xff]   ;;  %v1651_v16 = vld [vmem:[%s1740_s7 + $0x28] sm:$0xff]  }
  0x14   : > { %v1648_v13 = vld [vmem:[%s1740_s7 + $0x98] sm:$0xff]   ;;  %v1650_v15 = vld [vmem:[%s1740_s7 + $0xa0] sm:$0xff]   ;;  %v1652_v17 = vld [vmem:[%s1740_s7 + $0xa8] sm:$0xff]  }
  0x15   : > { %1546 = vmatpush3.bf16.msra.mxu0 %v1638_v3  ;;  %1622 = vmatpush3.bf16.msra.mxu1 %v1638_v3  ;;  %v1653_v18 = vld [vmem:[%s1740_s7 + $0x30] sm:$0xff]   ;;  %v1655_v20 = vld [vmem:[%s1740_s7 + $0x38] sm:$0xff]   ;;  %v1657_v22 = vld [vmem:[%s1740_s7 + $0x40] sm:$0xff]  }
  0x16   : > { %1547 = vmatprep.subr.bf16.mxu0 %v1639_v4  ;;  %1618 = vmatprep.subr.bf16.mxu1 %v1639_v4  ;;  %v1654_v19 = vld [vmem:[%s1740_s7 + $0xb0] sm:$0xff]   ;;  %v1656_v21 = vld [vmem:[%s1740_s7 + $0xb8] sm:$0xff]   ;;  %v1658_v23 = vld [vmem:[%s1740_s7 + $0xc0] sm:$0xff]  }
  0x17   : > { %v1659_v24 = vld [vmem:[%s1740_s7 + $0x48] sm:$0xff]   ;;  %v1661_v26 = vld [vmem:[%s1740_s7 + $0x50] sm:$0xff]   ;;  %v1663_v28 = vld [vmem:[%s1740_s7 + $0x58] sm:$0xff]  }
  0x18   : > { %v1660_v25 = vld [vmem:[%s1740_s7 + $0xc8] sm:$0xff]   ;;  %v1662_v27 = vld [vmem:[%s1740_s7 + $0xd0] sm:$0xff]   ;;  %v1664_v29 = vld [vmem:[%s1740_s7 + $0xd8] sm:$0xff]  }
  0x19   : > { %1548 = vmatpush3.bf16.msra.mxu0 %v1639_v4  ;;  %1623 = vmatpush3.bf16.msra.mxu1 %v1639_v4  ;;  %v1665_v30 = vld [vmem:[%s1740_s7 + $0x60] sm:$0xff]   ;;  %v1667_v32 = vld [vmem:[%s1740_s7 + $0x68] sm:$0xff]   ;;  %v1669_v34 = vld [vmem:[%s1740_s7 + $0x70] sm:$0xff]  }
  0x1a   : > { %1549 = vmatprep.subr.bf16.mxu0 %v1640_v7  ;;  %1619 = vmatprep.subr.bf16.mxu1 %v1640_v7  ;;  %v1666_v31 = vld [vmem:[%s1740_s7 + $0xe0] sm:$0xff]   ;;  %v1668_v33 = vld [vmem:[%s1740_s7 + $0xe8] sm:$0xff]   ;;  %v1670_v35 = vld [vmem:[%s1740_s7 + $0xf0] sm:$0xff]  }
  0x1b   : > { %v1671_v36 = vld [vmem:[%s1740_s7 + $0x78] sm:$0xff]  }
  0x1c   : > { %v1672_v37 = vld [vmem:[%s1740_s7 + $0xf8] sm:$0xff]  }
  0x1d   : > { %1550 = vmatpush3.bf16.msra.mxu0 %v1640_v7  ;;  %1624 = vmatpush3.bf16.msra.mxu1 %v1640_v7 }
  0x20   : > { %1552 = vmatmul.mubr.msk.bf16.vlgmr.msra.gmra.mxu0 %vm491_vm1, %v1643_v8  ;;  %1584 = vmatmul.mubr.msk.bf16.vlgmr.msra.gmra.mxu1 %vm491_vm1, %v1644_v9 }
  0x21   : > { %1555 = vmatprep.mubr.msk.bf16.mxu0 %vm491_vm1, %v1645_v10  ;;  %1587 = vmatprep.mubr.msk.bf16.mxu1 %vm491_vm1, %v1646_v11 }
  0x28   : > { %1556 = vmatmul.mubr.msk.bf16.gmra.mxu0 %vm491_vm1, %v1647_v12  ;;  %1588 = vmatmul.mubr.msk.bf16.gmra.mxu1 %vm491_vm1, %v1648_v13 }
  0x29   : > { %1559 = vmatprep.mubr.msk.bf16.mxu0 %vm491_vm1, %v1649_v14  ;;  %1591 = vmatprep.mubr.msk.bf16.mxu1 %vm491_vm1, %v1650_v15 }
  0x30   : > { %1560 = vmatmul.mubr.msk.bf16.gmra.mxu0 %vm491_vm1, %v1651_v16  ;;  %1592 = vmatmul.mubr.msk.bf16.gmra.mxu1 %vm491_vm1, %v1652_v17 }
  0x31   : > { %1563 = vmatprep.mubr.msk.bf16.mxu0 %vm491_vm1, %v1653_v18  ;;  %1595 = vmatprep.mubr.msk.bf16.mxu1 %vm491_vm1, %v1654_v19 }
  0x38   : > { %1564 = vmatmul.mubr.msk.bf16.gmra.mxu0 %vm491_vm1, %v1655_v20  ;;  %1596 = vmatmul.mubr.msk.bf16.gmra.mxu1 %vm491_vm1, %v1656_v21 }
  0x39   : > { %1567 = vmatprep.mubr.msk.bf16.mxu0 %vm491_vm1, %v1657_v22  ;;  %1599 = vmatprep.mubr.msk.bf16.mxu1 %vm491_vm1, %v1658_v23 }
  0x40   : > { %1568 = vmatmul.mubr.msk.bf16.gmra.mxu0 %vm491_vm1, %v1659_v24  ;;  %1600 = vmatmul.mubr.msk.bf16.gmra.mxu1 %vm491_vm1, %v1660_v25 }
  0x41   : > { %1571 = vmatprep.mubr.msk.bf16.mxu0 %vm491_vm1, %v1661_v26  ;;  %1603 = vmatprep.mubr.msk.bf16.mxu1 %vm491_vm1, %v1662_v27 }
  0x48   : > { %1572 = vmatmul.mubr.msk.bf16.gmra.mxu0 %vm491_vm1, %v1663_v28  ;;  %1604 = vmatmul.mubr.msk.bf16.gmra.mxu1 %vm491_vm1, %v1664_v29 }
  0x49   : > { %1575 = vmatprep.mubr.msk.bf16.mxu0 %vm491_vm1, %v1665_v30  ;;  %1607 = vmatprep.mubr.msk.bf16.mxu1 %vm491_vm1, %v1666_v31 }
  0x50   : > { %1576 = vmatmul.mubr.msk.bf16.gmra.mxu0 %vm491_vm1, %v1667_v32  ;;  %1608 = vmatmul.mubr.msk.bf16.gmra.mxu1 %vm491_vm1, %v1668_v33 }
  0x51   : > { %1579 = vmatprep.mubr.msk.bf16.mxu0 %vm491_vm1, %v1669_v34  ;;  %1611 = vmatprep.mubr.msk.bf16.mxu1 %vm491_vm1, %v1670_v35 }
  0x58   : > { %1580 = vmatmul.mubr.msk.bf16.gmra.mxu0 %vm491_vm1, %v1671_v36  ;;  %1612 = vmatmul.mubr.msk.bf16.gmra.mxu1 %vm491_vm1, %v1672_v37 }
  0xe0   : > { %v1553_v39 = vpop.f32.mrf.mxu0  ;;  %v1585_v40 = vpop.f32.mrf.mxu1 }
  0xe1   : > { %v635_v41 = vadd.f32 %v1553_v39, %v1812_v38  ;;  %v763_v42 = vadd.f32 %v1585_v40, %v1812_v38 }
  0xe2   : > { %v626_v43 = vpop.f32.mrf.mxu0  ;;  %v754_v44 = vpop.f32.mrf.mxu1 }
  0xe3   : > { %v1822_v45 = vmax.f32 %v635_v41, 0.0  ;;  %v1824_v46 = vmax.f32 %v763_v42, 0.0  ;;  %v627_v47 = vadd.f32 %v1812_v38, %v626_v43  ;;  %v755_v48 = vadd.f32 %v1812_v38, %v754_v44 }
  0xe4   : > { %v1554_v49 = vpop.f32.mrf.mxu0  ;;  %v1586_v50 = vpop.f32.mrf.mxu1 }
  0xe5   : > { %948 = vst.msk [vmem:[%s1820_s15 + $0x10] sm:$0xff] %vm945_vm2, %v1822_v45  ;;  %980 = vst.msk [vmem:[%s1820_s15 + $0x110] sm:$0xff] %vm945_vm2, %v1824_v46  ;;  %v1834_v51 = vmax.f32 %v627_v47, 0.0  ;;  %v1836_v52 = vmax.f32 %v755_v48, 0.0  ;;  %v638_v53 = vadd.f32 %v1554_v49, %v1812_v38  ;;  %v766_v54 = vadd.f32 %v1586_v50, %v1812_v38 }
  0xe6   : > { %v629_v55 = vpop.f32.mrf.mxu0  ;;  %v757_v56 = vpop.f32.mrf.mxu1 }
  0xe7   : > { %946 = vst.msk [vmem:[%s1820_s15] sm:$0xff] %vm945_vm2, %v1834_v51  ;;  %978 = vst.msk [vmem:[%s1820_s15 + $0x100] sm:$0xff] %vm945_vm2, %v1836_v52  ;;  %v1846_v57 = vmax.f32 %v638_v53, 0.0  ;;  %v1848_v58 = vmax.f32 %v766_v54, 0.0  ;;  %v630_v59 = vadd.f32 %v1812_v38, %v629_v55  ;;  %v758_v60 = vadd.f32 %v1812_v38, %v757_v56 }
  0xe8   : > { %v1557_v61 = vpop.f32.mrf.mxu0  ;;  %v1589_v62 = vpop.f32.mrf.mxu1 }
  0xe9   : > { %949 = vst.msk [vmem:[%s1820_s15 + $0x18] sm:$0xff] %vm945_vm2, %v1846_v57  ;;  %981 = vst.msk [vmem:[%s1820_s15 + $0x118] sm:$0xff] %vm945_vm2, %v1848_v58  ;;  %v1858_v63 = vmax.f32 %v630_v59, 0.0  ;;  %v1860_v0 = vmax.f32 %v758_v60, 0.0  ;;  %v651_v1 = vadd.f32 %v1557_v61, %v1812_v38  ;;  %v779_v2 = vadd.f32 %v1589_v62, %v1812_v38 }
  0xea   : > { %v642_v3 = vpop.f32.mrf.mxu0  ;;  %v770_v4 = vpop.f32.mrf.mxu1 }
  0xeb   : > { %947 = vst.msk [vmem:[%s1820_s15 + $0x8] sm:$0xff] %vm945_vm2, %v1858_v63  ;;  %979 = vst.msk [vmem:[%s1820_s15 + $0x108] sm:$0xff] %vm945_vm2, %v1860_v0  ;;  %v1870_v5 = vmax.f32 %v651_v1, 0.0  ;;  %v1872_v6 = vmax.f32 %v779_v2, 0.0  ;;  %v643_v7 = vadd.f32 %v1812_v38, %v642_v3  ;;  %v771_v8 = vadd.f32 %v1812_v38, %v770_v4 }
  0xec   : > { %v1558_v9 = vpop.f32.mrf.mxu0  ;;  %v1590_v10 = vpop.f32.mrf.mxu1 }
  0xed   : > { %952 = vst.msk [vmem:[%s1820_s15 + $0x30] sm:$0xff] %vm945_vm2, %v1870_v5  ;;  %984 = vst.msk [vmem:[%s1820_s15 + $0x130] sm:$0xff] %vm945_vm2, %v1872_v6  ;;  %v1882_v11 = vmax.f32 %v643_v7, 0.0  ;;  %v1884_v12 = vmax.f32 %v771_v8, 0.0  ;;  %v654_v13 = vadd.f32 %v1558_v9, %v1812_v38  ;;  %v782_v14 = vadd.f32 %v1590_v10, %v1812_v38 }
  0xee   : > { %v645_v15 = vpop.f32.mrf.mxu0  ;;  %v773_v16 = vpop.f32.mrf.mxu1 }
  0xef   : > { %950 = vst.msk [vmem:[%s1820_s15 + $0x20] sm:$0xff] %vm945_vm2, %v1882_v11  ;;  %982 = vst.msk [vmem:[%s1820_s15 + $0x120] sm:$0xff] %vm945_vm2, %v1884_v12  ;;  %v1894_v17 = vmax.f32 %v654_v13, 0.0  ;;  %v1896_v18 = vmax.f32 %v782_v14, 0.0  ;;  %v646_v19 = vadd.f32 %v1812_v38, %v645_v15  ;;  %v774_v20 = vadd.f32 %v1812_v38, %v773_v16 }
  0xf0   : > { %v1561_v21 = vpop.f32.mrf.mxu0  ;;  %v1593_v22 = vpop.f32.mrf.mxu1 }
  0xf1   : > { %953 = vst.msk [vmem:[%s1820_s15 + $0x38] sm:$0xff] %vm945_vm2, %v1894_v17  ;;  %985 = vst.msk [vmem:[%s1820_s15 + $0x138] sm:$0xff] %vm945_vm2, %v1896_v18  ;;  %v1906_v23 = vmax.f32 %v646_v19, 0.0  ;;  %v1908_v24 = vmax.f32 %v774_v20, 0.0  ;;  %v667_v25 = vadd.f32 %v1561_v21, %v1812_v38  ;;  %v795_v26 = vadd.f32 %v1593_v22, %v1812_v38 }
  0xf2   : > { %v658_v27 = vpop.f32.mrf.mxu0  ;;  %v786_v28 = vpop.f32.mrf.mxu1 }
  0xf3   : > { %951 = vst.msk [vmem:[%s1820_s15 + $0x28] sm:$0xff] %vm945_vm2, %v1906_v23  ;;  %983 = vst.msk [vmem:[%s1820_s15 + $0x128] sm:$0xff] %vm945_vm2, %v1908_v24  ;;  %v1918_v29 = vmax.f32 %v667_v25, 0.0  ;;  %v1920_v30 = vmax.f32 %v795_v26, 0.0  ;;  %v659_v31 = vadd.f32 %v1812_v38, %v658_v27  ;;  %v787_v32 = vadd.f32 %v1812_v38, %v786_v28 }
  0xf4   : > { %v1562_v33 = vpop.f32.mrf.mxu0  ;;  %v1594_v34 = vpop.f32.mrf.mxu1 }
  0xf5   : > { %956 = vst.msk [vmem:[%s1820_s15 + $0x50] sm:$0xff] %vm945_vm2, %v1918_v29  ;;  %988 = vst.msk [vmem:[%s1820_s15 + $0x150] sm:$0xff] %vm945_vm2, %v1920_v30  ;;  %v1930_v35 = vmax.f32 %v659_v31, 0.0  ;;  %v1932_v36 = vmax.f32 %v787_v32, 0.0  ;;  %v670_v37 = vadd.f32 %v1562_v33, %v1812_v38  ;;  %v798_v39 = vadd.f32 %v1594_v34, %v1812_v38 }
  0xf6   : > { %v661_v40 = vpop.f32.mrf.mxu0  ;;  %v789_v41 = vpop.f32.mrf.mxu1 }
  0xf7   : > { %954 = vst.msk [vmem:[%s1820_s15 + $0x40] sm:$0xff] %vm945_vm2, %v1930_v35  ;;  %986 = vst.msk [vmem:[%s1820_s15 + $0x140] sm:$0xff] %vm945_vm2, %v1932_v36  ;;  %v1942_v42 = vmax.f32 %v670_v37, 0.0  ;;  %v1944_v43 = vmax.f32 %v798_v39, 0.0  ;;  %v662_v44 = vadd.f32 %v1812_v38, %v661_v40  ;;  %v790_v47 = vadd.f32 %v1812_v38, %v789_v41 }
  0xf8   : > { %v1565_v48 = vpop.f32.mrf.mxu0  ;;  %v1597_v49 = vpop.f32.mrf.mxu1 }
  0xf9   : > { %957 = vst.msk [vmem:[%s1820_s15 + $0x58] sm:$0xff] %vm945_vm2, %v1942_v42  ;;  %989 = vst.msk [vmem:[%s1820_s15 + $0x158] sm:$0xff] %vm945_vm2, %v1944_v43  ;;  %v1954_v50 = vmax.f32 %v662_v44, 0.0  ;;  %v1956_v53 = vmax.f32 %v790_v47, 0.0  ;;  %v683_v54 = vadd.f32 %v1565_v48, %v1812_v38  ;;  %v811_v55 = vadd.f32 %v1597_v49, %v1812_v38 }
  0xfa   : > { %v674_v56 = vpop.f32.mrf.mxu0  ;;  %v802_v59 = vpop.f32.mrf.mxu1 }
  0xfb   : > { %955 = vst.msk [vmem:[%s1820_s15 + $0x48] sm:$0xff] %vm945_vm2, %v1954_v50  ;;  %987 = vst.msk [vmem:[%s1820_s15 + $0x148] sm:$0xff] %vm945_vm2, %v1956_v53  ;;  %v1966_v60 = vmax.f32 %v683_v54, 0.0  ;;  %v1968_v61 = vmax.f32 %v811_v55, 0.0  ;;  %v675_v62 = vadd.f32 %v1812_v38, %v674_v56  ;;  %v803_v1 = vadd.f32 %v1812_v38, %v802_v59 }
  0xfc   : > { %v1566_v2 = vpop.f32.mrf.mxu0  ;;  %v1598_v3 = vpop.f32.mrf.mxu1 }
  0xfd   : > { %960 = vst.msk [vmem:[%s1820_s15 + $0x70] sm:$0xff] %vm945_vm2, %v1966_v60  ;;  %992 = vst.msk [vmem:[%s1820_s15 + $0x170] sm:$0xff] %vm945_vm2, %v1968_v61  ;;  %v1978_v4 = vmax.f32 %v675_v62, 0.0  ;;  %v1980_v7 = vmax.f32 %v803_v1, 0.0  ;;  %v686_v8 = vadd.f32 %v1566_v2, %v1812_v38  ;;  %v814_v9 = vadd.f32 %v1598_v3, %v1812_v38 }
  0xfe   : > { %v677_v10 = vpop.f32.mrf.mxu0  ;;  %v805_v13 = vpop.f32.mrf.mxu1 }
  0xff   : > { %958 = vst.msk [vmem:[%s1820_s15 + $0x60] sm:$0xff] %vm945_vm2, %v1978_v4  ;;  %990 = vst.msk [vmem:[%s1820_s15 + $0x160] sm:$0xff] %vm945_vm2, %v1980_v7  ;;  %v1990_v14 = vmax.f32 %v686_v8, 0.0  ;;  %v1992_v15 = vmax.f32 %v814_v9, 0.0  ;;  %v678_v16 = vadd.f32 %v1812_v38, %v677_v10  ;;  %v806_v19 = vadd.f32 %v1812_v38, %v805_v13 }
 0x100   : > { %v1569_v20 = vpop.f32.mrf.mxu0  ;;  %v1601_v21 = vpop.f32.mrf.mxu1 }
 0x101   : > { %961 = vst.msk [vmem:[%s1820_s15 + $0x78] sm:$0xff] %vm945_vm2, %v1990_v14  ;;  %993 = vst.msk [vmem:[%s1820_s15 + $0x178] sm:$0xff] %vm945_vm2, %v1992_v15  ;;  %v2002_v22 = vmax.f32 %v678_v16, 0.0  ;;  %v2004_v25 = vmax.f32 %v806_v19, 0.0  ;;  %v699_v26 = vadd.f32 %v1569_v20, %v1812_v38  ;;  %v827_v27 = vadd.f32 %v1601_v21, %v1812_v38 }
 0x102   : > { %v690_v28 = vpop.f32.mrf.mxu0  ;;  %v818_v31 = vpop.f32.mrf.mxu1 }
 0x103   : > { %959 = vst.msk [vmem:[%s1820_s15 + $0x68] sm:$0xff] %vm945_vm2, %v2002_v22  ;;  %991 = vst.msk [vmem:[%s1820_s15 + $0x168] sm:$0xff] %vm945_vm2, %v2004_v25  ;;  %v2014_v32 = vmax.f32 %v699_v26, 0.0  ;;  %v2016_v33 = vmax.f32 %v827_v27, 0.0  ;;  %v691_v34 = vadd.f32 %v1812_v38, %v690_v28  ;;  %v819_v37 = vadd.f32 %v1812_v38, %v818_v31 }
 0x104   : > { %v1570_v39 = vpop.f32.mrf.mxu0  ;;  %v1602_v40 = vpop.f32.mrf.mxu1 }
 0x105   : > { %964 = vst.msk [vmem:[%s1820_s15 + $0x90] sm:$0xff] %vm945_vm2, %v2014_v32  ;;  %996 = vst.msk [vmem:[%s1820_s15 + $0x190] sm:$0xff] %vm945_vm2, %v2016_v33  ;;  %v2026_v41 = vmax.f32 %v691_v34, 0.0  ;;  %v2028_v44 = vmax.f32 %v819_v37, 0.0  ;;  %v702_v47 = vadd.f32 %v1570_v39, %v1812_v38  ;;  %v830_v48 = vadd.f32 %v1602_v40, %v1812_v38 }
 0x106   : > { %v693_v49 = vpop.f32.mrf.mxu0  ;;  %v821_v54 = vpop.f32.mrf.mxu1 }
 0x107   : > { %962 = vst.msk [vmem:[%s1820_s15 + $0x80] sm:$0xff] %vm945_vm2, %v2026_v41  ;;  %994 = vst.msk [vmem:[%s1820_s15 + $0x180] sm:$0xff] %vm945_vm2, %v2028_v44  ;;  %v2038_v55 = vmax.f32 %v702_v47, 0.0  ;;  %v2040_v56 = vmax.f32 %v830_v48, 0.0  ;;  %v694_v59 = vadd.f32 %v1812_v38, %v693_v49  ;;  %v822_v62 = vadd.f32 %v1812_v38, %v821_v54 }
 0x108   : > { %v1573_v1 = vpop.f32.mrf.mxu0  ;;  %v1605_v2 = vpop.f32.mrf.mxu1 }
 0x109   : > { %2581 = vst [vmem:[#allocation2_spill] sm:$0xff] %v2040_v56  ;;  %965 = vst.msk [vmem:[%s1820_s15 + $0x98] sm:$0xff] %vm945_vm2, %v2038_v55  ;;  %v2050_v3 = vmax.f32 %v694_v59, 0.0  ;;  %v2052_v8 = vmax.f32 %v822_v62, 0.0  ;;  %v715_v9 = vadd.f32 %v1573_v1, %v1812_v38  ;;  %v843_v10 = vadd.f32 %v1605_v2, %v1812_v38 }
 0x10a   : > { %997 = vst.msk [vmem:[%s1820_s15 + $0x198] sm:$0xff] %vm945_vm2, %v2040_v56  ;;  %v706_v13 = vpop.f32.mrf.mxu0  ;;  %v834_v16 = vpop.f32.mrf.mxu1 }
 0x10b   : > { %963 = vst.msk [vmem:[%s1820_s15 + $0x88] sm:$0xff] %vm945_vm2, %v2050_v3  ;;  %995 = vst.msk [vmem:[%s1820_s15 + $0x188] sm:$0xff] %vm945_vm2, %v2052_v8  ;;  %v2062_v19 = vmax.f32 %v715_v9, 0.0  ;;  %v2064_v20 = vmax.f32 %v843_v10, 0.0  ;;  %v707_v21 = vadd.f32 %v1812_v38, %v706_v13  ;;  %v835_v26 = vadd.f32 %v1812_v38, %v834_v16 }
 0x10c   : > { %v1574_v27 = vpop.f32.mrf.mxu0  ;;  %v1606_v28 = vpop.f32.mrf.mxu1 }
 0x10d   : > { %2582 = vst [vmem:[#allocation3_spill] sm:$0xff] %v2064_v20  ;;  %968 = vst.msk [vmem:[%s1820_s15 + $0xb0] sm:$0xff] %vm945_vm2, %v2062_v19  ;;  %v2074_v31 = vmax.f32 %v707_v21, 0.0  ;;  %v2076_v34 = vmax.f32 %v835_v26, 0.0  ;;  %v718_v37 = vadd.f32 %v1574_v27, %v1812_v38  ;;  %v846_v39 = vadd.f32 %v1606_v28, %v1812_v38 }
 0x10e   : > { %1000 = vst.msk [vmem:[%s1820_s15 + $0x1b0] sm:$0xff] %vm945_vm2, %v2064_v20  ;;  %v709_v40 = vpop.f32.mrf.mxu0  ;;  %v837_v47 = vpop.f32.mrf.mxu1 }
 0x10f   : > { %2583 = vst [vmem:[#allocation4_spill] sm:$0xff] %v2076_v34  ;;  %966 = vst.msk [vmem:[%s1820_s15 + $0xa0] sm:$0xff] %vm945_vm2, %v2074_v31  ;;  %v2086_v48 = vmax.f32 %v718_v37, 0.0  ;;  %v2088_v49 = vmax.f32 %v846_v39, 0.0  ;;  %v710_v54 = vadd.f32 %v1812_v38, %v709_v40  ;;  %v838_v59 = vadd.f32 %v1812_v38, %v837_v47 }
 0x110   : > { %998 = vst.msk [vmem:[%s1820_s15 + $0x1a0] sm:$0xff] %vm945_vm2, %v2076_v34  ;;  %v1577_v62 = vpop.f32.mrf.mxu0  ;;  %v1609_v1 = vpop.f32.mrf.mxu1 }
 0x111   : > { %2584 = vst [vmem:[#allocation5_spill] sm:$0xff] %v2088_v49  ;;  %969 = vst.msk [vmem:[%s1820_s15 + $0xb8] sm:$0xff] %vm945_vm2, %v2086_v48  ;;  %v2098_v2 = vmax.f32 %v710_v54, 0.0  ;;  %v2100_v9 = vmax.f32 %v838_v59, 0.0  ;;  %v731_v10 = vadd.f32 %v1577_v62, %v1812_v38  ;;  %v859_v13 = vadd.f32 %v1609_v1, %v1812_v38 }
 0x112   : > { %1001 = vst.msk [vmem:[%s1820_s15 + $0x1b8] sm:$0xff] %vm945_vm2, %v2088_v49  ;;  %v722_v16 = vpop.f32.mrf.mxu0  ;;  %v850_v21 = vpop.f32.mrf.mxu1 }
 0x113   : > { %2585 = vst [vmem:[#allocation6_spill] sm:$0xff] %v2100_v9  ;;  %967 = vst.msk [vmem:[%s1820_s15 + $0xa8] sm:$0xff] %vm945_vm2, %v2098_v2  ;;  %v2110_v26 = vmax.f32 %v731_v10, 0.0  ;;  %v2112_v27 = vmax.f32 %v859_v13, 0.0  ;;  %v723_v28 = vadd.f32 %v1812_v38, %v722_v16  ;;  %v851_v37 = vadd.f32 %v1812_v38, %v850_v21 }
 0x114   : > { %999 = vst.msk [vmem:[%s1820_s15 + $0x1a8] sm:$0xff] %vm945_vm2, %v2100_v9  ;;  %v1578_v39 = vpop.f32.mrf.mxu0  ;;  %v1610_v40 = vpop.f32.mrf.mxu1 }
 0x115   : > { %2586 = vst [vmem:[#allocation7_spill] sm:$0xff] %v2112_v27  ;;  %972 = vst.msk [vmem:[%s1820_s15 + $0xd0] sm:$0xff] %vm945_vm2, %v2110_v26  ;;  %v2122_v47 = vmax.f32 %v723_v28, 0.0  ;;  %v2124_v54 = vmax.f32 %v851_v37, 0.0  ;;  %v734_v59 = vadd.f32 %v1578_v39, %v1812_v38  ;;  %v862_v62 = vadd.f32 %v1610_v40, %v1812_v38 }
 0x116   : > { %1004 = vst.msk [vmem:[%s1820_s15 + $0x1d0] sm:$0xff] %vm945_vm2, %v2112_v27  ;;  %v725_v1 = vpop.f32.mrf.mxu0  ;;  %v853_v10 = vpop.f32.mrf.mxu1 }
 0x117   : > { %2587 = vst [vmem:[#allocation8_spill] sm:$0xff] %v2124_v54  ;;  %970 = vst.msk [vmem:[%s1820_s15 + $0xc0] sm:$0xff] %vm945_vm2, %v2122_v47  ;;  %v2134_v13 = vmax.f32 %v734_v59, 0.0  ;;  %v2136_v16 = vmax.f32 %v862_v62, 0.0  ;;  %v726_v21 = vadd.f32 %v1812_v38, %v725_v1  ;;  %v854_v28 = vadd.f32 %v1812_v38, %v853_v10 }
 0x118   : > { %1002 = vst.msk [vmem:[%s1820_s15 + $0x1c0] sm:$0xff] %vm945_vm2, %v2124_v54  ;;  %v1581_v37 = vpop.f32.mrf.mxu0  ;;  %v1613_v39 = vpop.f32.mrf.mxu1 }
 0x119   : > { %2588 = vst [vmem:[#allocation9_spill] sm:$0xff] %v2136_v16  ;;  %973 = vst.msk [vmem:[%s1820_s15 + $0xd8] sm:$0xff] %vm945_vm2, %v2134_v13  ;;  %v2146_v40 = vmax.f32 %v726_v21, 0.0  ;;  %v2148_v59 = vmax.f32 %v854_v28, 0.0  ;;  %v747_v62 = vadd.f32 %v1581_v37, %v1812_v38  ;;  %v875_v1 = vadd.f32 %v1613_v39, %v1812_v38 }
 0x11a   : > { %1005 = vst.msk [vmem:[%s1820_s15 + $0x1d8] sm:$0xff] %vm945_vm2, %v2136_v16  ;;  %v738_v27 = vpop.f32.mrf.mxu0  ;;  %v866_v10 = vpop.f32.mrf.mxu1 }
 0x11b   : > { %2589 = vst [vmem:[#allocation10_spill] sm:$0xff] %v2148_v59  ;;  %971 = vst.msk [vmem:[%s1820_s15 + $0xc8] sm:$0xff] %vm945_vm2, %v2146_v40  ;;  %v2158_v16 = vmax.f32 %v747_v62, 0.0  ;;  %v2160_v21 = vmax.f32 %v875_v1, 0.0  ;;  %v739_v28 = vadd.f32 %v1812_v38, %v738_v27  ;;  %v867_v37 = vadd.f32 %v1812_v38, %v866_v10 }
 0x11c   : > { %1003 = vst.msk [vmem:[%s1820_s15 + $0x1c8] sm:$0xff] %vm945_vm2, %v2148_v59  ;;  %v1582_v54 = vpop.f32.mrf.mxu0  ;;  %v1614_v39 = vpop.f32.mrf.mxu1 }
 0x11d   : > { %2590 = vst [vmem:[#allocation11_spill] sm:$0xff] %v2160_v21  ;;  %976 = vst.msk [vmem:[%s1820_s15 + $0xf0] sm:$0xff] %vm945_vm2, %v2158_v16  ;;  %v2170_v59 = vmax.f32 %v739_v28, 0.0  ;;  %v2172_v62 = vmax.f32 %v867_v37, 0.0  ;;  %v750_v27 = vadd.f32 %v1582_v54, %v1812_v38  ;;  %v878_v1 = vadd.f32 %v1614_v39, %v1812_v38 }
 0x11e   : > { %1008 = vst.msk [vmem:[%s1820_s15 + $0x1f0] sm:$0xff] %vm945_vm2, %v2160_v21  ;;  %v741_v10 = vpop.f32.mrf.mxu0  ;;  %v869_v49 = vpop.f32.mrf.mxu1 }
 0x11f   : > { %2591 = vst [vmem:[#allocation12_spill] sm:$0xff] %v2172_v62  ;;  %974 = vst.msk [vmem:[%s1820_s15 + $0xe0] sm:$0xff] %vm945_vm2, %v2170_v59  ;;  %v2182_v20 = vmax.f32 %v750_v27, 0.0  ;;  %v2184_v28 = vmax.f32 %v878_v1, 0.0  ;;  %v742_v37 = vadd.f32 %v1812_v38, %v741_v10  ;;  %v870_v21 = vadd.f32 %v1812_v38, %v869_v49 }
 0x120   : > { %1006 = vst.msk [vmem:[%s1820_s15 + $0x1e0] sm:$0xff] %vm945_vm2, %v2172_v62  ;;  %1013 = sbr.rel (%p1501_p4) target bundleno = 295 (0x127), region = 36 }
 0x121   : > { %2592 = vst [vmem:[#allocation13_spill] sm:$0xff] %v2184_v28  ;;  %977 = vst.msk [vmem:[%s1820_s15 + $0xf8] sm:$0xff] %vm945_vm2, %v2182_v20  ;;  %v2194_v54 = vmax.f32 %v742_v37, 0.0  ;;  %v2196_v39 = vmax.f32 %v870_v21, 0.0 }
 0x122   : > { %1009 = vst.msk [vmem:[%s1820_s15 + $0x1f8] sm:$0xff] %vm945_vm2, %v2184_v28 }
 0x123   : > { %2593 = vst [vmem:[#allocation14_spill] sm:$0xff] %v2196_v39  ;;  %975 = vst.msk [vmem:[%s1820_s15 + $0xe8] sm:$0xff] %vm945_vm2, %v2194_v54 }
 0x124   : > { %1007 = vst.msk [vmem:[%s1820_s15 + $0x1e8] sm:$0xff] %vm945_vm2, %v2196_v39 }
 0x125   : > { %vm1014_vm3 = vcmask 57344   ;;  %v1681_v38 = vmov 0.0  }
 0x126   : > { %1015 = vst.msk [vmem:[%s2553_s4] sm:$0x1] %vm1014_vm3, %v1681_v38  ;;  %1016 = vst.msk [vmem:[%s2554_s5] sm:$0x1] %vm1014_vm3, %v1681_v38 }
 0x127 PF: > { %v1018_v49 = vsel %vm945_vm2, %v1834_v51, 0.0  ;;  %v1019_v21 = vsel %vm945_vm2, %v1858_v63, 0.0  ;;  %v1021_v27 = vsel %vm945_vm2, %v1822_v45, 0.0  ;;  %v1023_v10 = vsel %vm945_vm2, %v1846_v57, 0.0 }
 0x128   : > { %v1020_v1 = vadd.f32 %v1019_v21, %v1018_v49  ;;  %v1025_v28 = vsel %vm945_vm2, %v1882_v11, 0.0  ;;  %v1027_v38 = vsel %vm945_vm2, %v1906_v23, 0.0  ;;  %v1029_v9 = vsel %vm945_vm2, %v1870_v5, 0.0 }
 0x129   : > { %v1031_v56 = vsel %vm945_vm2, %v1894_v17, 0.0  ;;  %v1033_v21 = vsel %vm945_vm2, %v1930_v35, 0.0  ;;  %vm1152_vm4 = vcmask 57344  }
 0x12a   : > { %v1022_v37 = vadd.f32 %v1021_v27, %v1020_v1  ;;  %v1035_v1 = vsel %vm945_vm2, %v1954_v50, 0.0 }
 0x12c   : > { %v1024_v39 = vadd.f32 %v1023_v10, %v1022_v37  ;;  %v1037_v37 = vsel %vm945_vm2, %v1918_v29, 0.0 }
 0x12e   : > { %v1026_v62 = vadd.f32 %v1025_v28, %v1024_v39  ;;  %v1039_v39 = vsel %vm945_vm2, %v1942_v42, 0.0 }
 0x130   : > { %v1028_v34 = vadd.f32 %v1027_v38, %v1026_v62  ;;  %v1041_v38 = vsel %vm945_vm2, %v1978_v4, 0.0 }
 0x132   : > { %v1030_v49 = vadd.f32 %v1029_v9, %v1028_v34  ;;  %v1043_v9 = vsel %vm945_vm2, %v2002_v22, 0.0 }
 0x134   : > { %v1032_v27 = vadd.f32 %v1031_v56, %v1030_v49  ;;  %v1045_v49 = vsel %vm945_vm2, %v1966_v60, 0.0 }
 0x136   : > { %v1034_v10 = vadd.f32 %v1033_v21, %v1032_v27  ;;  %v1047_v27 = vsel %vm945_vm2, %v1990_v14, 0.0 }
 0x138   : > { %v1036_v28 = vadd.f32 %v1035_v1, %v1034_v10  ;;  %v1049_v10 = vsel %vm945_vm2, %v2026_v41, 0.0 }
 0x13a   : > { %v1038_v62 = vadd.f32 %v1037_v37, %v1036_v28  ;;  %v1051_v28 = vsel %vm945_vm2, %v2050_v3, 0.0 }
 0x13c   : > { %v1040_v34 = vadd.f32 %v1039_v39, %v1038_v62  ;;  %v1053_v62 = vsel %vm945_vm2, %v2014_v32, 0.0 }
 0x13e   : > { %v1042_v56 = vadd.f32 %v1041_v38, %v1040_v34  ;;  %v1155_v38 = vmul.f32 %v1834_v51, %v1834_v51 }
 0x140   : > { %v1044_v21 = vadd.f32 %v1043_v9, %v1042_v56  ;;  %v1156_v9 = vmul.f32 %v1858_v63, %v1858_v63  ;;  %v1157_v56 = vmul.f32 %v1822_v45, %v1822_v45 }
 0x142   : > { %v1046_v1 = vadd.f32 %v1045_v49, %v1044_v21  ;;  %v1055_v49 = vsel %vm945_vm2, %v2038_v55, 0.0  ;;  %v1220_v63 = vsel %vm945_vm2, %v1156_v9, 0.0  ;;  %v1222_v45 = vsel %vm945_vm2, %v1157_v56, 0.0 }
 0x143   : > { %v1063_v56 = vsel %vm945_vm2, %v2086_v48, 0.0 }
 0x144   : > { %v1048_v37 = vadd.f32 %v1047_v27, %v1046_v1  ;;  %v1158_v27 = vmul.f32 %v1846_v57, %v1846_v57  ;;  %v1057_v1 = vsel %vm945_vm2, %v2074_v31, 0.0  ;;  %v1160_v57 = vmul.f32 %v1906_v23, %v1906_v23 }
 0x145   : > { %v1162_v23 = vmul.f32 %v1894_v17, %v1894_v17  ;;  %v1164_v17 = vmul.f32 %v1954_v50, %v1954_v50  ;;  %v1166_v50 = vmul.f32 %v1942_v42, %v1942_v42  ;;  %v1168_v42 = vmul.f32 %v2002_v22, %v2002_v22 }
 0x146   : > { %v1050_v39 = vadd.f32 %v1049_v10, %v1048_v37  ;;  %v1219_v10 = vsel %vm945_vm2, %v1155_v38, 0.0  ;;  %v1159_v37 = vmul.f32 %v1882_v11, %v1882_v11  ;;  %v1061_v38 = vsel %vm945_vm2, %v2062_v19, 0.0 }
 0x147   : > { %v1161_v11 = vmul.f32 %v1870_v5, %v1870_v5  ;;  %v1163_v5 = vmul.f32 %v1930_v35, %v1930_v35  ;;  %v1165_v35 = vmul.f32 %v1918_v29, %v1918_v29  ;;  %v1167_v29 = vmul.f32 %v1978_v4, %v1978_v4 }
 0x148   : > { %v1052_v34 = vadd.f32 %v1051_v28, %v1050_v39  ;;  %v1059_v28 = vsel %vm945_vm2, %v2098_v2, 0.0  ;;  %v1221_v39 = vadd.f32 %v1220_v63, %v1219_v10  ;;  %v1226_v9 = vsel %vm945_vm2, %v1159_v37, 0.0 }
 0x149   : > { %v1230_v37 = vsel %vm945_vm2, %v1161_v11, 0.0  ;;  %v1071_v11 = vsel %vm945_vm2, %v2134_v13, 0.0  ;;  %v1169_v4 = vmul.f32 %v1966_v60, %v1966_v60  ;;  %v1170_v22 = vmul.f32 %v1990_v14, %v1990_v14 }
 0x14a   : > { %v1054_v21 = vadd.f32 %v1053_v62, %v1052_v34  ;;  %v1224_v34 = vsel %vm945_vm2, %v1158_v27, 0.0  ;;  %v1228_v27 = vsel %vm945_vm2, %v1160_v57, 0.0  ;;  %v1232_v57 = vsel %vm945_vm2, %v1162_v23, 0.0 }
 0x14b   : > { %v1171_v60 = vmul.f32 %v2026_v41, %v2026_v41  ;;  %v1172_v14 = vmul.f32 %v2050_v3, %v2050_v3  ;;  %v1173_v41 = vmul.f32 %v2014_v32, %v2014_v32  ;;  %v1174_v3 = vmul.f32 %v2038_v55, %v2038_v55 }
 0x14c   : > { %v1056_v51 = vadd.f32 %v1055_v49, %v1054_v21  ;;  %v1223_v49 = vadd.f32 %v1222_v45, %v1221_v39  ;;  %v1175_v32 = vmul.f32 %v2074_v31, %v2074_v31  ;;  %v1176_v55 = vmul.f32 %v2098_v2, %v2098_v2 }
 0x14d   : > { %v1177_v31 = vmul.f32 %v2062_v19, %v2062_v19  ;;  %v1178_v2 = vmul.f32 %v2086_v48, %v2086_v48  ;;  %v1179_v19 = vmul.f32 %v2122_v47, %v2122_v47  ;;  %v1180_v48 = vmul.f32 %v2146_v40, %v2146_v40 }
 0x14e   : > { %v1058_v62 = vadd.f32 %v1057_v1, %v1056_v51  ;;  %v1225_v10 = vadd.f32 %v1224_v34, %v1223_v49  ;;  %v1065_v51 = vsel %vm945_vm2, %v2122_v47, 0.0  ;;  %v1069_v34 = vsel %vm945_vm2, %v2110_v26, 0.0 }
 0x14f   : > { %v1181_v47 = vmul.f32 %v2110_v26, %v2110_v26  ;;  %v1183_v26 = vmul.f32 %v2170_v59, %v2170_v59 }
 0x150   : > { %v1060_v21 = vadd.f32 %v1059_v28, %v1058_v62  ;;  %v1227_v63 = vadd.f32 %v1226_v9, %v1225_v10  ;;  %v1067_v28 = vsel %vm945_vm2, %v2146_v40, 0.0  ;;  %v1236_v10 = vsel %vm945_vm2, %v1164_v17, 0.0 }
 0x151   : > { %v1242_v17 = vsel %vm945_vm2, %v1167_v29, 0.0  ;;  %v1182_v40 = vmul.f32 %v2134_v13, %v2134_v13  ;;  %v1184_v13 = vmul.f32 %v2194_v54, %v2194_v54 }
 0x152   : > { %v1062_v1 = vadd.f32 %v1061_v38, %v1060_v21  ;;  %v1229_v39 = vadd.f32 %v1228_v27, %v1227_v63  ;;  %v1234_v21 = vsel %vm945_vm2, %v1163_v5, 0.0  ;;  %v1075_v63 = vsel %vm945_vm2, %v2194_v54, 0.0 }
 0x153   : > { %v1186_v54 = vmul.f32 %v2182_v20, %v2182_v20 }
 0x154   : > { %v1064_v45 = vadd.f32 %v1063_v56, %v1062_v1  ;;  %v1231_v38 = vadd.f32 %v1230_v37, %v1229_v39  ;;  %v1073_v1 = vsel %vm945_vm2, %v2170_v59, 0.0  ;;  %v1240_v37 = vsel %vm945_vm2, %v1166_v50, 0.0 }
 0x155   : > { %v1185_v59 = vmul.f32 %v2158_v16, %v2158_v16 }
 0x156   : > { %v1066_v62 = vadd.f32 %v1065_v51, %v1064_v45  ;;  %v1233_v9 = vadd.f32 %v1232_v57, %v1231_v38  ;;  %v1238_v51 = vsel %vm945_vm2, %v1165_v35, 0.0  ;;  %v1079_v57 = vsel %vm945_vm2, %v2182_v20, 0.0 }
 0x157   : > { %v1081_v35 = vsel %vm945_vm2, %v1836_v52, 0.0  ;;  %v1188_v20 = vmul.f32 %v1860_v0, %v1860_v0 }
 0x158   : > { %v1068_v49 = vadd.f32 %v1067_v28, %v1066_v62  ;;  %v1235_v23 = vadd.f32 %v1234_v21, %v1233_v9  ;;  %v1077_v28 = vsel %vm945_vm2, %v2158_v16, 0.0  ;;  %v1246_v9 = vsel %vm945_vm2, %v1169_v4, 0.0 }
 0x159   : > { %v1091_v4 = vsel %vm945_vm2, %v1908_v24, 0.0  ;;  %v1187_v16 = vmul.f32 %v1836_v52, %v1836_v52  ;;  %v1189_v52 = vmul.f32 %v1824_v46, %v1824_v46 }
 0x15a   : > { %v1070_v56 = vadd.f32 %v1069_v34, %v1068_v49  ;;  %v1237_v45 = vadd.f32 %v1236_v10, %v1235_v23  ;;  %v1244_v49 = vsel %vm945_vm2, %v1168_v42, 0.0  ;;  %v1085_v23 = vsel %vm945_vm2, %v1824_v46, 0.0 }
 0x15b   : > { %v1252_v42 = vsel %vm945_vm2, %v1172_v14, 0.0  ;;  %v1262_v14 = vsel %vm945_vm2, %v1177_v31, 0.0  ;;  %v1111_v31 = vsel %vm945_vm2, %v1992_v15, 0.0  ;;  %v1191_v46 = vmul.f32 %v1884_v12, %v1884_v12 }
 0x15c   : > { %v1072_v27 = vadd.f32 %v1071_v11, %v1070_v56  ;;  %v1239_v39 = vadd.f32 %v1238_v51, %v1237_v45  ;;  %v1083_v56 = vsel %vm945_vm2, %v1860_v0, 0.0  ;;  %v1250_v51 = vsel %vm945_vm2, %v1171_v60, 0.0 }
 0x15d   : > { %v1190_v0 = vmul.f32 %v1848_v58, %v1848_v58 }
 0x15e   : > { %v1074_v5 = vadd.f32 %v1073_v1, %v1072_v27  ;;  %v1241_v34 = vadd.f32 %v1240_v37, %v1239_v39  ;;  %v1248_v1 = vsel %vm945_vm2, %v1170_v22, 0.0  ;;  %v1089_v37 = vsel %vm945_vm2, %v1884_v12, 0.0 }
 0x15f   : > { %v1193_v12 = vmul.f32 %v1872_v6, %v1872_v6 }
 0x160   : > { %v1076_v62 = vadd.f32 %v1075_v63, %v1074_v5  ;;  %v1243_v21 = vadd.f32 %v1242_v17, %v1241_v34  ;;  %v1087_v63 = vsel %vm945_vm2, %v1848_v58, 0.0  ;;  %v1256_v34 = vsel %vm945_vm2, %v1174_v3, 0.0 }
 0x161   : > { %v1192_v58 = vmul.f32 %v1908_v24, %v1908_v24  ;;  %v1194_v24 = vmul.f32 %v1896_v18, %v1896_v18 }
 0x162   : > { %v1078_v38 = vadd.f32 %v1077_v28, %v1076_v62  ;;  %v1245_v50 = vadd.f32 %v1244_v49, %v1243_v21  ;;  %v1254_v62 = vsel %vm945_vm2, %v1173_v41, 0.0  ;;  %v1095_v21 = vsel %vm945_vm2, %v1896_v18, 0.0 }
 0x163   : > { %v1101_v41 = vsel %vm945_vm2, %v1920_v30, 0.0  ;;  %v1196_v18 = vmul.f32 %v1956_v53, %v1956_v53 }
 0x164   : > { %v1080_v11 = vadd.f32 %v1079_v57, %v1078_v38  ;;  %v1247_v27 = vadd.f32 %v1246_v9, %v1245_v50  ;;  %v1093_v38 = vsel %vm945_vm2, %v1872_v6, 0.0  ;;  %v1260_v9 = vsel %vm945_vm2, %v1176_v55, 0.0 }
 0x165   : > { %v1272_v55 = vsel %vm945_vm2, %v1182_v40, 0.0  ;;  %v1286_v40 = vsel %vm945_vm2, %v1189_v52, 0.0  ;;  %v1195_v6 = vmul.f32 %v1932_v36, %v1932_v36  ;;  %v1300_v52 = vsel %vm945_vm2, %v1196_v18, 0.0 }
 0x166   : > { %v1082_v10 = vadd.f32 %v1081_v35, %v1080_v11  ;;  %v1249_v45 = vadd.f32 %v1248_v1, %v1247_v27  ;;  %v1258_v35 = vsel %vm945_vm2, %v1175_v32, 0.0  ;;  %v1099_v1 = vsel %vm945_vm2, %v1956_v53, 0.0 }
 0x167   : > { %v1198_v53 = vmul.f32 %v1944_v43, %v1944_v43 }
 0x168   : > { %v1084_v29 = vadd.f32 %v1083_v56, %v1082_v10  ;;  %v1251_v28 = vadd.f32 %v1250_v51, %v1249_v45  ;;  %v1097_v56 = vsel %vm945_vm2, %v1932_v36, 0.0  ;;  %v1266_v45 = vsel %vm945_vm2, %v1179_v19, 0.0 }
 0x169   : > { %v1197_v36 = vmul.f32 %v1920_v30, %v1920_v30  ;;  %v1199_v30 = vmul.f32 %v1980_v7, %v1980_v7 }
 0x16a   : > { %v1086_v5 = vadd.f32 %v1085_v23, %v1084_v29  ;;  %v1253_v17 = vadd.f32 %v1252_v42, %v1251_v28  ;;  %v1264_v29 = vsel %vm945_vm2, %v1178_v2, 0.0  ;;  %v1105_v28 = vsel %vm945_vm2, %v1980_v7, 0.0 }
 0x16b   : > { %v1201_v7 = vmul.f32 %v1968_v61, %v1968_v61 }
 0x16c   : > { %v1088_v39 = vadd.f32 %v1087_v63, %v1086_v5  ;;  %v1255_v22 = vadd.f32 %v1254_v62, %v1253_v17  ;;  %v1103_v5 = vsel %vm945_vm2, %v1944_v43, 0.0  ;;  %v1270_v62 = vsel %vm945_vm2, %v1181_v47, 0.0 }
 0x16d   : > { %v1284_v47 = vsel %vm945_vm2, %v1188_v20, 0.0  ;;  %v1298_v20 = vsel %vm945_vm2, %v1195_v6, 0.0  ;;  %v1200_v43 = vmul.f32 %v2004_v25, %v2004_v25 }
 0x16e   : > { %v1090_v57 = vadd.f32 %v1089_v37, %v1088_v39  ;;  %v1257_v11 = vadd.f32 %v1256_v34, %v1255_v22  ;;  %v1268_v37 = vsel %vm945_vm2, %v1180_v48, 0.0  ;;  %v1109_v34 = vsel %vm945_vm2, %v1968_v61, 0.0 }
 0x16f   : > { %v1282_v48 = vsel %vm945_vm2, %v1187_v16, 0.0  ;;  %v1296_v16 = vsel %vm945_vm2, %v1194_v24, 0.0 }
 0x170   : > { %v1092_v49 = vadd.f32 %v1091_v4, %v1090_v57  ;;  %v1259_v50 = vadd.f32 %v1258_v35, %v1257_v11  ;;  %v1107_v4 = vsel %vm945_vm2, %v2004_v25, 0.0  ;;  %v1276_v11 = vsel %vm945_vm2, %v1184_v13, 0.0 }
 0x171   : > { %v1290_v13 = vsel %vm945_vm2, %v1191_v46, 0.0  ;;  %v1304_v46 = vsel %vm945_vm2, %v1198_v53, 0.0  ;;  %v1202_v25 = vmul.f32 %v1992_v15, %v1992_v15  ;;  %v1205_v15 = vmul.f32 %v2016_v33, %v2016_v33 }
 0x172   : > { %v1094_v60 = vadd.f32 %v1093_v38, %v1092_v49  ;;  %v1261_v23 = vadd.f32 %v1260_v9, %v1259_v50  ;;  %v1274_v49 = vsel %vm945_vm2, %v1183_v26, 0.0  ;;  %v1115_v50 = vsel %vm945_vm2, %v2052_v8, 0.0 }
 0x173   : > { %v1288_v26 = vsel %vm945_vm2, %v1190_v0, 0.0  ;;  %v1302_v0 = vsel %vm945_vm2, %v1197_v36, 0.0 }
 0x174   : > { %v1096_v10 = vadd.f32 %v1095_v21, %v1094_v60  ;;  %v1263_v51 = vadd.f32 %v1262_v14, %v1261_v23  ;;  %v1113_v60 = vsel %vm945_vm2, %v2028_v44, 0.0  ;;  %v1280_v14 = vsel %vm945_vm2, %v1186_v54, 0.0 }
 0x175   : > { %v1294_v54 = vsel %vm945_vm2, %v1193_v12, 0.0  ;;  %v1308_v12 = vsel %vm945_vm2, %v1200_v43, 0.0 }
 0x176   : > { %v1098_v27 = vadd.f32 %v1097_v56, %v1096_v10  ;;  %v1265_v3 = vadd.f32 %v1264_v29, %v1263_v51  ;;  %v1278_v56 = vsel %vm945_vm2, %v1185_v59, 0.0  ;;  %v2594_v29 = vld [vmem:[#allocation2_spill] sm:$0xff]  ;;  %v1292_v59 = vsel %vm945_vm2, %v1192_v58, 0.0 }
 0x177   : > { %v1306_v58 = vsel %vm945_vm2, %v1199_v30, 0.0 }
 0x178   : > { %v1100_v63 = vadd.f32 %v1099_v1, %v1098_v27  ;;  %v1267_v39 = vadd.f32 %v1266_v45, %v1265_v3  ;;  %v1117_v1 = vsel %vm945_vm2, %v2016_v33, 0.0  ;;  %v2595_v45 = vld [vmem:[#allocation4_spill] sm:$0xff] }
 0x17a   : > { %v1102_v42 = vadd.f32 %v1101_v41, %v1100_v63  ;;  %v1269_v17 = vadd.f32 %v1268_v37, %v1267_v39  ;;  %v1119_v41 = vsel %vm945_vm2, %v2594_v29, 0.0  ;;  %v2596_v37 = vld [vmem:[#allocation6_spill] sm:$0xff] }
 0x17b   : > { %v1208_v33 = vmul.f32 %v2596_v37, %v2596_v37 }
 0x17c   : > { %v1104_v32 = vadd.f32 %v1103_v5, %v1102_v42  ;;  %v1271_v38 = vadd.f32 %v1270_v62, %v1269_v17  ;;  %v1121_v5 = vsel %vm945_vm2, %v2595_v45, 0.0  ;;  %v2597_v62 = vld [vmem:[#allocation3_spill] sm:$0xff] }
 0x17e   : > { %v1106_v57 = vadd.f32 %v1105_v28, %v1104_v32  ;;  %v1273_v35 = vadd.f32 %v1272_v55, %v1271_v38  ;;  %v1123_v28 = vsel %vm945_vm2, %v2596_v37, 0.0  ;;  %v2598_v55 = vld [vmem:[#allocation5_spill] sm:$0xff]  ;;  %v1324_v37 = vsel %vm945_vm2, %v1208_v33, 0.0 }
 0x17f   : > { %v1210_v53 = vmul.f32 %v2598_v55, %v2598_v55 }
 0x180   : > { %v1108_v22 = vadd.f32 %v1107_v4, %v1106_v57  ;;  %v1275_v2 = vadd.f32 %v1274_v49, %v1273_v35  ;;  %v1125_v4 = vsel %vm945_vm2, %v2597_v62, 0.0  ;;  %v2599_v49 = vld [vmem:[#allocation8_spill] sm:$0xff] }
 0x181   : > { %v1328_v30 = vsel %vm945_vm2, %v1210_v53, 0.0 }
 0x182   : > { %v1110_v21 = vadd.f32 %v1109_v34, %v1108_v22  ;;  %v1277_v10 = vadd.f32 %v1276_v11, %v1275_v2  ;;  %v1127_v34 = vsel %vm945_vm2, %v2598_v55, 0.0  ;;  %v2600_v11 = vld [vmem:[#allocation10_spill] sm:$0xff] }
 0x184   : > { %v1112_v9 = vadd.f32 %v1111_v31, %v1110_v21  ;;  %v1279_v23 = vadd.f32 %v1278_v56, %v1277_v10  ;;  %v1129_v31 = vsel %vm945_vm2, %v2599_v49, 0.0  ;;  %v2601_v56 = vld [vmem:[#allocation7_spill] sm:$0xff] }
 0x186   : > { %v1114_v19 = vadd.f32 %v1113_v60, %v1112_v9  ;;  %v1281_v51 = vadd.f32 %v1280_v14, %v1279_v23  ;;  %v1131_v60 = vsel %vm945_vm2, %v2600_v11, 0.0  ;;  %v2602_v14 = vld [vmem:[#allocation9_spill] sm:$0xff] }
 0x188   : > { %v1116_v27 = vadd.f32 %v1115_v50, %v1114_v19  ;;  %v1283_v3 = vadd.f32 %v1282_v48, %v1281_v51  ;;  %v1133_v50 = vsel %vm945_vm2, %v2601_v56, 0.0  ;;  %v2603_v48 = vld [vmem:[#allocation12_spill] sm:$0xff] }
 0x18a   : > { %v1118_v63 = vadd.f32 %v1117_v1, %v1116_v27  ;;  %v1285_v39 = vadd.f32 %v1284_v47, %v1283_v3  ;;  %v1135_v1 = vsel %vm945_vm2, %v2602_v14, 0.0  ;;  %v2604_v47 = vld [vmem:[#allocation14_spill] sm:$0xff] }
 0x18c   : > { %v1120_v42 = vadd.f32 %v1119_v41, %v1118_v63  ;;  %v1287_v17 = vadd.f32 %v1286_v40, %v1285_v39  ;;  %v1137_v41 = vsel %vm945_vm2, %v2603_v48, 0.0  ;;  %v2605_v40 = vld [vmem:[#allocation11_spill] sm:$0xff] }
 0x18e   : > { %v1122_v32 = vadd.f32 %v1121_v5, %v1120_v42  ;;  %v1289_v38 = vadd.f32 %v1288_v26, %v1287_v17  ;;  %v1139_v5 = vsel %vm945_vm2, %v2604_v47, 0.0  ;;  %v2606_v26 = vld [vmem:[#allocation13_spill] sm:$0xff] }
 0x190   : > { %v1124_v57 = vadd.f32 %v1123_v28, %v1122_v32  ;;  %v1291_v35 = vadd.f32 %v1290_v13, %v1289_v38  ;;  %v1141_v28 = vsel %vm945_vm2, %v2605_v40, 0.0  ;;  %v1203_v38 = vmul.f32 %v2028_v44, %v2028_v44 }
 0x191   : > { %v1206_v44 = vmul.f32 %v2594_v29, %v2594_v29  ;;  %v1017_v29 = vld [vmem:[%s2553_s4] sm:$0x1] }
 0x192   : > { %v1126_v22 = vadd.f32 %v1125_v4, %v1124_v57  ;;  %v1293_v2 = vadd.f32 %v1292_v59, %v1291_v35  ;;  %v1143_v4 = vsel %vm945_vm2, %v2606_v26, 0.0  ;;  %v1204_v59 = vmul.f32 %v2052_v8, %v2052_v8 }
 0x193   : > { %v1314_v6 = vsel %vm945_vm2, %v1203_v38, 0.0  ;;  %v1207_v8 = vmul.f32 %v2595_v45, %v2595_v45 }
 0x194   : > { %v1128_v21 = vadd.f32 %v1127_v34, %v1126_v22  ;;  %v1295_v10 = vadd.f32 %v1294_v54, %v1293_v2  ;;  %v1310_v22 = vsel %vm945_vm2, %v1201_v7, 0.0  ;;  %v1316_v2 = vsel %vm945_vm2, %v1204_v59, 0.0 }
 0x195   : > { %v1322_v45 = vsel %vm945_vm2, %v1207_v8, 0.0  ;;  %v1217_v7 = vmul.f32 %v2605_v40, %v2605_v40 }
 0x196   : > { %v1130_v9 = vadd.f32 %v1129_v31, %v1128_v21  ;;  %v1297_v23 = vadd.f32 %v1296_v16, %v1295_v10  ;;  %v1312_v31 = vsel %vm945_vm2, %v1202_v25, 0.0  ;;  %v1318_v16 = vsel %vm945_vm2, %v1205_v15, 0.0 }
 0x198   : > { %v1132_v19 = vadd.f32 %v1131_v60, %v1130_v9  ;;  %v1299_v51 = vadd.f32 %v1298_v20, %v1297_v23 }
 0x19a   : > { %v1134_v27 = vadd.f32 %v1133_v50, %v1132_v19  ;;  %v1301_v3 = vadd.f32 %v1300_v52, %v1299_v51  ;;  %v1320_v19 = vsel %vm945_vm2, %v1206_v44, 0.0 }
 0x19c   : > { %v1136_v63 = vadd.f32 %v1135_v1, %v1134_v27  ;;  %v1303_v39 = vadd.f32 %v1302_v0, %v1301_v3  ;;  %v1209_v1 = vmul.f32 %v2597_v62, %v2597_v62  ;;  %v1213_v0 = vmul.f32 %v2601_v56, %v2601_v56 }
 0x19e   : > { %v1138_v42 = vadd.f32 %v1137_v41, %v1136_v63  ;;  %v1305_v17 = vadd.f32 %v1304_v46, %v1303_v39  ;;  %v1211_v41 = vmul.f32 %v2599_v49, %v2599_v49  ;;  %v1326_v62 = vsel %vm945_vm2, %v1209_v1, 0.0 }
 0x19f   : > { %v1212_v63 = vmul.f32 %v2600_v11, %v2600_v11  ;;  %v1215_v46 = vmul.f32 %v2603_v48, %v2603_v48  ;;  %v1334_v11 = vsel %vm945_vm2, %v1213_v0, 0.0  ;;  %v1216_v39 = vmul.f32 %v2604_v47, %v2604_v47 }
 0x1a0   : > { %v1140_v32 = vadd.f32 %v1139_v5, %v1138_v42  ;;  %v1307_v13 = vadd.f32 %v1306_v58, %v1305_v17  ;;  %v1330_v5 = vsel %vm945_vm2, %v1211_v41, 0.0  ;;  %v1214_v42 = vmul.f32 %v2602_v14, %v2602_v14 }
 0x1a1   : > { %v1332_v49 = vsel %vm945_vm2, %v1212_v63, 0.0  ;;  %v1338_v14 = vsel %vm945_vm2, %v1215_v46, 0.0  ;;  %v1340_v48 = vsel %vm945_vm2, %v1216_v39, 0.0 }
 0x1a2   : > { %v1142_v57 = vadd.f32 %v1141_v28, %v1140_v32  ;;  %v1309_v61 = vadd.f32 %v1308_v12, %v1307_v13  ;;  %v1336_v56 = vsel %vm945_vm2, %v1214_v42, 0.0 }
 0x1a4   : > { %v1144_v34 = vadd.f32 %v1143_v4, %v1142_v57  ;;  %v1311_v35 = vadd.f32 %v1310_v22, %v1309_v61  ;;  %v1218_v4 = vmul.f32 %v2606_v26, %v2606_v26  ;;  %v1342_v57 = vsel %vm945_vm2, %v1217_v7, 0.0 }
 0x1a6   : > { %v1145_v24 = vrot.slane %v1144_v34, 4  ;;  %v1313_v54 = vadd.f32 %v1312_v31, %v1311_v35  ;;  %v1344_v47 = vsel %vm945_vm2, %v1218_v4, 0.0 }
 0x1a8   : > { %v1146_v21 = vadd.f32 %v1145_v24, %v1144_v34  ;;  %v1315_v9 = vadd.f32 %v1314_v6, %v1313_v54  ;;  %v1154_v24 = vld [vmem:[%s2554_s5] sm:$0x1] }
 0x1aa   : > { %v1147_v60 = vrot.slane %v1146_v21, 2  ;;  %v1317_v50 = vadd.f32 %v1316_v2, %v1315_v9 }
 0x1ac   : > { %v1148_v18 = vadd.f32 %v1147_v60, %v1146_v21  ;;  %v1319_v36 = vadd.f32 %v1318_v16, %v1317_v50 }
 0x1ae   : > { %v1149_v10 = vrot.slane %v1148_v18, 1  ;;  %v1321_v23 = vadd.f32 %v1320_v19, %v1319_v36 }
 0x1b0   : > { %v1150_v20 = vadd.f32 %v1149_v10, %v1148_v18  ;;  %v1323_v52 = vadd.f32 %v1322_v45, %v1321_v23 }
 0x1b2   : > { %v1151_v27 = vadd.f32 %v1150_v20, %v1017_v29  ;;  %v1325_v51 = vadd.f32 %v1324_v37, %v1323_v52 }
 0x1b4   : > { %1153 = vst.msk [vmem:[%s2553_s4] sm:$0x1] %vm1152_vm4, %v1151_v27  ;;  %v1327_v55 = vadd.f32 %v1326_v62, %v1325_v51 }
 0x1b6   : > { %v1329_v3 = vadd.f32 %v1328_v30, %v1327_v55 }
 0x1b8   : > { %v1331_v43 = vadd.f32 %v1330_v5, %v1329_v3 }
 0x1ba   : > { %v1333_v28 = vadd.f32 %v1332_v49, %v1331_v43 }
 0x1bc   : > { %v1335_v32 = vadd.f32 %v1334_v11, %v1333_v28 }
 0x1be   : > { %v1337_v58 = vadd.f32 %v1336_v56, %v1335_v32 }
 0x1c0   : > { %v1339_v17 = vadd.f32 %v1338_v14, %v1337_v58 }
 0x1c2   : > { %v1341_v25 = vadd.f32 %v1340_v48, %v1339_v17 }
 0x1c4   : > { %v1343_v12 = vadd.f32 %v1342_v57, %v1341_v25 }
 0x1c6   : > { %v1345_v13 = vadd.f32 %v1344_v47, %v1343_v12 }
 0x1c8   : > { %v1346_v34 = vrot.slane %v1345_v13, 4 }
 0x1ca   : > { %v1347_v38 = vadd.f32 %v1346_v34, %v1345_v13 }
 0x1cc   : > { %v1348_v22 = vrot.slane %v1347_v38, 2 }
 0x1ce   : > { %v1349_v40 = vadd.f32 %v1348_v22, %v1347_v38 }
 0x1d0   : > { %v1350_v61 = vrot.slane %v1349_v40, 1 }
 0x1d2   : > { %v1351_v26 = vadd.f32 %v1350_v61, %v1349_v40 }
 0x1d4   : > { %v1352_v59 = vadd.f32 %v1351_v26, %v1154_v24 }
 0x1d6   : > { %1353 = vst.msk [vmem:[%s2554_s5] sm:$0x1] %vm1152_vm4, %v1352_v59 }
 0x1d7 PF: > { %s16_s18 = sadd.s32 1, %s1679_s18  }
 0x1d8   : > { %p13_p5 = scmp.ge.s32.totalorder %s16_s18, 6  }
 0x1da   :  { %15 = sbr.rel (!%p13_p5) target bundleno = 1 (0x1), region = 82 }

</bundles_post_ra>
